<compile_context>
chip_gen: v6e
topology: v6e:2x2x1
jax: 0.10.0
libtpu: 0.0.40
codegen_flags: <defaults>
</compile_context>

<pallas_src>
import jax
import jax.numpy as jnp
from jax.experimental import pallas as pl
from jax.experimental.pallas import tpu as pltpu

HIDDEN = 768
EPS = 1e-5


def fused_kernel(x151_ref, x148_ref, gamma_ref, beta_ref, w_ref, b_ref, o_ref):
    # dropout (identity at inference) + residual add, all in f32
    x = x151_ref[...] + x148_ref[...]                      # (tm, H) f32

    # LayerNorm over the hidden axis, affine params broadcast from (1, H)
    mean = jnp.mean(x, axis=-1, keepdims=True)
    cent = x - mean
    var = jnp.mean(cent * cent, axis=-1, keepdims=True)
    xn = cent * jax.lax.rsqrt(var + EPS)
    h = xn * gamma_ref[...] + beta_ref[...]                # (tm, H) f32

    # Linear: y = h @ W^T + b.  W^T arrives in bf16 (cast once by the caller);
    # only `h` is cast here so the MXU runs a native bf16 matmul with f32 acc.
    y = jnp.dot(h.astype(jnp.bfloat16), w_ref[...],
                preferred_element_type=jnp.float32)        # (tm, H) f32
    o_ref[...] = (y + b_ref[...]).astype(o_ref.dtype)


def _device_info():
    """Return (is_v7x, num_tensorcores_per_chip) with a safe fallback."""
    try:
        kind = jax.devices()[0].device_kind.lower()
    except Exception:
        kind = ""
    is_v7 = "v7" in kind
    return is_v7, (2 if is_v7 else 1)


def fused_forward(x151, x148, gamma, beta, w_t_bf16, bias, *, tm=None,
                  out_dtype=jnp.float32):
    """x151, x148: (B, S, H) f32.  w_t_bf16: (H_in, H_out) bf16 (cast once,
    persistently, by the caller).  Returns (B, S, H) in `out_dtype`."""
    B, S, H = x151.shape
    assert H == HIDDEN
    rows = B * S

    is_v7x, n_cores = _device_info()
    if tm is None:
        # v7x (2 TCs): grid must be >= 2 steps PER CORE to pipeline -> tm=96
        # (grid=4).  v5e/v6e (1 TC): grid=2 already pipelines; keep tm=192 to
        # avoid per-step overhead on a ~3-6 us kernel.
        tm = 96 if is_v7x else 192
    if rows % tm != 0:
        tm = 96 if rows % 96 == 0 else rows  # fallback for odd row counts
    assert rows % tm == 0

    x151_2d = x151.reshape(rows, H)
    x148_2d = x148.reshape(rows, H)
    gamma_2d = gamma.reshape(1, H)
    beta_2d = beta.reshape(1, H)
    bias_2d = bias.reshape(1, H)
    assert w_t_bf16.dtype == jnp.bfloat16  # caller ships bf16 persistently

    # Advisory cost for the outer XLA scheduler.  Under megacore sharding on
    # v7x each TensorCore DMAs its own copy of W, so count it n_cores times.
    matmul_flops = 2 * rows * H * H
    ln_flops = 8 * rows * H
    out_bytes_per_elem = jnp.dtype(out_dtype).itemsize
    bytes_accessed = (
        2 * rows * H * 4                    # x151 + x148 (f32)
        + rows * H * out_bytes_per_elem     # output
        + n_cores * H * H * 2               # W^T (bf16), duplicated per core
        + 3 * H * 4                         # gamma, beta, bias
    )
    cost = pl.CostEstimate(
        flops=matmul_flops + ln_flops,
        transcendentals=rows,               # one rsqrt per row
        bytes_accessed=bytes_accessed,
    )

    out = pl.pallas_call(
        fused_kernel,
        out_shape=jax.ShapeDtypeStruct((rows, H), out_dtype),
        grid_spec=pltpu.PrefetchScalarGridSpec(
            num_scalar_prefetch=0,
            grid=(rows // tm,),
            in_specs=[
                pl.BlockSpec((tm, H), lambda i: (i, 0)),   # x151 rows
                pl.BlockSpec((tm, H), lambda i: (i, 0)),   # x148 rows
                pl.BlockSpec((1, H), lambda i: (0, 0)),    # gamma (grid-invariant)
                pl.BlockSpec((1, H), lambda i: (0, 0)),    # beta  (grid-invariant)
                pl.BlockSpec((H, H), lambda i: (0, 0)),    # W^T bf16 (grid-invariant)
                pl.BlockSpec((1, H), lambda i: (0, 0)),    # bias  (grid-invariant)
            ],
            out_specs=pl.BlockSpec((tm, H), lambda i: (i, 0)),
        ),
        compiler_params=pltpu.CompilerParams(
            dimension_semantics=("parallel",),
        ),
        cost_estimate=cost,
    )(x151_2d, x148_2d, gamma_2d, beta_2d, w_t_bf16, bias_2d)

    return out.reshape(B, S, H)


def reference_forward(x151, x148, gamma, beta, w_t, bias):
    """Pure-JAX reference using the same bf16-matmul / f32-accumulate path."""
    x = x151 + x148
    mean = jnp.mean(x, axis=-1, keepdims=True)
    var = jnp.mean((x - mean) ** 2, axis=-1, keepdims=True)
    xn = (x - mean) * jax.lax.rsqrt(var + EPS)
    h = xn * gamma + beta
    y = jnp.dot(h.astype(jnp.bfloat16), w_t.astype(jnp.bfloat16),
                preferred_element_type=jnp.float32)
    return y + bias


if __name__ == "__main__":
    key = jax.random.PRNGKey(0)
    k1, k2, k3, k4, k5, k6 = jax.random.split(key, 6)

    B, S, H = 1, 384, HIDDEN
    x151 = jax.random.normal(k1, (B, S, H), dtype=jnp.float32)
    x148 = jax.random.normal(k2, (B, S, H), dtype=jnp.float32)

    # Deterministic parameter init (LayerNorm affine + Linear weight/bias).
    gamma = jnp.ones((H,), dtype=jnp.float32) + 0.01 * jax.random.normal(k3, (H,), dtype=jnp.float32)
    beta = 0.01 * jax.random.normal(k4, (H,), dtype=jnp.float32)
    w = jax.random.normal(k5, (H, H), dtype=jnp.float32) * (1.0 / jnp.sqrt(H))  # (out, in)
    bias = 0.01 * jax.random.normal(k6, (H,), dtype=jnp.float32)

    # Hoisted, one-time weight preparation (persistent bf16 parameter): the
    # per-call f32->bf16 cast is gone from the hot path.
    w_t_bf16 = jax.block_until_ready(w.T.astype(jnp.bfloat16))  # (in, out) bf16

    out = fused_forward(x151, x148, gamma, beta, w_t_bf16, bias)
    out = jax.block_until_ready(out)

    ref = reference_forward(x151, x148, gamma, beta, w.T, bias)
    assert out.shape == (B, S, H)
    # bf16 matmul (K=768) -> compare against the matching bf16-path reference.
    assert jnp.allclose(out, ref, atol=1e-2, rtol=1e-2), "mismatch vs reference"

    print("KERNEL_OK")
</pallas_src>

<mosaic_0001>
module attributes {stable_mosaic.version = 11 : i64} {
  func.func @fused_kernel(%arg0: i32, %arg1: memref<192x768xf32, #tpu.memory_space<vmem>>, %arg2: memref<192x768xf32, #tpu.memory_space<vmem>>, %arg3: memref<1x768xf32, #tpu.memory_space<vmem>>, %arg4: memref<1x768xf32, #tpu.memory_space<vmem>>, %arg5: memref<768x768xbf16, #tpu.memory_space<vmem>>, %arg6: memref<1x768xf32, #tpu.memory_space<vmem>>, %arg7: memref<192x768xf32, #tpu.memory_space<vmem>>) attributes {dimension_semantics = [#tpu.dimension_semantics<parallel>], iteration_bounds = array<i64: 2>, scalar_prefetch = 0 : i64, scratch_operands = 0 : i64, tpu.core_type = #tpu.core_type<tc>, window_params = [{transform_indices = @transform_0, window_bounds = array<i64: 192, 768>}, {transform_indices = @transform_1, window_bounds = array<i64: 192, 768>}, {pipeline_mode = #tpu.pipeline_mode<synchronous>, transform_indices = @transform_2, window_bounds = array<i64: 1, 768>}, {pipeline_mode = #tpu.pipeline_mode<synchronous>, transform_indices = @transform_3, window_bounds = array<i64: 1, 768>}, {pipeline_mode = #tpu.pipeline_mode<synchronous>, transform_indices = @transform_4, window_bounds = array<i64: 768, 768>}, {pipeline_mode = #tpu.pipeline_mode<synchronous>, transform_indices = @transform_5, window_bounds = array<i64: 1, 768>}, {transform_indices = @transform_6, window_bounds = array<i64: 192, 768>}]} {
    %c0 = arith.constant 0 : index
    %c0_0 = arith.constant 0 : index
    %0 = vector.load %arg1[%c0, %c0_0] : memref<192x768xf32, #tpu.memory_space<vmem>>, vector<192x768xf32>
    %c0_1 = arith.constant 0 : index
    %c0_2 = arith.constant 0 : index
    %1 = vector.load %arg2[%c0_1, %c0_2] : memref<192x768xf32, #tpu.memory_space<vmem>>, vector<192x768xf32>
    %2 = arith.addf %0, %1 : vector<192x768xf32>
    %cst = arith.constant dense<0.000000e+00> : vector<192xf32>
    %3 = vector.multi_reduction <add>, %2, %cst [1] : vector<192x768xf32> to vector<192xf32>
    %4 = vector.shape_cast %3 : vector<192xf32> to vector<192x1xf32>
    %cst_3 = arith.constant 7.680000e+02 : f32
    %5 = vector.broadcast %cst_3 : f32 to vector<192x1xf32>
    %6 = arith.divf %4, %5 : vector<192x1xf32>
    %7 = vector.broadcast %6 : vector<192x1xf32> to vector<192x768xf32>
    %8 = arith.subf %2, %7 : vector<192x768xf32>
    %9 = arith.mulf %8, %8 : vector<192x768xf32>
    %cst_4 = arith.constant dense<0.000000e+00> : vector<192xf32>
    %10 = vector.multi_reduction <add>, %9, %cst_4 [1] : vector<192x768xf32> to vector<192xf32>
    %11 = vector.shape_cast %10 : vector<192xf32> to vector<192x1xf32>
    %cst_5 = arith.constant 7.680000e+02 : f32
    %12 = vector.broadcast %cst_5 : f32 to vector<192x1xf32>
    %13 = arith.divf %11, %12 : vector<192x1xf32>
    %cst_6 = arith.constant 9.99999974E-6 : f32
    %14 = vector.broadcast %cst_6 : f32 to vector<192x1xf32>
    %15 = arith.addf %13, %14 : vector<192x1xf32>
    %16 = math.rsqrt %15 : vector<192x1xf32>
    %17 = vector.broadcast %16 : vector<192x1xf32> to vector<192x768xf32>
    %18 = arith.mulf %8, %17 : vector<192x768xf32>
    %c0_7 = arith.constant 0 : index
    %c0_8 = arith.constant 0 : index
    %19 = vector.load %arg3[%c0_7, %c0_8] : memref<1x768xf32, #tpu.memory_space<vmem>>, vector<1x768xf32>
    %20 = vector.broadcast %19 : vector<1x768xf32> to vector<192x768xf32>
    %21 = arith.mulf %18, %20 : vector<192x768xf32>
    %c0_9 = arith.constant 0 : index
    %c0_10 = arith.constant 0 : index
    %22 = vector.load %arg4[%c0_9, %c0_10] : memref<1x768xf32, #tpu.memory_space<vmem>>, vector<1x768xf32>
    %23 = vector.broadcast %22 : vector<1x768xf32> to vector<192x768xf32>
    %24 = arith.addf %21, %23 : vector<192x768xf32>
    %25 = arith.truncf %24 : vector<192x768xf32> to vector<192x768xbf16>
    %c0_11 = arith.constant 0 : index
    %c0_12 = arith.constant 0 : index
    %26 = vector.load %arg5[%c0_11, %c0_12] : memref<768x768xbf16, #tpu.memory_space<vmem>>, vector<768x768xbf16>
    %cst_13 = arith.constant dense<0.000000e+00> : vector<192x768xf32>
    %27 = tpu.matmul %25, %26, %cst_13 {dimension_numbers = #tpu.dot_dimension_numbers<[1], [0], [0], [1], [0, 0, 1, 1], [], []>} : vector<192x768xbf16>, vector<768x768xbf16>, vector<192x768xf32> -> vector<192x768xf32>
    %c0_14 = arith.constant 0 : index
    %c0_15 = arith.constant 0 : index
    %28 = vector.load %arg6[%c0_14, %c0_15] : memref<1x768xf32, #tpu.memory_space<vmem>>, vector<1x768xf32>
    %29 = vector.broadcast %28 : vector<1x768xf32> to vector<192x768xf32>
    %30 = arith.addf %27, %29 : vector<192x768xf32>
    %c0_16 = arith.constant 0 : index
    %c0_17 = arith.constant 0 : index
    %31 = vector.load %arg7[%c0_16, %c0_17] : memref<192x768xf32, #tpu.memory_space<vmem>>, vector<192x768xf32>
    tpu.vector_store %arg7[%c0_16, %c0_17], %30 {strides = array<i32>} : memref<192x768xf32, #tpu.memory_space<vmem>>, vector<192x768xf32>,
    return
  }
  func.func @transform_0(%arg0: i32) -> (i32, i32) {
    %c0_i32 = arith.constant 0 : i32
    %c0_i32_0 = arith.constant 0 : i32
    return %arg0, %c0_i32 : i32, i32
  }
  func.func @transform_1(%arg0: i32) -> (i32, i32) {
    %c0_i32 = arith.constant 0 : i32
    %c0_i32_0 = arith.constant 0 : i32
    return %arg0, %c0_i32 : i32, i32
  }
  func.func @transform_2(%arg0: i32) -> (i32, i32) {
    %c0_i32 = arith.constant 0 : i32
    %c0_i32_0 = arith.constant 0 : i32
    %c0_i32_1 = arith.constant 0 : i32
    return %c0_i32, %c0_i32_0 : i32, i32
  }
  func.func @transform_3(%arg0: i32) -> (i32, i32) {
    %c0_i32 = arith.constant 0 : i32
    %c0_i32_0 = arith.constant 0 : i32
    %c0_i32_1 = arith.constant 0 : i32
    return %c0_i32, %c0_i32_0 : i32, i32
  }
  func.func @transform_4(%arg0: i32) -> (i32, i32) {
    %c0_i32 = arith.constant 0 : i32
    %c0_i32_0 = arith.constant 0 : i32
    %c0_i32_1 = arith.constant 0 : i32
    return %c0_i32, %c0_i32_0 : i32, i32
  }
  func.func @transform_5(%arg0: i32) -> (i32, i32) {
    %c0_i32 = arith.constant 0 : i32
    %c0_i32_0 = arith.constant 0 : i32
    %c0_i32_1 = arith.constant 0 : i32
    return %c0_i32, %c0_i32_0 : i32, i32
  }
  func.func @transform_6(%arg0: i32) -> (i32, i32) {
    %c0_i32 = arith.constant 0 : i32
    %c0_i32_0 = arith.constant 0 : i32
    return %arg0, %c0_i32 : i32, i32
  }
}

</mosaic_0001>

<bundles_post_ra>
// kernel: tpu_custom_call.1
= control target key start
LH: loop header
LB: loop body
LE: loop exit
PB: predicated region body
PF: predicated region fallthrough
CT: control target
= control target key end

     0   :  { %s10323_s0 = inlined_call_operand.hbm [shape: f32[384,768], index: 0, kind: input, shape index: {}]   ;;  %s10324_s1 = inlined_call_operand.hbm [shape: f32[384,768], index: 1, kind: input, shape index: {}]   ;;  %s10325_s2 = inlined_call_operand.hbm [shape: f32[1,768], index: 2, kind: input, shape index: {}]   ;;  %s10326_s3 = inlined_call_operand.hbm [shape: f32[1,768], index: 3, kind: input, shape index: {}]   ;;  %s10327_s4 = inlined_call_operand.hbm [shape: bf16[768,768], index: 4, kind: input, shape index: {}]   ;;  %s10328_s5 = inlined_call_operand.hbm [shape: f32[1,768], index: 5, kind: input, shape index: {}]   ;;  %s10329_s6 = inlined_call_operand.hbm [shape: f32[384,768], index: 6, kind: output, shape index: {}]  }
   0x1   :  { %10660 = sst [smem:[#allocation140_spill]] %s10323_s0 }
   0x2   :  { %10661 = sst [smem:[#allocation141_spill]] %s10325_s2 }
   0x3   :  { %10662 = sst [smem:[#allocation142_spill]] %s10326_s3 }
   0x4   :  { %11 = vsyncpa [#allocation3], 0 }
   0x5   :  { %13 = vsyncpa [#allocation3 + $0x1], 0 }
   0x6   :  { %14 = vsyncpa [#allocation6], 0 }
   0x7   :  { %16 = vsyncpa [#allocation6 + $0x1], 0 }
   0x8   :  { %17 = vsyncpa [#allocation9], 0 }
   0x9   :  { %18 = vsyncpa [#allocation12], 0 }
   0xa   :  { %19 = vsyncpa [#allocation4], 0 }
   0xb   :  { %21 = vsyncpa [#allocation4 + $0x1], 0  ;;  %s6733_s21 = smov 0   ;;  %s6735_s22 = smov 0  }
   0xc   :  { %s6737_s23 = smov 0   ;;  %s6739_s24 = smov 0  }
   0xd LB: > { %s6754_s25 = sadd.s32 4294967295, %s6683_s24   ;;  %s5518_s26 = sadd.s32 4294967294, %s6683_s24   ;;  %s6683_s24 = sphi %s6739_s24, %s11400_s24   ;;  %s6679_s23 = sphi %s6737_s23, %s11399_s23   ;;  %s6675_s22 = sphi %s6735_s22, %s11398_s22   ;;  %s6671_s21 = sphi %s6733_s21, %s11397_s21  }
   0xe   : > { %p47_p0 = scmp.ne.s32.totalorder %s6675_s22, %s6671_s21  ;;  %p10330_p1 = scmp.eq.s32.totalorder %s6754_s25, 0 }
   0xf   : > { %p187_p3 = scmp.eq.s32.totalorder %s5518_s26, 1  ;;  %p5519_p5 = scmp.ge.s32.totalorder %s6683_s24, 1 }
  0x10   : > { %p6763_p4 = por %p10330_p1, %p47_p0  ;;  %p194_p7 = scmp.lt.s32.totalorder %s6683_s24, 3 }
  0x11   : > { %p6768_p6 = por %p187_p3, %p47_p0  ;;  %s6685_s30 = smov [#allocation7]  }
  0x12   : > { %s10663_s27 = scalar_select %p6763_p4, 1, 0 }
  0x13   : > { %s10664_s28 = scalar_select %p6768_p6, 1, 0 }
  0x14   : > { %p6773_p8 = pnand %p5519_p5, %p194_p7  ;;  %s207_s7 = sshll.u32 %s6685_s30, 4  ;;  %s208_s7 = int_to_ptr.vmem [resolvable:$true] %s207_s7 }
  0x15   : > { %s6686_s9 = smov [#allocation8]   ;;  %s6687_s11 = smov [#allocation10]  }
  0x16   : > { %s10665_s29 = scalar_select %p6773_p8, 1, 0 }
  0x17   : > { %p5883_p10 = pneg %p6773_p8  ;;  %s218_s10 = sshll.u32 %s6686_s9, 4  ;;  %s219_s10 = int_to_ptr.vmem [resolvable:$true] %s218_s10 }
  0x18   : > { %s228_s12 = sshll.u32 %s6687_s11, 4  ;;  %s6454_s13 = scalar_lea.vmem %s208_s7, 96  ;;  %s6786_s12 = int_to_ptr.vmem [resolvable:$true] %s228_s12 }
  0x19   : > { %p6782_p11 = pnand %p5883_p10, %p10330_p1  ;;  %p6455_p13 = scmp.ne.s32.totalorder %s208_s7, %s6454_s13 }
  0x1a   : > { %p6462_p5 = scmp.lt.s32.totalorder %s208_s7, %s208_s7  ;;  %p6463_p7 = scmp.lt.s32.totalorder %s6454_s13, %s6454_s13 }
  0x1b   : > { %p6445_p12 = pneg %p6782_p11 }
  0x1c   : > { %p6464_p10 = por %p6463_p7, %p6462_p5 }
  0x1d   : > { %p6457_p0 = pnand %p6455_p13, %p6445_p12 }
  0x1f   : > { %p6458_p3 = pneg %p6457_p0 }
  0x21   : > { %p6465_p9 = pnand %p6464_p10, %p6458_p3 }
  0x23   : > { %6468 = shalt.err (!%p6465_p9)
}
  0x24   : > { %s10667_s2 = sld [smem:[#allocation141_spill]]  ;;  %s6480_s16 = scalar_lea.vmem %s219_s10, 96 }
  0x25   : > { %p6481_p1 = scmp.ne.s32.totalorder %s219_s10, %s6480_s16  ;;  %p6488_p13 = scmp.lt.s32.totalorder %s219_s10, %s219_s10 }
  0x26   : > { %p6489_p0 = scmp.lt.s32.totalorder %s6480_s16, %s6480_s16 }
  0x27   : > { %p6483_p2 = pnand %p6481_p1, %p6445_p12 }
  0x28   : > { %p6490_p4 = por %p6489_p0, %p6488_p13 }
  0x29   : > { %p6484_p6 = pneg %p6483_p2 }
  0x2a   : > { %5886 = dma.hbm_to_vmem [thread:$0]  (!%p6782_p11), %s10667_s2, 96, %s208_s7, [#allocation6]  }
  0x2b   : > { %p6491_p8 = pnand %p6490_p4, %p6484_p6 }
  0x2d   : > { %6494 = shalt.err (!%p6491_p8)
}
  0x2e   : > { %s10668_s3 = sld [smem:[#allocation142_spill]]  ;;  %s6506_s19 = scalar_lea.vmem %s6786_s12, 36864 }
  0x2f   : > { %p6507_p9 = scmp.ne.s32.totalorder %s6786_s12, %s6506_s19  ;;  %p6514_p3 = scmp.lt.s32.totalorder %s6786_s12, %s6786_s12 }
  0x30   : > { %p6515_p4 = scmp.lt.s32.totalorder %s6506_s19, %s6506_s19 }
  0x31   : > { %p6509_p1 = pnand %p6507_p9, %p6445_p12 }
  0x32   : > { %p6516_p6 = por %p6515_p4, %p6514_p3 }
  0x33   : > { %p6510_p2 = pneg %p6509_p1 }
  0x34   : > { %5889 = dma.hbm_to_vmem [thread:$0]  (!%p6782_p11), %s10668_s3, 96, %s219_s10, [#allocation9]  }
  0x35   : > { %p6517_p8 = pnand %p6516_p6, %p6510_p2 }
  0x37   : > { %6520 = shalt.err (!%p6517_p8)
}
  0x38   : > { %s6688_s20 = smov 384   ;;  %s6689_s26 = smov 24  }
  0x39   : > { %5892 = dma.hbm_to_vmem [thread:$0]  (!%p6782_p11), %s10327_s4, 36864, %s6786_s12, [#allocation9], %s6688_s20, %s6688_s20, %s6689_s26  }
  0x3a   : > { %s6690_s9 = smov [#allocation11]   ;;  %s6820_s11 = sadd.s32 1, %s6683_s24  }
  0x3b   : > { %s242_s10 = sshll.u32 %s6690_s9, 4  ;;  %s243_s10 = int_to_ptr.vmem [resolvable:$true] %s242_s10 }
  0x3c   : > { %s6532_s13 = scalar_lea.vmem %s243_s10, 96  ;;  %p6540_p13 = scmp.lt.s32.totalorder %s243_s10, %s243_s10 }
  0x3d   : > { %p6533_p5 = scmp.ne.s32.totalorder %s243_s10, %s6532_s13  ;;  %p6541_p0 = scmp.lt.s32.totalorder %s6532_s13, %s6532_s13 }
  0x3f   : > { %p6535_p7 = pnand %p6533_p5, %p6445_p12  ;;  %p6542_p9 = por %p6541_p0, %p6540_p13 }
  0x41   : > { %p6536_p10 = pneg %p6535_p7 }
  0x43   : > { %p6543_p1 = pnand %p6542_p9, %p6536_p10 }
  0x45   : > { %6546 = shalt.err (!%p6543_p1)
}
  0x46   : > { %5895 = dma.hbm_to_vmem [thread:$0]  (!%p6782_p11), %s10328_s5, 96, %s243_s10, [#allocation12]  }
  0x47   : > { %s31_s15 = ssub.s32 %s6683_s24, %s6820_s11  ;;  %s34_s16 = sadd.s32 1, %s6679_s23 }
  0x48   : > { %p32_p12 = scmp.eq.s32.totalorder %s31_s15, 0  ;;  %p41_p2 = scmp.ne.s32.totalorder %s6679_s23, %s6675_s22 }
  0x49   : > { %p42_p3 = scmp.eq.s32.totalorder %s6683_s24, 0  ;;  %p5911_p4 = scmp.lt.s32.totalorder %s6683_s24, 2 }
  0x4a   : > { %s6838_s8 = scalar_select %p32_p12, %s6679_s23, %s34_s16  }
  0x4b   : > { %p43_p6 = por %p42_p3, %p41_p2  ;;  %p10669_p8 = scmp.eq.s32.totalorder %s6754_s25, 1 }
  0x4c   : > { %s253_s18 = sand.u32 1, %s6679_s23   ;;  %s10333_s19 = smul.u32 18432, %s6683_s24 }
  0x4d   : > { %p6842_p5 = por %p10669_p8, %p41_p2  ;;  %s6848_s20 = smul.u32 1152, %s253_s18 }
  0x4e   : > { %s10671_s0 = sld [smem:[#allocation140_spill]]  ;;  %p6857_p11 = pnand %p5911_p4, %p43_p6 }
  0x4f   : > { %s257_s10 = scalar_lea.vmem [#allocation2], %s6848_s20  ;;  %s6864_s14 = scalar_lea.sflag [#allocation3], %s253_s18 }
  0x50   : > { %s265_s13 = sshll.u32 %s257_s10, 4  ;;  %p6549_p10 = pneg %p6857_p11  ;;  %s6862_s13 = int_to_ptr.vmem [resolvable:$true] %s265_s13 }
  0x54   : > { %s6855_s7 = scalar_lea.hbm %s10671_s0, %s10333_s19  ;;  %s6552_s26 = scalar_lea.hbm %s10671_s0, 36864 }
  0x55   : > { %s6547_s12 = scalar_lea.hbm %s6855_s7, 18432  ;;  %p6553_p9 = scmp.lt.s32.totalorder %s6855_s7, %s10671_s0 }
  0x56   : > { %p6548_p7 = scmp.ne.s32.totalorder %s6855_s7, %s6547_s12  ;;  %p6554_p1 = scmp.lt.s32.totalorder %s6552_s26, %s6547_s12 }
  0x58   : > { %p6550_p13 = pnand %p6549_p10, %p6548_p7  ;;  %p6555_p12 = por %p6554_p1, %p6553_p9 }
  0x5a   : > { %p6551_p0 = pneg %p6550_p13 }
  0x5c   : > { %p6556_p2 = pnand %p6555_p12, %p6551_p0 }
  0x5e   : > { %6559 = shalt.err (!%p6556_p2)
}
  0x5f   : > { %s6560_s18 = scalar_lea.vmem %s6862_s13, 18432  ;;  %s6691_s10 = smov [#allocation2]  }
  0x60   : > { %p6561_p3 = scmp.ne.s32.totalorder %s6862_s13, %s6560_s18  ;;  %s6565_s15 = sshll.u32 %s6691_s10, 4  ;;  %s6566_s15 = int_to_ptr.vmem [resolvable:$false] %s6565_s15 }
  0x61   : > { %s6567_s16 = scalar_lea.vmem %s6566_s15, 36864  ;;  %p6568_p8 = scmp.lt.s32.totalorder %s6862_s13, %s6566_s15 }
  0x62   : > { %p6563_p4 = pnand %p6561_p3, %p6549_p10  ;;  %p6569_p7 = scmp.lt.s32.totalorder %s6567_s16, %s6560_s18 }
  0x64   : > { %p6564_p6 = pneg %p6563_p4  ;;  %p6570_p13 = por %p6569_p7, %p6568_p8 }
  0x66   : > { %p6571_p9 = pnand %p6570_p13, %p6564_p6 }
  0x68   : > { %6574 = shalt.err (!%p6571_p9)
}
  0x69   : > { %s6692_s19 = smov 768   ;;  %s6693_s12 = smov 48  }
  0x6a   : > { %5899 = dma.hbm_to_vmem [thread:$0]  (!%p6857_p11), %s6855_s7, 18432, %s6862_s13, %s6864_s14, %s6692_s19, %s6692_s19, %s6693_s12  }
  0x6b   : > { %s275_s26 = sand.u32 1, %s6683_s24   ;;  %s10673_s30 = smul.u32 18432, %s6683_s24 }
  0x6c   : > { %s279_s16 = scalar_lea.vmem [#allocation5], %s6848_s20  ;;  %s276_s2 = scalar_lea.sflag [#allocation6], %s275_s26 }
  0x6d   : > { %s6900_s15 = scalar_lea.hbm %s10324_s1, %s10673_s30  ;;  %s287_s0 = sshll.u32 %s279_s16, 4  ;;  %s6903_s0 = int_to_ptr.vmem [resolvable:$true] %s287_s0 }
  0x6e   : > { %s6575_s3 = scalar_lea.hbm %s6900_s15, 18432  ;;  %s6580_s14 = scalar_lea.hbm %s10324_s1, 36864 }
  0x6f   : > { %p6576_p0 = scmp.ne.s32.totalorder %s6900_s15, %s6575_s3  ;;  %p6581_p2 = scmp.lt.s32.totalorder %s6900_s15, %s10324_s1 }
  0x70   : > { %p6582_p3 = scmp.lt.s32.totalorder %s6580_s14, %s6575_s3 }
  0x71   : > { %p6578_p1 = pnand %p6576_p0, %p6549_p10 }
  0x72   : > { %p6583_p4 = por %p6582_p3, %p6581_p2 }
  0x73   : > { %p6579_p12 = pneg %p6578_p1 }
  0x75   : > { %p6584_p6 = pnand %p6583_p4, %p6579_p12 }
  0x77   : > { %6587 = shalt.err (!%p6584_p6)
}
  0x78   : > { %s6588_s20 = scalar_lea.vmem %s6903_s0, 18432  ;;  %s6694_s26 = smov [#allocation5]  }
  0x79   : > { %p6589_p8 = scmp.ne.s32.totalorder %s6903_s0, %s6588_s20  ;;  %s6593_s10 = sshll.u32 %s6694_s26, 4  ;;  %s6594_s10 = int_to_ptr.vmem [resolvable:$false] %s6593_s10 }
  0x7a   : > { %s6595_s16 = scalar_lea.vmem %s6594_s10, 36864  ;;  %p6596_p9 = scmp.lt.s32.totalorder %s6903_s0, %s6594_s10 }
  0x7b   : > { %p6591_p7 = pnand %p6589_p8, %p6549_p10  ;;  %p6597_p0 = scmp.lt.s32.totalorder %s6595_s16, %s6588_s20 }
  0x7d   : > { %p6592_p13 = pneg %p6591_p7  ;;  %p6598_p1 = por %p6597_p0, %p6596_p9 }
  0x7f   : > { %p6599_p2 = pnand %p6598_p1, %p6592_p13 }
  0x81   : > { %6602 = shalt.err (!%p6599_p2)
}
  0x82   : > { %5902 = dma.hbm_to_vmem [thread:$0]  (!%p6857_p11), %s6900_s15, 18432, %s6903_s0, %s276_s2, %s6692_s19, %s6692_s19, %s6693_s12  }
  0x83   : > { %p10674_p10 = scmp.ne.s32.totalorder %s10665_s29, 0 }
  0x85   : > { %299 = sbr.rel (%p10674_p10) target bundleno = 1207 (0x4b7), region = 44 }
  0x8a   : > { %s6933_s3 = sand.u32 1, %s6675_s22   ;;  %p10675_p12 = scmp.ne.s32.totalorder %s10663_s27, 0 }
  0x8b   : > { %s6936_s7 = smul.u32 1152, %s6933_s3  ;;  %s302_s13 = scalar_lea.sflag [#allocation3], %s6933_s3 }
  0x8d   : > { %s6940_s9 = scalar_lea.vmem [#allocation2], %s6936_s7 }
  0x8e   : > { %6646 = dma.done.wait (%p10675_p12), %s302_s13, 18432  }
  0x8f   : > { %6648 = vsyncadd (%p10675_p12), %s302_s13, 4294948864  ;;  %s310_s0 = sand.u32 1, %s6754_s25   ;;  %s6948_s29 = scalar_lea.vmem [#allocation5], %s6936_s7 }
  0x90   : > { %s311_s2 = scalar_lea.sflag [#allocation6], %s310_s0 }
  0x91   : > { %6650 = dma.done.wait (%p10675_p12), %s311_s2, 18432  }
  0x92   : > { %6652 = vsyncadd (%p10675_p12), %s311_s2, 4294948864  ;;  %p10676_p11 = scmp.eq.s32.totalorder %s6754_s25, 0 }
  0x94   : > { %6654 = dma.done.wait (%p10676_p11), [#allocation6], 96   ;;  %p10677_p3 = pmov %p10676_p11 }
  0x96   : > { %6656 = vsyncadd (%p10677_p3), [#allocation6], 4294967200  ;;  %p10678_p4 = pmov %p10677_p3 }
  0x97   : > { %p10679_p6 = pmov %p10677_p3 }
  0x98   : > { %6658 = dma.done.wait (%p10678_p4), [#allocation9], 36960  }
  0x99   : > { %6660 = vsyncadd (%p10679_p6), [#allocation9], 4294930336  ;;  %p10680_p8 = pmov %p10677_p3 }
  0x9a   : > { %p10681_p7 = pmov %p10677_p3 }
  0x9b   : > { %6662 = dma.done.wait (%p10680_p8), [#allocation12], 96  }
  0x9c   : > { %6664 = vsyncadd (%p10681_p7), [#allocation12], 4294967200  ;;  %v367_v0 = vld [vmem:[%s6940_s9] sm:$0xff]  ;;  %v368_v1 = vld [vmem:[%s6940_s9 + $0x8] sm:$0xff]  ;;  %s9554_s27 = scalar_lea.vmem [#allocation13], %s6936_s7  ;;  %s5918_s19 = smul.u32 18432, %s6754_s25 }
  0x9d   : > { %v369_v2 = vld [vmem:[%s6940_s9 + $0x10] sm:$0xff]  ;;  %v370_v3 = vld [vmem:[%s6940_s9 + $0x18] sm:$0xff]  ;;  %v511_v4 = vld [vmem:[%s6948_s29] sm:$0xff]  ;;  %s5384_s12 = sshll.u32 %s9554_s27, 4  ;;  %s5370_s30 = scalar_lea.sflag [#allocation4], %s6933_s3  ;;  %s10278_s12 = int_to_ptr.vmem [resolvable:$true] %s5384_s12 }
  0x9e   : > { %v512_v5 = vld [vmem:[%s6948_s29 + $0x8] sm:$0xff]  ;;  %v513_v6 = vld [vmem:[%s6948_s29 + $0x10] sm:$0xff]  ;;  %v371_v7 = vld [vmem:[%s6940_s9 + $0x20] sm:$0xff]  ;;  %v6976_v10 = vadd.f32 %v511_v4, %v367_v0  ;;  %s10273_s14 = scalar_lea.hbm %s10329_s6, %s5918_s19  ;;  %s6603_s18 = scalar_lea.vmem %s10278_s12, 18432 }
  0x9f   : > { %v514_v8 = vld [vmem:[%s6948_s29 + $0x18] sm:$0xff]  ;;  %v515_v9 = vld [vmem:[%s6948_s29 + $0x20] sm:$0xff]  ;;  %v6978_v11 = vadd.f32 %v512_v5, %v368_v1  ;;  %v6980_v12 = vadd.f32 %v513_v6, %v369_v2  ;;  %v373_v13 = vld [vmem:[%s6940_s9 + $0x30] sm:$0xff]  ;;  %p6604_p13 = scmp.ne.s32.totalorder %s10278_s12, %s6603_s18  ;;  %s6695_s20 = smov [#allocation13]  }
  0xa0   : > { %v374_v14 = vld [vmem:[%s6940_s9 + $0x38] sm:$0xff]  ;;  %v375_v15 = vld [vmem:[%s6940_s9 + $0x40] sm:$0xff]  ;;  %v372_v16 = vld [vmem:[%s6940_s9 + $0x28] sm:$0xff]  ;;  %v6987_v18 = vadd.f32 %v514_v8, %v370_v3  ;;  %v6992_v21 = vadd.f32 %v515_v9, %v371_v7  ;;  %s6607_s26 = sshll.u32 %s6695_s20, 4  ;;  %s6608_s26 = int_to_ptr.vmem [resolvable:$false] %s6607_s26 }
  0xa1   : > { %v516_v17 = vld [vmem:[%s6948_s29 + $0x28] sm:$0xff]  ;;  %v799_v19 = vadd.f32 %v6978_v11, %v6976_v10  ;;  %v517_v22 = vld [vmem:[%s6948_s29 + $0x30] sm:$0xff]  ;;  %v518_v23 = vld [vmem:[%s6948_s29 + $0x38] sm:$0xff]  ;;  %p6605_p9 = pnand %p6604_p13, %p6842_p5  ;;  %s6609_s10 = scalar_lea.vmem %s6608_s26, 36864 }
  0xa2   : > { %v376_v20 = vld [vmem:[%s6940_s9 + $0x48] sm:$0xff]  ;;  %v519_v24 = vld [vmem:[%s6948_s29 + $0x40] sm:$0xff]  ;;  %v377_v26 = vld [vmem:[%s6940_s9 + $0x50] sm:$0xff]  ;;  %v7001_v29 = vadd.f32 %v517_v22, %v373_v13  ;;  %v7003_v30 = vadd.f32 %v518_v23, %v374_v14  ;;  %v7010_v35 = vadd.f32 %v516_v17, %v372_v16  ;;  %p6610_p1 = scmp.lt.s32.totalorder %s10278_s12, %s6608_s26  ;;  %p6611_p2 = scmp.lt.s32.totalorder %s6609_s10, %s6603_s18 }
  0xa3   : > { %v800_v25 = vadd.f32 %v799_v19, %v6980_v12  ;;  %v520_v27 = vld [vmem:[%s6948_s29 + $0x48] sm:$0xff]  ;;  %v521_v28 = vld [vmem:[%s6948_s29 + $0x50] sm:$0xff]  ;;  %v7005_v31 = vadd.f32 %v519_v24, %v375_v15  ;;  %v378_v32 = vld [vmem:[%s6940_s9 + $0x58] sm:$0xff]  ;;  %p6606_p0 = pneg %p6605_p9 }
  0xa4   : > { %v379_v33 = vld [vmem:[%s6940_s9 + $0x60] sm:$0xff]  ;;  %v380_v34 = vld [vmem:[%s6940_s9 + $0x68] sm:$0xff]  ;;  %v522_v37 = vld [vmem:[%s6948_s29 + $0x58] sm:$0xff]  ;;  %v7014_v38 = vadd.f32 %v520_v27, %v376_v20  ;;  %v806_v39 = vadd.f32 %v7003_v30, %v7001_v29  ;;  %v7020_v42 = vadd.f32 %v521_v28, %v377_v26  ;;  %p6612_p10 = por %p6611_p2, %p6610_p1 }
  0xa5   : > { %v801_v36 = vadd.f32 %v800_v25, %v6987_v18  ;;  %v381_v40 = vld [vmem:[%s6940_s9 + $0x70] sm:$0xff]  ;;  %v382_v41 = vld [vmem:[%s6940_s9 + $0x78] sm:$0xff]  ;;  %v523_v43 = vld [vmem:[%s6948_s29 + $0x60] sm:$0xff]  ;;  %v7034_v53 = vadd.f32 %v522_v37, %v378_v32 }
  0xa6   : > { %v524_v44 = vld [vmem:[%s6948_s29 + $0x68] sm:$0xff]  ;;  %v525_v45 = vld [vmem:[%s6948_s29 + $0x70] sm:$0xff]  ;;  %v807_v47 = vadd.f32 %v806_v39, %v7005_v31  ;;  %v383_v48 = vld [vmem:[%s6940_s9 + $0x80] sm:$0xff]  ;;  %v7030_v51 = vadd.f32 %v523_v43, %v379_v33  ;;  %p6613_p12 = pnand %p6612_p10, %p6606_p0 }
  0xa7   : > { %v802_v46 = vadd.f32 %v801_v36, %v6992_v21  ;;  %v526_v49 = vld [vmem:[%s6948_s29 + $0x78] sm:$0xff]  ;;  %v527_v50 = vld [vmem:[%s6948_s29 + $0x80] sm:$0xff]  ;;  %v7032_v52 = vadd.f32 %v524_v44, %v380_v34  ;;  %v384_v54 = vld [vmem:[%s6940_s9 + $0x88] sm:$0xff]  ;;  %v7037_v55 = vadd.f32 %v525_v45, %v381_v40 }
  0xa8   : > { %v385_v56 = vld [vmem:[%s6940_s9 + $0x90] sm:$0xff]  ;;  %v386_v57 = vld [vmem:[%s6940_s9 + $0x98] sm:$0xff]  ;;  %v808_v59 = vadd.f32 %v807_v47, %v7014_v38  ;;  %v528_v60 = vld [vmem:[%s6948_s29 + $0x88] sm:$0xff]  ;;  %v7044_v61 = vadd.f32 %v526_v49, %v382_v41  ;;  %v7050_v1 = vadd.f32 %v527_v50, %v383_v48 }
  0xa9   : > { %v803_v58 = vadd.f32 %v802_v46, %v7010_v35  ;;  %v813_v62 = vadd.f32 %v7032_v52, %v7030_v51  ;;  %v387_v63 = vld [vmem:[%s6940_s9 + $0xa0] sm:$0xff]  ;;  %v388_v0 = vld [vmem:[%s6940_s9 + $0xa8] sm:$0xff]  ;;  %v529_v2 = vld [vmem:[%s6948_s29 + $0x90] sm:$0xff]  ;;  %v7064_v15 = vadd.f32 %v528_v60, %v384_v54 }
  0xaa   : > { %v530_v3 = vld [vmem:[%s6948_s29 + $0x98] sm:$0xff]  ;;  %v531_v4 = vld [vmem:[%s6948_s29 + $0xa0] sm:$0xff]  ;;  %v809_v5 = vadd.f32 %v808_v59, %v7020_v42  ;;  %v389_v7 = vld [vmem:[%s6940_s9 + $0xb0] sm:$0xff]  ;;  %v7060_v13 = vadd.f32 %v529_v2, %v385_v56 }
  0xab   : > { %804 = vadd.xlane.f32.xlu0 %v803_v58  ;;  %v814_v6 = vadd.f32 %v813_v62, %v7037_v55  ;;  %v532_v8 = vld [vmem:[%s6948_s29 + $0xa8] sm:$0xff]  ;;  %v533_v9 = vld [vmem:[%s6948_s29 + $0xb0] sm:$0xff]  ;;  %v7062_v14 = vadd.f32 %v530_v3, %v386_v57  ;;  %v390_v16 = vld [vmem:[%s6940_s9 + $0xb8] sm:$0xff]  ;;  %v7067_v17 = vadd.f32 %v531_v4, %v387_v63 }
  0xac   : > { %v391_v19 = vld [vmem:[%s6940_s9 + $0xc0] sm:$0xff]  ;;  %v392_v20 = vld [vmem:[%s6940_s9 + $0xc8] sm:$0xff]  ;;  %v810_v22 = vadd.f32 %v809_v5, %v7034_v53  ;;  %v534_v24 = vld [vmem:[%s6948_s29 + $0xb8] sm:$0xff]  ;;  %v7074_v25 = vadd.f32 %v532_v8, %v388_v0  ;;  %v7080_v32 = vadd.f32 %v533_v9, %v389_v7 }
  0xad   : > { %v815_v23 = vadd.f32 %v814_v6, %v7044_v61  ;;  %v820_v26 = vadd.f32 %v7062_v14, %v7060_v13  ;;  %v393_v27 = vld [vmem:[%s6940_s9 + $0xd0] sm:$0xff]  ;;  %v394_v28 = vld [vmem:[%s6940_s9 + $0xd8] sm:$0xff]  ;;  %v535_v33 = vld [vmem:[%s6948_s29 + $0xc0] sm:$0xff]  ;;  %v7094_v46 = vadd.f32 %v534_v24, %v390_v16 }
  0xae   : > { %v536_v34 = vld [vmem:[%s6948_s29 + $0xc8] sm:$0xff]  ;;  %v537_v36 = vld [vmem:[%s6948_s29 + $0xd0] sm:$0xff]  ;;  %v395_v40 = vld [vmem:[%s6940_s9 + $0xe0] sm:$0xff]  ;;  %v7090_v44 = vadd.f32 %v535_v33, %v391_v19 }
  0xaf   : > { %811 = vadd.xlane.f32.xlu0 %v810_v22  ;;  %v816_v37 = vadd.f32 %v815_v23, %v7050_v1  ;;  %v821_v39 = vadd.f32 %v820_v26, %v7067_v17  ;;  %v538_v41 = vld [vmem:[%s6948_s29 + $0xd8] sm:$0xff]  ;;  %v539_v43 = vld [vmem:[%s6948_s29 + $0xe0] sm:$0xff]  ;;  %v7092_v45 = vadd.f32 %v536_v34, %v392_v20  ;;  %v396_v47 = vld [vmem:[%s6940_s9 + $0xe8] sm:$0xff]  ;;  %v7097_v48 = vadd.f32 %v537_v36, %v393_v27 }
  0xb0   : > { %v397_v49 = vld [vmem:[%s6940_s9 + $0xf0] sm:$0xff]  ;;  %v398_v50 = vld [vmem:[%s6940_s9 + $0xf8] sm:$0xff]  ;;  %v540_v57 = vld [vmem:[%s6948_s29 + $0xe8] sm:$0xff]  ;;  %v7104_v58 = vadd.f32 %v538_v41, %v394_v28  ;;  %v7110_v63 = vadd.f32 %v539_v43, %v395_v40 }
  0xb1   : > { %v817_v54 = vadd.f32 %v816_v37, %v7064_v15  ;;  %v822_v56 = vadd.f32 %v821_v39, %v7074_v25  ;;  %v827_v59 = vadd.f32 %v7092_v45, %v7090_v44  ;;  %v399_v60 = vld [vmem:[%s6940_s9 + $0x100] sm:$0xff]  ;;  %v400_v62 = vld [vmem:[%s6940_s9 + $0x108] sm:$0xff]  ;;  %v541_v0 = vld [vmem:[%s6948_s29 + $0xf0] sm:$0xff]  ;;  %v7124_v19 = vadd.f32 %v540_v57, %v396_v47 }
  0xb2   : > { %v542_v2 = vld [vmem:[%s6948_s29 + $0xf8] sm:$0xff]  ;;  %v543_v3 = vld [vmem:[%s6948_s29 + $0x100] sm:$0xff]  ;;  %v401_v6 = vld [vmem:[%s6940_s9 + $0x110] sm:$0xff]  ;;  %v7120_v9 = vadd.f32 %v541_v0, %v397_v49 }
  0xb3   : > { %818 = vadd.xlane.f32.xlu1 %v817_v54  ;;  %v823_v4 = vadd.f32 %v822_v56, %v7080_v32  ;;  %v828_v5 = vadd.f32 %v827_v59, %v7097_v48  ;;  %v544_v7 = vld [vmem:[%s6948_s29 + $0x108] sm:$0xff]  ;;  %v545_v8 = vld [vmem:[%s6948_s29 + $0x110] sm:$0xff]  ;;  %v7122_v16 = vadd.f32 %v542_v2, %v398_v50  ;;  %v402_v20 = vld [vmem:[%s6940_s9 + $0x118] sm:$0xff]  ;;  %v7127_v22 = vadd.f32 %v543_v3, %v399_v60 }
  0xb4   : > { %v403_v23 = vld [vmem:[%s6940_s9 + $0x120] sm:$0xff]  ;;  %v404_v24 = vld [vmem:[%s6940_s9 + $0x128] sm:$0xff]  ;;  %v546_v28 = vld [vmem:[%s6948_s29 + $0x118] sm:$0xff]  ;;  %v7134_v33 = vadd.f32 %v544_v7, %v400_v62  ;;  %v7140_v39 = vadd.f32 %v545_v8, %v401_v6 }
  0xb5   : > { %v824_v26 = vadd.f32 %v823_v4, %v7094_v46  ;;  %v829_v27 = vadd.f32 %v828_v5, %v7104_v58  ;;  %v834_v34 = vadd.f32 %v7122_v16, %v7120_v9  ;;  %v405_v36 = vld [vmem:[%s6940_s9 + $0x130] sm:$0xff]  ;;  %v406_v37 = vld [vmem:[%s6940_s9 + $0x138] sm:$0xff]  ;;  %v547_v40 = vld [vmem:[%s6948_s29 + $0x120] sm:$0xff]  ;;  %v7154_v60 = vadd.f32 %v546_v28, %v402_v20 }
  0xb6   : > { %v548_v41 = vld [vmem:[%s6948_s29 + $0x128] sm:$0xff]  ;;  %v549_v43 = vld [vmem:[%s6948_s29 + $0x130] sm:$0xff]  ;;  %v407_v50 = vld [vmem:[%s6940_s9 + $0x140] sm:$0xff]  ;;  %v7150_v57 = vadd.f32 %v547_v40, %v403_v23 }
  0xb7   : > { %825 = vadd.xlane.f32.xlu1 %v824_v26  ;;  %v830_v47 = vadd.f32 %v829_v27, %v7110_v63  ;;  %v835_v49 = vadd.f32 %v834_v34, %v7127_v22  ;;  %v550_v54 = vld [vmem:[%s6948_s29 + $0x138] sm:$0xff]  ;;  %v551_v56 = vld [vmem:[%s6948_s29 + $0x140] sm:$0xff]  ;;  %v7152_v59 = vadd.f32 %v548_v41, %v404_v24  ;;  %v408_v62 = vld [vmem:[%s6940_s9 + $0x148] sm:$0xff]  ;;  %v7157_v0 = vadd.f32 %v549_v43, %v405_v36 }
  0xb8   : > { %10682 = vst [vmem:[#allocation20_spill] sm:$0xff] %v7150_v57  ;;  %v409_v2 = vld [vmem:[%s6940_s9 + $0x150] sm:$0xff]  ;;  %v410_v3 = vld [vmem:[%s6940_s9 + $0x158] sm:$0xff]  ;;  %v552_v6 = vld [vmem:[%s6948_s29 + $0x148] sm:$0xff]  ;;  %v7164_v7 = vadd.f32 %v550_v54, %v406_v37  ;;  %v7170_v24 = vadd.f32 %v551_v56, %v407_v50 }
  0xb9   : > { %10683 = vst [vmem:[#allocation21_spill] sm:$0xff] %v7152_v59  ;;  %10684 = vst [vmem:[#allocation22_spill] sm:$0xff] %v7157_v0  ;;  %v831_v4 = vadd.f32 %v830_v47, %v7124_v19  ;;  %v836_v5 = vadd.f32 %v835_v49, %v7134_v33  ;;  %v841_v8 = vadd.f32 %v7152_v59, %v7150_v57  ;;  %v411_v20 = vld [vmem:[%s6940_s9 + $0x160] sm:$0xff]  ;;  %v412_v23 = vld [vmem:[%s6940_s9 + $0x168] sm:$0xff] }
  0xba   : > { %10685 = vst [vmem:[#allocation23_spill] sm:$0xff] %v7164_v7  ;;  %10686 = vst [vmem:[#allocation24_spill] sm:$0xff] %v7170_v24  ;;  %v553_v26 = vld [vmem:[%s6948_s29 + $0x150] sm:$0xff]  ;;  %v554_v27 = vld [vmem:[%s6948_s29 + $0x158] sm:$0xff]  ;;  %v7184_v49 = vadd.f32 %v552_v6, %v408_v62 }
  0xbb   : > { %v555_v28 = vld [vmem:[%s6948_s29 + $0x160] sm:$0xff]  ;;  %832 = vadd.xlane.f32.xlu0 %v831_v4  ;;  %v837_v34 = vadd.f32 %v836_v5, %v7140_v39  ;;  %v842_v36 = vadd.f32 %v841_v8, %v7157_v0  ;;  %v413_v37 = vld [vmem:[%s6940_s9 + $0x170] sm:$0xff]  ;;  %v556_v40 = vld [vmem:[%s6948_s29 + $0x168] sm:$0xff]  ;;  %v7180_v43 = vadd.f32 %v553_v26, %v409_v2  ;;  %v7182_v47 = vadd.f32 %v554_v27, %v410_v3 }
  0xbc   : > { %v557_v41 = vld [vmem:[%s6948_s29 + $0x170] sm:$0xff]  ;;  %10689 = vst [vmem:[#allocation27_spill] sm:$0xff] %v7184_v49  ;;  %v414_v50 = vld [vmem:[%s6940_s9 + $0x178] sm:$0xff]  ;;  %v7187_v54 = vadd.f32 %v555_v28, %v411_v20  ;;  %v415_v56 = vld [vmem:[%s6940_s9 + $0x180] sm:$0xff]  ;;  %v7194_v26 = vadd.f32 %v556_v40, %v412_v23 }
  0xbd   : > { %10687 = vst [vmem:[#allocation25_spill] sm:$0xff] %v7180_v43  ;;  %10688 = vst [vmem:[#allocation26_spill] sm:$0xff] %v7182_v47  ;;  %v416_v4 = vld [vmem:[%s6940_s9 + $0x188] sm:$0xff]  ;;  %v838_v5 = vadd.f32 %v837_v34, %v7154_v60  ;;  %v843_v8 = vadd.f32 %v842_v36, %v7164_v7  ;;  %v558_v2 = vld [vmem:[%s6948_s29 + $0x178] sm:$0xff]  ;;  %v848_v3 = vadd.f32 %v7182_v47, %v7180_v43 }
  0xbe   : > { %10690 = vst [vmem:[#allocation28_spill] sm:$0xff] %v7187_v54  ;;  %10691 = vst [vmem:[#allocation29_spill] sm:$0xff] %v7194_v26  ;;  %v417_v62 = vld [vmem:[%s6940_s9 + $0x190] sm:$0xff]  ;;  %v418_v6 = vld [vmem:[%s6940_s9 + $0x198] sm:$0xff]  ;;  %v7200_v20 = vadd.f32 %v557_v41, %v413_v37  ;;  %v7214_v41 = vadd.f32 %v558_v2, %v414_v50 }
  0xbf   : > { %v559_v27 = vld [vmem:[%s6948_s29 + $0x180] sm:$0xff]  ;;  %v560_v28 = vld [vmem:[%s6948_s29 + $0x188] sm:$0xff]  ;;  %v561_v0 = vld [vmem:[%s6948_s29 + $0x190] sm:$0xff]  ;;  %839 = vadd.xlane.f32.xlu1 %v838_v5  ;;  %v844_v34 = vadd.f32 %v843_v8, %v7170_v24  ;;  %v849_v23 = vadd.f32 %v848_v3, %v7187_v54 }
  0xc0   : > { %10692 = vst [vmem:[#allocation30_spill] sm:$0xff] %v7200_v20  ;;  %v419_v36 = vld [vmem:[%s6940_s9 + $0x1a0] sm:$0xff]  ;;  %v562_v40 = vld [vmem:[%s6948_s29 + $0x198] sm:$0xff]  ;;  %v7210_v43 = vadd.f32 %v559_v27, %v415_v56  ;;  %v7212_v37 = vadd.f32 %v560_v28, %v416_v4  ;;  %10695 = vst [vmem:[#allocation33_spill] sm:$0xff] %v7214_v41  ;;  %v7217_v5 = vadd.f32 %v561_v0, %v417_v62 }
  0xc1   : > { %v563_v47 = vld [vmem:[%s6948_s29 + $0x1a0] sm:$0xff]  ;;  %v420_v7 = vld [vmem:[%s6940_s9 + $0x1a8] sm:$0xff]  ;;  %v421_v8 = vld [vmem:[%s6940_s9 + $0x1b0] sm:$0xff]  ;;  %v845_v54 = vadd.f32 %v844_v34, %v7184_v49  ;;  %v850_v24 = vadd.f32 %v849_v23, %v7194_v26  ;;  %v7224_v27 = vadd.f32 %v562_v40, %v418_v6 }
  0xc2   : > { %10693 = vst [vmem:[#allocation31_spill] sm:$0xff] %v7210_v43  ;;  %10694 = vst [vmem:[#allocation32_spill] sm:$0xff] %v7212_v37  ;;  %v422_v3 = vld [vmem:[%s6940_s9 + $0x1b8] sm:$0xff]  ;;  %v564_v56 = vld [vmem:[%s6948_s29 + $0x1a8] sm:$0xff]  ;;  %v855_v4 = vadd.f32 %v7212_v37, %v7210_v43  ;;  %v7230_v0 = vadd.f32 %v563_v47, %v419_v36 }
  0xc3   : > { %10696 = vst [vmem:[#allocation34_spill] sm:$0xff] %v7217_v5  ;;  %10697 = vst [vmem:[#allocation35_spill] sm:$0xff] %v7224_v27  ;;  %v423_v50 = vld [vmem:[%s6940_s9 + $0x1c0] sm:$0xff]  ;;  %v424_v2 = vld [vmem:[%s6940_s9 + $0x1c8] sm:$0xff]  ;;  %846 = vadd.xlane.f32.xlu0 %v845_v54  ;;  %v851_v34 = vadd.f32 %v850_v24, %v7200_v20  ;;  %v7244_v36 = vadd.f32 %v564_v56, %v420_v7 }
  0xc4   : > { %10698 = vst [vmem:[#allocation36_spill] sm:$0xff] %v7230_v0  ;;  %v565_v62 = vld [vmem:[%s6948_s29 + $0x1b0] sm:$0xff]  ;;  %v566_v28 = vld [vmem:[%s6948_s29 + $0x1b8] sm:$0xff]  ;;  %v567_v59 = vld [vmem:[%s6948_s29 + $0x1c0] sm:$0xff]  ;;  %v856_v6 = vadd.f32 %v855_v4, %v7217_v5 }
  0xc5   : > { %v425_v23 = vld [vmem:[%s6940_s9 + $0x1d0] sm:$0xff]  ;;  %v568_v40 = vld [vmem:[%s6948_s29 + $0x1c8] sm:$0xff]  ;;  %v7240_v43 = vadd.f32 %v565_v62, %v421_v8  ;;  %v7242_v47 = vadd.f32 %v566_v28, %v422_v3  ;;  %10701 = vst [vmem:[#allocation39_spill] sm:$0xff] %v7244_v36  ;;  %v426_v26 = vld [vmem:[%s6940_s9 + $0x1d8] sm:$0xff]  ;;  %v7247_v54 = vadd.f32 %v567_v59, %v423_v50  ;;  %v852_v5 = vadd.f32 %v851_v34, %v7214_v41 }
  0xc6   : > { %v569_v37 = vld [vmem:[%s6948_s29 + $0x1d0] sm:$0xff]  ;;  %v427_v24 = vld [vmem:[%s6940_s9 + $0x1e0] sm:$0xff]  ;;  %v428_v4 = vld [vmem:[%s6940_s9 + $0x1e8] sm:$0xff]  ;;  %v857_v20 = vadd.f32 %v856_v6, %v7224_v27  ;;  %v7254_v62 = vadd.f32 %v568_v40, %v424_v2 }
  0xc7   : > { %10699 = vst [vmem:[#allocation37_spill] sm:$0xff] %v7240_v43  ;;  %10700 = vst [vmem:[#allocation38_spill] sm:$0xff] %v7242_v47  ;;  %v570_v8 = vld [vmem:[%s6948_s29 + $0x1d8] sm:$0xff]  ;;  %v862_v3 = vadd.f32 %v7242_v47, %v7240_v43  ;;  %v429_v7 = vld [vmem:[%s6940_s9 + $0x1f0] sm:$0xff]  ;;  %v7260_v59 = vadd.f32 %v569_v37, %v425_v23  ;;  %853 = vadd.xlane.f32.xlu1 %v852_v5 }
  0xc8   : > { %10702 = vst [vmem:[#allocation40_spill] sm:$0xff] %v7247_v54  ;;  %10703 = vst [vmem:[#allocation41_spill] sm:$0xff] %v7254_v62  ;;  %v430_v56 = vld [vmem:[%s6940_s9 + $0x1f8] sm:$0xff]  ;;  %v571_v50 = vld [vmem:[%s6948_s29 + $0x1e0] sm:$0xff]  ;;  %v858_v34 = vadd.f32 %v857_v20, %v7230_v0  ;;  %v7274_v23 = vadd.f32 %v570_v8, %v426_v26 }
  0xc9   : > { %10704 = vst [vmem:[#allocation42_spill] sm:$0xff] %v7260_v59  ;;  %v572_v28 = vld [vmem:[%s6948_s29 + $0x1e8] sm:$0xff]  ;;  %v573_v49 = vld [vmem:[%s6948_s29 + $0x1f0] sm:$0xff]  ;;  %v863_v2 = vadd.f32 %v862_v3, %v7247_v54  ;;  %v431_v6 = vld [vmem:[%s6940_s9 + $0x200] sm:$0xff]  ;;  %v7270_v43 = vadd.f32 %v571_v50, %v427_v24 }
  0xca   : > { %v574_v40 = vld [vmem:[%s6948_s29 + $0x1f8] sm:$0xff]  ;;  %v575_v47 = vld [vmem:[%s6948_s29 + $0x200] sm:$0xff]  ;;  %v7272_v37 = vadd.f32 %v572_v28, %v428_v4  ;;  %10707 = vst [vmem:[#allocation45_spill] sm:$0xff] %v7274_v23  ;;  %v432_v27 = vld [vmem:[%s6940_s9 + $0x208] sm:$0xff]  ;;  %v7277_v5 = vadd.f32 %v573_v49, %v429_v7  ;;  %v859_v54 = vadd.f32 %v858_v34, %v7244_v36 }
  0xcb   : > { %10705 = vst [vmem:[#allocation43_spill] sm:$0xff] %v7270_v43  ;;  %v433_v20 = vld [vmem:[%s6940_s9 + $0x210] sm:$0xff]  ;;  %v434_v3 = vld [vmem:[%s6940_s9 + $0x218] sm:$0xff]  ;;  %v864_v0 = vadd.f32 %v863_v2, %v7254_v62  ;;  %v576_v24 = vld [vmem:[%s6948_s29 + $0x208] sm:$0xff]  ;;  %v7284_v50 = vadd.f32 %v574_v40, %v430_v56  ;;  %v7290_v49 = vadd.f32 %v575_v47, %v431_v6 }
  0xcc   : > { %10706 = vst [vmem:[#allocation44_spill] sm:$0xff] %v7272_v37  ;;  %10708 = vst [vmem:[#allocation46_spill] sm:$0xff] %v7277_v5  ;;  %v869_v4 = vadd.f32 %v7272_v37, %v7270_v43  ;;  %v435_v26 = vld [vmem:[%s6940_s9 + $0x220] sm:$0xff]  ;;  %v436_v8 = vld [vmem:[%s6940_s9 + $0x228] sm:$0xff]  ;;  %860 = vadd.xlane.f32.xlu0 %v859_v54  ;;  %v7304_v6 = vadd.f32 %v576_v24, %v432_v27 }
  0xcd   : > { %10709 = vst [vmem:[#allocation47_spill] sm:$0xff] %v7284_v50  ;;  %10710 = vst [vmem:[#allocation48_spill] sm:$0xff] %v7290_v49  ;;  %v577_v7 = vld [vmem:[%s6948_s29 + $0x210] sm:$0xff]  ;;  %v578_v28 = vld [vmem:[%s6948_s29 + $0x218] sm:$0xff]  ;;  %v865_v34 = vadd.f32 %v864_v0, %v7260_v59 }
  0xce   : > { %v579_v41 = vld [vmem:[%s6948_s29 + $0x220] sm:$0xff]  ;;  %v870_v56 = vadd.f32 %v869_v4, %v7277_v5  ;;  %v437_v2 = vld [vmem:[%s6940_s9 + $0x230] sm:$0xff]  ;;  %v580_v40 = vld [vmem:[%s6948_s29 + $0x228] sm:$0xff]  ;;  %v7300_v43 = vadd.f32 %v577_v7, %v433_v20  ;;  %v7302_v47 = vadd.f32 %v578_v28, %v434_v3  ;;  %10713 = vst [vmem:[#allocation51_spill] sm:$0xff] %v7304_v6 }
  0xcf   : > { %v581_v37 = vld [vmem:[%s6948_s29 + $0x230] sm:$0xff]  ;;  %v438_v62 = vld [vmem:[%s6940_s9 + $0x238] sm:$0xff]  ;;  %v7307_v54 = vadd.f32 %v579_v41, %v435_v26  ;;  %v439_v0 = vld [vmem:[%s6940_s9 + $0x240] sm:$0xff]  ;;  %v866_v5 = vadd.f32 %v865_v34, %v7274_v23  ;;  %v7314_v7 = vadd.f32 %v580_v40, %v436_v8 }
  0xd0   : > { %10711 = vst [vmem:[#allocation49_spill] sm:$0xff] %v7300_v43  ;;  %10712 = vst [vmem:[#allocation50_spill] sm:$0xff] %v7302_v47  ;;  %v440_v4 = vld [vmem:[%s6940_s9 + $0x248] sm:$0xff]  ;;  %v871_v59 = vadd.f32 %v870_v56, %v7284_v50  ;;  %v582_v20 = vld [vmem:[%s6948_s29 + $0x238] sm:$0xff]  ;;  %v876_v3 = vadd.f32 %v7302_v47, %v7300_v43  ;;  %v7320_v41 = vadd.f32 %v581_v37, %v437_v2 }
  0xd1   : > { %10714 = vst [vmem:[#allocation52_spill] sm:$0xff] %v7307_v54  ;;  %10715 = vst [vmem:[#allocation53_spill] sm:$0xff] %v7314_v7  ;;  %v441_v27 = vld [vmem:[%s6940_s9 + $0x250] sm:$0xff]  ;;  %v442_v24 = vld [vmem:[%s6940_s9 + $0x258] sm:$0xff]  ;;  %867 = vadd.xlane.f32.xlu1 %v866_v5  ;;  %v7334_v2 = vadd.f32 %v582_v20, %v438_v62 }
  0xd2   : > { %10716 = vst [vmem:[#allocation54_spill] sm:$0xff] %v7320_v41  ;;  %v583_v26 = vld [vmem:[%s6948_s29 + $0x240] sm:$0xff]  ;;  %v584_v28 = vld [vmem:[%s6948_s29 + $0x248] sm:$0xff]  ;;  %v585_v36 = vld [vmem:[%s6948_s29 + $0x250] sm:$0xff]  ;;  %v872_v34 = vadd.f32 %v871_v59, %v7290_v49  ;;  %v877_v8 = vadd.f32 %v876_v3, %v7307_v54 }
  0xd3   : > { %v443_v56 = vld [vmem:[%s6940_s9 + $0x260] sm:$0xff]  ;;  %v586_v40 = vld [vmem:[%s6948_s29 + $0x258] sm:$0xff]  ;;  %v7330_v43 = vadd.f32 %v583_v26, %v439_v0  ;;  %v7332_v37 = vadd.f32 %v584_v28, %v440_v4  ;;  %10719 = vst [vmem:[#allocation57_spill] sm:$0xff] %v7334_v2  ;;  %v444_v50 = vld [vmem:[%s6940_s9 + $0x268] sm:$0xff]  ;;  %v7337_v5 = vadd.f32 %v585_v36, %v441_v27 }
  0xd4   : > { %v587_v47 = vld [vmem:[%s6948_s29 + $0x260] sm:$0xff]  ;;  %v445_v59 = vld [vmem:[%s6940_s9 + $0x270] sm:$0xff]  ;;  %v446_v3 = vld [vmem:[%s6940_s9 + $0x278] sm:$0xff]  ;;  %v873_v54 = vadd.f32 %v872_v34, %v7304_v6  ;;  %v878_v49 = vadd.f32 %v877_v8, %v7314_v7  ;;  %v7344_v26 = vadd.f32 %v586_v40, %v442_v24 }
  0xd5   : > { %10717 = vst [vmem:[#allocation55_spill] sm:$0xff] %v7330_v43  ;;  %10718 = vst [vmem:[#allocation56_spill] sm:$0xff] %v7332_v37  ;;  %v588_v0 = vld [vmem:[%s6948_s29 + $0x268] sm:$0xff]  ;;  %v883_v4 = vadd.f32 %v7332_v37, %v7330_v43  ;;  %v447_v62 = vld [vmem:[%s6940_s9 + $0x280] sm:$0xff]  ;;  %v7350_v36 = vadd.f32 %v587_v47, %v443_v56 }
  0xd6   : > { %10720 = vst [vmem:[#allocation58_spill] sm:$0xff] %v7337_v5  ;;  %10721 = vst [vmem:[#allocation59_spill] sm:$0xff] %v7344_v26  ;;  %v448_v20 = vld [vmem:[%s6940_s9 + $0x288] sm:$0xff]  ;;  %v589_v27 = vld [vmem:[%s6948_s29 + $0x270] sm:$0xff]  ;;  %874 = vadd.xlane.f32.xlu0 %v873_v54  ;;  %v879_v34 = vadd.f32 %v878_v49, %v7320_v41  ;;  %v7364_v56 = vadd.f32 %v588_v0, %v444_v50 }
  0xd7   : > { %10722 = vst [vmem:[#allocation60_spill] sm:$0xff] %v7350_v36  ;;  %v590_v28 = vld [vmem:[%s6948_s29 + $0x278] sm:$0xff]  ;;  %v591_v23 = vld [vmem:[%s6948_s29 + $0x280] sm:$0xff]  ;;  %v884_v24 = vadd.f32 %v883_v4, %v7337_v5  ;;  %v449_v8 = vld [vmem:[%s6940_s9 + $0x290] sm:$0xff]  ;;  %v7360_v43 = vadd.f32 %v589_v27, %v445_v59 }
  0xd8   : > { %v592_v40 = vld [vmem:[%s6948_s29 + $0x288] sm:$0xff]  ;;  %v593_v37 = vld [vmem:[%s6948_s29 + $0x290] sm:$0xff]  ;;  %v7362_v47 = vadd.f32 %v590_v28, %v446_v3  ;;  %10725 = vst [vmem:[#allocation63_spill] sm:$0xff] %v7364_v56  ;;  %v450_v7 = vld [vmem:[%s6940_s9 + $0x298] sm:$0xff]  ;;  %v7367_v54 = vadd.f32 %v591_v23, %v447_v62  ;;  %v880_v5 = vadd.f32 %v879_v34, %v7334_v2 }
  0xd9   : > { %10723 = vst [vmem:[#allocation61_spill] sm:$0xff] %v7360_v43  ;;  %v451_v49 = vld [vmem:[%s6940_s9 + $0x2a0] sm:$0xff]  ;;  %v452_v4 = vld [vmem:[%s6940_s9 + $0x2a8] sm:$0xff]  ;;  %v885_v41 = vadd.f32 %v884_v24, %v7344_v26  ;;  %v594_v59 = vld [vmem:[%s6948_s29 + $0x298] sm:$0xff]  ;;  %v7374_v27 = vadd.f32 %v592_v40, %v448_v20  ;;  %v7380_v23 = vadd.f32 %v593_v37, %v449_v8 }
  0xda   : > { %10724 = vst [vmem:[#allocation62_spill] sm:$0xff] %v7362_v47  ;;  %10726 = vst [vmem:[#allocation64_spill] sm:$0xff] %v7367_v54  ;;  %v890_v3 = vadd.f32 %v7362_v47, %v7360_v43  ;;  %v453_v50 = vld [vmem:[%s6940_s9 + $0x2b0] sm:$0xff]  ;;  %v454_v0 = vld [vmem:[%s6940_s9 + $0x2b8] sm:$0xff]  ;;  %881 = vadd.xlane.f32.xlu1 %v880_v5  ;;  %v7394_v8 = vadd.f32 %v594_v59, %v450_v7 }
  0xdb   : > { %10727 = vst [vmem:[#allocation65_spill] sm:$0xff] %v7374_v27  ;;  %10728 = vst [vmem:[#allocation66_spill] sm:$0xff] %v7380_v23  ;;  %v595_v62 = vld [vmem:[%s6948_s29 + $0x2a0] sm:$0xff]  ;;  %v596_v28 = vld [vmem:[%s6948_s29 + $0x2a8] sm:$0xff]  ;;  %v886_v34 = vadd.f32 %v885_v41, %v7350_v36 }
  0xdc   : > { %v597_v6 = vld [vmem:[%s6948_s29 + $0x2b0] sm:$0xff]  ;;  %v891_v20 = vadd.f32 %v890_v3, %v7367_v54  ;;  %v455_v24 = vld [vmem:[%s6940_s9 + $0x2c0] sm:$0xff]  ;;  %v598_v40 = vld [vmem:[%s6948_s29 + $0x2b8] sm:$0xff]  ;;  %v7390_v43 = vadd.f32 %v595_v62, %v451_v49  ;;  %v7392_v37 = vadd.f32 %v596_v28, %v452_v4  ;;  %10731 = vst [vmem:[#allocation69_spill] sm:$0xff] %v7394_v8 }
  0xdd   : > { %v599_v47 = vld [vmem:[%s6948_s29 + $0x2c0] sm:$0xff]  ;;  %v456_v26 = vld [vmem:[%s6940_s9 + $0x2c8] sm:$0xff]  ;;  %v7397_v5 = vadd.f32 %v597_v6, %v453_v50  ;;  %v457_v41 = vld [vmem:[%s6940_s9 + $0x2d0] sm:$0xff]  ;;  %v887_v54 = vadd.f32 %v886_v34, %v7364_v56  ;;  %v7404_v62 = vadd.f32 %v598_v40, %v454_v0 }
  0xde   : > { %10729 = vst [vmem:[#allocation67_spill] sm:$0xff] %v7390_v43  ;;  %10730 = vst [vmem:[#allocation68_spill] sm:$0xff] %v7392_v37  ;;  %v458_v3 = vld [vmem:[%s6940_s9 + $0x2d8] sm:$0xff]  ;;  %v892_v36 = vadd.f32 %v891_v20, %v7374_v27  ;;  %v600_v49 = vld [vmem:[%s6948_s29 + $0x2c8] sm:$0xff]  ;;  %v897_v4 = vadd.f32 %v7392_v37, %v7390_v43  ;;  %v7410_v6 = vadd.f32 %v599_v47, %v455_v24 }
  0xdf   : > { %10732 = vst [vmem:[#allocation70_spill] sm:$0xff] %v7397_v5  ;;  %10733 = vst [vmem:[#allocation71_spill] sm:$0xff] %v7404_v62  ;;  %v459_v7 = vld [vmem:[%s6940_s9 + $0x2e0] sm:$0xff]  ;;  %v460_v59 = vld [vmem:[%s6940_s9 + $0x2e8] sm:$0xff]  ;;  %888 = vadd.xlane.f32.xlu0 %v887_v54  ;;  %v7424_v24 = vadd.f32 %v600_v49, %v456_v26 }
  0xe0   : > { %10734 = vst [vmem:[#allocation72_spill] sm:$0xff] %v7410_v6  ;;  %v601_v50 = vld [vmem:[%s6948_s29 + $0x2d0] sm:$0xff]  ;;  %v602_v28 = vld [vmem:[%s6948_s29 + $0x2d8] sm:$0xff]  ;;  %v603_v2 = vld [vmem:[%s6948_s29 + $0x2e0] sm:$0xff]  ;;  %v893_v34 = vadd.f32 %v892_v36, %v7380_v23  ;;  %v898_v0 = vadd.f32 %v897_v4, %v7397_v5 }
  0xe1   : > { %v461_v20 = vld [vmem:[%s6940_s9 + $0x2f0] sm:$0xff]  ;;  %v604_v40 = vld [vmem:[%s6948_s29 + $0x2e8] sm:$0xff]  ;;  %v7420_v43 = vadd.f32 %v601_v50, %v457_v41  ;;  %v7422_v47 = vadd.f32 %v602_v28, %v458_v3  ;;  %10737 = vst [vmem:[#allocation75_spill] sm:$0xff] %v7424_v24  ;;  %v462_v27 = vld [vmem:[%s6940_s9 + $0x2f8] sm:$0xff]  ;;  %v7427_v54 = vadd.f32 %v603_v2, %v459_v7 }
  0xe2   : > { %v605_v37 = vld [vmem:[%s6948_s29 + $0x2f0] sm:$0xff]  ;;  %v463_v36 = vld [vmem:[%s6940_s9 + $0x300] sm:$0xff]  ;;  %v464_v4 = vld [vmem:[%s6940_s9 + $0x308] sm:$0xff]  ;;  %v894_v5 = vadd.f32 %v893_v34, %v7394_v8  ;;  %v899_v23 = vadd.f32 %v898_v0, %v7404_v62  ;;  %v7434_v50 = vadd.f32 %v604_v40, %v460_v59 }
  0xe3   : > { %10735 = vst [vmem:[#allocation73_spill] sm:$0xff] %v7420_v43  ;;  %10736 = vst [vmem:[#allocation74_spill] sm:$0xff] %v7422_v47  ;;  %v606_v41 = vld [vmem:[%s6948_s29 + $0x2f8] sm:$0xff]  ;;  %v904_v3 = vadd.f32 %v7422_v47, %v7420_v43  ;;  %v465_v26 = vld [vmem:[%s6940_s9 + $0x310] sm:$0xff]  ;;  %v7440_v2 = vadd.f32 %v605_v37, %v461_v20 }
  0xe4   : > { %10738 = vst [vmem:[#allocation76_spill] sm:$0xff] %v7427_v54  ;;  %10739 = vst [vmem:[#allocation77_spill] sm:$0xff] %v7434_v50  ;;  %v466_v49 = vld [vmem:[%s6940_s9 + $0x318] sm:$0xff]  ;;  %v607_v7 = vld [vmem:[%s6948_s29 + $0x300] sm:$0xff]  ;;  %895 = vadd.xlane.f32.xlu1 %v894_v5  ;;  %v900_v34 = vadd.f32 %v899_v23, %v7410_v6  ;;  %v7454_v20 = vadd.f32 %v606_v41, %v462_v27 }
  0xe5   : > { %10740 = vst [vmem:[#allocation78_spill] sm:$0xff] %v7440_v2  ;;  %v608_v28 = vld [vmem:[%s6948_s29 + $0x308] sm:$0xff]  ;;  %v609_v56 = vld [vmem:[%s6948_s29 + $0x310] sm:$0xff]  ;;  %v905_v59 = vadd.f32 %v904_v3, %v7427_v54  ;;  %v467_v0 = vld [vmem:[%s6940_s9 + $0x320] sm:$0xff]  ;;  %v7450_v43 = vadd.f32 %v607_v7, %v463_v36 }
  0xe6   : > { %v610_v40 = vld [vmem:[%s6948_s29 + $0x318] sm:$0xff]  ;;  %v611_v47 = vld [vmem:[%s6948_s29 + $0x320] sm:$0xff]  ;;  %v7452_v37 = vadd.f32 %v608_v28, %v464_v4  ;;  %10743 = vst [vmem:[#allocation81_spill] sm:$0xff] %v7454_v20  ;;  %v468_v62 = vld [vmem:[%s6940_s9 + $0x328] sm:$0xff]  ;;  %v7457_v5 = vadd.f32 %v609_v56, %v465_v26  ;;  %v901_v54 = vadd.f32 %v900_v34, %v7424_v24 }
  0xe7   : > { %10741 = vst [vmem:[#allocation79_spill] sm:$0xff] %v7450_v43  ;;  %v469_v23 = vld [vmem:[%s6940_s9 + $0x330] sm:$0xff]  ;;  %v470_v3 = vld [vmem:[%s6940_s9 + $0x338] sm:$0xff]  ;;  %v906_v6 = vadd.f32 %v905_v59, %v7434_v50  ;;  %v612_v36 = vld [vmem:[%s6948_s29 + $0x328] sm:$0xff]  ;;  %v7464_v7 = vadd.f32 %v610_v40, %v466_v49  ;;  %v7470_v56 = vadd.f32 %v611_v47, %v467_v0 }
  0xe8   : > { %10742 = vst [vmem:[#allocation80_spill] sm:$0xff] %v7452_v37  ;;  %10744 = vst [vmem:[#allocation82_spill] sm:$0xff] %v7457_v5  ;;  %v911_v4 = vadd.f32 %v7452_v37, %v7450_v43  ;;  %v471_v27 = vld [vmem:[%s6940_s9 + $0x340] sm:$0xff]  ;;  %v472_v41 = vld [vmem:[%s6940_s9 + $0x348] sm:$0xff]  ;;  %902 = vadd.xlane.f32.xlu0 %v901_v54  ;;  %v7484_v0 = vadd.f32 %v612_v36, %v468_v62 }
  0xe9   : > { %10745 = vst [vmem:[#allocation83_spill] sm:$0xff] %v7464_v7  ;;  %10746 = vst [vmem:[#allocation84_spill] sm:$0xff] %v7470_v56  ;;  %v613_v26 = vld [vmem:[%s6948_s29 + $0x330] sm:$0xff]  ;;  %v614_v28 = vld [vmem:[%s6948_s29 + $0x338] sm:$0xff]  ;;  %v907_v34 = vadd.f32 %v906_v6, %v7440_v2 }
  0xea   : > { %v615_v8 = vld [vmem:[%s6948_s29 + $0x340] sm:$0xff]  ;;  %v912_v49 = vadd.f32 %v911_v4, %v7457_v5  ;;  %v473_v59 = vld [vmem:[%s6940_s9 + $0x350] sm:$0xff]  ;;  %v616_v40 = vld [vmem:[%s6948_s29 + $0x348] sm:$0xff]  ;;  %v7480_v43 = vadd.f32 %v613_v26, %v469_v23  ;;  %v7482_v47 = vadd.f32 %v614_v28, %v470_v3  ;;  %10749 = vst [vmem:[#allocation87_spill] sm:$0xff] %v7484_v0 }
  0xeb   : > { %v617_v37 = vld [vmem:[%s6948_s29 + $0x350] sm:$0xff]  ;;  %v474_v50 = vld [vmem:[%s6940_s9 + $0x358] sm:$0xff]  ;;  %v7487_v54 = vadd.f32 %v615_v8, %v471_v27  ;;  %v475_v6 = vld [vmem:[%s6940_s9 + $0x360] sm:$0xff]  ;;  %v908_v5 = vadd.f32 %v907_v34, %v7454_v20  ;;  %v7494_v26 = vadd.f32 %v616_v40, %v472_v41 }
  0xec   : > { %10747 = vst [vmem:[#allocation85_spill] sm:$0xff] %v7480_v43  ;;  %10748 = vst [vmem:[#allocation86_spill] sm:$0xff] %v7482_v47  ;;  %v476_v4 = vld [vmem:[%s6940_s9 + $0x368] sm:$0xff]  ;;  %v913_v2 = vadd.f32 %v912_v49, %v7464_v7  ;;  %v618_v23 = vld [vmem:[%s6948_s29 + $0x358] sm:$0xff]  ;;  %v918_v3 = vadd.f32 %v7482_v47, %v7480_v43  ;;  %v7500_v8 = vadd.f32 %v617_v37, %v473_v59 }
  0xed   : > { %10750 = vst [vmem:[#allocation88_spill] sm:$0xff] %v7487_v54  ;;  %10751 = vst [vmem:[#allocation89_spill] sm:$0xff] %v7494_v26  ;;  %v477_v62 = vld [vmem:[%s6940_s9 + $0x370] sm:$0xff]  ;;  %v478_v36 = vld [vmem:[%s6940_s9 + $0x378] sm:$0xff]  ;;  %909 = vadd.xlane.f32.xlu1 %v908_v5  ;;  %v7514_v59 = vadd.f32 %v618_v23, %v474_v50 }
  0xee   : > { %10752 = vst [vmem:[#allocation90_spill] sm:$0xff] %v7500_v8  ;;  %v619_v27 = vld [vmem:[%s6948_s29 + $0x360] sm:$0xff]  ;;  %v620_v28 = vld [vmem:[%s6948_s29 + $0x368] sm:$0xff]  ;;  %v621_v24 = vld [vmem:[%s6948_s29 + $0x370] sm:$0xff]  ;;  %v914_v34 = vadd.f32 %v913_v2, %v7470_v56  ;;  %v919_v41 = vadd.f32 %v918_v3, %v7487_v54 }
  0xef   : > { %v479_v49 = vld [vmem:[%s6940_s9 + $0x380] sm:$0xff]  ;;  %v622_v40 = vld [vmem:[%s6948_s29 + $0x378] sm:$0xff]  ;;  %v7510_v43 = vadd.f32 %v619_v27, %v475_v6  ;;  %v7512_v37 = vadd.f32 %v620_v28, %v476_v4  ;;  %10755 = vst [vmem:[#allocation93_spill] sm:$0xff] %v7514_v59  ;;  %v480_v7 = vld [vmem:[%s6940_s9 + $0x388] sm:$0xff]  ;;  %v7517_v5 = vadd.f32 %v621_v24, %v477_v62 }
  0xf0   : > { %v623_v47 = vld [vmem:[%s6948_s29 + $0x380] sm:$0xff]  ;;  %v481_v2 = vld [vmem:[%s6940_s9 + $0x390] sm:$0xff]  ;;  %v482_v3 = vld [vmem:[%s6940_s9 + $0x398] sm:$0xff]  ;;  %v915_v54 = vadd.f32 %v914_v34, %v7484_v0  ;;  %v920_v56 = vadd.f32 %v919_v41, %v7494_v26  ;;  %v7524_v27 = vadd.f32 %v622_v40, %v478_v36 }
  0xf1   : > { %10753 = vst [vmem:[#allocation91_spill] sm:$0xff] %v7510_v43  ;;  %10754 = vst [vmem:[#allocation92_spill] sm:$0xff] %v7512_v37  ;;  %v624_v6 = vld [vmem:[%s6948_s29 + $0x388] sm:$0xff]  ;;  %v925_v4 = vadd.f32 %v7512_v37, %v7510_v43  ;;  %v483_v50 = vld [vmem:[%s6940_s9 + $0x3a0] sm:$0xff]  ;;  %v7530_v24 = vadd.f32 %v623_v47, %v479_v49 }
  0xf2   : > { %10756 = vst [vmem:[#allocation94_spill] sm:$0xff] %v7517_v5  ;;  %10757 = vst [vmem:[#allocation95_spill] sm:$0xff] %v7524_v27  ;;  %v484_v23 = vld [vmem:[%s6940_s9 + $0x3a8] sm:$0xff]  ;;  %v625_v62 = vld [vmem:[%s6948_s29 + $0x390] sm:$0xff]  ;;  %916 = vadd.xlane.f32.xlu0 %v915_v54  ;;  %v921_v34 = vadd.f32 %v920_v56, %v7500_v8  ;;  %v7544_v49 = vadd.f32 %v624_v6, %v480_v7 }
  0xf3   : > { %10758 = vst [vmem:[#allocation96_spill] sm:$0xff] %v7530_v24  ;;  %v626_v28 = vld [vmem:[%s6948_s29 + $0x398] sm:$0xff]  ;;  %v627_v20 = vld [vmem:[%s6948_s29 + $0x3a0] sm:$0xff]  ;;  %v926_v36 = vadd.f32 %v925_v4, %v7517_v5  ;;  %v485_v41 = vld [vmem:[%s6940_s9 + $0x3b0] sm:$0xff]  ;;  %v7540_v43 = vadd.f32 %v625_v62, %v481_v2 }
  0xf4   : > { %v628_v40 = vld [vmem:[%s6948_s29 + $0x3a8] sm:$0xff]  ;;  %v629_v37 = vld [vmem:[%s6948_s29 + $0x3b0] sm:$0xff]  ;;  %v7542_v47 = vadd.f32 %v626_v28, %v482_v3  ;;  %10761 = vst [vmem:[#allocation99_spill] sm:$0xff] %v7544_v49  ;;  %v486_v26 = vld [vmem:[%s6940_s9 + $0x3b8] sm:$0xff]  ;;  %v7547_v54 = vadd.f32 %v627_v20, %v483_v50  ;;  %v922_v5 = vadd.f32 %v921_v34, %v7514_v59 }
  0xf5   : > { %10759 = vst [vmem:[#allocation97_spill] sm:$0xff] %v7540_v43  ;;  %v487_v56 = vld [vmem:[%s6940_s9 + $0x3c0] sm:$0xff]  ;;  %v488_v4 = vld [vmem:[%s6940_s9 + $0x3c8] sm:$0xff]  ;;  %v927_v8 = vadd.f32 %v926_v36, %v7524_v27  ;;  %v630_v2 = vld [vmem:[%s6948_s29 + $0x3b8] sm:$0xff]  ;;  %v7554_v62 = vadd.f32 %v628_v40, %v484_v23  ;;  %v7560_v20 = vadd.f32 %v629_v37, %v485_v41 }
  0xf6   : > { %10760 = vst [vmem:[#allocation98_spill] sm:$0xff] %v7542_v47  ;;  %10762 = vst [vmem:[#allocation100_spill] sm:$0xff] %v7547_v54  ;;  %v932_v3 = vadd.f32 %v7542_v47, %v7540_v43  ;;  %v489_v7 = vld [vmem:[%s6940_s9 + $0x3d0] sm:$0xff]  ;;  %v490_v6 = vld [vmem:[%s6940_s9 + $0x3d8] sm:$0xff]  ;;  %923 = vadd.xlane.f32.xlu1 %v922_v5  ;;  %v7574_v41 = vadd.f32 %v630_v2, %v486_v26 }
  0xf7   : > { %10763 = vst [vmem:[#allocation101_spill] sm:$0xff] %v7554_v62  ;;  %v631_v50 = vld [vmem:[%s6948_s29 + $0x3c0] sm:$0xff]  ;;  %v632_v28 = vld [vmem:[%s6948_s29 + $0x3c8] sm:$0xff]  ;;  %v633_v0 = vld [vmem:[%s6948_s29 + $0x3d0] sm:$0xff]  ;;  %v928_v34 = vadd.f32 %v927_v8, %v7530_v24 }
  0xf8   : > { %v933_v23 = vadd.f32 %v932_v3, %v7547_v54  ;;  %v491_v36 = vld [vmem:[%s6940_s9 + $0x3e0] sm:$0xff]  ;;  %v634_v40 = vld [vmem:[%s6948_s29 + $0x3d8] sm:$0xff]  ;;  %v7570_v43 = vadd.f32 %v631_v50, %v487_v56  ;;  %v7572_v37 = vadd.f32 %v632_v28, %v488_v4  ;;  %10766 = vst [vmem:[#allocation104_spill] sm:$0xff] %v7574_v41  ;;  %v492_v27 = vld [vmem:[%s6940_s9 + $0x3e8] sm:$0xff]  ;;  %v7577_v5 = vadd.f32 %v633_v0, %v489_v7 }
  0xf9   : > { %v635_v47 = vld [vmem:[%s6948_s29 + $0x3e0] sm:$0xff]  ;;  %v493_v8 = vld [vmem:[%s6940_s9 + $0x3f0] sm:$0xff]  ;;  %v494_v3 = vld [vmem:[%s6940_s9 + $0x3f8] sm:$0xff]  ;;  %v929_v54 = vadd.f32 %v928_v34, %v7544_v49  ;;  %v7584_v56 = vadd.f32 %v634_v40, %v490_v6 }
  0xfa   : > { %10764 = vst [vmem:[#allocation102_spill] sm:$0xff] %v7570_v43  ;;  %10765 = vst [vmem:[#allocation103_spill] sm:$0xff] %v7572_v37  ;;  %v934_v24 = vadd.f32 %v933_v23, %v7554_v62  ;;  %v636_v59 = vld [vmem:[%s6948_s29 + $0x3e8] sm:$0xff]  ;;  %v939_v4 = vadd.f32 %v7572_v37, %v7570_v43  ;;  %v495_v26 = vld [vmem:[%s6940_s9 + $0x400] sm:$0xff]  ;;  %v7590_v50 = vadd.f32 %v635_v47, %v491_v36 }
  0xfb   : > { %10767 = vst [vmem:[#allocation105_spill] sm:$0xff] %v7577_v5  ;;  %10768 = vst [vmem:[#allocation106_spill] sm:$0xff] %v7584_v56  ;;  %v496_v2 = vld [vmem:[%s6940_s9 + $0x408] sm:$0xff]  ;;  %v637_v0 = vld [vmem:[%s6948_s29 + $0x3f0] sm:$0xff]  ;;  %930 = vadd.xlane.f32.xlu0 %v929_v54  ;;  %v7602_v37 = vadd.f32 %v636_v59, %v492_v27 }
  0xfc   : > { %10769 = vst [vmem:[#allocation107_spill] sm:$0xff] %v7590_v50  ;;  %v638_v7 = vld [vmem:[%s6948_s29 + $0x3f8] sm:$0xff]  ;;  %v639_v28 = vld [vmem:[%s6948_s29 + $0x400] sm:$0xff]  ;;  %v935_v34 = vadd.f32 %v934_v24, %v7560_v20  ;;  %v940_v23 = vadd.f32 %v939_v4, %v7577_v5  ;;  %v640_v6 = vld [vmem:[%s6948_s29 + $0x408] sm:$0xff]  ;;  %v7598_v40 = vadd.f32 %v637_v0, %v493_v8 }
  0xfd   : > { %v7600_v62 = vadd.f32 %v638_v7, %v494_v3  ;;  %10772 = vst [vmem:[#allocation110_spill] sm:$0xff] %v7602_v37  ;;  %v497_v43 = vld [vmem:[%s6940_s9 + $0x410] sm:$0xff]  ;;  %v7606_v36 = vadd.f32 %v639_v28, %v495_v26  ;;  %v7610_v54 = vadd.f32 %v640_v6, %v496_v2  ;;  %v498_v8 = vld [vmem:[%s6940_s9 + $0x418] sm:$0xff]  ;;  %v499_v28 = vld [vmem:[%s6940_s9 + $0x420] sm:$0xff] }
  0xfe   : > { %10770 = vst [vmem:[#allocation108_spill] sm:$0xff] %v7598_v40  ;;  %v641_v47 = vld [vmem:[%s6948_s29 + $0x410] sm:$0xff]  ;;  %v936_v49 = vadd.f32 %v935_v34, %v7574_v41  ;;  %v941_v57 = vadd.f32 %v940_v23, %v7584_v56  ;;  %v642_v59 = vld [vmem:[%s6948_s29 + $0x418] sm:$0xff]  ;;  %v644_v34 = vld [vmem:[%s6948_s29 + $0x428] sm:$0xff] }
  0xff   : > { %10771 = vst [vmem:[#allocation109_spill] sm:$0xff] %v7600_v62  ;;  %10773 = vst [vmem:[#allocation111_spill] sm:$0xff] %v7606_v36  ;;  %v946_v24 = vadd.f32 %v7600_v62, %v7598_v40  ;;  %v7617_v3 = vadd.f32 %v641_v47, %v497_v43  ;;  %v7621_v2 = vadd.f32 %v642_v59, %v498_v8  ;;  %v643_v43 = vld [vmem:[%s6948_s29 + $0x420] sm:$0xff]  ;;  %v505_v23 = vld [vmem:[%s6940_s9 + $0x450] sm:$0xff] }
 0x100   : > { %10774 = vst [vmem:[#allocation112_spill] sm:$0xff] %v7610_v54  ;;  %937 = vadd.xlane.f32.xlu1 %v936_v49  ;;  %v942_v27 = vadd.f32 %v941_v57, %v7590_v50  ;;  %v500_v57 = vld [vmem:[%s6940_s9 + $0x428] sm:$0xff]  ;;  %v506_v6 = vld [vmem:[%s6940_s9 + $0x458] sm:$0xff]  ;;  %v649_v47 = vld [vmem:[%s6948_s29 + $0x450] sm:$0xff] }
 0x101   : > { %10775 = vst [vmem:[#allocation113_spill] sm:$0xff] %v7617_v3  ;;  %v947_v4 = vadd.f32 %v946_v24, %v7606_v36  ;;  %10776 = vst [vmem:[#allocation114_spill] sm:$0xff] %v7621_v2  ;;  %v650_v24 = vld [vmem:[%s6948_s29 + $0x458] sm:$0xff]  ;;  %v7641_v36 = vadd.f32 %v649_v47, %v505_v23  ;;  %v651_v40 = vld [vmem:[%s6948_s29 + $0x460] sm:$0xff] }
 0x102   : > { %v943_v26 = vadd.f32 %v942_v27, %v7602_v37  ;;  %v5962_v8 = vld [vmem:[#allocation10 + $0x154] ss:$24 sps:$4 sm:$0xff]   ;;  %v5966_v27 = vld [vmem:[#allocation10 + $0x150] ss:$24 sps:$4 sm:$0xff]   ;;  %v7643_v62 = vadd.f32 %v650_v24, %v506_v6  ;;  %v508_v24 = vld [vmem:[%s6940_s9 + $0x468] sm:$0xff] }
 0x103   : > { %v948_v0 = vadd.f32 %v947_v4, %v7610_v54  ;;  %v5964_v59 = vld [vmem:[#allocation10 + $0x454] ss:$24 sps:$4 sm:$0xff]   ;;  %v7634_v4 = vadd.f32 %v643_v43, %v499_v28  ;;  %10779 = vst [vmem:[#allocation117_spill] sm:$0xff] %v7641_v36  ;;  %3848 = vmatprep.subr.bf16.mxu0 %v5962_v8  ;;  %v5972_v28 = vld [vmem:[#allocation10 + $0x120] ss:$24 sps:$4 sm:$0xff]  }
 0x104   : > { %944 = vadd.xlane.f32.xlu0 %v943_v26  ;;  %v7636_v26 = vadd.f32 %v644_v34, %v500_v57  ;;  %v507_v54 = vld [vmem:[%s6940_s9 + $0x460] sm:$0xff]  ;;  %10780 = vst [vmem:[#allocation118_spill] sm:$0xff] %v7643_v62  ;;  %4001 = vmatprep.subr.bf16.mxu1 %v5964_v59  ;;  %v502_v6 = vld [vmem:[%s6940_s9 + $0x438] sm:$0xff]  ;;  %v960_v59 = vadd.f32 %v7643_v62, %v7641_v36  ;;  %v653_v62 = vld [vmem:[%s6948_s29 + $0x470] sm:$0xff] }
 0x105   : > { %v949_v7 = vadd.f32 %v948_v0, %v7617_v3  ;;  %10777 = vst [vmem:[#allocation115_spill] sm:$0xff] %v7634_v4  ;;  %v5967_v0 = vld [vmem:[#allocation10 + $0x450] ss:$24 sps:$4 sm:$0xff]   ;;  %3849 = vmatpush1.bf16.msra.mxu0 %v5966_v27  ;;  %v5973_v57 = vld [vmem:[#allocation10 + $0x420] ss:$24 sps:$4 sm:$0xff]   ;;  %v7653_v8 = vadd.f32 %v651_v40, %v507_v54 }
 0x106   : > { %10778 = vst [vmem:[#allocation116_spill] sm:$0xff] %v7636_v26  ;;  %v645_v3 = vld [vmem:[%s6948_s29 + $0x430] sm:$0xff]  ;;  %4002 = vmatpush1.bf16.msra.mxu1 %v5967_v0  ;;  %v5974_v43 = vld [vmem:[#allocation10 + $0xf4] ss:$24 sps:$4 sm:$0xff]   ;;  %v953_v23 = vadd.f32 %v7636_v26, %v7634_v4  ;;  %v652_v27 = vld [vmem:[%s6948_s29 + $0x468] sm:$0xff] }
 0x107   : > { %v950_v49 = vadd.f32 %v949_v7, %v7621_v2  ;;  %v5968_v7 = vld [vmem:[#allocation10 + $0x124] ss:$24 sps:$4 sm:$0xff]   ;;  %v5976_v34 = vld [vmem:[#allocation10 + $0x3f4] ss:$24 sps:$4 sm:$0xff]   ;;  %10782 = vst [vmem:[#allocation120_spill] sm:$0xff] %v7653_v8 }
 0x108   : > { %v501_v2 = vld [vmem:[%s6940_s9 + $0x430] sm:$0xff]  ;;  %3850 = vmatprep.subr.bf16.mxu0 %v5968_v7  ;;  %v646_v47 = vld [vmem:[%s6948_s29 + $0x438] sm:$0xff]  ;;  %v647_v26 = vld [vmem:[%s6948_s29 + $0x440] sm:$0xff] }
 0x109   : > { %951 = vadd.xlane.f32.xlu1 %v950_v49  ;;  %v5970_v49 = vld [vmem:[#allocation10 + $0x424] ss:$24 sps:$4 sm:$0xff]   ;;  %v7646_v37 = vadd.f32 %v645_v3, %v501_v2  ;;  %3851 = vmatpush1.bf16.msra.mxu0 %v5972_v28  ;;  %v5978_v0 = vld [vmem:[#allocation10 + $0xf0] ss:$24 sps:$4 sm:$0xff]   ;;  %v503_v2 = vld [vmem:[%s6940_s9 + $0x440] sm:$0xff]  ;;  %v7660_v4 = vadd.f32 %v646_v47, %v502_v6  ;;  %v7665_v28 = vadd.f32 %v652_v27, %v508_v24 }
 0x10a   : > { %4003 = vmatprep.subr.bf16.mxu1 %v5970_v49  ;;  %v5979_v3 = vld [vmem:[#allocation10 + $0x3f0] ss:$24 sps:$4 sm:$0xff]   ;;  %3852 = vmatprep.subr.bf16.mxu0 %v5974_v43  ;;  %v5980_v7 = vld [vmem:[#allocation10 + $0xc4] ss:$24 sps:$4 sm:$0xff]   ;;  %v5984_v36 = vld [vmem:[#allocation10 + $0xc0] ss:$24 sps:$4 sm:$0xff]   ;;  %v7670_v6 = vadd.f32 %v647_v26, %v503_v2 }
 0x10b   : > { %10781 = vst [vmem:[#allocation119_spill] sm:$0xff] %v7646_v37  ;;  %4004 = vmatpush1.bf16.msra.mxu1 %v5973_v57  ;;  %v5982_v49 = vld [vmem:[#allocation10 + $0x3c4] ss:$24 sps:$4 sm:$0xff]   ;;  %10783 = vst [vmem:[#allocation121_spill] sm:$0xff] %v7660_v4  ;;  %v954_v40 = vadd.f32 %v953_v23, %v7646_v37  ;;  %v961_v57 = vadd.f32 %v960_v59, %v7653_v8  ;;  %v5985_v43 = vld [vmem:[#allocation10 + $0x3c0] ss:$24 sps:$4 sm:$0xff]  }
 0x10c   : > { %4005 = vmatprep.subr.bf16.mxu1 %v5976_v34  ;;  %v509_v54 = vld [vmem:[%s6940_s9 + $0x470] sm:$0xff]  ;;  %v5986_v34 = vld [vmem:[#allocation10 + $0x94] ss:$24 sps:$4 sm:$0xff]   ;;  %v504_v56 = vld [vmem:[%s6940_s9 + $0x448] sm:$0xff] }
 0x10d   : > { %3853 = vmatpush1.bf16.msra.mxu0 %v5978_v0  ;;  %v5988_v50 = vld [vmem:[#allocation10 + $0x394] ss:$24 sps:$4 sm:$0xff]   ;;  %v648_v5 = vld [vmem:[%s6948_s29 + $0x448] sm:$0xff]  ;;  %v955_v23 = vadd.f32 %v954_v40, %v7660_v4  ;;  %v5990_v24 = vld [vmem:[#allocation10 + $0x90] ss:$24 sps:$4 sm:$0xff]   ;;  %v7675_v41 = vadd.f32 %v653_v62, %v509_v54  ;;  %v962_v59 = vadd.f32 %v961_v57, %v7665_v28 }
 0x10e   : > { %3854 = vmatprep.subr.bf16.mxu0 %v5980_v7  ;;  %v510_v47 = vld [vmem:[%s6940_s9 + $0x478] sm:$0xff]  ;;  %v5992_v8 = vld [vmem:[#allocation10 + $0x64] ss:$24 sps:$4 sm:$0xff]   ;;  %v7678_v7 = vadd.f32 %v648_v5, %v504_v56  ;;  %v5996_v2 = vld [vmem:[#allocation10 + $0x60] ss:$24 sps:$4 sm:$0xff]  }
 0x10f   : > { %4006 = vmatpush1.bf16.msra.mxu1 %v5979_v3  ;;  %v654_v37 = vld [vmem:[%s6948_s29 + $0x478] sm:$0xff]  ;;  %v5994_v0 = vld [vmem:[#allocation10 + $0x364] ss:$24 sps:$4 sm:$0xff]   ;;  %v956_v26 = vadd.f32 %v955_v23, %v7670_v6  ;;  %v963_v62 = vadd.f32 %v962_v59, %v7675_v41 }
 0x110   : > { %4007 = vmatprep.subr.bf16.mxu1 %v5982_v49  ;;  %v5991_v27 = vld [vmem:[#allocation10 + $0x390] ss:$24 sps:$4 sm:$0xff]   ;;  %v5997_v49 = vld [vmem:[#allocation10 + $0x360] ss:$24 sps:$4 sm:$0xff]   ;;  %v7681_v4 = vadd.f32 %v654_v37, %v510_v47  ;;  %v5998_v54 = vld [vmem:[#allocation10 + $0x34] ss:$24 sps:$4 sm:$0xff]  }
 0x111   : > { %3855 = vmatpush1.bf16.msra.mxu0 %v5984_v36  ;;  %v6000_v36 = vld [vmem:[#allocation10 + $0x334] ss:$24 sps:$4 sm:$0xff]  }
 0x112   : > { %3856 = vmatprep.subr.bf16.mxu0 %v5986_v34 }
 0x113   : > { %4008 = vmatpush1.bf16.msra.mxu1 %v5985_v43 }
 0x114   : > { %4009 = vmatprep.subr.bf16.mxu1 %v5988_v50 }
 0x115   : > { %3857 = vmatpush1.bf16.msra.mxu0 %v5990_v24 }
 0x116   : > { %3858 = vmatprep.subr.bf16.mxu0 %v5992_v8  ;;  %v7710_v8 = vadd.f32 %v963_v62, %v7681_v4 }
 0x117   : > { %4010 = vmatpush1.bf16.msra.mxu1 %v5991_v27  ;;  %v6004_v27 = vld [vmem:[#allocation10 + $0x4] ss:$24 sps:$4 sm:$0xff]  }
 0x118   : > { %4011 = vmatprep.subr.bf16.mxu1 %v5994_v0 }
 0x119   : > { %3859 = vmatpush1.bf16.msra.mxu0 %v5996_v2 }
 0x11a   : > { %3860 = vmatprep.subr.bf16.mxu0 %v5998_v54 }
 0x11b   : > { %4012 = vmatpush1.bf16.msra.mxu1 %v5997_v49 }
 0x11c   : > { %4013 = vmatprep.subr.bf16.mxu1 %v6000_v36 }
 0x134   : > { %v805_v3 = vpop.xlane.xlu0 %804 }
 0x135   : > { %v968_v40 = vmul.f32 0.0013020834, %v805_v3 }
 0x137   : > { %v7685_v57 = vsub.f32 %v6976_v10, %v968_v40  ;;  %v7688_v50 = vsub.f32 %v6978_v11, %v968_v40  ;;  %v7691_v5 = vsub.f32 %v6980_v12, %v968_v40  ;;  %v7694_v56 = vsub.f32 %v6987_v18, %v968_v40  ;;  %v6002_v11 = vld [vmem:[#allocation10 + $0x30] ss:$24 sps:$4 sm:$0xff]  }
 0x138   : > { %v812_v37 = vpop.xlane.xlu0 %811  ;;  %v7697_v43 = vsub.f32 %v6992_v21, %v968_v40  ;;  %v7700_v34 = vsub.f32 %v7010_v35, %v968_v40  ;;  %v7703_v10 = vadd.f32 %v956_v26, %v7678_v7  ;;  %v6003_v21 = vld [vmem:[#allocation10 + $0x330] ss:$24 sps:$4 sm:$0xff]   ;;  %v6006_v40 = vld [vmem:[#allocation10 + $0x304] ss:$24 sps:$4 sm:$0xff]   ;;  %3861 = vmatpush1.bf16.msra.mxu0 %v6002_v11 }
 0x139   : > { %v969_v23 = vmul.f32 0.0013020834, %v812_v37  ;;  %v1136_v12 = vmul.f32 %v7685_v57, %v7685_v57  ;;  %v1137_v18 = vmul.f32 %v7688_v50, %v7688_v50  ;;  %v1138_v35 = vmul.f32 %v7691_v5, %v7691_v5  ;;  %4014 = vmatpush1.bf16.msra.mxu1 %v6003_v21  ;;  %3862 = vmatprep.subr.bf16.mxu0 %v6004_v27 }
 0x13a   : > { %10784 = vst [vmem:[#allocation122_spill] sm:$0xff] %v7697_v43  ;;  %v1139_v47 = vmul.f32 %v7694_v56, %v7694_v56  ;;  %v1140_v24 = vmul.f32 %v7697_v43, %v7697_v43  ;;  %v1141_v37 = vmul.f32 %v7700_v34, %v7700_v34  ;;  %v6009_v43 = vld [vmem:[#allocation10 + $0x300] ss:$24 sps:$4 sm:$0xff]   ;;  %4015 = vmatprep.subr.bf16.mxu1 %v6006_v40 }
 0x13b   : > { %v1280_v59 = vadd.f32 %v1137_v18, %v1136_v12  ;;  %v7719_v0 = vsub.f32 %v7001_v29, %v969_v23  ;;  %v7722_v3 = vsub.f32 %v7003_v30, %v969_v23  ;;  %v7725_v26 = vsub.f32 %v7005_v31, %v969_v23  ;;  %v6008_v30 = vld [vmem:[#allocation10] ss:$24 sps:$4 sm:$0xff]  }
 0x13c   : > { %v819_v62 = vpop.xlane.xlu1 %818  ;;  %v7730_v2 = vsub.f32 %v7014_v38, %v969_v23  ;;  %v7733_v49 = vsub.f32 %v7020_v42, %v969_v23  ;;  %v7736_v29 = vsub.f32 %v7034_v53, %v969_v23  ;;  %v6010_v23 = vld [vmem:[#allocation10 + $0x2d4] ss:$24 sps:$4 sm:$0xff]   ;;  %3863 = vmatpush1.bf16.msra.mxu0 %v6008_v30 }
 0x13d   : > { %10785 = vst [vmem:[#allocation123_spill] sm:$0xff] %v7719_v0  ;;  %10786 = vst [vmem:[#allocation124_spill] sm:$0xff] %v7722_v3  ;;  %v970_v12 = vmul.f32 0.0013020834, %v819_v62  ;;  %v1281_v31 = vadd.f32 %v1280_v59, %v1138_v35  ;;  %v1142_v54 = vmul.f32 %v7719_v0, %v7719_v0  ;;  %v1143_v18 = vmul.f32 %v7722_v3, %v7722_v3 }
 0x13e   : > { %10787 = vst [vmem:[#allocation125_spill] sm:$0xff] %v7725_v26  ;;  %10788 = vst [vmem:[#allocation126_spill] sm:$0xff] %v7730_v2  ;;  %v1144_v38 = vmul.f32 %v7725_v26, %v7725_v26  ;;  %v1145_v42 = vmul.f32 %v7730_v2, %v7730_v2  ;;  %v1146_v53 = vmul.f32 %v7733_v49, %v7733_v49  ;;  %v6012_v26 = vld [vmem:[#allocation10 + $0x5d4] ss:$24 sps:$4 sm:$0xff]   ;;  %4016 = vmatpush1.bf16.msra.mxu1 %v6009_v43 }
 0x13f   : > { %10789 = vst [vmem:[#allocation127_spill] sm:$0xff] %v7733_v49  ;;  %v1147_v36 = vmul.f32 %v7736_v29, %v7736_v29  ;;  %v1282_v35 = vadd.f32 %v1281_v31, %v1139_v47  ;;  %v1287_v59 = vadd.f32 %v1143_v18, %v1142_v54  ;;  %v7751_v62 = vsub.f32 %v7030_v51, %v970_v12 }
 0x140   : > { %v7754_v0 = vsub.f32 %v7032_v52, %v970_v12  ;;  %v826_v3 = vpop.xlane.xlu1 %825  ;;  %v7757_v2 = vsub.f32 %v7037_v55, %v970_v12  ;;  %v7760_v49 = vsub.f32 %v7044_v61, %v970_v12  ;;  %v7763_v11 = vsub.f32 %v7050_v1, %v970_v12  ;;  %3864 = vmatprep.subr.bf16.mxu0 %v6010_v23 }
 0x141   : > { %v7766_v47 = vsub.f32 %v7064_v15, %v970_v12  ;;  %v971_v51 = vmul.f32 0.0013020834, %v826_v3  ;;  %v1283_v31 = vadd.f32 %v1282_v35, %v1140_v24  ;;  %v1288_v52 = vadd.f32 %v1287_v59, %v1144_v38  ;;  %4017 = vmatprep.subr.bf16.mxu1 %v6012_v26 }
 0x142   : > { %10790 = vst [vmem:[#allocation128_spill] sm:$0xff] %v7763_v11  ;;  %v1148_v21 = vmul.f32 %v7751_v62, %v7751_v62  ;;  %v1149_v55 = vmul.f32 %v7754_v0, %v7754_v0  ;;  %v1150_v61 = vmul.f32 %v7757_v2, %v7757_v2  ;;  %v1151_v1 = vmul.f32 %v7760_v49, %v7760_v49 }
 0x143   : > { %10791 = vst [vmem:[#allocation129_spill] sm:$0xff] %v7766_v47  ;;  %v1152_v15 = vmul.f32 %v7763_v11, %v7763_v11  ;;  %v1284_v27 = vadd.f32 %v1283_v31, %v1141_v37  ;;  %v1289_v24 = vadd.f32 %v1288_v52, %v1145_v42  ;;  %v1153_v3 = vmul.f32 %v7766_v47, %v7766_v47  ;;  %v10823_v47 = vld [vmem:[#allocation35_spill] sm:$0xff] }
 0x144   : > { %v7781_v40 = vsub.f32 %v7060_v13, %v971_v51  ;;  %v833_v12 = vpop.xlane.xlu0 %832  ;;  %v1294_v54 = vadd.f32 %v1149_v55, %v1148_v21  ;;  %v7784_v18 = vsub.f32 %v7062_v14, %v971_v51  ;;  %v7787_v38 = vsub.f32 %v7067_v17, %v971_v51 }
 0x145   : > { %v7790_v35 = vsub.f32 %v7074_v25, %v971_v51  ;;  %v972_v37 = vmul.f32 0.0013020834, %v833_v12  ;;  %1285 = vadd.xlane.f32.xlu0 %v1284_v27  ;;  %v1290_v30 = vadd.f32 %v1289_v24, %v1146_v53  ;;  %v7793_v42 = vsub.f32 %v7080_v32, %v971_v51 }
 0x146   : > { %v7796_v13 = vsub.f32 %v7094_v46, %v971_v51  ;;  %v1295_v43 = vadd.f32 %v1294_v54, %v1150_v61  ;;  %v1154_v14 = vmul.f32 %v7781_v40, %v7781_v40  ;;  %v1155_v17 = vmul.f32 %v7784_v18, %v7784_v18 }
 0x147   : > { %10792 = vst [vmem:[#allocation130_spill] sm:$0xff] %v7793_v42  ;;  %v1156_v25 = vmul.f32 %v7787_v38, %v7787_v38  ;;  %v1291_v23 = vadd.f32 %v1290_v30, %v1147_v36  ;;  %v1157_v53 = vmul.f32 %v7790_v35, %v7790_v35  ;;  %v1158_v32 = vmul.f32 %v7793_v42, %v7793_v42 }
 0x148   : > { %10793 = vst [vmem:[#allocation131_spill] sm:$0xff] %v7796_v13  ;;  %v1159_v46 = vmul.f32 %v7796_v13, %v7796_v13  ;;  %v840_v26 = vpop.xlane.xlu1 %839  ;;  %v1296_v59 = vadd.f32 %v1295_v43, %v1151_v1  ;;  %v1301_v51 = vadd.f32 %v1155_v17, %v1154_v14  ;;  %v7811_v31 = vsub.f32 %v7090_v44, %v972_v37 }
 0x149   : > { %v7814_v52 = vsub.f32 %v7092_v45, %v972_v37  ;;  %v973_v21 = vmul.f32 0.0013020834, %v840_v26  ;;  %958 = vadd.xlane.f32.xlu0 %v7703_v10  ;;  %1292 = vadd.xlane.f32.xlu1 %v1291_v23  ;;  %v7818_v36 = vsub.f32 %v7097_v48, %v972_v37  ;;  %v7821_v55 = vsub.f32 %v7104_v58, %v972_v37 }
 0x14a   : > { %v7824_v61 = vsub.f32 %v7110_v63, %v972_v37  ;;  %v1297_v1 = vadd.f32 %v1296_v59, %v1152_v15  ;;  %v1302_v27 = vadd.f32 %v1301_v51, %v1156_v25  ;;  %v7827_v44 = vsub.f32 %v7124_v19, %v972_v37 }
 0x14b   : > { %v1160_v45 = vmul.f32 %v7811_v31, %v7811_v31  ;;  %v1161_v10 = vmul.f32 %v7814_v52, %v7814_v52  ;;  %v1162_v48 = vmul.f32 %v7818_v36, %v7818_v36  ;;  %v1163_v58 = vmul.f32 %v7821_v55, %v7821_v55 }
 0x14c   : > { %10794 = vst [vmem:[#allocation132_spill] sm:$0xff] %v7824_v61  ;;  %10795 = vst [vmem:[#allocation133_spill] sm:$0xff] %v7827_v44  ;;  %v1164_v63 = vmul.f32 %v7824_v61, %v7824_v61  ;;  %v847_v15 = vpop.xlane.xlu0 %846  ;;  %v1298_v24 = vadd.f32 %v1297_v1, %v1153_v3  ;;  %v1303_v12 = vadd.f32 %v1302_v27, %v1157_v53  ;;  %v10799_v27 = vld [vmem:[#allocation21_spill] sm:$0xff] }
 0x14d   : > { %v1165_v19 = vmul.f32 %v7827_v44, %v7827_v44  ;;  %v7842_v54 = vsub.f32 %v7120_v9, %v973_v21  ;;  %v974_v37 = vmul.f32 0.0013020834, %v847_v15  ;;  %965 = vadd.xlane.f32.xlu1 %v7710_v8  ;;  %v1308_v30 = vadd.f32 %v1161_v10, %v1160_v45  ;;  %v10806_v61 = vld [vmem:[#allocation25_spill] sm:$0xff]  ;;  %v10808_v44 = vld [vmem:[#allocation26_spill] sm:$0xff] }
 0x14e   : > { %v7846_v43 = vsub.f32 %v7122_v16, %v973_v21  ;;  %v7849_v14 = vsub.f32 %v7127_v22, %v973_v21  ;;  %1299 = vadd.xlane.f32.xlu0 %v1298_v24  ;;  %v1304_v17 = vadd.f32 %v1303_v12, %v1158_v32  ;;  %v7852_v3 = vsub.f32 %v7134_v33, %v973_v21  ;;  %v10802_v24 = vld [vmem:[#allocation24_spill] sm:$0xff] }
 0x14f   : > { %v7855_v25 = vsub.f32 %v7140_v39, %v973_v21  ;;  %v7858_v9 = vsub.f32 %v7154_v60, %v973_v21  ;;  %v1309_v23 = vadd.f32 %v1308_v30, %v1162_v48  ;;  %v1166_v8 = vmul.f32 %v7842_v54, %v7842_v54  ;;  %v10798_v21 = vld [vmem:[#allocation20_spill] sm:$0xff]  ;;  %v10801_v48 = vld [vmem:[#allocation23_spill] sm:$0xff] }
 0x150   : > { %v1167_v16 = vmul.f32 %v7846_v43, %v7846_v43  ;;  %v1168_v22 = vmul.f32 %v7849_v14, %v7849_v14  ;;  %v854_v53 = vpop.xlane.xlu1 %853  ;;  %v1305_v32 = vadd.f32 %v1304_v17, %v1159_v46  ;;  %v1169_v33 = vmul.f32 %v7852_v3, %v7852_v3  ;;  %v10800_v46 = vld [vmem:[#allocation22_spill] sm:$0xff] }
 0x151   : > { %10796 = vst [vmem:[#allocation134_spill] sm:$0xff] %v7855_v25  ;;  %10797 = vst [vmem:[#allocation135_spill] sm:$0xff] %v7858_v9  ;;  %v1170_v39 = vmul.f32 %v7855_v25, %v7855_v25  ;;  %v1171_v60 = vmul.f32 %v7858_v9, %v7858_v9  ;;  %v975_v26 = vmul.f32 0.0013020834, %v854_v53  ;;  %v1310_v59 = vadd.f32 %v1309_v23, %v1163_v58  ;;  %v10804_v58 = vld [vmem:[#allocation27_spill] sm:$0xff]  ;;  %v10809_v9 = vld [vmem:[#allocation28_spill] sm:$0xff] }
 0x152   : > { %v1315_v51 = vadd.f32 %v1167_v16, %v1166_v8  ;;  %v7873_v1 = vsub.f32 %v10798_v21, %v974_v37  ;;  %1306 = vadd.xlane.f32.xlu1 %v1305_v32  ;;  %v7876_v45 = vsub.f32 %v10799_v27, %v974_v37  ;;  %v7879_v10 = vsub.f32 %v10800_v46, %v974_v37  ;;  %v6014_v16 = vld [vmem:[#allocation10 + $0x2d0] ss:$24 sps:$4 sm:$0xff]   ;;  %v6016_v32 = vld [vmem:[#allocation10 + $0x2a4] ss:$24 sps:$4 sm:$0xff]  }
 0x153   : > { %v7882_v15 = vsub.f32 %v10801_v48, %v974_v37  ;;  %v7885_v12 = vsub.f32 %v10802_v24, %v974_v37  ;;  %v1311_v30 = vadd.f32 %v1310_v59, %v1164_v63  ;;  %v7888_v23 = vsub.f32 %v10804_v58, %v974_v37  ;;  %v6015_v53 = vld [vmem:[#allocation10 + $0x5d0] ss:$24 sps:$4 sm:$0xff]   ;;  %3865 = vmatpush2.bf16.msra.mxu0 %v6014_v16 }
 0x154   : > { %v1316_v17 = vadd.f32 %v1315_v51, %v1168_v22  ;;  %v1172_v8 = vmul.f32 %v7873_v1, %v7873_v1  ;;  %v1173_v27 = vmul.f32 %v7876_v45, %v7876_v45  ;;  %v1174_v46 = vmul.f32 %v7879_v10, %v7879_v10  ;;  %v6018_v22 = vld [vmem:[#allocation10 + $0x5a4] ss:$24 sps:$4 sm:$0xff]   ;;  %4018 = vmatpush2.bf16.msra.mxu1 %v6015_v53  ;;  %v10815_v16 = vld [vmem:[#allocation33_spill] sm:$0xff]  ;;  %v6021_v53 = vld [vmem:[#allocation10 + $0x5a0] ss:$24 sps:$4 sm:$0xff]  }
 0x155   : > { %10803 = vst [vmem:[#allocation20_spill] sm:$0xff] %v7885_v12  ;;  %10805 = vst [vmem:[#allocation21_spill] sm:$0xff] %v7888_v23  ;;  %v861_v21 = vpop.xlane.xlu0 %860  ;;  %v1175_v63 = vmul.f32 %v7882_v15, %v7882_v15  ;;  %v1176_v37 = vmul.f32 %v7885_v12, %v7885_v12  ;;  %v1312_v51 = vadd.f32 %v1311_v30, %v1165_v19  ;;  %3866 = vmatprep.subr.bf16.mxu0 %v6016_v32  ;;  %v10811_v19 = vld [vmem:[#allocation29_spill] sm:$0xff]  ;;  %v10813_v30 = vld [vmem:[#allocation30_spill] sm:$0xff] }
 0x156   : > { %v976_v59 = vmul.f32 0.0013020834, %v861_v21  ;;  %v1317_v48 = vadd.f32 %v1316_v17, %v1169_v33  ;;  %v1177_v24 = vmul.f32 %v7888_v23, %v7888_v23  ;;  %v1322_v58 = vadd.f32 %v1173_v27, %v1172_v8  ;;  %v6022_v27 = vld [vmem:[#allocation10 + $0x274] ss:$24 sps:$4 sm:$0xff]   ;;  %4019 = vmatprep.subr.bf16.mxu1 %v6018_v22  ;;  %v10817_v23 = vld [vmem:[#allocation31_spill] sm:$0xff] }
 0x157   : > { %v7903_v25 = vsub.f32 %v10806_v61, %v975_v26  ;;  %v7906_v11 = vsub.f32 %v10808_v44, %v975_v26  ;;  %v7909_v42 = vsub.f32 %v10809_v9, %v975_v26  ;;  %1313 = vadd.xlane.f32.xlu0 %v1312_v51  ;;  %v7912_v33 = vsub.f32 %v10811_v19, %v975_v26  ;;  %v6020_v61 = vld [vmem:[#allocation10 + $0x2a0] ss:$24 sps:$4 sm:$0xff]   ;;  %v6024_v51 = vld [vmem:[#allocation10 + $0x574] ss:$24 sps:$4 sm:$0xff]  }
 0x158   : > { %v1318_v21 = vadd.f32 %v1317_v48, %v1170_v39  ;;  %v7915_v17 = vsub.f32 %v10813_v30, %v975_v26  ;;  %v7918_v8 = vsub.f32 %v10815_v16, %v975_v26  ;;  %v1323_v12 = vadd.f32 %v1322_v58, %v1174_v46  ;;  %3867 = vmatpush2.bf16.msra.mxu0 %v6020_v61  ;;  %v10819_v22 = vld [vmem:[#allocation32_spill] sm:$0xff] }
 0x159   : > { %10807 = vst [vmem:[#allocation22_spill] sm:$0xff] %v7903_v25  ;;  %10810 = vst [vmem:[#allocation23_spill] sm:$0xff] %v7909_v42  ;;  %v1178_v9 = vmul.f32 %v7903_v25, %v7903_v25  ;;  %v1179_v39 = vmul.f32 %v7906_v11, %v7906_v11  ;;  %v1180_v32 = vmul.f32 %v7909_v42, %v7909_v42  ;;  %4020 = vmatpush2.bf16.msra.mxu1 %v6021_v53  ;;  %v10825_v61 = vld [vmem:[#allocation36_spill] sm:$0xff] }
 0x15a   : > { %10812 = vst [vmem:[#allocation24_spill] sm:$0xff] %v7912_v33  ;;  %10814 = vst [vmem:[#allocation27_spill] sm:$0xff] %v7915_v17  ;;  %v868_v44 = vpop.xlane.xlu1 %867  ;;  %v1319_v19 = vadd.f32 %v1318_v21, %v1171_v60  ;;  %v1181_v26 = vmul.f32 %v7912_v33, %v7912_v33  ;;  %v1182_v30 = vmul.f32 %v7915_v17, %v7915_v17  ;;  %3868 = vmatprep.subr.bf16.mxu0 %v6022_v27  ;;  %v10821_v21 = vld [vmem:[#allocation34_spill] sm:$0xff] }
 0x15b   : > { %10816 = vst [vmem:[#allocation25_spill] sm:$0xff] %v7918_v8  ;;  %v977_v48 = vmul.f32 0.0013020834, %v868_v44  ;;  %v1324_v46 = vadd.f32 %v1323_v12, %v1175_v63  ;;  %v1183_v58 = vmul.f32 %v7918_v8, %v7918_v8  ;;  %v1329_v16 = vadd.f32 %v1179_v39, %v1178_v9  ;;  %v10827_v39 = vld [vmem:[#allocation39_spill] sm:$0xff]  ;;  %4021 = vmatprep.subr.bf16.mxu1 %v6024_v51 }
 0x15c   : > { %v7933_v13 = vsub.f32 %v10817_v23, %v976_v59  ;;  %1320 = vadd.xlane.f32.xlu1 %v1319_v19  ;;  %v7936_v60 = vsub.f32 %v10819_v22, %v976_v59  ;;  %v7939_v44 = vsub.f32 %v10821_v21, %v976_v59  ;;  %v7942_v17 = vsub.f32 %v10823_v47, %v976_v59  ;;  %v6026_v19 = vld [vmem:[#allocation10 + $0x270] ss:$24 sps:$4 sm:$0xff]   ;;  %v6028_v21 = vld [vmem:[#allocation10 + $0x244] ss:$24 sps:$4 sm:$0xff]  }
 0x15d   : > { %v7945_v12 = vsub.f32 %v10825_v61, %v976_v59  ;;  %v1325_v53 = vadd.f32 %v1324_v46, %v1176_v37  ;;  %v1330_v9 = vadd.f32 %v1329_v16, %v1180_v32  ;;  %v7948_v23 = vsub.f32 %v10827_v39, %v976_v59  ;;  %v6027_v22 = vld [vmem:[#allocation10 + $0x570] ss:$24 sps:$4 sm:$0xff]   ;;  %v6030_v32 = vld [vmem:[#allocation10 + $0x544] ss:$24 sps:$4 sm:$0xff]   ;;  %3869 = vmatpush2.bf16.msra.mxu0 %v6026_v19 }
 0x15e   : > { %10818 = vst [vmem:[#allocation26_spill] sm:$0xff] %v7933_v13  ;;  %10820 = vst [vmem:[#allocation28_spill] sm:$0xff] %v7936_v60  ;;  %v1184_v27 = vmul.f32 %v7933_v13, %v7933_v13  ;;  %v1185_v47 = vmul.f32 %v7936_v60, %v7936_v60  ;;  %v1186_v61 = vmul.f32 %v7939_v44, %v7939_v44  ;;  %v10829_v39 = vld [vmem:[#allocation37_spill] sm:$0xff]  ;;  %v10831_v60 = vld [vmem:[#allocation38_spill] sm:$0xff]  ;;  %4022 = vmatpush2.bf16.msra.mxu1 %v6027_v22 }
 0x15f   : > { %10822 = vst [vmem:[#allocation29_spill] sm:$0xff] %v7939_v44  ;;  %10824 = vst [vmem:[#allocation30_spill] sm:$0xff] %v7942_v17  ;;  %v875_v63 = vpop.xlane.xlu0 %874  ;;  %v1187_v37 = vmul.f32 %v7942_v17, %v7942_v17  ;;  %v1326_v59 = vadd.f32 %v1325_v53, %v1177_v24  ;;  %v1331_v46 = vadd.f32 %v1330_v9, %v1181_v26  ;;  %v10833_v44 = vld [vmem:[#allocation40_spill] sm:$0xff]  ;;  %v10835_v53 = vld [vmem:[#allocation41_spill] sm:$0xff]  ;;  %3870 = vmatprep.subr.bf16.mxu0 %v6028_v21 }
 0x160   : > { %10826 = vst [vmem:[#allocation33_spill] sm:$0xff] %v7945_v12  ;;  %10828 = vst [vmem:[#allocation31_spill] sm:$0xff] %v7948_v23  ;;  %v978_v8 = vmul.f32 0.0013020834, %v875_v63  ;;  %v1188_v16 = vmul.f32 %v7945_v12, %v7945_v12  ;;  %v1189_v51 = vmul.f32 %v7948_v23, %v7948_v23  ;;  %v1336_v63 = vadd.f32 %v1185_v47, %v1184_v27  ;;  %v10837_v12 = vld [vmem:[#allocation42_spill] sm:$0xff]  ;;  %v10839_v27 = vld [vmem:[#allocation45_spill] sm:$0xff] }
 0x161   : > { %v7963_v13 = vsub.f32 %v10829_v39, %v977_v48  ;;  %v7966_v42 = vsub.f32 %v10831_v60, %v977_v48  ;;  %v7969_v25 = vsub.f32 %v10833_v44, %v977_v48  ;;  %1327 = vadd.xlane.f32.xlu0 %v1326_v59  ;;  %v1332_v26 = vadd.f32 %v1331_v46, %v1182_v30  ;;  %v10843_v21 = vld [vmem:[#allocation44_spill] sm:$0xff] }
 0x162   : > { %v7972_v9 = vsub.f32 %v10835_v53, %v977_v48  ;;  %v7975_v23 = vsub.f32 %v10837_v12, %v977_v48  ;;  %v7978_v19 = vsub.f32 %v10839_v27, %v977_v48  ;;  %v1337_v47 = vadd.f32 %v1336_v63, %v1186_v61  ;;  %4023 = vmatprep.subr.bf16.mxu1 %v6030_v32  ;;  %v10841_v63 = vld [vmem:[#allocation43_spill] sm:$0xff] }
 0x163   : > { %10830 = vst [vmem:[#allocation32_spill] sm:$0xff] %v7963_v13  ;;  %10832 = vst [vmem:[#allocation34_spill] sm:$0xff] %v7966_v42  ;;  %v882_v24 = vpop.xlane.xlu1 %881  ;;  %v1190_v60 = vmul.f32 %v7963_v13, %v7963_v13  ;;  %v1191_v44 = vmul.f32 %v7966_v42, %v7966_v42  ;;  %v1333_v30 = vadd.f32 %v1332_v26, %v1183_v58  ;;  %v10845_v58 = vld [vmem:[#allocation46_spill] sm:$0xff]  ;;  %v10847_v26 = vld [vmem:[#allocation47_spill] sm:$0xff] }
 0x164   : > { %10834 = vst [vmem:[#allocation35_spill] sm:$0xff] %v7969_v25  ;;  %10836 = vst [vmem:[#allocation36_spill] sm:$0xff] %v7972_v9  ;;  %v979_v22 = vmul.f32 0.0013020834, %v882_v24  ;;  %v1192_v59 = vmul.f32 %v7969_v25, %v7969_v25  ;;  %v1193_v12 = vmul.f32 %v7972_v9, %v7972_v9  ;;  %v1338_v46 = vadd.f32 %v1337_v47, %v1187_v37  ;;  %v10849_v25 = vld [vmem:[#allocation48_spill] sm:$0xff]  ;;  %v10851_v13 = vld [vmem:[#allocation51_spill] sm:$0xff] }
 0x165   : > { %10838 = vst [vmem:[#allocation39_spill] sm:$0xff] %v7975_v23  ;;  %10840 = vst [vmem:[#allocation37_spill] sm:$0xff] %v7978_v19  ;;  %v1194_v48 = vmul.f32 %v7975_v23, %v7975_v23  ;;  %v1343_v61 = vadd.f32 %v1191_v44, %v1190_v60  ;;  %v7991_v39 = vsub.f32 %v10841_v63, %v978_v8  ;;  %1334 = vadd.xlane.f32.xlu1 %v1333_v30  ;;  %v6032_v63 = vld [vmem:[#allocation10 + $0x240] ss:$24 sps:$4 sm:$0xff]  }
 0x166   : > { %v7994_v32 = vsub.f32 %v10843_v21, %v978_v8  ;;  %v7997_v24 = vsub.f32 %v10845_v58, %v978_v8  ;;  %v8000_v27 = vsub.f32 %v10847_v26, %v978_v8  ;;  %v8003_v37 = vsub.f32 %v10849_v25, %v978_v8  ;;  %v6033_v30 = vld [vmem:[#allocation10 + $0x540] ss:$24 sps:$4 sm:$0xff]   ;;  %3871 = vmatpush2.bf16.msra.mxu0 %v6032_v63 }
 0x167   : > { %10842 = vst [vmem:[#allocation38_spill] sm:$0xff] %v7991_v39  ;;  %v1339_v23 = vadd.f32 %v1338_v46, %v1188_v16  ;;  %v1195_v60 = vmul.f32 %v7978_v19, %v7978_v19  ;;  %v1344_v44 = vadd.f32 %v1343_v61, %v1192_v59  ;;  %v8008_v21 = vsub.f32 %v10851_v13, %v978_v8  ;;  %v6036_v16 = vld [vmem:[#allocation10 + $0x514] ss:$24 sps:$4 sm:$0xff]  }
 0x168   : > { %v889_v53 = vpop.xlane.xlu0 %888  ;;  %10844 = vst [vmem:[#allocation40_spill] sm:$0xff] %v7994_v32  ;;  %10846 = vst [vmem:[#allocation41_spill] sm:$0xff] %v7997_v24  ;;  %v1196_v58 = vmul.f32 %v7991_v39, %v7991_v39  ;;  %v1197_v26 = vmul.f32 %v7994_v32, %v7994_v32  ;;  %v1198_v25 = vmul.f32 %v7997_v24, %v7997_v24  ;;  %v10853_v19 = vld [vmem:[#allocation49_spill] sm:$0xff]  ;;  %v10855_v32 = vld [vmem:[#allocation50_spill] sm:$0xff]  ;;  %4024 = vmatpush2.bf16.msra.mxu1 %v6033_v30 }
 0x169   : > { %10848 = vst [vmem:[#allocation42_spill] sm:$0xff] %v8000_v27  ;;  %10850 = vst [vmem:[#allocation45_spill] sm:$0xff] %v8003_v37  ;;  %v980_v47 = vmul.f32 0.0013020834, %v889_v53  ;;  %v6034_v53 = vld [vmem:[#allocation10 + $0x214] ss:$24 sps:$4 sm:$0xff]   ;;  %v1340_v46 = vadd.f32 %v1339_v23, %v1189_v51  ;;  %v1345_v9 = vadd.f32 %v1344_v44, %v1193_v12  ;;  %v1199_v59 = vmul.f32 %v8000_v27, %v8000_v27 }
 0x16a   : > { %10852 = vst [vmem:[#allocation43_spill] sm:$0xff] %v8008_v21  ;;  %v1200_v13 = vmul.f32 %v8003_v37, %v8003_v37  ;;  %v1350_v61 = vadd.f32 %v1197_v26, %v1196_v58  ;;  %v8021_v39 = vsub.f32 %v10853_v19, %v979_v22  ;;  %v8024_v42 = vsub.f32 %v10855_v32, %v979_v22  ;;  %v10857_v24 = vld [vmem:[#allocation52_spill] sm:$0xff]  ;;  %v10859_v51 = vld [vmem:[#allocation53_spill] sm:$0xff]  ;;  %v10861_v44 = vld [vmem:[#allocation54_spill] sm:$0xff] }
 0x16b   : > { %v8027_v17 = vsub.f32 %v10857_v24, %v979_v22  ;;  %1341 = vadd.xlane.f32.xlu0 %v1340_v46  ;;  %v1346_v23 = vadd.f32 %v1345_v9, %v1194_v48  ;;  %v8030_v12 = vsub.f32 %v10859_v51, %v979_v22  ;;  %v8033_v37 = vsub.f32 %v10861_v44, %v979_v22  ;;  %v10863_v58 = vld [vmem:[#allocation57_spill] sm:$0xff]  ;;  %v10865_v46 = vld [vmem:[#allocation55_spill] sm:$0xff] }
 0x16c   : > { %10854 = vst [vmem:[#allocation44_spill] sm:$0xff] %v8021_v39  ;;  %10856 = vst [vmem:[#allocation46_spill] sm:$0xff] %v8024_v42  ;;  %3872 = vmatprep.subr.bf16.mxu0 %v6034_v53  ;;  %v1351_v63 = vadd.f32 %v1350_v61, %v1198_v25  ;;  %v8036_v19 = vsub.f32 %v10863_v58, %v979_v22  ;;  %v1202_v32 = vmul.f32 %v8021_v39, %v8021_v39  ;;  %v10871_v44 = vld [vmem:[#allocation59_spill] sm:$0xff] }
 0x16d   : > { %v896_v8 = vpop.xlane.xlu1 %895  ;;  %10858 = vst [vmem:[#allocation47_spill] sm:$0xff] %v8027_v17  ;;  %10860 = vst [vmem:[#allocation48_spill] sm:$0xff] %v8030_v12  ;;  %v1203_v24 = vmul.f32 %v8024_v42, %v8024_v42  ;;  %4025 = vmatprep.subr.bf16.mxu1 %v6036_v16  ;;  %v1347_v9 = vadd.f32 %v1346_v23, %v1195_v60  ;;  %v1201_v48 = vmul.f32 %v8008_v21, %v8008_v21  ;;  %v10869_v23 = vld [vmem:[#allocation58_spill] sm:$0xff]  ;;  %v6038_v21 = vld [vmem:[#allocation10 + $0x210] ss:$24 sps:$4 sm:$0xff]  }
 0x16e   : > { %10862 = vst [vmem:[#allocation51_spill] sm:$0xff] %v8033_v37  ;;  %10864 = vst [vmem:[#allocation49_spill] sm:$0xff] %v8036_v19  ;;  %v981_v30 = vmul.f32 0.0013020834, %v896_v8  ;;  %v1204_v26 = vmul.f32 %v8027_v17, %v8027_v17  ;;  %v1352_v53 = vadd.f32 %v1351_v63, %v1199_v59  ;;  %v1205_v22 = vmul.f32 %v8030_v12, %v8030_v12  ;;  %v10867_v8 = vld [vmem:[#allocation56_spill] sm:$0xff] }
 0x16f   : > { %v1357_v25 = vadd.f32 %v1203_v24, %v1202_v32  ;;  %v8049_v61 = vsub.f32 %v10865_v46, %v980_v47  ;;  %1348 = vadd.xlane.f32.xlu1 %v1347_v9  ;;  %v1206_v16 = vmul.f32 %v8033_v37, %v8033_v37  ;;  %v8054_v60 = vsub.f32 %v10867_v8, %v980_v47  ;;  %v10873_v46 = vld [vmem:[#allocation60_spill] sm:$0xff]  ;;  %v10875_v8 = vld [vmem:[#allocation63_spill] sm:$0xff] }
 0x170   : > { %v8057_v51 = vsub.f32 %v10869_v23, %v980_v47  ;;  %v8060_v58 = vsub.f32 %v10871_v44, %v980_v47  ;;  %v1353_v63 = vadd.f32 %v1352_v53, %v1200_v13  ;;  %v1207_v32 = vmul.f32 %v8036_v19, %v8036_v19  ;;  %v6039_v37 = vld [vmem:[#allocation10 + $0x510] ss:$24 sps:$4 sm:$0xff]   ;;  %v6040_v17 = vld [vmem:[#allocation10 + $0x1e4] ss:$24 sps:$4 sm:$0xff]   ;;  %3873 = vmatpush2.bf16.msra.mxu0 %v6038_v21 }
 0x171   : > { %10866 = vst [vmem:[#allocation50_spill] sm:$0xff] %v8049_v61  ;;  %10868 = vst [vmem:[#allocation52_spill] sm:$0xff] %v8054_v60  ;;  %v903_v59 = vpop.xlane.xlu0 %902  ;;  %v1358_v24 = vadd.f32 %v1357_v25, %v1204_v26  ;;  %v8065_v9 = vsub.f32 %v10873_v46, %v980_v47  ;;  %v8068_v39 = vsub.f32 %v10875_v8, %v980_v47  ;;  %v6042_v53 = vld [vmem:[#allocation10 + $0x4e4] ss:$24 sps:$4 sm:$0xff]   ;;  %4026 = vmatpush2.bf16.msra.mxu1 %v6039_v37 }
 0x172   : > { %10870 = vst [vmem:[#allocation53_spill] sm:$0xff] %v8057_v51  ;;  %10872 = vst [vmem:[#allocation54_spill] sm:$0xff] %v8060_v58  ;;  %v1208_v23 = vmul.f32 %v8049_v61, %v8049_v61  ;;  %v1209_v44 = vmul.f32 %v8054_v60, %v8054_v60  ;;  %v1210_v13 = vmul.f32 %v8057_v51, %v8057_v51  ;;  %v982_v47 = vmul.f32 0.0013020834, %v903_v59  ;;  %v10877_v61 = vld [vmem:[#allocation61_spill] sm:$0xff]  ;;  %v10879_v60 = vld [vmem:[#allocation62_spill] sm:$0xff] }
 0x173   : > { %10874 = vst [vmem:[#allocation57_spill] sm:$0xff] %v8065_v9  ;;  %10876 = vst [vmem:[#allocation55_spill] sm:$0xff] %v8068_v39  ;;  %v1354_v26 = vadd.f32 %v1353_v63, %v1201_v48  ;;  %v1359_v25 = vadd.f32 %v1358_v24, %v1205_v22  ;;  %v1211_v46 = vmul.f32 %v8060_v58, %v8060_v58  ;;  %3874 = vmatprep.subr.bf16.mxu0 %v6040_v17  ;;  %v10881_v22 = vld [vmem:[#allocation64_spill] sm:$0xff]  ;;  %v10883_v24 = vld [vmem:[#allocation65_spill] sm:$0xff] }
 0x174   : > { %v1212_v19 = vmul.f32 %v8065_v9, %v8065_v9  ;;  %v1364_v12 = vadd.f32 %v1209_v44, %v1208_v23  ;;  %v8081_v42 = vsub.f32 %v10877_v61, %v981_v30  ;;  %v8084_v27 = vsub.f32 %v10879_v60, %v981_v30  ;;  %v10885_v21 = vld [vmem:[#allocation66_spill] sm:$0xff]  ;;  %v10887_v44 = vld [vmem:[#allocation69_spill] sm:$0xff]  ;;  %4027 = vmatprep.subr.bf16.mxu1 %v6042_v53  ;;  %v10894_v9 = vld [vmem:[#allocation71_spill] sm:$0xff] }
 0x175   : > { %1355 = vadd.xlane.f32.xlu0 %v1354_v26  ;;  %v1360_v48 = vadd.f32 %v1359_v25, %v1206_v16  ;;  %v8087_v63 = vsub.f32 %v10881_v22, %v981_v30  ;;  %v8090_v51 = vsub.f32 %v10883_v24, %v981_v30  ;;  %v8093_v59 = vsub.f32 %v10885_v21, %v981_v30  ;;  %v10889_v21 = vld [vmem:[#allocation67_spill] sm:$0xff] }
 0x176   : > { %v910_v8 = vpop.xlane.xlu1 %909  ;;  %10878 = vst [vmem:[#allocation56_spill] sm:$0xff] %v8081_v42  ;;  %10880 = vst [vmem:[#allocation58_spill] sm:$0xff] %v8084_v27  ;;  %v1365_v23 = vadd.f32 %v1364_v12, %v1210_v13  ;;  %v8096_v61 = vsub.f32 %v10887_v44, %v981_v30  ;;  %v1214_v60 = vmul.f32 %v8081_v42, %v8081_v42 }
 0x177   : > { %10882 = vst [vmem:[#allocation59_spill] sm:$0xff] %v8087_v63  ;;  %10884 = vst [vmem:[#allocation60_spill] sm:$0xff] %v8090_v51  ;;  %v1215_v17 = vmul.f32 %v8084_v27, %v8084_v27  ;;  %v983_v37 = vmul.f32 0.0013020834, %v910_v8  ;;  %v1361_v16 = vadd.f32 %v1360_v48, %v1207_v32  ;;  %v1213_v26 = vmul.f32 %v8068_v39, %v8068_v39  ;;  %v10891_v32 = vld [vmem:[#allocation68_spill] sm:$0xff]  ;;  %v10892_v48 = vld [vmem:[#allocation70_spill] sm:$0xff] }
 0x178   : > { %10886 = vst [vmem:[#allocation63_spill] sm:$0xff] %v8093_v59  ;;  %10888 = vst [vmem:[#allocation61_spill] sm:$0xff] %v8096_v61  ;;  %v1216_v25 = vmul.f32 %v8087_v63, %v8087_v63  ;;  %v1366_v22 = vadd.f32 %v1365_v23, %v1211_v46  ;;  %v1217_v12 = vmul.f32 %v8090_v51, %v8090_v51  ;;  %v6046_v63 = vld [vmem:[#allocation10 + $0x1b4] ss:$24 sps:$4 sm:$0xff]  }
 0x179   : > { %v1218_v30 = vmul.f32 %v8093_v59, %v8093_v59  ;;  %v1371_v13 = vadd.f32 %v1215_v17, %v1214_v60  ;;  %1362 = vadd.xlane.f32.xlu1 %v1361_v16  ;;  %v8111_v53 = vsub.f32 %v10889_v21, %v982_v47  ;;  %v8114_v8 = vsub.f32 %v10891_v32, %v982_v47  ;;  %v10896_v60 = vld [vmem:[#allocation72_spill] sm:$0xff]  ;;  %v6044_v16 = vld [vmem:[#allocation10 + $0x1e0] ss:$24 sps:$4 sm:$0xff]   ;;  %v10900_v27 = vld [vmem:[#allocation73_spill] sm:$0xff] }
 0x17a   : > { %v8117_v44 = vsub.f32 %v10892_v48, %v982_v47  ;;  %v8120_v46 = vsub.f32 %v10894_v9, %v982_v47  ;;  %v1367_v23 = vadd.f32 %v1366_v22, %v1212_v19  ;;  %v1219_v39 = vmul.f32 %v8096_v61, %v8096_v61  ;;  %v6045_v21 = vld [vmem:[#allocation10 + $0x4e0] ss:$24 sps:$4 sm:$0xff]   ;;  %3875 = vmatpush2.bf16.msra.mxu0 %v6044_v16 }
 0x17b   : > { %v917_v24 = vpop.xlane.xlu0 %916  ;;  %10890 = vst [vmem:[#allocation62_spill] sm:$0xff] %v8111_v53  ;;  %v1372_v59 = vadd.f32 %v1371_v13, %v1216_v25  ;;  %v8125_v17 = vsub.f32 %v10896_v60, %v982_v47  ;;  %v10898_v32 = vld [vmem:[#allocation75_spill] sm:$0xff]  ;;  %v1220_v48 = vmul.f32 %v8111_v53, %v8111_v53  ;;  %v1221_v19 = vmul.f32 %v8114_v8, %v8114_v8  ;;  %v6048_v25 = vld [vmem:[#allocation10 + $0x4b4] ss:$24 sps:$4 sm:$0xff]  }
 0x17c   : > { %10893 = vst [vmem:[#allocation64_spill] sm:$0xff] %v8117_v44  ;;  %10895 = vst [vmem:[#allocation65_spill] sm:$0xff] %v8120_v46  ;;  %v8128_v51 = vsub.f32 %v10898_v32, %v982_v47  ;;  %v1222_v9 = vmul.f32 %v8117_v44, %v8117_v44  ;;  %v984_v22 = vmul.f32 0.0013020834, %v917_v24  ;;  %v1368_v13 = vadd.f32 %v1367_v23, %v1213_v26  ;;  %v10902_v53 = vld [vmem:[#allocation74_spill] sm:$0xff]  ;;  %v10906_v24 = vld [vmem:[#allocation77_spill] sm:$0xff] }
 0x17d   : > { %10897 = vst [vmem:[#allocation66_spill] sm:$0xff] %v8125_v17  ;;  %v1373_v60 = vadd.f32 %v1372_v59, %v1217_v12  ;;  %v1223_v61 = vmul.f32 %v8120_v46, %v8120_v46  ;;  %4028 = vmatpush2.bf16.msra.mxu1 %v6045_v21  ;;  %v1378_v32 = vadd.f32 %v1221_v19, %v1220_v48  ;;  %v10904_v59 = vld [vmem:[#allocation76_spill] sm:$0xff]  ;;  %v10908_v21 = vld [vmem:[#allocation78_spill] sm:$0xff]  ;;  %v10910_v19 = vld [vmem:[#allocation81_spill] sm:$0xff] }
 0x17e   : > { %10899 = vst [vmem:[#allocation69_spill] sm:$0xff] %v8128_v51  ;;  %v8139_v58 = vsub.f32 %v10900_v27, %v983_v37  ;;  %v8142_v33 = vsub.f32 %v10902_v53, %v983_v37  ;;  %3876 = vmatprep.subr.bf16.mxu0 %v6046_v63  ;;  %1369 = vadd.xlane.f32.xlu0 %v1368_v13 }
 0x17f   : > { %v924_v42 = vpop.xlane.xlu1 %923  ;;  %v1374_v44 = vadd.f32 %v1373_v60, %v1218_v30  ;;  %v1224_v26 = vmul.f32 %v8125_v17, %v8125_v17  ;;  %v8147_v12 = vsub.f32 %v10904_v59, %v983_v37  ;;  %v8150_v23 = vsub.f32 %v10906_v24, %v983_v37  ;;  %4029 = vmatprep.subr.bf16.mxu1 %v6048_v25  ;;  %v10916_v17 = vld [vmem:[#allocation82_spill] sm:$0xff] }
 0x180   : > { %v985_v47 = vmul.f32 0.0013020834, %v924_v42  ;;  %10901 = vst [vmem:[#allocation67_spill] sm:$0xff] %v8139_v58  ;;  %10903 = vst [vmem:[#allocation68_spill] sm:$0xff] %v8142_v33  ;;  %v1379_v16 = vadd.f32 %v1378_v32, %v1222_v9  ;;  %v8153_v27 = vsub.f32 %v10908_v21, %v983_v37  ;;  %v1226_v53 = vmul.f32 %v8139_v58, %v8139_v58  ;;  %v10912_v21 = vld [vmem:[#allocation79_spill] sm:$0xff] }
 0x181   : > { %10905 = vst [vmem:[#allocation70_spill] sm:$0xff] %v8147_v12  ;;  %10907 = vst [vmem:[#allocation71_spill] sm:$0xff] %v8150_v23  ;;  %v1227_v63 = vmul.f32 %v8142_v33, %v8142_v33  ;;  %v1375_v30 = vadd.f32 %v1374_v44, %v1219_v39  ;;  %v1225_v48 = vmul.f32 %v8128_v51, %v8128_v51  ;;  %v10914_v39 = vld [vmem:[#allocation80_spill] sm:$0xff] }
 0x182   : > { %10909 = vst [vmem:[#allocation72_spill] sm:$0xff] %v8153_v27  ;;  %v8162_v13 = vsub.f32 %v10910_v19, %v983_v37  ;;  %v1228_v9 = vmul.f32 %v8147_v12, %v8147_v12  ;;  %v1380_v32 = vadd.f32 %v1379_v16, %v1223_v61  ;;  %v1229_v59 = vmul.f32 %v8150_v23, %v8150_v23  ;;  %v10918_v19 = vld [vmem:[#allocation83_spill] sm:$0xff]  ;;  %v10920_v12 = vld [vmem:[#allocation84_spill] sm:$0xff] }
 0x183   : > { %v1385_v24 = vadd.f32 %v1227_v63, %v1226_v53  ;;  %1376 = vadd.xlane.f32.xlu1 %v1375_v30  ;;  %v8171_v25 = vsub.f32 %v10912_v21, %v984_v22  ;;  %v8174_v44 = vsub.f32 %v10914_v39, %v984_v22  ;;  %v8177_v37 = vsub.f32 %v10916_v17, %v984_v22  ;;  %v6050_v63 = vld [vmem:[#allocation10 + $0x1b0] ss:$24 sps:$4 sm:$0xff]  }
 0x184   : > { %v931_v42 = vpop.xlane.xlu0 %930  ;;  %10911 = vst [vmem:[#allocation75_spill] sm:$0xff] %v8162_v13  ;;  %v8180_v51 = vsub.f32 %v10918_v19, %v984_v22  ;;  %v1230_v61 = vmul.f32 %v8153_v27, %v8153_v27  ;;  %v8185_v53 = vsub.f32 %v10920_v12, %v984_v22  ;;  %v6051_v30 = vld [vmem:[#allocation10 + $0x4b0] ss:$24 sps:$4 sm:$0xff]   ;;  %v1231_v21 = vmul.f32 %v8162_v13, %v8162_v13  ;;  %v6054_v19 = vld [vmem:[#allocation10 + $0x484] ss:$24 sps:$4 sm:$0xff]  }
 0x185   : > { %v8166_v60 = vmul.f32 0.0013020834, %v931_v42  ;;  %10913 = vst [vmem:[#allocation73_spill] sm:$0xff] %v8171_v25  ;;  %10915 = vst [vmem:[#allocation74_spill] sm:$0xff] %v8174_v44  ;;  %v1381_v42 = vadd.f32 %v1380_v32, %v1224_v26  ;;  %v1386_v16 = vadd.f32 %v1385_v24, %v1228_v9  ;;  %v1232_v17 = vmul.f32 %v8171_v25, %v8171_v25  ;;  %v6052_v32 = vld [vmem:[#allocation10 + $0x184] ss:$24 sps:$4 sm:$0xff]  }
 0x186   : > { %10917 = vst [vmem:[#allocation76_spill] sm:$0xff] %v8177_v37  ;;  %10919 = vst [vmem:[#allocation77_spill] sm:$0xff] %v8180_v51  ;;  %v1233_v39 = vmul.f32 %v8174_v44, %v8174_v44  ;;  %v1234_v26 = vmul.f32 %v8177_v37, %v8177_v37  ;;  %v10922_v27 = vld [vmem:[#allocation87_spill] sm:$0xff]  ;;  %v1235_v13 = vmul.f32 %v8180_v51, %v8180_v51  ;;  %3877 = vmatpush2.bf16.msra.mxu0 %v6050_v63  ;;  %v10924_v44 = vld [vmem:[#allocation85_spill] sm:$0xff] }
 0x187   : > { %10921 = vst [vmem:[#allocation78_spill] sm:$0xff] %v8185_v53  ;;  %v1382_v24 = vadd.f32 %v1381_v42, %v1225_v48  ;;  %v1387_v12 = vadd.f32 %v1386_v16, %v1229_v59  ;;  %v8196_v58 = vsub.f32 %v10922_v27, %v984_v22  ;;  %v1236_v25 = vmul.f32 %v8185_v53, %v8185_v53  ;;  %v10926_v37 = vld [vmem:[#allocation86_spill] sm:$0xff]  ;;  %v10928_v22 = vld [vmem:[#allocation88_spill] sm:$0xff]  ;;  %v10930_v42 = vld [vmem:[#allocation89_spill] sm:$0xff] }
 0x188   : > { %v1392_v23 = vadd.f32 %v1233_v39, %v1232_v17  ;;  %v8203_v33 = vsub.f32 %v10924_v44, %v985_v47  ;;  %v8206_v46 = vsub.f32 %v10926_v37, %v985_v47  ;;  %4030 = vmatpush2.bf16.msra.mxu1 %v6051_v30  ;;  %v8209_v27 = vsub.f32 %v10928_v22, %v985_v47  ;;  %v10932_v63 = vld [vmem:[#allocation90_spill] sm:$0xff]  ;;  %v10934_v44 = vld [vmem:[#allocation93_spill] sm:$0xff] }
 0x189   : > { %v938_v9 = vpop.xlane.xlu1 %937  ;;  %10923 = vst [vmem:[#allocation81_spill] sm:$0xff] %v8196_v58  ;;  %1383 = vadd.xlane.f32.xlu0 %v1382_v24  ;;  %v1388_v59 = vadd.f32 %v1387_v12, %v1230_v61  ;;  %v8212_v16 = vsub.f32 %v10930_v42, %v985_v47  ;;  %v8215_v51 = vsub.f32 %v10932_v63, %v985_v47  ;;  %v10940_v42 = vld [vmem:[#allocation94_spill] sm:$0xff] }
 0x18a   : > { %10925 = vst [vmem:[#allocation79_spill] sm:$0xff] %v8203_v33  ;;  %10927 = vst [vmem:[#allocation80_spill] sm:$0xff] %v8206_v46  ;;  %v987_v17 = vmul.f32 0.0013020834, %v938_v9  ;;  %v1393_v39 = vadd.f32 %v1392_v23, %v1234_v26  ;;  %v8218_v53 = vsub.f32 %v10934_v44, %v985_v47  ;;  %v1238_v37 = vmul.f32 %v8203_v33, %v8203_v33  ;;  %v10936_v26 = vld [vmem:[#allocation91_spill] sm:$0xff]  ;;  %v10948_v33 = vld [vmem:[#allocation97_spill] sm:$0xff] }
 0x18b   : > { %10929 = vst [vmem:[#allocation82_spill] sm:$0xff] %v8209_v27  ;;  %10931 = vst [vmem:[#allocation83_spill] sm:$0xff] %v8212_v16  ;;  %3878 = vmatprep.subr.bf16.mxu0 %v6052_v32  ;;  %4031 = vmatprep.subr.bf16.mxu1 %v6054_v19  ;;  %v1389_v61 = vadd.f32 %v1388_v59, %v1231_v21  ;;  %v1237_v30 = vmul.f32 %v8196_v58, %v8196_v58  ;;  %v10938_v19 = vld [vmem:[#allocation92_spill] sm:$0xff] }
 0x18c   : > { %10933 = vst [vmem:[#allocation84_spill] sm:$0xff] %v8215_v51  ;;  %10935 = vst [vmem:[#allocation87_spill] sm:$0xff] %v8218_v53  ;;  %v1239_v24 = vmul.f32 %v8206_v46, %v8206_v46  ;;  %v1240_v12 = vmul.f32 %v8209_v27, %v8209_v27  ;;  %v1394_v23 = vadd.f32 %v1393_v39, %v1235_v13  ;;  %v10942_v13 = vld [vmem:[#allocation95_spill] sm:$0xff] }
 0x18d   : > { %v945_v48 = vpop.xlane.xlu0 %944  ;;  %v1241_v47 = vmul.f32 %v8212_v16, %v8212_v16  ;;  %v8232_v22 = vsub.f32 %v10936_v26, %v8166_v60  ;;  %1390 = vadd.xlane.f32.xlu1 %v1389_v61  ;;  %v8236_v59 = vsub.f32 %v10938_v19, %v8166_v60  ;;  %v8240_v63 = vsub.f32 %v10940_v42, %v8166_v60  ;;  %v6056_v26 = vld [vmem:[#allocation10 + $0x180] ss:$24 sps:$4 sm:$0xff]  }
 0x18e   : > { %v988_v9 = vmul.f32 0.0013020834, %v945_v48  ;;  %v1399_v21 = vadd.f32 %v1239_v24, %v1238_v37  ;;  %v8244_v48 = vsub.f32 %v10942_v13, %v8166_v60  ;;  %v1395_v39 = vadd.f32 %v1394_v23, %v1236_v25  ;;  %v10944_v37 = vld [vmem:[#allocation96_spill] sm:$0xff]  ;;  %v6057_v19 = vld [vmem:[#allocation10 + $0x480] ss:$24 sps:$4 sm:$0xff]   ;;  %3879 = vmatpush2.bf16.msra.mxu0 %v6056_v26 }
 0x18f   : > { %10937 = vst [vmem:[#allocation85_spill] sm:$0xff] %v8232_v22  ;;  %10939 = vst [vmem:[#allocation86_spill] sm:$0xff] %v8236_v59  ;;  %v1242_v44 = vmul.f32 %v8215_v51, %v8215_v51  ;;  %v1243_v61 = vmul.f32 %v8218_v53, %v8218_v53  ;;  %v8252_v24 = vsub.f32 %v10944_v37, %v8166_v60  ;;  %v10946_v53 = vld [vmem:[#allocation99_spill] sm:$0xff]  ;;  %v10950_v16 = vld [vmem:[#allocation98_spill] sm:$0xff]  ;;  %4032 = vmatpush2.bf16.msra.mxu1 %v6057_v19 }
 0x190   : > { %10941 = vst [vmem:[#allocation88_spill] sm:$0xff] %v8240_v63  ;;  %10943 = vst [vmem:[#allocation89_spill] sm:$0xff] %v8244_v48  ;;  %v1400_v58 = vadd.f32 %v1399_v21, %v1240_v12  ;;  %v1244_v42 = vmul.f32 %v8232_v22, %v8232_v22  ;;  %v1245_v13 = vmul.f32 %v8236_v59, %v8236_v59  ;;  %v10957_v19 = vld [vmem:[#allocation104_spill] sm:$0xff] }
 0x191   : > { %10945 = vst [vmem:[#allocation90_spill] sm:$0xff] %v8252_v24  ;;  %v1246_v25 = vmul.f32 %v8240_v63, %v8240_v63  ;;  %v1396_v51 = vadd.f32 %v1395_v39, %v1237_v30  ;;  %v8262_v27 = vsub.f32 %v10946_v53, %v8166_v60  ;;  %v1247_v37 = vmul.f32 %v8244_v48, %v8244_v48  ;;  %v10954_v53 = vld [vmem:[#allocation101_spill] sm:$0xff] }
 0x192   : > { %v952_v32 = vpop.xlane.xlu1 %951  ;;  %v1401_v12 = vadd.f32 %v1400_v58, %v1241_v47  ;;  %v1406_v21 = vadd.f32 %v1245_v13, %v1244_v42  ;;  %v8267_v22 = vsub.f32 %v10948_v33, %v987_v17  ;;  %v8270_v59 = vsub.f32 %v10950_v16, %v987_v17 }
 0x193   : > { %v989_v23 = vmul.f32 0.0013020834, %v952_v32  ;;  %10947 = vst [vmem:[#allocation93_spill] sm:$0xff] %v8262_v27  ;;  %1397 = vadd.xlane.f32.xlu0 %v1396_v51  ;;  %v1248_v30 = vmul.f32 %v8252_v24, %v8252_v24  ;;  %v10952_v32 = vld [vmem:[#allocation100_spill] sm:$0xff]  ;;  %v8278_v39 = vsub.f32 %v10954_v53, %v987_v17  ;;  %v8281_v58 = vsub.f32 %v7560_v20, %v987_v17  ;;  %v10961_v24 = vld [vmem:[#allocation103_spill] sm:$0xff] }
 0x194   : > { %10949 = vst [vmem:[#allocation91_spill] sm:$0xff] %v8267_v22  ;;  %10951 = vst [vmem:[#allocation92_spill] sm:$0xff] %v8270_v59  ;;  %v8275_v60 = vsub.f32 %v10952_v32, %v987_v17  ;;  %v1402_v47 = vadd.f32 %v1401_v12, %v1242_v44  ;;  %v1407_v33 = vadd.f32 %v1406_v21, %v1246_v25  ;;  %v10959_v21 = vld [vmem:[#allocation102_spill] sm:$0xff] }
 0x195   : > { %10955 = vst [vmem:[#allocation95_spill] sm:$0xff] %v8278_v39  ;;  %10956 = vst [vmem:[#allocation96_spill] sm:$0xff] %v8281_v58  ;;  %v1250_v16 = vmul.f32 %v8267_v22, %v8267_v22  ;;  %v1251_v51 = vmul.f32 %v8270_v59, %v8270_v59  ;;  %v1249_v26 = vmul.f32 %v8262_v27, %v8262_v27  ;;  %v10965_v22 = vld [vmem:[#allocation106_spill] sm:$0xff] }
 0x196   : > { %10953 = vst [vmem:[#allocation94_spill] sm:$0xff] %v8275_v60  ;;  %v8290_v42 = vsub.f32 %v10957_v19, %v987_v17  ;;  %v1252_v13 = vmul.f32 %v8275_v60, %v8275_v60  ;;  %v1253_v20 = vmul.f32 %v8278_v39, %v8278_v39  ;;  %v1403_v44 = vadd.f32 %v1402_v47, %v1243_v61  ;;  %v10963_v17 = vld [vmem:[#allocation105_spill] sm:$0xff] }
 0x197   : > { %v1408_v25 = vadd.f32 %v1407_v33, %v1247_v37  ;;  %v1413_v12 = vadd.f32 %v1251_v51, %v1250_v16  ;;  %v8297_v32 = vsub.f32 %v10959_v21, %v988_v9  ;;  %v1254_v53 = vmul.f32 %v8281_v58, %v8281_v58  ;;  %v10967_v37 = vld [vmem:[#allocation107_spill] sm:$0xff] }
 0x198   : > { %10958 = vst [vmem:[#allocation99_spill] sm:$0xff] %v8290_v42  ;;  %v8302_v27 = vsub.f32 %v10961_v24, %v988_v9  ;;  %v8305_v19 = vsub.f32 %v10963_v17, %v988_v9  ;;  %v8308_v60 = vsub.f32 %v10965_v22, %v988_v9  ;;  %1404 = vadd.xlane.f32.xlu1 %v1403_v44  ;;  %v10969_v24 = vld [vmem:[#allocation110_spill] sm:$0xff] }
 0x199   : > { %10960 = vst [vmem:[#allocation97_spill] sm:$0xff] %v8297_v32  ;;  %v1409_v39 = vadd.f32 %v1408_v25, %v1248_v30  ;;  %v1414_v61 = vadd.f32 %v1413_v12, %v1252_v13  ;;  %v8311_v47 = vsub.f32 %v10967_v37, %v988_v9  ;;  %v1256_v33 = vmul.f32 %v8297_v32, %v8297_v32  ;;  %v10971_v25 = vld [vmem:[#allocation108_spill] sm:$0xff]  ;;  %v10973_v37 = vld [vmem:[#allocation109_spill] sm:$0xff] }
 0x19a   : > { %10962 = vst [vmem:[#allocation98_spill] sm:$0xff] %v8302_v27  ;;  %10964 = vst [vmem:[#allocation100_spill] sm:$0xff] %v8305_v19  ;;  %v1255_v16 = vmul.f32 %v8290_v42, %v8290_v42  ;;  %v8318_v51 = vsub.f32 %v10969_v24, %v988_v9  ;;  %v1257_v21 = vmul.f32 %v8302_v27, %v8302_v27  ;;  %v10975_v9 = vld [vmem:[#allocation111_spill] sm:$0xff]  ;;  %v10977_v42 = vld [vmem:[#allocation112_spill] sm:$0xff] }
 0x19b   : > { %10966 = vst [vmem:[#allocation101_spill] sm:$0xff] %v8308_v60  ;;  %10968 = vst [vmem:[#allocation104_spill] sm:$0xff] %v8311_v47  ;;  %v1258_v22 = vmul.f32 %v8305_v19, %v8305_v19  ;;  %v1410_v30 = vadd.f32 %v1409_v39, %v1249_v26  ;;  %v1415_v13 = vadd.f32 %v1414_v61, %v1253_v20  ;;  %v10979_v61 = vld [vmem:[#allocation113_spill] sm:$0xff] }
 0x19c   : > { %10970 = vst [vmem:[#allocation102_spill] sm:$0xff] %v8318_v51  ;;  %v1259_v44 = vmul.f32 %v8308_v60, %v8308_v60  ;;  %v8327_v12 = vsub.f32 %v10971_v25, %v989_v23  ;;  %v1420_v17 = vadd.f32 %v1257_v21, %v1256_v33  ;;  %v8330_v58 = vsub.f32 %v10973_v37, %v989_v23 }
 0x19d   : > { %v8333_v24 = vsub.f32 %v10975_v9, %v989_v23  ;;  %v8336_v32 = vsub.f32 %v10977_v42, %v989_v23  ;;  %1411 = vadd.xlane.f32.xlu0 %v1410_v30  ;;  %v1416_v19 = vadd.f32 %v1415_v13, %v1254_v53  ;;  %v1260_v39 = vmul.f32 %v8311_v47, %v8311_v47  ;;  %v10981_v13 = vld [vmem:[#allocation114_spill] sm:$0xff] }
 0x19e   : > { %10972 = vst [vmem:[#allocation103_spill] sm:$0xff] %v8327_v12  ;;  %10974 = vst [vmem:[#allocation105_spill] sm:$0xff] %v8330_v58  ;;  %v1262_v26 = vmul.f32 %v8327_v12, %v8327_v12  ;;  %v1421_v20 = vadd.f32 %v1420_v17, %v1258_v22  ;;  %v8343_v33 = vsub.f32 %v10979_v61, %v989_v23 }
 0x19f   : > { %10976 = vst [vmem:[#allocation106_spill] sm:$0xff] %v8333_v24  ;;  %10978 = vst [vmem:[#allocation107_spill] sm:$0xff] %v8336_v32  ;;  %v1263_v21 = vmul.f32 %v8330_v58, %v8330_v58  ;;  %v1264_v25 = vmul.f32 %v8333_v24, %v8333_v24  ;;  %v1417_v42 = vadd.f32 %v1416_v19, %v1255_v16  ;;  %v10995_v24 = vld [vmem:[#allocation121_spill] sm:$0xff] }
 0x1a0   : > { %10980 = vst [vmem:[#allocation110_spill] sm:$0xff] %v8343_v33  ;;  %v1261_v53 = vmul.f32 %v8318_v51, %v8318_v51  ;;  %v1422_v30 = vadd.f32 %v1421_v20, %v1259_v44  ;;  %v8352_v37 = vsub.f32 %v10981_v13, %v989_v23  ;;  %v1265_v22 = vmul.f32 %v8336_v32, %v8336_v32  ;;  %v6060_v23 = vld [vmem:[#allocation10 + $0x754] ss:$24 sps:$4 sm:$0xff]  }
 0x1a1   : > { %v1427_v17 = vadd.f32 %v1263_v21, %v1262_v26  ;;  %1418 = vadd.xlane.f32.xlu1 %v1417_v42  ;;  %v1266_v61 = vmul.f32 %v8343_v33, %v8343_v33  ;;  %v6063_v13 = vld [vmem:[#allocation10 + $0x15c] ss:$24 sps:$4 sm:$0xff]   ;;  %4154 = vmatprep.subr.bf16.mxu0 %v6060_v23  ;;  %v1666_v26 = vlaneseq }
 0x1a2   : > { %10982 = vst [vmem:[#allocation108_spill] sm:$0xff] %v8352_v37  ;;  %v1423_v9 = vadd.f32 %v1422_v30, %v1260_v39  ;;  %v1267_v19 = vmul.f32 %v8352_v37, %v8352_v37  ;;  %4307 = vmatprep.subr.bf16.mxu1 %v6063_v13 }
 0x1a3   : > { %v1428_v47 = vadd.f32 %v1427_v17, %v1264_v25  ;;  %v1667_v21 = vshrl.u32 %v1666_v26, 7  ;;  %v1664_v17 = vld [vmem:[#allocation7] sm:$0x3f] }
 0x1a4   : > { %v1424_v12 = vadd.f32 %v1423_v9, %v1261_v53  ;;  %v8364_v9 = vld [vmem:[#allocation8] sm:$0x3f] }
 0x1a5   : > { %v1429_v16 = vadd.f32 %v1428_v47, %v1265_v22  ;;  %v8360_v30 = vsub.s32 1, %v1667_v21  ;;  %v8362_v25 = vsub.s32 3, %v1667_v21  ;;  %v8366_v22 = vsub.s32 0, %v1667_v21 }
 0x1a6   : > { %1425 = vadd.xlane.f32.xlu0 %v1424_v12  ;;  %v8382_v26 = vsub.s32 4, %v1667_v21 }
 0x1a7   : > { %v1430_v44 = vadd.f32 %v1429_v16, %v1266_v61  ;;  %10983 = vst [vmem:[#allocation109_spill] sm:$0xff] %v8360_v30  ;;  %10984 = vst [vmem:[#allocation111_spill] sm:$0xff] %v8362_v25  ;;  %v8368_v61 = vsub.s32 2, %v1667_v21  ;;  %v8377_v23 = vrot.slane %v8364_v9, %v8360_v30  ;;  %v8380_v13 = vrot.slane %v1664_v17, %v8362_v25 }
 0x1a8   : > { %10985 = vst [vmem:[#allocation112_spill] sm:$0xff] %v8366_v22  ;;  %10988 = vst [vmem:[#allocation136_spill] sm:$0xff] %v8382_v26 }
 0x1a9   : > { %v1431_v20 = vadd.f32 %v1430_v44, %v1267_v19  ;;  %10986 = vst [vmem:[#allocation113_spill] sm:$0xff] %v8368_v61  ;;  %v8370_v44 = vsub.s32 5, %v1667_v21  ;;  %v8401_v21 = vrot.slane %v1664_v17, %v8366_v22  ;;  %v8417_v27 = vrot.slane %v1664_v17, %v8368_v61 }
 0x1ab   : > { %1432 = vadd.xlane.f32.xlu1 %v1431_v20  ;;  %10987 = vst [vmem:[#allocation114_spill] sm:$0xff] %v8370_v44  ;;  %v8373_v20 = vrot.slane %v1664_v17, %v8360_v30  ;;  %v8398_v30 = vrot.slane %v8364_v9, %v8362_v25 }
 0x1ce   : > { %v1286_v39 = vpop.xlane.xlu0 %1285 }
 0x1cf   : > { %v1448_v42 = vmul.f32 0.0013020834, %v1286_v39 }
 0x1d1   : > { %v1472_v53 = vadd.f32 1e-05, %v1448_v42  ;;  %v10989_v42 = vld [vmem:[#allocation115_spill] sm:$0xff] }
 0x1d2   : > { %v1293_v47 = vpop.xlane.xlu1 %1292  ;;  %v959_v12 = vpop.xlane.xlu0 %958 }
 0x1d3   : > { %6394 = vrsqrt.f32 %v1472_v53  ;;  %v1449_v19 = vmul.f32 0.0013020834, %v1293_v47  ;;  %v990_v16 = vmul.f32 0.0013020834, %v959_v12  ;;  %v10991_v53 = vld [vmem:[#allocation116_spill] sm:$0xff]  ;;  %v10993_v12 = vld [vmem:[#allocation119_spill] sm:$0xff] }
 0x1d5   : > { %v1473_v39 = vadd.f32 1e-05, %v1449_v19  ;;  %v8385_v33 = vsub.f32 %v10989_v42, %v990_v16  ;;  %v8388_v47 = vsub.f32 %v10991_v53, %v990_v16  ;;  %v8391_v37 = vsub.f32 %v10993_v12, %v990_v16 }
 0x1d6   : > { %v966_v51 = vpop.xlane.xlu1 %965  ;;  %v8394_v32 = vsub.f32 %v10995_v24, %v990_v16  ;;  %v8405_v19 = vrot.slane %v8364_v9, %v8366_v22  ;;  %v8412_v25 = vsub.f32 %v7670_v6, %v990_v16  ;;  %v10997_v22 = vld [vmem:[#allocation117_spill] sm:$0xff]  ;;  %v8428_v6 = vsub.f32 %v7678_v7, %v990_v16 }
 0x1d7   : > { %10990 = vst [vmem:[#allocation115_spill] sm:$0xff] %v8385_v33  ;;  %10992 = vst [vmem:[#allocation116_spill] sm:$0xff] %v8388_v47  ;;  %6396 = vrsqrt.f32 %v1473_v39  ;;  %v991_v42 = vmul.f32 0.0013020834, %v966_v51  ;;  %v1300_v53 = vpop.xlane.xlu0 %1299  ;;  %v1268_v12 = vmul.f32 %v8385_v33, %v8385_v33  ;;  %v1269_v24 = vmul.f32 %v8388_v47, %v8388_v47  ;;  %v10999_v33 = vld [vmem:[#allocation118_spill] sm:$0xff]  ;;  %v11000_v47 = vld [vmem:[#allocation120_spill] sm:$0xff] }
 0x1d8   : > { %10994 = vst [vmem:[#allocation119_spill] sm:$0xff] %v8391_v37  ;;  %10996 = vst [vmem:[#allocation121_spill] sm:$0xff] %v8394_v32  ;;  %v1450_v58 = vmul.f32 0.0013020834, %v1300_v53  ;;  %v1270_v60 = vmul.f32 %v8391_v37, %v8391_v37  ;;  %v1271_v51 = vmul.f32 %v8394_v32, %v8394_v32  ;;  %v8435_v37 = vrot.slane %v8364_v9, %v8368_v61 }
 0x1d9   : > { %v1434_v39 = vadd.f32 %v1269_v24, %v1268_v12  ;;  %v8422_v59 = vsub.f32 %v10997_v22, %v991_v42  ;;  %v8425_v63 = vsub.f32 %v10999_v33, %v991_v42  ;;  %v8431_v48 = vsub.f32 %v11000_v47, %v991_v42 }
 0x1da   : > { %v1474_v53 = vadd.f32 1e-05, %v1450_v58  ;;  %v8438_v12 = vsub.f32 %v7665_v28, %v991_v42  ;;  %v8445_v22 = vsub.f32 %v7675_v41, %v991_v42  ;;  %v8448_v16 = vsub.f32 %v7681_v4, %v991_v42 }
 0x1db   : > { %10998 = vst [vmem:[#allocation117_spill] sm:$0xff] %v8422_v59  ;;  %11001 = vst [vmem:[#allocation118_spill] sm:$0xff] %v8431_v48  ;;  %v1307_v46 = vpop.xlane.xlu1 %1306  ;;  %v1435_v32 = vadd.f32 %v1434_v39, %v1270_v60  ;;  %v1274_v33 = vmul.f32 %v8422_v59, %v8422_v59  ;;  %v1275_v58 = vmul.f32 %v8425_v63, %v8425_v63 }
 0x1dc   : > { %11002 = vst [vmem:[#allocation120_spill] sm:$0xff] %v8438_v12  ;;  %6398 = vrsqrt.f32 %v1474_v53  ;;  %v1451_v7 = vmul.f32 0.0013020834, %v1307_v46  ;;  %11003 = vst [vmem:[#allocation137_spill] sm:$0xff] %v8445_v22  ;;  %v1272_v60 = vmul.f32 %v8412_v25, %v8412_v25  ;;  %v1276_v28 = vmul.f32 %v8431_v48, %v8431_v48 }
 0x1dd   : > { %11004 = vst [vmem:[#allocation138_spill] sm:$0xff] %v8448_v16  ;;  %v1436_v47 = vadd.f32 %v1435_v32, %v1271_v51  ;;  %v1441_v24 = vadd.f32 %v1275_v58, %v1274_v33  ;;  %v8455_v61 = vrot.slane %v1664_v17, %v8370_v44  ;;  %v8459_v46 = vrot.slane %v8364_v9, %v8370_v44 }
 0x1de   : > { %v1475_v39 = vadd.f32 1e-05, %v1451_v7  ;;  %v8462_v41 = vrot.slane %v1664_v17, %v8382_v26  ;;  %v1273_v4 = vmul.f32 %v8428_v6, %v8428_v6  ;;  %v1277_v32 = vmul.f32 %v8438_v12, %v8438_v12 }
 0x1df   : > { %v1437_v42 = vadd.f32 %v1436_v47, %v1272_v60  ;;  %v1442_v51 = vadd.f32 %v1441_v24, %v1276_v28  ;;  %v1278_v58 = vmul.f32 %v8445_v22, %v8445_v22  ;;  %v1279_v7 = vmul.f32 %v8448_v16, %v8448_v16 }
 0x1e0   : > { %v6395_v53 = vpop.eup %6394  ;;  %6400 = vrsqrt.f32 %v1475_v39  ;;  %v1314_v33 = vpop.xlane.xlu0 %1313  ;;  %v8474_v17 = vrot.slane %v8364_v9, %v8382_v26  ;;  %v11005_v9 = vld [vmem:[#allocation122_spill] sm:$0xff] }
 0x1e1   : > { %v1452_v44 = vmul.f32 0.0013020834, %v1314_v33  ;;  %v1438_v48 = vadd.f32 %v1437_v42, %v1273_v4  ;;  %v1443_v60 = vadd.f32 %v1442_v51, %v1277_v32  ;;  %v1521_v47 = vmul.f32 %v6395_v53, %v7688_v50 }
 0x1e2   : > { %v1523_v28 = vmul.f32 %v6395_v53, %v7694_v56  ;;  %v1520_v24 = vmul.f32 %v6395_v53, %v7685_v57  ;;  %v1522_v39 = vmul.f32 %v6395_v53, %v7691_v5  ;;  %v1525_v22 = vmul.f32 %v6395_v53, %v7700_v34 }
 0x1e3   : > { %v1476_v59 = vadd.f32 1e-05, %v1452_v44  ;;  %1439 = vadd.xlane.f32.xlu0 %v1438_v48  ;;  %v1444_v16 = vadd.f32 %v1443_v60, %v1278_v58  ;;  %v1697_v12 = vmul.f32 %v8373_v20, %v1521_v47  ;;  %v8483_v26 = vmul.f32 %v6395_v53, %v11005_v9  ;;  %v11006_v44 = vld [vmem:[#allocation124_spill] sm:$0xff]  ;;  %v11007_v53 = vld [vmem:[#allocation126_spill] sm:$0xff]  ;;  %v11008_v60 = vld [vmem:[#allocation123_spill] sm:$0xff] }
 0x1e4   : > { %v8485_v4 = vpop.eup %6396  ;;  %v1699_v50 = vmul.f32 %v8380_v13, %v1523_v28  ;;  %v1696_v56 = vmul.f32 %v8401_v21, %v1520_v24  ;;  %v1698_v57 = vmul.f32 %v8417_v27, %v1522_v39  ;;  %v1701_v5 = vmul.f32 %v8455_v61, %v1525_v22 }
 0x1e5   : > { %v1321_v42 = vpop.xlane.xlu1 %1320  ;;  %6402 = vrsqrt.f32 %v1476_v59  ;;  %v1445_v48 = vadd.f32 %v1444_v16, %v1279_v7  ;;  %v1527_v32 = vmul.f32 %v8485_v4, %v11006_v44  ;;  %v1873_v51 = vadd.f32 %v8377_v23, %v1697_v12  ;;  %v11009_v16 = vld [vmem:[#allocation125_spill] sm:$0xff] }
 0x1e6   : > { %v1453_v34 = vmul.f32 0.0013020834, %v1321_v42  ;;  %v1529_v33 = vmul.f32 %v8485_v4, %v11007_v53  ;;  %v1875_v58 = vadd.f32 %v8398_v30, %v1699_v50  ;;  %v1526_v47 = vmul.f32 %v8485_v4, %v11008_v60 }
 0x1e7   : > { %1446 = vadd.xlane.f32.xlu1 %v1445_v48  ;;  %v1703_v22 = vmul.f32 %v8373_v20, %v1527_v32  ;;  %v1872_v59 = vadd.f32 %v8405_v19, %v1696_v56  ;;  %v1528_v7 = vmul.f32 %v8485_v4, %v11009_v16  ;;  %v1874_v39 = vadd.f32 %v8435_v37, %v1698_v57 }
 0x1e8   : > { %v1477_v28 = vadd.f32 1e-05, %v1453_v34  ;;  %v1705_v24 = vmul.f32 %v8380_v13, %v1529_v33  ;;  %v1702_v12 = vmul.f32 %v8401_v21, %v1526_v47  ;;  %v1531_v9 = vmul.f32 %v8485_v4, %v7736_v29 }
 0x1e9   : > { %v8508_v42 = vpop.eup %6398  ;;  %v1879_v34 = vadd.f32 %v8377_v23, %v1703_v22  ;;  %v1704_v56 = vmul.f32 %v8417_v27, %v1528_v7  ;;  %v8513_v48 = vadd.f32 %v8459_v46, %v1701_v5  ;;  %v6058_v7 = vld [vmem:[#allocation10 + $0x750] ss:$24 sps:$4 sm:$0xff]  }
 0x1ea   : > { %6404 = vrsqrt.f32 %v1477_v28  ;;  %v1328_v50 = vpop.xlane.xlu0 %1327  ;;  %v1881_v32 = vadd.f32 %v8398_v30, %v1705_v24  ;;  %v1878_v53 = vadd.f32 %v8405_v19, %v1702_v12  ;;  %v1533_v57 = vmul.f32 %v8508_v42, %v7754_v0  ;;  %v6061_v24 = vld [vmem:[#allocation10 + $0x158] ss:$24 sps:$4 sm:$0xff]  }
 0x1eb   : > { %v1454_v44 = vmul.f32 0.0013020834, %v1328_v50  ;;  %v8519_v29 = vpack.c.bf16 %v1879_v34, %v1873_v51  ;;  %v1880_v33 = vadd.f32 %v8435_v37, %v1704_v56  ;;  %v1535_v60 = vmul.f32 %v8508_v42, %v7760_v49  ;;  %v6069_v50 = vld [vmem:[#allocation10 + $0x12c] ss:$24 sps:$4 sm:$0xff]  }
 0x1ec   : > { %v1532_v47 = vmul.f32 %v8508_v42, %v7751_v62  ;;  %v8526_v28 = vpack.c.bf16 %v1881_v32, %v1875_v58  ;;  %v8528_v22 = vpack.c.bf16 %v1878_v53, %v1872_v59  ;;  %v1709_v16 = vmul.f32 %v8373_v20, %v1533_v57  ;;  %v6066_v59 = vld [vmem:[#allocation10 + $0x724] ss:$24 sps:$4 sm:$0xff]  }
 0x1ed   : > { %v1478_v5 = vadd.f32 1e-05, %v1454_v44  ;;  %v8531_v0 = vpop.eup %6400  ;;  %3880 = vmatprep.mubr.bf16.mxu0 %v8519_v29  ;;  %v8534_v12 = vpack.c.bf16 %v1880_v33, %v1874_v39  ;;  %v1711_v49 = vmul.f32 %v8380_v13, %v1535_v60  ;;  %v1534_v58 = vmul.f32 %v8508_v42, %v7757_v2 }
 0x1ee   : > { %11010 = vst [vmem:[#allocation122_spill] sm:$0xff] %v8526_v28  ;;  %v1335_v51 = vpop.xlane.xlu1 %1334  ;;  %v1708_v62 = vmul.f32 %v8401_v21, %v1532_v47  ;;  %4033 = vmatprep.mubr.bf16.mxu1 %v8526_v28  ;;  %3881 = vmatmul.mubr.bf16.vlgmr.msra.gmra.mxu0 %v8528_v22  ;;  %v1539_v56 = vmul.f32 %v8531_v0, %v7784_v18  ;;  %v6064_v47 = vld [vmem:[#allocation10 + $0x720] ss:$24 sps:$4 sm:$0xff]  }
 0x1ef   : > { %11011 = vst [vmem:[#allocation124_spill] sm:$0xff] %v8534_v12  ;;  %6406 = vrsqrt.f32 %v1478_v5  ;;  %v1455_v34 = vmul.f32 0.0013020834, %v1335_v51  ;;  %v1885_v39 = vadd.f32 %v8377_v23, %v1709_v16  ;;  %4034 = vmatmul.mubr.bf16.vlgmr.msra.gmra.mxu1 %v8534_v12  ;;  %v1541_v44 = vmul.f32 %v8531_v0, %v7790_v35  ;;  %4155 = vmatpush1.bf16.msra.mxu0 %v6058_v7  ;;  %v6067_v16 = vld [vmem:[#allocation10 + $0x128] ss:$24 sps:$4 sm:$0xff]   ;;  %v11049_v28 = vld [vmem:[#allocation54_spill] sm:$0xff] }
 0x1f0   : > { %v1887_v2 = vadd.f32 %v8398_v30, %v1711_v49  ;;  %v1538_v32 = vmul.f32 %v8531_v0, %v7781_v40  ;;  %v1884_v53 = vadd.f32 %v8405_v19, %v1708_v62  ;;  %v1715_v33 = vmul.f32 %v8373_v20, %v1539_v56  ;;  %4308 = vmatpush1.bf16.msra.mxu1 %v6061_v24  ;;  %v6072_v40 = vld [vmem:[#allocation10 + $0x6f4] ss:$24 sps:$4 sm:$0xff]  }
 0x1f1   : > { %v1479_v57 = vadd.f32 1e-05, %v1455_v34  ;;  %v1540_v18 = vmul.f32 %v8531_v0, %v7787_v38  ;;  %v1710_v60 = vmul.f32 %v8417_v27, %v1534_v58  ;;  %v1717_v35 = vmul.f32 %v8380_v13, %v1541_v44  ;;  %4156 = vmatprep.subr.bf16.mxu0 %v6066_v59  ;;  %4309 = vmatprep.subr.bf16.mxu1 %v6069_v50  ;;  %v6120_v12 = vld [vmem:[#allocation10 + $0x874] ss:$24 sps:$4 sm:$0xff]  }
 0x1f2   : > { %v1714_v5 = vmul.f32 %v8401_v21, %v1538_v32  ;;  %v1707_v51 = vmul.f32 %v8455_v61, %v1531_v9  ;;  %v8559_v49 = vpop.eup %6402  ;;  %v1891_v38 = vadd.f32 %v8377_v23, %v1715_v33 }
 0x1f3   : > { %6408 = vrsqrt.f32 %v1479_v57  ;;  %v1716_v7 = vmul.f32 %v8417_v27, %v1540_v18  ;;  %v1886_v24 = vadd.f32 %v8435_v37, %v1710_v60  ;;  %v1893_v34 = vadd.f32 %v8398_v30, %v1717_v35  ;;  %4157 = vmatpush1.bf16.msra.mxu0 %v6064_v47  ;;  %v6073_v47 = vld [vmem:[#allocation10 + $0xf8] ss:$24 sps:$4 sm:$0xff]  }
 0x1f4   : > { %v1342_v62 = vpop.xlane.xlu0 %1341  ;;  %v1890_v59 = vadd.f32 %v8405_v19, %v1714_v5  ;;  %v1545_v50 = vmul.f32 %v8559_v49, %v7814_v52  ;;  %v8568_v56 = vpack.c.bf16 %v1891_v38, %v1885_v39  ;;  %v1547_v44 = vmul.f32 %v8559_v49, %v7821_v55  ;;  %4310 = vmatpush1.bf16.msra.mxu1 %v6067_v16  ;;  %v6070_v52 = vld [vmem:[#allocation10 + $0x6f0] ss:$24 sps:$4 sm:$0xff]   ;;  %v6075_v39 = vld [vmem:[#allocation10 + $0xfc] ss:$24 sps:$4 sm:$0xff]  }
 0x1f5   : > { %v1456_v58 = vmul.f32 0.0013020834, %v1342_v62  ;;  %v1892_v9 = vadd.f32 %v8435_v37, %v1716_v7  ;;  %v1544_v32 = vmul.f32 %v8559_v49, %v7811_v31  ;;  %v8575_v33 = vpack.c.bf16 %v1893_v34, %v1887_v2  ;;  %4158 = vmatprep.subr.bf16.mxu0 %v6072_v40  ;;  %v6078_v62 = vld [vmem:[#allocation10 + $0x6c4] ss:$24 sps:$4 sm:$0xff]   ;;  %4311 = vmatprep.subr.bf16.mxu1 %v6075_v39 }
 0x1f6   : > { %v8577_v18 = vpack.c.bf16 %v1890_v59, %v1884_v53  ;;  %v1721_v60 = vmul.f32 %v8373_v20, %v1545_v50  ;;  %3890 = vmatprep.mubr.bf16.mxu0 %v8568_v56  ;;  %v1723_v31 = vmul.f32 %v8380_v13, %v1547_v44  ;;  %v1546_v53 = vmul.f32 %v8559_v49, %v7818_v36  ;;  %v6081_v7 = vld [vmem:[#allocation10 + $0xcc] ss:$24 sps:$4 sm:$0xff]   ;;  %v6076_v44 = vld [vmem:[#allocation10 + $0x6c0] ss:$24 sps:$4 sm:$0xff]  }
 0x1f7   : > { %v1480_v57 = vadd.f32 1e-05, %v1456_v58  ;;  %11012 = vst [vmem:[#allocation126_spill] sm:$0xff] %v8575_v33  ;;  %v8580_v35 = vpop.eup %6404  ;;  %v8583_v55 = vpack.c.bf16 %v1892_v9, %v1886_v24  ;;  %v1720_v2 = vmul.f32 %v8401_v21, %v1544_v32  ;;  %4043 = vmatprep.mubr.bf16.mxu1 %v8575_v33  ;;  %4159 = vmatpush1.bf16.msra.mxu0 %v6070_v52  ;;  %v11046_v33 = vld [vmem:[#allocation47_spill] sm:$0xff] }
 0x1f8   : > { %v1349_v5 = vpop.xlane.xlu1 %1348  ;;  %3891 = vmatmul.mubr.bf16.gmra.mxu0 %v8577_v18  ;;  %v1551_v40 = vmul.f32 %v8580_v35, %v7846_v43  ;;  %v1897_v38 = vadd.f32 %v8377_v23, %v1721_v60  ;;  %v1553_v24 = vmul.f32 %v8580_v35, %v7852_v3  ;;  %v1899_v36 = vadd.f32 %v8398_v30, %v1723_v31 }
 0x1f9   : > { %11013 = vst [vmem:[#allocation123_spill] sm:$0xff] %v8583_v55  ;;  %6410 = vrsqrt.f32 %v1480_v57  ;;  %v1457_v16 = vmul.f32 0.0013020834, %v1349_v5  ;;  %4044 = vmatmul.mubr.bf16.gmra.mxu1 %v8583_v55  ;;  %v1550_v58 = vmul.f32 %v8580_v35, %v7842_v54  ;;  %v1896_v34 = vadd.f32 %v8405_v19, %v1720_v2  ;;  %4160 = vmatprep.subr.bf16.mxu0 %v6078_v62  ;;  %v6079_v54 = vld [vmem:[#allocation10 + $0xc8] ss:$24 sps:$4 sm:$0xff]   ;;  %v11037_v55 = vld [vmem:[#allocation38_spill] sm:$0xff] }
 0x1fa   : > { %v1727_v50 = vmul.f32 %v8373_v20, %v1551_v40  ;;  %v1552_v43 = vmul.f32 %v8580_v35, %v7849_v14  ;;  %v1722_v9 = vmul.f32 %v8417_v27, %v1546_v53  ;;  %v1729_v3 = vmul.f32 %v8380_v13, %v1553_v24  ;;  %4312 = vmatpush1.bf16.msra.mxu1 %v6073_v47  ;;  %v6084_v57 = vld [vmem:[#allocation10 + $0x694] ss:$24 sps:$4 sm:$0xff]  }
 0x1fb   : > { %v1481_v59 = vadd.f32 1e-05, %v1457_v16  ;;  %v1726_v32 = vmul.f32 %v8401_v21, %v1550_v58  ;;  %v1883_v60 = vadd.f32 %v8459_v46, %v1707_v51  ;;  %4313 = vmatprep.subr.bf16.mxu1 %v6081_v7  ;;  %4161 = vmatpush1.bf16.msra.mxu0 %v6076_v44  ;;  %v6085_v44 = vld [vmem:[#allocation10 + $0x98] ss:$24 sps:$4 sm:$0xff]  }
 0x1fc   : > { %v8608_v5 = vpop.eup %6406  ;;  %v1903_v14 = vadd.f32 %v8377_v23, %v1727_v50  ;;  %v1728_v39 = vmul.f32 %v8417_v27, %v1552_v43  ;;  %v1898_v52 = vadd.f32 %v8435_v37, %v1722_v9  ;;  %v1905_v53 = vadd.f32 %v8398_v30, %v1729_v3  ;;  %4162 = vmatprep.subr.bf16.mxu0 %v6084_v57  ;;  %v6090_v3 = vld [vmem:[#allocation10 + $0x664] ss:$24 sps:$4 sm:$0xff]  }
 0x1fd   : > { %6412 = vrsqrt.f32 %v1481_v59  ;;  %v1902_v47 = vadd.f32 %v8405_v19, %v1726_v32  ;;  %v1557_v62 = vmul.f32 %v8608_v5, %v7876_v45  ;;  %v1559_v40 = vmul.f32 %v8608_v5, %v7882_v15  ;;  %v6082_v45 = vld [vmem:[#allocation10 + $0x690] ss:$24 sps:$4 sm:$0xff]  }
 0x1fe   : > { %v1356_v31 = vpop.xlane.xlu0 %1355  ;;  %v8617_v51 = vpack.c.bf16 %v1903_v14, %v1897_v38  ;;  %v1904_v16 = vadd.f32 %v8435_v37, %v1728_v39  ;;  %v1556_v24 = vmul.f32 %v8608_v5, %v7873_v1  ;;  %v8624_v58 = vpack.c.bf16 %v1905_v53, %v1899_v36  ;;  %4314 = vmatpush1.bf16.msra.mxu1 %v6079_v54  ;;  %v6087_v38 = vld [vmem:[#allocation10 + $0x9c] ss:$24 sps:$4 sm:$0xff]   ;;  %v11016_v14 = vld [vmem:[#allocation24_spill] sm:$0xff] }
 0x1ff   : > { %v1458_v2 = vmul.f32 0.0013020834, %v1356_v31  ;;  %v8626_v59 = vpack.c.bf16 %v1902_v47, %v1896_v34  ;;  %v1733_v50 = vmul.f32 %v8373_v20, %v1557_v62  ;;  %v1735_v1 = vmul.f32 %v8380_v13, %v1559_v40  ;;  %v6093_v31 = vld [vmem:[#allocation10 + $0x6c] ss:$24 sps:$4 sm:$0xff]   ;;  %4315 = vmatprep.subr.bf16.mxu1 %v6087_v38  ;;  %4163 = vmatpush1.bf16.msra.mxu0 %v6082_v45 }
 0x200   : > { %11014 = vst [vmem:[#allocation125_spill] sm:$0xff] %v8624_v58  ;;  %v8629_v43 = vpop.eup %6408  ;;  %3900 = vmatprep.mubr.bf16.mxu0 %v8617_v51  ;;  %v8632_v15 = vpack.c.bf16 %v1904_v16, %v1898_v52  ;;  %v1732_v36 = vmul.f32 %v8401_v21, %v1556_v24  ;;  %v1558_v34 = vmul.f32 %v8608_v5, %v7879_v10  ;;  %v11017_v52 = vld [vmem:[#allocation22_spill] sm:$0xff]  ;;  %v11018_v16 = vld [vmem:[#allocation23_spill] sm:$0xff] }
 0x201   : > { %v1482_v7 = vadd.f32 1e-05, %v1458_v2  ;;  %4053 = vmatprep.mubr.bf16.mxu1 %v8624_v58  ;;  %3901 = vmatmul.mubr.bf16.gmra.mxu0 %v8626_v59  ;;  %v1563_v54 = vmul.f32 %v8629_v43, %v7906_v11  ;;  %v1909_v57 = vadd.f32 %v8377_v23, %v1733_v50  ;;  %v1565_v39 = vmul.f32 %v8629_v43, %v11016_v14  ;;  %v6088_v24 = vld [vmem:[#allocation10 + $0x660] ss:$24 sps:$4 sm:$0xff]  }
 0x202   : > { %v1363_v9 = vpop.xlane.xlu1 %1362  ;;  %11015 = vst [vmem:[#allocation139_spill] sm:$0xff] %v8632_v15  ;;  %4054 = vmatmul.mubr.bf16.gmra.mxu1 %v8632_v15  ;;  %v1911_v10 = vadd.f32 %v8398_v30, %v1735_v1  ;;  %v1562_v2 = vmul.f32 %v8629_v43, %v11017_v52  ;;  %v1908_v53 = vadd.f32 %v8405_v19, %v1732_v36  ;;  %v6096_v1 = vld [vmem:[#allocation10 + $0x634] ss:$24 sps:$4 sm:$0xff]  }
 0x203   : > { %6414 = vrsqrt.f32 %v1482_v7  ;;  %v1459_v32 = vmul.f32 0.0013020834, %v1363_v9  ;;  %v1739_v62 = vmul.f32 %v8373_v20, %v1563_v54  ;;  %v1564_v11 = vmul.f32 %v8629_v43, %v11018_v16  ;;  %4316 = vmatpush1.bf16.msra.mxu1 %v6085_v44  ;;  %4164 = vmatprep.subr.bf16.mxu0 %v6090_v3  ;;  %v6091_v9 = vld [vmem:[#allocation10 + $0x68] ss:$24 sps:$4 sm:$0xff]   ;;  %v6108_v15 = vld [vmem:[#allocation10 + $0x8d4] ss:$24 sps:$4 sm:$0xff]  }
 0x204   : > { %v1734_v40 = vmul.f32 %v8417_v27, %v1558_v34  ;;  %v1741_v7 = vmul.f32 %v8380_v13, %v1565_v39  ;;  %v1738_v50 = vmul.f32 %v8401_v21, %v1562_v2  ;;  %v8657_v36 = vpack.c.bf16 %v1883_v60, %v8513_v48  ;;  %4317 = vmatprep.subr.bf16.mxu1 %v6093_v31  ;;  %v11020_v39 = vld [vmem:[#allocation28_spill] sm:$0xff]  ;;  %v11022_v2 = vld [vmem:[#allocation30_spill] sm:$0xff] }
 0x205   : > { %v1483_v47 = vadd.f32 1e-05, %v1459_v32  ;;  %v1915_v34 = vadd.f32 %v8377_v23, %v1739_v62  ;;  %v1740_v45 = vmul.f32 %v8417_v27, %v1564_v11  ;;  %v11023_v62 = vld [vmem:[#allocation26_spill] sm:$0xff]  ;;  %4165 = vmatpush1.bf16.msra.mxu0 %v6088_v24 }
 0x206   : > { %11019 = vst [vmem:[#allocation24_spill] sm:$0xff] %v8657_v36  ;;  %v8659_v32 = vpop.eup %6410  ;;  %v1910_v38 = vadd.f32 %v8435_v37, %v1734_v40  ;;  %v1917_v44 = vadd.f32 %v8398_v30, %v1741_v7  ;;  %v1914_v3 = vadd.f32 %v8405_v19, %v1738_v50  ;;  %v6094_v50 = vld [vmem:[#allocation10 + $0x630] ss:$24 sps:$4 sm:$0xff]   ;;  %4166 = vmatprep.subr.bf16.mxu0 %v6096_v1  ;;  %v11028_v1 = vld [vmem:[#allocation34_spill] sm:$0xff] }
 0x207   : > { %6416 = vrsqrt.f32 %v1483_v47  ;;  %v1370_v54 = vpop.xlane.xlu0 %1369  ;;  %v1569_v48 = vmul.f32 %v8659_v32, %v11020_v39  ;;  %v8668_v60 = vpack.c.bf16 %v1915_v34, %v1909_v57  ;;  %v1916_v52 = vadd.f32 %v8435_v37, %v1740_v45  ;;  %4318 = vmatpush1.bf16.msra.mxu1 %v6091_v9  ;;  %v6099_v57 = vld [vmem:[#allocation10 + $0x3c] ss:$24 sps:$4 sm:$0xff]  }
 0x208   : > { %v1460_v14 = vmul.f32 0.0013020834, %v1370_v54  ;;  %v1571_v47 = vmul.f32 %v8659_v32, %v11022_v2  ;;  %v1568_v16 = vmul.f32 %v8659_v32, %v11023_v62  ;;  %v8675_v11 = vpack.c.bf16 %v1917_v44, %v1911_v10  ;;  %v6097_v44 = vld [vmem:[#allocation10 + $0x38] ss:$24 sps:$4 sm:$0xff]   ;;  %v11030_v62 = vld [vmem:[#allocation32_spill] sm:$0xff]  ;;  %4319 = vmatprep.subr.bf16.mxu1 %v6099_v57 }
 0x209   : > { %11021 = vst [vmem:[#allocation22_spill] sm:$0xff] %v8668_v60  ;;  %v8677_v40 = vpack.c.bf16 %v1914_v3, %v1908_v53  ;;  %v1745_v7 = vmul.f32 %v8373_v20, %v1569_v48  ;;  %3910 = vmatprep.mubr.bf16.mxu0 %v8668_v60  ;;  %v8683_v45 = vpack.c.bf16 %v1916_v52, %v1910_v38  ;;  %v6102_v3 = vld [vmem:[#allocation10 + $0x604] ss:$24 sps:$4 sm:$0xff]  }
 0x20a   : > { %v1484_v31 = vadd.f32 1e-05, %v1460_v14  ;;  %11024 = vst [vmem:[#allocation23_spill] sm:$0xff] %v8675_v11  ;;  %v8680_v54 = vpop.eup %6412  ;;  %v1747_v24 = vmul.f32 %v8380_v13, %v1571_v47  ;;  %v1744_v10 = vmul.f32 %v8401_v21, %v1568_v16  ;;  %v11027_v14 = vld [vmem:[#allocation29_spill] sm:$0xff]  ;;  %4063 = vmatprep.mubr.bf16.mxu1 %v8675_v11  ;;  %v11029_v52 = vld [vmem:[#allocation36_spill] sm:$0xff]  ;;  %v11031_v11 = vld [vmem:[#allocation35_spill] sm:$0xff]  ;;  %4167 = vmatpush1.bf16.msra.mxu0 %v6094_v50 }
 0x20b   : > { %11025 = vst [vmem:[#allocation28_spill] sm:$0xff] %v8677_v40  ;;  %11026 = vst [vmem:[#allocation30_spill] sm:$0xff] %v8683_v45  ;;  %v1570_v53 = vmul.f32 %v8659_v32, %v11027_v14  ;;  %3911 = vmatmul.mubr.bf16.gmra.mxu0 %v8677_v40  ;;  %v1575_v39 = vmul.f32 %v8680_v54, %v11028_v1  ;;  %v1921_v38 = vadd.f32 %v8377_v23, %v1745_v7  ;;  %v6105_v48 = vld [vmem:[#allocation10 + $0xc] ss:$24 sps:$4 sm:$0xff]   ;;  %v11036_v58 = vld [vmem:[#allocation42_spill] sm:$0xff] }
 0x20c   : > { %v1377_v34 = vpop.xlane.xlu1 %1376  ;;  %6418 = vrsqrt.f32 %v1484_v31  ;;  %4064 = vmatmul.mubr.bf16.gmra.mxu1 %v8683_v45  ;;  %v1577_v2 = vmul.f32 %v8680_v54, %v11029_v52  ;;  %v1923_v47 = vadd.f32 %v8398_v30, %v1747_v24  ;;  %v1574_v16 = vmul.f32 %v8680_v54, %v11030_v62  ;;  %v6100_v45 = vld [vmem:[#allocation10 + $0x600] ss:$24 sps:$4 sm:$0xff]   ;;  %4168 = vmatprep.subr.bf16.mxu0 %v6102_v3 }
 0x20d   : > { %v1461_v9 = vmul.f32 0.0013020834, %v1377_v34  ;;  %v1920_v31 = vadd.f32 %v8405_v19, %v1744_v10  ;;  %v1751_v14 = vmul.f32 %v8373_v20, %v1575_v39  ;;  %v1576_v1 = vmul.f32 %v8680_v54, %v11031_v11  ;;  %4320 = vmatpush1.bf16.msra.mxu1 %v6097_v44  ;;  %v6103_v62 = vld [vmem:[#allocation10 + $0x8] ss:$24 sps:$4 sm:$0xff]  }
 0x20e   : > { %v1746_v7 = vmul.f32 %v8417_v27, %v1570_v53  ;;  %v1753_v52 = vmul.f32 %v8380_v13, %v1577_v2  ;;  %v1750_v24 = vmul.f32 %v8401_v21, %v1574_v16  ;;  %v11032_v10 = vld [vmem:[#allocation127_spill] sm:$0xff]  ;;  %4321 = vmatprep.subr.bf16.mxu1 %v6105_v48  ;;  %v11034_v16 = vld [vmem:[#allocation40_spill] sm:$0xff]  ;;  %4169 = vmatpush1.bf16.msra.mxu0 %v6100_v45 }
 0x20f   : > { %v1485_v34 = vadd.f32 1e-05, %v1461_v9  ;;  %v8709_v9 = vmul.f32 %v8485_v4, %v11032_v10  ;;  %v1927_v57 = vadd.f32 %v8377_v23, %v1751_v14  ;;  %v1752_v50 = vmul.f32 %v8417_v27, %v1576_v1  ;;  %4170 = vmatprep.subr.bf16.mxu0 %v6108_v15  ;;  %v11043_v15 = vld [vmem:[#allocation46_spill] sm:$0xff] }
 0x210   : > { %v8711_v39 = vpop.eup %6414  ;;  %v1922_v53 = vadd.f32 %v8435_v37, %v1746_v7  ;;  %v1929_v44 = vadd.f32 %v8398_v30, %v1753_v52  ;;  %v1926_v3 = vadd.f32 %v8405_v19, %v1750_v24 }
 0x211   : > { %11033 = vst [vmem:[#allocation26_spill] sm:$0xff] %v8711_v39  ;;  %6420 = vrsqrt.f32 %v1485_v34  ;;  %v1581_v4 = vmul.f32 %v8711_v39, %v11034_v16  ;;  %v8720_v10 = vpack.c.bf16 %v1927_v57, %v1921_v38  ;;  %v1928_v34 = vadd.f32 %v8435_v37, %v1752_v50  ;;  %4322 = vmatpush1.bf16.msra.mxu1 %v6103_v62  ;;  %v6111_v38 = vld [vmem:[#allocation10 + $0x2dc] ss:$24 sps:$4 sm:$0xff]   ;;  %v6117_v16 = vld [vmem:[#allocation10 + $0x2ac] ss:$24 sps:$4 sm:$0xff]  }
 0x212   : > { %v1384_v11 = vpop.xlane.xlu0 %1383  ;;  %v1583_v14 = vmul.f32 %v8711_v39, %v11036_v58  ;;  %v1580_v1 = vmul.f32 %v8711_v39, %v11037_v55  ;;  %v8727_v7 = vpack.c.bf16 %v1929_v44, %v1923_v47  ;;  %v8729_v52 = vpack.c.bf16 %v1926_v3, %v1920_v31  ;;  %v11042_v47 = vld [vmem:[#allocation41_spill] sm:$0xff]  ;;  %v6114_v44 = vld [vmem:[#allocation10 + $0x8a4] ss:$24 sps:$4 sm:$0xff]   ;;  %4323 = vmatprep.subr.bf16.mxu1 %v6111_v38 }
 0x213   : > { %v1462_v2 = vmul.f32 0.0013020834, %v1384_v11  ;;  %11035 = vst [vmem:[#allocation29_spill] sm:$0xff] %v8720_v10  ;;  %v1757_v24 = vmul.f32 %v8373_v20, %v1581_v4  ;;  %v6106_v11 = vld [vmem:[#allocation10 + $0x8d0] ss:$24 sps:$4 sm:$0xff]   ;;  %3920 = vmatprep.mubr.bf16.mxu0 %v8720_v10  ;;  %v8735_v58 = vpack.c.bf16 %v1928_v34, %v1922_v53  ;;  %v1582_v31 = vmul.f32 %v8711_v39, %v11042_v47 }
 0x214   : > { %11038 = vst [vmem:[#allocation34_spill] sm:$0xff] %v8727_v7  ;;  %11039 = vst [vmem:[#allocation36_spill] sm:$0xff] %v8729_v52  ;;  %v8732_v57 = vpop.eup %6416  ;;  %v1759_v55 = vmul.f32 %v8380_v13, %v1583_v14  ;;  %v1756_v45 = vmul.f32 %v8401_v21, %v1580_v1  ;;  %4073 = vmatprep.mubr.bf16.mxu1 %v8727_v7  ;;  %3921 = vmatmul.mubr.bf16.gmra.mxu0 %v8729_v52  ;;  %v11044_v4 = vld [vmem:[#allocation48_spill] sm:$0xff]  ;;  %v11050_v52 = vld [vmem:[#allocation50_spill] sm:$0xff] }
 0x215   : > { %v1486_v48 = vadd.f32 1e-05, %v1462_v2  ;;  %11040 = vst [vmem:[#allocation32_spill] sm:$0xff] %v8732_v57  ;;  %11041 = vst [vmem:[#allocation35_spill] sm:$0xff] %v8735_v58  ;;  %v6109_v2 = vld [vmem:[#allocation10 + $0x2d8] ss:$24 sps:$4 sm:$0xff]   ;;  %v1587_v3 = vmul.f32 %v8732_v57, %v11043_v15  ;;  %v1933_v53 = vadd.f32 %v8377_v23, %v1757_v24  ;;  %4074 = vmatmul.mubr.bf16.gmra.mxu1 %v8735_v58  ;;  %4171 = vmatpush2.bf16.msra.mxu0 %v6106_v11 }
 0x216   : > { %v1391_v50 = vpop.xlane.xlu1 %1390  ;;  %v1589_v34 = vmul.f32 %v8732_v57, %v11044_v4  ;;  %v1935_v14 = vadd.f32 %v8398_v30, %v1759_v55  ;;  %v11045_v1 = vld [vmem:[#allocation44_spill] sm:$0xff]  ;;  %v1588_v15 = vmul.f32 %v8732_v57, %v11046_v33  ;;  %v1758_v24 = vmul.f32 %v8417_v27, %v1582_v31  ;;  %v6112_v58 = vld [vmem:[#allocation10 + $0x8a0] ss:$24 sps:$4 sm:$0xff]   ;;  %4324 = vmatpush2.bf16.msra.mxu1 %v6109_v2 }
 0x217   : > { %6422 = vrsqrt.f32 %v1486_v48  ;;  %v1463_v62 = vmul.f32 0.0013020834, %v1391_v50  ;;  %v1586_v48 = vmul.f32 %v8732_v57, %v11045_v1  ;;  %v1932_v50 = vadd.f32 %v8405_v19, %v1756_v45  ;;  %4172 = vmatprep.subr.bf16.mxu0 %v6114_v44  ;;  %v6115_v1 = vld [vmem:[#allocation10 + $0x2a8] ss:$24 sps:$4 sm:$0xff]   ;;  %4325 = vmatprep.subr.bf16.mxu1 %v6117_v16  ;;  %v6123_v16 = vld [vmem:[#allocation10 + $0x27c] ss:$24 sps:$4 sm:$0xff]  }
 0x218   : > { %v1763_v7 = vmul.f32 %v8373_v20, %v1587_v3  ;;  %v1765_v4 = vmul.f32 %v8380_v13, %v1589_v34  ;;  %v1700_v45 = vmul.f32 %v8462_v41, %v8483_v26  ;;  %v1764_v11 = vmul.f32 %v8417_v27, %v1588_v15  ;;  %v11047_v34 = vld [vmem:[#allocation52_spill] sm:$0xff] }
 0x219   : > { %v1487_v47 = vadd.f32 1e-05, %v1463_v62  ;;  %v1762_v55 = vmul.f32 %v8401_v21, %v1586_v48  ;;  %v8761_v62 = vpop.eup %6418  ;;  %v1934_v38 = vadd.f32 %v8435_v37, %v1758_v24  ;;  %4173 = vmatpush2.bf16.msra.mxu0 %v6112_v58  ;;  %v11086_v39 = vld [vmem:[#allocation88_spill] sm:$0xff] }
 0x21a   : > { %v1939_v31 = vadd.f32 %v8377_v23, %v1763_v7  ;;  %v1941_v2 = vadd.f32 %v8398_v30, %v1765_v4  ;;  %v1593_v48 = vmul.f32 %v8761_v62, %v11047_v34  ;;  %v1595_v7 = vmul.f32 %v8761_v62, %v11049_v28  ;;  %4326 = vmatpush2.bf16.msra.mxu1 %v6115_v1 }
 0x21b   : > { %6424 = vrsqrt.f32 %v1487_v47  ;;  %v1938_v44 = vadd.f32 %v8405_v19, %v1762_v55  ;;  %v1940_v47 = vadd.f32 %v8435_v37, %v1764_v11  ;;  %v1592_v15 = vmul.f32 %v8761_v62, %v11050_v52  ;;  %4174 = vmatprep.subr.bf16.mxu0 %v6120_v12  ;;  %v11054_v11 = vld [vmem:[#allocation53_spill] sm:$0xff]  ;;  %v11055_v12 = vld [vmem:[#allocation58_spill] sm:$0xff]  ;;  %4327 = vmatprep.subr.bf16.mxu1 %v6123_v16 }
 0x21c   : > { %v1398_v33 = vpop.xlane.xlu0 %1397  ;;  %v8770_v26 = vpack.c.bf16 %v1939_v31, %v1933_v53  ;;  %v1769_v55 = vmul.f32 %v8373_v20, %v1593_v48  ;;  %v6118_v53 = vld [vmem:[#allocation10 + $0x870] ss:$24 sps:$4 sm:$0xff]   ;;  %v1771_v52 = vmul.f32 %v8380_v13, %v1595_v7  ;;  %v6129_v48 = vld [vmem:[#allocation10 + $0x24c] ss:$24 sps:$4 sm:$0xff]   ;;  %v8811_v16 = vmul.f32 %v8462_v41, %v8709_v9 }
 0x21d   : > { %v1464_v3 = vmul.f32 0.0013020834, %v1398_v33  ;;  %v8777_v33 = vpack.c.bf16 %v1941_v2, %v1935_v14  ;;  %v8779_v4 = vpack.c.bf16 %v1938_v44, %v1932_v50  ;;  %v8785_v28 = vpack.c.bf16 %v1940_v47, %v1934_v38  ;;  %v6121_v50 = vld [vmem:[#allocation10 + $0x278] ss:$24 sps:$4 sm:$0xff]   ;;  %v11056_v44 = vld [vmem:[#allocation60_spill] sm:$0xff]  ;;  %4175 = vmatpush2.bf16.msra.mxu0 %v6118_v53 }
 0x21e   : > { %11048 = vst [vmem:[#allocation127_spill] sm:$0xff] %v8770_v26  ;;  %v8782_v31 = vpop.eup %6420  ;;  %3930 = vmatprep.mubr.bf16.mxu0 %v8770_v26  ;;  %v1768_v58 = vmul.f32 %v8401_v21, %v1592_v15  ;;  %v1594_v14 = vmul.f32 %v8761_v62, %v11054_v11  ;;  %v1945_v38 = vadd.f32 %v8377_v23, %v1769_v55  ;;  %v11057_v15 = vld [vmem:[#allocation56_spill] sm:$0xff]  ;;  %v11058_v55 = vld [vmem:[#allocation59_spill] sm:$0xff] }
 0x21f   : > { %v1488_v24 = vadd.f32 1e-05, %v1464_v3  ;;  %11051 = vst [vmem:[#allocation40_spill] sm:$0xff] %v8777_v33  ;;  %11052 = vst [vmem:[#allocation42_spill] sm:$0xff] %v8779_v4  ;;  %v6126_v3 = vld [vmem:[#allocation10 + $0x844] ss:$24 sps:$4 sm:$0xff]   ;;  %4083 = vmatprep.mubr.bf16.mxu1 %v8777_v33  ;;  %3931 = vmatmul.mubr.bf16.gmra.mxu0 %v8779_v4  ;;  %v1599_v1 = vmul.f32 %v8782_v31, %v11055_v12  ;;  %v1601_v34 = vmul.f32 %v8782_v31, %v11056_v44 }
 0x220   : > { %11053 = vst [vmem:[#allocation38_spill] sm:$0xff] %v8785_v28  ;;  %4084 = vmatmul.mubr.bf16.gmra.mxu1 %v8785_v28  ;;  %v1947_v7 = vadd.f32 %v8398_v30, %v1771_v52  ;;  %v1944_v11 = vadd.f32 %v8405_v19, %v1768_v58  ;;  %v1600_v4 = vmul.f32 %v8782_v31, %v11058_v55  ;;  %v6132_v26 = vld [vmem:[#allocation10 + $0x814] ss:$24 sps:$4 sm:$0xff]  }
 0x221   : > { %6426 = vrsqrt.f32 %v1488_v24  ;;  %v1405_v2 = vpop.xlane.xlu1 %1404  ;;  %v1598_v24 = vmul.f32 %v8782_v31, %v11057_v15  ;;  %v1775_v33 = vmul.f32 %v8373_v20, %v1599_v1  ;;  %v1777_v12 = vmul.f32 %v8380_v13, %v1601_v34  ;;  %4328 = vmatpush2.bf16.msra.mxu1 %v6121_v50  ;;  %4176 = vmatprep.subr.bf16.mxu0 %v6126_v3  ;;  %v6127_v15 = vld [vmem:[#allocation10 + $0x248] ss:$24 sps:$4 sm:$0xff]  }
 0x222   : > { %v1465_v47 = vmul.f32 0.0013020834, %v1405_v2  ;;  %v1770_v44 = vmul.f32 %v8417_v27, %v1594_v14  ;;  %v6124_v2 = vld [vmem:[#allocation10 + $0x840] ss:$24 sps:$4 sm:$0xff]   ;;  %v8814_v58 = vadd.f32 %v8474_v17, %v1700_v45  ;;  %4329 = vmatprep.subr.bf16.mxu1 %v6129_v48 }
 0x223   : > { %v1774_v52 = vmul.f32 %v8401_v21, %v1598_v24  ;;  %v1951_v53 = vadd.f32 %v8377_v23, %v1775_v33  ;;  %v1953_v14 = vadd.f32 %v8398_v30, %v1777_v12  ;;  %v6135_v24 = vld [vmem:[#allocation10 + $0x21c] ss:$24 sps:$4 sm:$0xff]   ;;  %4177 = vmatpush2.bf16.msra.mxu0 %v6124_v2 }
 0x224   : > { %v1489_v28 = vadd.f32 1e-05, %v1465_v47  ;;  %v8816_v1 = vpop.eup %6422  ;;  %v1776_v47 = vmul.f32 %v8417_v27, %v1600_v4  ;;  %v1946_v50 = vadd.f32 %v8435_v37, %v1770_v44  ;;  %v11061_v12 = vld [vmem:[#allocation65_spill] sm:$0xff]  ;;  %4178 = vmatprep.subr.bf16.mxu0 %v6132_v26  ;;  %v11066_v26 = vld [vmem:[#allocation68_spill] sm:$0xff] }
 0x225   : > { %v1950_v9 = vadd.f32 %v8405_v19, %v1774_v52  ;;  %v1605_v45 = vmul.f32 %v8816_v1, %v8114_v8  ;;  %v8825_v55 = vpack.c.bf16 %v1951_v53, %v1945_v38  ;;  %v8827_v10 = vpack.c.bf16 %v1953_v14, %v1947_v7  ;;  %v11063_v52 = vld [vmem:[#allocation62_spill] sm:$0xff]  ;;  %4330 = vmatpush2.bf16.msra.mxu1 %v6127_v15  ;;  %v6130_v8 = vld [vmem:[#allocation10 + $0x810] ss:$24 sps:$4 sm:$0xff]  }
 0x226   : > { %v1412_v34 = vpop.xlane.xlu0 %1411  ;;  %6428 = vrsqrt.f32 %v1489_v28  ;;  %v1952_v33 = vadd.f32 %v8435_v37, %v1776_v47  ;;  %v1607_v4 = vmul.f32 %v8816_v1, %v11061_v12  ;;  %v6133_v38 = vld [vmem:[#allocation10 + $0x218] ss:$24 sps:$4 sm:$0xff]   ;;  %v11065_v14 = vld [vmem:[#allocation64_spill] sm:$0xff]  ;;  %4331 = vmatprep.subr.bf16.mxu1 %v6135_v24 }
 0x227   : > { %v1466_v3 = vmul.f32 0.0013020834, %v1412_v34  ;;  %11059 = vst [vmem:[#allocation41_spill] sm:$0xff] %v8825_v55  ;;  %11060 = vst [vmem:[#allocation46_spill] sm:$0xff] %v8827_v10  ;;  %v8832_v48 = vpack.c.bf16 %v1950_v9, %v1944_v11  ;;  %v1781_v28 = vmul.f32 %v8373_v20, %v1605_v45  ;;  %v1604_v34 = vmul.f32 %v8816_v1, %v11063_v52  ;;  %v6141_v9 = vld [vmem:[#allocation10 + $0x1ec] ss:$24 sps:$4 sm:$0xff]  }
 0x228   : > { %v8837_v7 = vpop.eup %6424  ;;  %3940 = vmatprep.mubr.bf16.mxu0 %v8825_v55  ;;  %4093 = vmatprep.mubr.bf16.mxu1 %v8827_v10  ;;  %v8841_v2 = vpack.c.bf16 %v1952_v33, %v1946_v50  ;;  %v1783_v11 = vmul.f32 %v8380_v13, %v1607_v4  ;;  %v1606_v47 = vmul.f32 %v8816_v1, %v11065_v14  ;;  %v11067_v50 = vld [vmem:[#allocation71_spill] sm:$0xff] }
 0x229   : > { %v1490_v44 = vadd.f32 1e-05, %v1466_v3  ;;  %11062 = vst [vmem:[#allocation48_spill] sm:$0xff] %v8832_v48  ;;  %v6138_v3 = vld [vmem:[#allocation10 + $0x7e4] ss:$24 sps:$4 sm:$0xff]   ;;  %3941 = vmatmul.mubr.bf16.gmra.mxu0 %v8832_v48  ;;  %v1611_v45 = vmul.f32 %v8837_v7, %v11066_v26  ;;  %v1957_v12 = vadd.f32 %v8377_v23, %v1781_v28  ;;  %v1613_v33 = vmul.f32 %v8837_v7, %v11067_v50 }
 0x22a   : > { %v1419_v53 = vpop.xlane.xlu1 %1418  ;;  %11064 = vst [vmem:[#allocation44_spill] sm:$0xff] %v8841_v2  ;;  %4094 = vmatmul.mubr.bf16.gmra.mxu1 %v8841_v2  ;;  %v1959_v4 = vadd.f32 %v8398_v30, %v1783_v11  ;;  %v11068_v52 = vld [vmem:[#allocation67_spill] sm:$0xff]  ;;  %v11069_v48 = vld [vmem:[#allocation70_spill] sm:$0xff]  ;;  %v1782_v24 = vmul.f32 %v8417_v27, %v1606_v47  ;;  %4179 = vmatpush2.bf16.msra.mxu0 %v6130_v8 }
 0x22b   : > { %6430 = vrsqrt.f32 %v1490_v44  ;;  %v1467_v15 = vmul.f32 0.0013020834, %v1419_v53  ;;  %v1610_v14 = vmul.f32 %v8837_v7, %v11068_v52  ;;  %v1780_v44 = vmul.f32 %v8401_v21, %v1604_v34  ;;  %4332 = vmatpush2.bf16.msra.mxu1 %v6133_v38  ;;  %v6136_v28 = vld [vmem:[#allocation10 + $0x7e0] ss:$24 sps:$4 sm:$0xff]   ;;  %4180 = vmatprep.subr.bf16.mxu0 %v6138_v3  ;;  %v6144_v34 = vld [vmem:[#allocation10 + $0x7b4] ss:$24 sps:$4 sm:$0xff]  }
 0x22c   : > { %v1787_v10 = vmul.f32 %v8373_v20, %v1611_v45  ;;  %v1612_v26 = vmul.f32 %v8837_v7, %v11069_v48  ;;  %v1789_v50 = vmul.f32 %v8380_v13, %v1613_v33  ;;  %v6139_v52 = vld [vmem:[#allocation10 + $0x1e8] ss:$24 sps:$4 sm:$0xff]   ;;  %4333 = vmatprep.subr.bf16.mxu1 %v6141_v9  ;;  %v1958_v38 = vadd.f32 %v8435_v37, %v1782_v24 }
 0x22d   : > { %v1491_v53 = vadd.f32 1e-05, %v1467_v15  ;;  %v1786_v11 = vmul.f32 %v8401_v21, %v1610_v14  ;;  %v1956_v2 = vadd.f32 %v8405_v19, %v1780_v44  ;;  %v11070_v44 = vld [vmem:[#allocation74_spill] sm:$0xff] }
 0x22e   : > { %v8864_v15 = vpop.eup %6426  ;;  %v1963_v48 = vadd.f32 %v8377_v23, %v1787_v10  ;;  %v1788_v8 = vmul.f32 %v8417_v27, %v1612_v26  ;;  %v1965_v33 = vadd.f32 %v8398_v30, %v1789_v50  ;;  %v11073_v10 = vld [vmem:[#allocation73_spill] sm:$0xff]  ;;  %4181 = vmatpush2.bf16.msra.mxu0 %v6136_v28 }
 0x22f   : > { %6432 = vrsqrt.f32 %v1491_v53  ;;  %v1426_v45 = vpop.xlane.xlu0 %1425  ;;  %v1962_v14 = vadd.f32 %v8405_v19, %v1786_v11  ;;  %v1617_v3 = vmul.f32 %v8864_v15, %v11070_v44  ;;  %v11072_v53 = vld [vmem:[#allocation77_spill] sm:$0xff]  ;;  %v1616_v26 = vmul.f32 %v8864_v15, %v11073_v10  ;;  %4334 = vmatpush2.bf16.msra.mxu1 %v6139_v52  ;;  %4182 = vmatprep.subr.bf16.mxu0 %v6144_v34  ;;  %v11079_v10 = vld [vmem:[#allocation83_spill] sm:$0xff] }
 0x230   : > { %v1468_v47 = vmul.f32 0.0013020834, %v1426_v45  ;;  %v8873_v9 = vpack.c.bf16 %v1963_v48, %v1957_v12  ;;  %v1964_v55 = vadd.f32 %v8435_v37, %v1788_v8  ;;  %v1619_v40 = vmul.f32 %v8864_v15, %v11072_v53  ;;  %v6142_v44 = vld [vmem:[#allocation10 + $0x7b0] ss:$24 sps:$4 sm:$0xff]   ;;  %v6147_v12 = vld [vmem:[#allocation10 + $0x1bc] ss:$24 sps:$4 sm:$0xff]  }
 0x231   : > { %v8880_v45 = vpack.c.bf16 %v1965_v33, %v1959_v4  ;;  %v8882_v50 = vpack.c.bf16 %v1962_v14, %v1956_v2  ;;  %v1793_v11 = vmul.f32 %v8373_v20, %v1617_v3  ;;  %v1792_v28 = vmul.f32 %v8401_v21, %v1616_v26  ;;  %v6145_v2 = vld [vmem:[#allocation10 + $0x1b8] ss:$24 sps:$4 sm:$0xff]   ;;  %v6150_v33 = vld [vmem:[#allocation10 + $0x784] ss:$24 sps:$4 sm:$0xff]   ;;  %4335 = vmatprep.subr.bf16.mxu1 %v6147_v12 }
 0x232   : > { %11071 = vst [vmem:[#allocation47_spill] sm:$0xff] %v8873_v9  ;;  %v1492_v24 = vadd.f32 1e-05, %v1468_v47  ;;  %3950 = vmatprep.mubr.bf16.mxu0 %v8873_v9  ;;  %v8886_v8 = vpack.c.bf16 %v1964_v55, %v1958_v38  ;;  %v1795_v53 = vmul.f32 %v8380_v13, %v1619_v40  ;;  %v11077_v47 = vld [vmem:[#allocation76_spill] sm:$0xff]  ;;  %v1882_v40 = vadd.f32 %v8474_v17, %v8811_v16  ;;  %v6156_v12 = vld [vmem:[#allocation10 + $0x45c] ss:$24 sps:$4 sm:$0xff]  }
 0x233   : > { %11074 = vst [vmem:[#allocation52_spill] sm:$0xff] %v8880_v45  ;;  %11075 = vst [vmem:[#allocation54_spill] sm:$0xff] %v8882_v50  ;;  %v1618_v4 = vmul.f32 %v8864_v15, %v11077_v47  ;;  %v8892_v14 = vpop.eup %6428  ;;  %4103 = vmatprep.mubr.bf16.mxu1 %v8880_v45  ;;  %3951 = vmatmul.mubr.bf16.gmra.mxu0 %v8882_v50  ;;  %v1969_v55 = vadd.f32 %v8377_v23, %v1793_v11  ;;  %v6153_v34 = vld [vmem:[#allocation10 + $0x18c] ss:$24 sps:$4 sm:$0xff]   ;;  %v11081_v50 = vld [vmem:[#allocation82_spill] sm:$0xff] }
 0x234   : > { %v1433_v48 = vpop.xlane.xlu1 %1432  ;;  %11076 = vst [vmem:[#allocation50_spill] sm:$0xff] %v8886_v8  ;;  %6434 = vrsqrt.f32 %v1492_v24  ;;  %4104 = vmatmul.mubr.bf16.gmra.mxu1 %v8886_v8  ;;  %v11078_v38 = vld [vmem:[#allocation80_spill] sm:$0xff]  ;;  %v1625_v26 = vmul.f32 %v8892_v14, %v11079_v10  ;;  %v1971_v24 = vadd.f32 %v8398_v30, %v1795_v53  ;;  %v1968_v11 = vadd.f32 %v8405_v19, %v1792_v28  ;;  %v6148_v8 = vld [vmem:[#allocation10 + $0x780] ss:$24 sps:$4 sm:$0xff]  }
 0x235   : > { %v1469_v52 = vmul.f32 0.0013020834, %v1433_v48  ;;  %v1623_v3 = vmul.f32 %v8892_v14, %v11078_v38  ;;  %v11080_v48 = vld [vmem:[#allocation79_spill] sm:$0xff]  ;;  %v1624_v9 = vmul.f32 %v8892_v14, %v11081_v50  ;;  %v1794_v16 = vmul.f32 %v8417_v27, %v1618_v4  ;;  %4183 = vmatpush2.bf16.msra.mxu0 %v6142_v44  ;;  %4336 = vmatpush2.bf16.msra.mxu1 %v6145_v2 }
 0x236   : > { %v1622_v47 = vmul.f32 %v8892_v14, %v11080_v48  ;;  %v1801_v10 = vmul.f32 %v8380_v13, %v1625_v26  ;;  %4184 = vmatprep.subr.bf16.mxu0 %v6150_v33  ;;  %v6151_v48 = vld [vmem:[#allocation10 + $0x188] ss:$24 sps:$4 sm:$0xff]   ;;  %4337 = vmatprep.subr.bf16.mxu1 %v6153_v34  ;;  %v8919_v44 = vpack.c.bf16 %v1882_v40, %v8814_v58  ;;  %v11083_v33 = vld [vmem:[#allocation86_spill] sm:$0xff] }
 0x237   : > { %v1493_v45 = vadd.f32 1e-05, %v1469_v52  ;;  %v1799_v38 = vmul.f32 %v8373_v20, %v1623_v3  ;;  %v1800_v28 = vmul.f32 %v8417_v27, %v1624_v9  ;;  %v1970_v50 = vadd.f32 %v8435_v37, %v1794_v16  ;;  %v11085_v16 = vld [vmem:[#allocation85_spill] sm:$0xff] }
 0x238   : > { %v1798_v53 = vmul.f32 %v8401_v21, %v1622_v47  ;;  %v8914_v52 = vpop.eup %6430  ;;  %11082 = vst [vmem:[#allocation53_spill] sm:$0xff] %v8919_v44  ;;  %v1977_v3 = vadd.f32 %v8398_v30, %v1801_v10  ;;  %v11084_v47 = vld [vmem:[#allocation89_spill] sm:$0xff] }
 0x239   : > { %6436 = vrsqrt.f32 %v1493_v45  ;;  %v1975_v4 = vadd.f32 %v8377_v23, %v1799_v38  ;;  %v1629_v26 = vmul.f32 %v8914_v52, %v11083_v33  ;;  %v1976_v45 = vadd.f32 %v8435_v37, %v1800_v28  ;;  %4185 = vmatpush2.bf16.msra.mxu0 %v6148_v8  ;;  %4338 = vmatpush2.bf16.msra.mxu1 %v6151_v48  ;;  %v11093_v48 = vld [vmem:[#allocation91_spill] sm:$0xff] }
 0x23a   : > { %v1974_v2 = vadd.f32 %v8405_v19, %v1798_v53  ;;  %v1631_v9 = vmul.f32 %v8914_v52, %v11084_v47  ;;  %v1628_v34 = vmul.f32 %v8914_v52, %v11085_v16  ;;  %v1630_v58 = vmul.f32 %v8914_v52, %v11086_v39  ;;  %v6159_v53 = vld [vmem:[#allocation10 + $0x75c] ss:$24 sps:$4 sm:$0xff]   ;;  %4460 = vmatprep.subr.bf16.mxu0 %v6156_v12  ;;  %v11091_v39 = vld [vmem:[#allocation92_spill] sm:$0xff] }
 0x23b   : > { %v8933_v40 = vpack.c.bf16 %v1975_v4, %v1969_v55  ;;  %v8935_v38 = vpack.c.bf16 %v1977_v3, %v1971_v24  ;;  %v8941_v28 = vpack.c.bf16 %v1976_v45, %v1970_v50  ;;  %v1805_v47 = vmul.f32 %v8373_v20, %v1629_v26  ;;  %v11092_v55 = vld [vmem:[#allocation95_spill] sm:$0xff]  ;;  %v11094_v3 = vld [vmem:[#allocation94_spill] sm:$0xff]  ;;  %4613 = vmatprep.subr.bf16.mxu1 %v6159_v53 }
 0x23c   : > { %v8937_v10 = vpack.c.bf16 %v1974_v2, %v1968_v11  ;;  %v8939_v33 = vpop.eup %6432  ;;  %v1807_v16 = vmul.f32 %v8380_v13, %v1631_v9  ;;  %v1804_v57 = vmul.f32 %v8401_v21, %v1628_v34  ;;  %v1806_v11 = vmul.f32 %v8417_v27, %v1630_v58 }
 0x23d   : > { %11087 = vst [vmem:[#allocation58_spill] sm:$0xff] %v8933_v40  ;;  %11088 = vst [vmem:[#allocation60_spill] sm:$0xff] %v8935_v38  ;;  %3960 = vmatprep.mubr.bf16.mxu0 %v8933_v40  ;;  %4113 = vmatprep.mubr.bf16.mxu1 %v8935_v38  ;;  %v1635_v8 = vmul.f32 %v8939_v33, %v11091_v39  ;;  %v1637_v24 = vmul.f32 %v8939_v33, %v11092_v55 }
 0x23e   : > { %11089 = vst [vmem:[#allocation56_spill] sm:$0xff] %v8937_v10  ;;  %11090 = vst [vmem:[#allocation59_spill] sm:$0xff] %v8941_v28  ;;  %3961 = vmatmul.mubr.bf16.gmra.mxu0 %v8937_v10  ;;  %4114 = vmatmul.mubr.bf16.gmra.mxu1 %v8941_v28  ;;  %v1634_v50 = vmul.f32 %v8939_v33, %v11093_v48  ;;  %v1636_v2 = vmul.f32 %v8939_v33, %v11094_v3  ;;  %v11095_v48 = vld [vmem:[#allocation98_spill] sm:$0xff]  ;;  %v11097_v3 = vld [vmem:[#allocation97_spill] sm:$0xff] }
 0x23f   : > { %v1811_v12 = vmul.f32 %v8373_v20, %v1635_v8  ;;  %v1813_v4 = vmul.f32 %v8380_v13, %v1637_v24  ;;  %v1981_v26 = vadd.f32 %v8377_v23, %v1805_v47  ;;  %v1983_v45 = vadd.f32 %v8398_v30, %v1807_v16  ;;  %v11096_v16 = vld [vmem:[#allocation101_spill] sm:$0xff] }
 0x240   : > { %v1810_v9 = vmul.f32 %v8401_v21, %v1634_v50  ;;  %v1980_v34 = vadd.f32 %v8405_v19, %v1804_v57  ;;  %v1812_v55 = vmul.f32 %v8417_v27, %v1636_v2  ;;  %v1982_v24 = vadd.f32 %v8435_v37, %v1806_v11  ;;  %v11100_v2 = vld [vmem:[#allocation100_spill] sm:$0xff] }
 0x241   : > { %v8965_v58 = vpop.eup %6434  ;;  %v1987_v39 = vadd.f32 %v8377_v23, %v1811_v12  ;;  %v1989_v8 = vadd.f32 %v8398_v30, %v1813_v4 }
 0x242   : > { %v1986_v53 = vadd.f32 %v8405_v19, %v1810_v9  ;;  %v1641_v47 = vmul.f32 %v8965_v58, %v11095_v48  ;;  %v1643_v50 = vmul.f32 %v8965_v58, %v11096_v16  ;;  %v1640_v57 = vmul.f32 %v8965_v58, %v11097_v3  ;;  %v11106_v3 = vld [vmem:[#allocation106_spill] sm:$0xff] }
 0x243   : > { %v8978_v28 = vpack.c.bf16 %v1987_v39, %v1981_v26  ;;  %v8980_v12 = vpack.c.bf16 %v1989_v8, %v1983_v45  ;;  %v1988_v4 = vadd.f32 %v8435_v37, %v1812_v55  ;;  %v1642_v11 = vmul.f32 %v8965_v58, %v11100_v2  ;;  %v11103_v26 = vld [vmem:[#allocation105_spill] sm:$0xff]  ;;  %v11104_v8 = vld [vmem:[#allocation107_spill] sm:$0xff] }
 0x244   : > { %v8985_v38 = vpack.c.bf16 %v1986_v53, %v1980_v34  ;;  %v1817_v39 = vmul.f32 %v8373_v20, %v1641_v47  ;;  %v1819_v34 = vmul.f32 %v8380_v13, %v1643_v50  ;;  %v11105_v53 = vld [vmem:[#allocation103_spill] sm:$0xff] }
 0x245   : > { %11098 = vst [vmem:[#allocation65_spill] sm:$0xff] %v8978_v28  ;;  %11099 = vst [vmem:[#allocation62_spill] sm:$0xff] %v8980_v12  ;;  %3970 = vmatprep.mubr.bf16.mxu0 %v8978_v28  ;;  %4123 = vmatprep.mubr.bf16.mxu1 %v8980_v12  ;;  %v8991_v48 = vpack.c.bf16 %v1988_v4, %v1982_v24  ;;  %v1816_v24 = vmul.f32 %v8401_v21, %v1640_v57 }
 0x246   : > { %11101 = vst [vmem:[#allocation64_spill] sm:$0xff] %v8985_v38  ;;  %v8987_v9 = vpop.eup %6436  ;;  %3971 = vmatmul.mubr.bf16.gmra.mxu0 %v8985_v38  ;;  %v1818_v2 = vmul.f32 %v8417_v27, %v1642_v11 }
 0x247   : > { %11102 = vst [vmem:[#allocation68_spill] sm:$0xff] %v8991_v48  ;;  %v1647_v45 = vmul.f32 %v8987_v9, %v11103_v26  ;;  %v1649_v55 = vmul.f32 %v8987_v9, %v11104_v8  ;;  %4124 = vmatmul.mubr.bf16.gmra.mxu1 %v8991_v48  ;;  %v1646_v16 = vmul.f32 %v8987_v9, %v11105_v53 }
 0x248   : > { %v1648_v4 = vmul.f32 %v8987_v9, %v11106_v3  ;;  %v1993_v48 = vadd.f32 %v8377_v23, %v1817_v39  ;;  %v1995_v53 = vadd.f32 %v8398_v30, %v1819_v34  ;;  %v1992_v3 = vadd.f32 %v8405_v19, %v1816_v24  ;;  %v11111_v34 = vld [vmem:[#allocation55_spill] sm:$0xff] }
 0x249   : > { %v1823_v26 = vmul.f32 %v8373_v20, %v1647_v45  ;;  %v1825_v47 = vmul.f32 %v8380_v13, %v1649_v55  ;;  %v1822_v8 = vmul.f32 %v8401_v21, %v1646_v16  ;;  %v1994_v45 = vadd.f32 %v8435_v37, %v1818_v2  ;;  %v11112_v2 = vld [vmem:[#allocation61_spill] sm:$0xff] }
 0x24a   : > { %v1824_v50 = vmul.f32 %v8417_v27, %v1648_v4  ;;  %v1597_v24 = vmul.f32 %v8761_v62, %v11111_v34  ;;  %v11116_v34 = vld [vmem:[#allocation75_spill] sm:$0xff] }
 0x24b   : > { %v1999_v12 = vadd.f32 %v8377_v23, %v1823_v26  ;;  %v2001_v57 = vadd.f32 %v8398_v30, %v1825_v47  ;;  %v1998_v11 = vadd.f32 %v8405_v19, %v1822_v8  ;;  %v11113_v26 = vld [vmem:[#allocation57_spill] sm:$0xff]  ;;  %v11114_v8 = vld [vmem:[#allocation63_spill] sm:$0xff] }
 0x24c   : > { %v2000_v55 = vadd.f32 %v8435_v37, %v1824_v50  ;;  %v1596_v47 = vmul.f32 %v8761_v62, %v11113_v26  ;;  %v1602_v50 = vmul.f32 %v8782_v31, %v11114_v8  ;;  %v11117_v26 = vld [vmem:[#allocation66_spill] sm:$0xff] }
 0x24d   : > { %v9019_v38 = vpack.c.bf16 %v1999_v12, %v1993_v48  ;;  %v9021_v16 = vpack.c.bf16 %v2001_v57, %v1995_v53  ;;  %v9023_v4 = vpack.c.bf16 %v1998_v11, %v1992_v3  ;;  %v1603_v12 = vmul.f32 %v8782_v31, %v11112_v2  ;;  %v11115_v57 = vld [vmem:[#allocation69_spill] sm:$0xff] }
 0x24e   : > { %v9025_v39 = vpack.c.bf16 %v2000_v55, %v1994_v45  ;;  %v1773_v48 = vmul.f32 %v8455_v61, %v1597_v24  ;;  %v1609_v3 = vmul.f32 %v8816_v1, %v11115_v57  ;;  %v1772_v45 = vmul.f32 %v8462_v41, %v1596_v47 }
 0x24f   : > { %11107 = vst [vmem:[#allocation71_spill] sm:$0xff] %v9019_v38  ;;  %11108 = vst [vmem:[#allocation67_spill] sm:$0xff] %v9021_v16  ;;  %3980 = vmatprep.mubr.bf16.mxu0 %v9019_v38  ;;  %4133 = vmatprep.mubr.bf16.mxu1 %v9021_v16  ;;  %v1779_v53 = vmul.f32 %v8455_v61, %v1603_v12  ;;  %v1778_v55 = vmul.f32 %v8462_v41, %v1602_v50  ;;  %v11118_v12 = vld [vmem:[#allocation72_spill] sm:$0xff]  ;;  %v11119_v50 = vld [vmem:[#allocation81_spill] sm:$0xff] }
 0x250   : > { %11109 = vst [vmem:[#allocation70_spill] sm:$0xff] %v9023_v4  ;;  %11110 = vst [vmem:[#allocation74_spill] sm:$0xff] %v9025_v39  ;;  %3981 = vmatmul.mubr.bf16.gmra.mxu0 %v9023_v4  ;;  %4134 = vmatmul.mubr.bf16.gmra.mxu1 %v9025_v39  ;;  %v1949_v11 = vadd.f32 %v8459_v46, %v1773_v48  ;;  %v1615_v24 = vmul.f32 %v8837_v7, %v11116_v34  ;;  %v11128_v16 = vld [vmem:[#allocation99_spill] sm:$0xff] }
 0x251   : > { %v1955_v2 = vadd.f32 %v8459_v46, %v1779_v53  ;;  %v1785_v62 = vmul.f32 %v8455_v61, %v1609_v3  ;;  %v1608_v31 = vmul.f32 %v8816_v1, %v11117_v26  ;;  %v1614_v8 = vmul.f32 %v8837_v7, %v11118_v12 }
 0x252   : > { %v1948_v57 = vadd.f32 %v8474_v17, %v1772_v45  ;;  %v1954_v48 = vadd.f32 %v8474_v17, %v1778_v55  ;;  %v1791_v47 = vmul.f32 %v8455_v61, %v1615_v24  ;;  %v1621_v39 = vmul.f32 %v8864_v15, %v11119_v50  ;;  %v11122_v45 = vld [vmem:[#allocation87_spill] sm:$0xff]  ;;  %v11124_v50 = vld [vmem:[#allocation84_spill] sm:$0xff] }
 0x253   : > { %v9059_v34 = vpack.c.bf16 %v1955_v2, %v1949_v11  ;;  %v1961_v53 = vadd.f32 %v8459_v46, %v1785_v62  ;;  %v1784_v3 = vmul.f32 %v8462_v41, %v1608_v31  ;;  %v1790_v1 = vmul.f32 %v8462_v41, %v1614_v8  ;;  %v11123_v2 = vld [vmem:[#allocation78_spill] sm:$0xff] }
 0x254   : > { %v9064_v26 = vpack.c.bf16 %v1954_v48, %v1948_v57  ;;  %v1967_v7 = vadd.f32 %v8459_v46, %v1791_v47  ;;  %v1627_v55 = vmul.f32 %v8892_v14, %v11122_v45  ;;  %v1797_v24 = vmul.f32 %v8455_v61, %v1621_v39  ;;  %v11126_v47 = vld [vmem:[#allocation93_spill] sm:$0xff] }
 0x255   : > { %11120 = vst [vmem:[#allocation77_spill] sm:$0xff] %v9059_v34  ;;  %v1960_v12 = vadd.f32 %v8474_v17, %v1784_v3  ;;  %v1966_v11 = vadd.f32 %v8474_v17, %v1790_v1  ;;  %v1620_v62 = vmul.f32 %v8864_v15, %v11123_v2  ;;  %v1626_v31 = vmul.f32 %v8892_v14, %v11124_v50  ;;  %v11131_v50 = vld [vmem:[#allocation102_spill] sm:$0xff] }
 0x256   : > { %11121 = vst [vmem:[#allocation73_spill] sm:$0xff] %v9064_v26  ;;  %v9076_v8 = vpack.c.bf16 %v1967_v7, %v1961_v53  ;;  %v1803_v57 = vmul.f32 %v8455_v61, %v1627_v55  ;;  %v1973_v48 = vadd.f32 %v8459_v46, %v1797_v24  ;;  %v1633_v45 = vmul.f32 %v8914_v52, %v11126_v47  ;;  %v11129_v7 = vld [vmem:[#allocation90_spill] sm:$0xff]  ;;  %v11130_v24 = vld [vmem:[#allocation96_spill] sm:$0xff] }
 0x257   : > { %v9082_v39 = vpack.c.bf16 %v1966_v11, %v1960_v12  ;;  %v1796_v3 = vmul.f32 %v8462_v41, %v1620_v62  ;;  %v1802_v1 = vmul.f32 %v8462_v41, %v1626_v31  ;;  %v1639_v15 = vmul.f32 %v8939_v33, %v11128_v16 }
 0x258   : > { %11125 = vst [vmem:[#allocation76_spill] sm:$0xff] %v9076_v8  ;;  %v1979_v14 = vadd.f32 %v8459_v46, %v1803_v57  ;;  %v1809_v53 = vmul.f32 %v8455_v61, %v1633_v45  ;;  %v1632_v55 = vmul.f32 %v8914_v52, %v11129_v7  ;;  %v1638_v2 = vmul.f32 %v8939_v33, %v11130_v24  ;;  %v11136_v24 = vld [vmem:[#allocation110_spill] sm:$0xff] }
 0x259   : > { %11127 = vst [vmem:[#allocation80_spill] sm:$0xff] %v9082_v39  ;;  %v1972_v12 = vadd.f32 %v8474_v17, %v1796_v3  ;;  %v1978_v11 = vadd.f32 %v8474_v17, %v1802_v1  ;;  %v1815_v62 = vmul.f32 %v8455_v61, %v1639_v15  ;;  %v1645_v31 = vmul.f32 %v8965_v58, %v11131_v50  ;;  %v11134_v3 = vld [vmem:[#allocation108_spill] sm:$0xff] }
 0x25a   : > { %v9099_v16 = vpack.c.bf16 %v1979_v14, %v1973_v48  ;;  %v1985_v57 = vadd.f32 %v8459_v46, %v1809_v53  ;;  %v1808_v47 = vmul.f32 %v8462_v41, %v1632_v55  ;;  %v1814_v52 = vmul.f32 %v8462_v41, %v1638_v2  ;;  %v11135_v14 = vld [vmem:[#allocation104_spill] sm:$0xff] }
 0x25b   : > { %v9104_v45 = vpack.c.bf16 %v1978_v11, %v1972_v12  ;;  %v1991_v33 = vadd.f32 %v8459_v46, %v1815_v62  ;;  %v1651_v1 = vmul.f32 %v8987_v9, %v11134_v3  ;;  %v1821_v15 = vmul.f32 %v8455_v61, %v1645_v31 }
 0x25c   : > { %11132 = vst [vmem:[#allocation83_spill] sm:$0xff] %v9099_v16  ;;  %v1984_v7 = vadd.f32 %v8474_v17, %v1808_v47  ;;  %v1990_v48 = vadd.f32 %v8474_v17, %v1814_v52  ;;  %v1644_v53 = vmul.f32 %v8965_v58, %v11135_v14  ;;  %v1650_v55 = vmul.f32 %v8987_v9, %v11136_v24 }
 0x25d   : > { %11133 = vst [vmem:[#allocation79_spill] sm:$0xff] %v9104_v45  ;;  %v9116_v2 = vpack.c.bf16 %v1991_v33, %v1985_v57  ;;  %v1827_v12 = vmul.f32 %v8455_v61, %v1651_v1  ;;  %v1997_v31 = vadd.f32 %v8459_v46, %v1821_v15  ;;  %v11141_v15 = vld [vmem:[#allocation116_spill] sm:$0xff] }
 0x25e   : > { %v9119_v11 = vpack.c.bf16 %v1990_v48, %v1984_v7  ;;  %v1820_v62 = vmul.f32 %v8462_v41, %v1644_v53  ;;  %v1826_v50 = vmul.f32 %v8462_v41, %v1650_v55  ;;  %v11142_v55 = vld [vmem:[#allocation121_spill] sm:$0xff] }
 0x25f   : > { %11137 = vst [vmem:[#allocation82_spill] sm:$0xff] %v9116_v2  ;;  %v2003_v47 = vadd.f32 %v8459_v46, %v1827_v12 }
 0x260   : > { %11138 = vst [vmem:[#allocation86_spill] sm:$0xff] %v9119_v11  ;;  %v1996_v52 = vadd.f32 %v8474_v17, %v1820_v62  ;;  %v2002_v58 = vadd.f32 %v8474_v17, %v1826_v50  ;;  %v11143_v62 = vld [vmem:[#allocation115_spill] sm:$0xff]  ;;  %v11151_v11 = vld [vmem:[#allocation137_spill] sm:$0xff] }
 0x261   : > { %v9127_v3 = vpack.c.bf16 %v2003_v47, %v1997_v31  ;;  %v11144_v50 = vld [vmem:[#allocation119_spill] sm:$0xff] }
 0x262   : > { %v9129_v9 = vpack.c.bf16 %v2002_v58, %v1996_v52 }
 0x263   : > { %11139 = vst [vmem:[#allocation89_spill] sm:$0xff] %v9127_v3  ;;  %v11150_v3 = vld [vmem:[#allocation138_spill] sm:$0xff] }
 0x264   : > { %11140 = vst [vmem:[#allocation85_spill] sm:$0xff] %v9129_v9 }
 0x26c   : > { %v1440_v57 = vpop.xlane.xlu0 %1439 }
 0x26d   : > { %v1470_v33 = vmul.f32 0.0013020834, %v1440_v57 }
 0x26f   : > { %v1494_v1 = vadd.f32 1e-05, %v1470_v33 }
 0x270   : > { %v1447_v7 = vpop.xlane.xlu1 %1446 }
 0x271   : > { %6438 = vrsqrt.f32 %v1494_v1  ;;  %v1471_v48 = vmul.f32 0.0013020834, %v1447_v7  ;;  %v11145_v1 = vld [vmem:[#allocation129_spill] sm:$0xff] }
 0x272   : > { %v1537_v7 = vmul.f32 %v8508_v42, %v11145_v1 }
 0x273   : > { %v1495_v14 = vadd.f32 1e-05, %v1471_v48  ;;  %v11146_v48 = vld [vmem:[#allocation131_spill] sm:$0xff] }
 0x275   : > { %6440 = vrsqrt.f32 %v1495_v14  ;;  %v1543_v14 = vmul.f32 %v8531_v0, %v11146_v48 }
 0x27e   : > { %v6439_v53 = vpop.eup %6438 }
 0x27f   : > { %v1653_v24 = vmul.f32 %v6439_v53, %v11141_v15  ;;  %v1655_v12 = vmul.f32 %v6439_v53, %v11142_v55  ;;  %v1652_v4 = vmul.f32 %v6439_v53, %v11143_v62  ;;  %v1654_v31 = vmul.f32 %v6439_v53, %v11144_v50  ;;  %v11147_v55 = vld [vmem:[#allocation120_spill] sm:$0xff] }
 0x280   : > { %v1657_v47 = vmul.f32 %v6439_v53, %v8428_v6  ;;  %v1656_v52 = vmul.f32 %v6439_v53, %v8412_v25  ;;  %v11148_v25 = vld [vmem:[#allocation117_spill] sm:$0xff] }
 0x281   : > { %v1829_v58 = vmul.f32 %v8373_v20, %v1653_v24  ;;  %v1831_v33 = vmul.f32 %v8380_v13, %v1655_v12  ;;  %v1828_v50 = vmul.f32 %v8401_v21, %v1652_v4  ;;  %v1830_v6 = vmul.f32 %v8417_v27, %v1654_v31  ;;  %v11149_v24 = vld [vmem:[#allocation118_spill] sm:$0xff] }
 0x282   : > { %v6441_v57 = vpop.eup %6440  ;;  %v1833_v12 = vmul.f32 %v8455_v61, %v1657_v47  ;;  %v1832_v38 = vmul.f32 %v8462_v41, %v1656_v52 }
 0x283   : > { %v1659_v15 = vmul.f32 %v6441_v57, %v8425_v63  ;;  %v1661_v62 = vmul.f32 %v6441_v57, %v11147_v55  ;;  %v1658_v53 = vmul.f32 %v6441_v57, %v11148_v25  ;;  %v1660_v9 = vmul.f32 %v6441_v57, %v11149_v24 }
 0x284   : > { %v2005_v48 = vadd.f32 %v8377_v23, %v1829_v58  ;;  %v1663_v55 = vmul.f32 %v6441_v57, %v11150_v3  ;;  %v2007_v4 = vadd.f32 %v8398_v30, %v1831_v33  ;;  %v1662_v24 = vmul.f32 %v6441_v57, %v11151_v11 }
 0x285   : > { %v1835_v1 = vmul.f32 %v8373_v20, %v1659_v15  ;;  %v1837_v63 = vmul.f32 %v8380_v13, %v1661_v62  ;;  %v1834_v31 = vmul.f32 %v8401_v21, %v1658_v53  ;;  %v1836_v25 = vmul.f32 %v8417_v27, %v1660_v9 }
 0x286   : > { %v2004_v20 = vadd.f32 %v8405_v19, %v1828_v50  ;;  %v1839_v58 = vmul.f32 %v8455_v61, %v1663_v55  ;;  %v2006_v3 = vadd.f32 %v8435_v37, %v1830_v6  ;;  %v1838_v21 = vmul.f32 %v8462_v41, %v1662_v24  ;;  %v11156_v6 = vld [vmem:[#allocation130_spill] sm:$0xff] }
 0x287   : > { %v2011_v47 = vadd.f32 %v8377_v23, %v1835_v1  ;;  %v2013_v52 = vadd.f32 %v8398_v30, %v1837_v63  ;;  %v2010_v13 = vadd.f32 %v8405_v19, %v1834_v31  ;;  %v2012_v33 = vadd.f32 %v8435_v37, %v1836_v25  ;;  %v11158_v63 = vld [vmem:[#allocation128_spill] sm:$0xff]  ;;  %v11159_v31 = vld [vmem:[#allocation133_spill] sm:$0xff] }
 0x288   : > { %v2009_v23 = vadd.f32 %v8459_v46, %v1833_v12  ;;  %v2015_v30 = vadd.f32 %v8459_v46, %v1839_v58  ;;  %v2008_v19 = vadd.f32 %v8474_v17, %v1832_v38  ;;  %v2014_v57 = vadd.f32 %v8474_v17, %v1838_v21  ;;  %v11157_v12 = vld [vmem:[#allocation135_spill] sm:$0xff] }
 0x289   : > { %v9167_v15 = vpack.c.bf16 %v2011_v47, %v2005_v48  ;;  %v9169_v27 = vpack.c.bf16 %v2013_v52, %v2007_v4  ;;  %v9173_v11 = vpack.c.bf16 %v2010_v13, %v2004_v20  ;;  %v9175_v9 = vpack.c.bf16 %v2012_v33, %v2006_v3  ;;  %v6157_v4 = vld [vmem:[#allocation10 + $0x758] ss:$24 sps:$4 sm:$0xff]   ;;  %v6162_v47 = vld [vmem:[#allocation10 + $0x42c] ss:$24 sps:$4 sm:$0xff]   ;;  %v6160_v58 = vld [vmem:[#allocation10 + $0x428] ss:$24 sps:$4 sm:$0xff]  }
 0x28a   : > { %v9181_v37 = vpack.c.bf16 %v2015_v30, %v2009_v23  ;;  %v1719_v62 = vmul.f32 %v8455_v61, %v1543_v14  ;;  %v9186_v50 = vpack.c.bf16 %v2014_v57, %v2008_v19  ;;  %v1713_v38 = vmul.f32 %v8455_v61, %v1537_v7  ;;  %v6154_v14 = vld [vmem:[#allocation10 + $0x458] ss:$24 sps:$4 sm:$0xff]   ;;  %v6165_v52 = vld [vmem:[#allocation10 + $0x72c] ss:$24 sps:$4 sm:$0xff]   ;;  %v6163_v13 = vld [vmem:[#allocation10 + $0x728] ss:$24 sps:$4 sm:$0xff]  }
 0x28b   : > { %11152 = vst [vmem:[#allocation88_spill] sm:$0xff] %v9167_v15  ;;  %11153 = vst [vmem:[#allocation92_spill] sm:$0xff] %v9173_v11  ;;  %3990 = vmatprep.mubr.bf16.mxu0 %v9167_v15  ;;  %4143 = vmatprep.mubr.bf16.mxu1 %v9169_v27  ;;  %v1542_v53 = vmul.f32 %v8531_v0, %v11156_v6  ;;  %v1555_v1 = vmul.f32 %v8580_v35, %v11157_v12  ;;  %v6168_v21 = vld [vmem:[#allocation10 + $0x3fc] ss:$24 sps:$4 sm:$0xff]  }
 0x28c   : > { %11154 = vst [vmem:[#allocation95_spill] sm:$0xff] %v9181_v37  ;;  %3991 = vmatmul.mubr.bf16.gmra.mxu0 %v9173_v11  ;;  %4144 = vmatmul.mubr.bf16.gmra.mxu1 %v9175_v9  ;;  %11155 = vst [vmem:[#allocation91_spill] sm:$0xff] %v9186_v50  ;;  %v1895_v48 = vadd.f32 %v8459_v46, %v1719_v62  ;;  %v1536_v55 = vmul.f32 %v8508_v42, %v11158_v63  ;;  %v6171_v23 = vld [vmem:[#allocation10 + $0x6fc] ss:$24 sps:$4 sm:$0xff]  }
 0x28d   : > { %4186 = vmatprep.mubr.bf16.mxu0 %v8657_v36  ;;  %4339 = vmatprep.mubr.bf16.mxu1 %v8519_v29  ;;  %v1549_v25 = vmul.f32 %v8559_v49, %v11159_v31  ;;  %v1889_v24 = vadd.f32 %v8459_v46, %v1713_v38  ;;  %v1718_v7 = vmul.f32 %v8462_v41, %v1542_v53  ;;  %v11161_v30 = vld [vmem:[#allocation134_spill] sm:$0xff]  ;;  %v11162_v62 = vld [vmem:[#allocation25_spill] sm:$0xff]  ;;  %v11163_v53 = vld [vmem:[#allocation132_spill] sm:$0xff] }
 0x28e   : > { %v1731_v0 = vmul.f32 %v8455_v61, %v1555_v1  ;;  %v1712_v42 = vmul.f32 %v8462_v41, %v1536_v55  ;;  %v1554_v19 = vmul.f32 %v8580_v35, %v11161_v30  ;;  %v1567_v38 = vmul.f32 %v8629_v43, %v11162_v62  ;;  %v6166_v55 = vld [vmem:[#allocation10 + $0x3f8] ss:$24 sps:$4 sm:$0xff]  }
 0x28f   : > { %v9205_v20 = vpack.c.bf16 %v1895_v48, %v1889_v24  ;;  %v1725_v3 = vmul.f32 %v8455_v61, %v1549_v25  ;;  %v1894_v33 = vadd.f32 %v8474_v17, %v1718_v7  ;;  %v1548_v12 = vmul.f32 %v8559_v49, %v11163_v53  ;;  %v11164_v48 = vld [vmem:[#allocation21_spill] sm:$0xff] }
 0x290   : > { %v1907_v57 = vadd.f32 %v8459_v46, %v1731_v0  ;;  %v1888_v6 = vadd.f32 %v8474_v17, %v1712_v42  ;;  %v1561_v63 = vmul.f32 %v8608_v5, %v11164_v48  ;;  %v1743_v25 = vmul.f32 %v8455_v61, %v1567_v38  ;;  %v6174_v49 = vld [vmem:[#allocation10 + $0x3cc] ss:$24 sps:$4 sm:$0xff]   ;;  %v6172_v0 = vld [vmem:[#allocation10 + $0x3c8] ss:$24 sps:$4 sm:$0xff]  }
 0x291   : > { %11160 = vst [vmem:[#allocation94_spill] sm:$0xff] %v9205_v20  ;;  %v1901_v1 = vadd.f32 %v8459_v46, %v1725_v3  ;;  %v6177_v24 = vld [vmem:[#allocation10 + $0x6cc] ss:$24 sps:$4 sm:$0xff]   ;;  %v1724_v7 = vmul.f32 %v8462_v41, %v1548_v12  ;;  %v6175_v42 = vld [vmem:[#allocation10 + $0x6c8] ss:$24 sps:$4 sm:$0xff]  }
 0x292   : > { %v9223_v35 = vpack.c.bf16 %v1894_v33, %v1888_v6  ;;  %v1919_v3 = vadd.f32 %v8459_v46, %v1743_v25  ;;  %v6180_v33 = vld [vmem:[#allocation10 + $0x39c] ss:$24 sps:$4 sm:$0xff]   ;;  %v6178_v12 = vld [vmem:[#allocation10 + $0x398] ss:$24 sps:$4 sm:$0xff]  }
 0x293   : > { %v9226_v31 = vpack.c.bf16 %v1907_v57, %v1901_v1  ;;  %v11169_v57 = vld [vmem:[#allocation20_spill] sm:$0xff]  ;;  %v11170_v6 = vld [vmem:[#allocation31_spill] sm:$0xff]  ;;  %v6181_v1 = vld [vmem:[#allocation10 + $0x698] ss:$24 sps:$4 sm:$0xff]  }
 0x294   : > { %4187 = vmatmul.mubr.bf16.vlgmr.msra.gmra.mxu0 %v8919_v44  ;;  %4340 = vmatmul.mubr.bf16.vlgmr.msra.gmra.mxu1 %v8528_v22  ;;  %11165 = vst [vmem:[#allocation98_spill] sm:$0xff] %v9223_v35  ;;  %v1560_v62 = vmul.f32 %v8608_v5, %v11169_v57  ;;  %v1573_v53 = vmul.f32 %v8659_v32, %v11170_v6  ;;  %v6186_v5 = vld [vmem:[#allocation10 + $0x36c] ss:$24 sps:$4 sm:$0xff]  }
 0x295   : > { %4461 = vmatpush1.bf16.msra.mxu0 %v6154_v14  ;;  %4614 = vmatpush1.bf16.msra.mxu1 %v6157_v4  ;;  %v6169_v14 = vld [vmem:[#allocation10 + $0x6f8] ss:$24 sps:$4 sm:$0xff]   ;;  %v1730_v4 = vmul.f32 %v8462_v41, %v1554_v19  ;;  %11166 = vst [vmem:[#allocation101_spill] sm:$0xff] %v9226_v31  ;;  %v1900_v19 = vadd.f32 %v8474_v17, %v1724_v7  ;;  %v6187_v7 = vld [vmem:[#allocation10 + $0x668] ss:$24 sps:$4 sm:$0xff]  }
 0x296   : > { %4196 = vmatprep.mubr.bf16.mxu0 %v9205_v20  ;;  %4349 = vmatprep.mubr.bf16.mxu1 %v8568_v56  ;;  %v1749_v25 = vmul.f32 %v8455_v61, %v1573_v53 }
 0x297   : > { %4462 = vmatprep.subr.bf16.mxu0 %v6162_v47  ;;  %4615 = vmatprep.subr.bf16.mxu1 %v6165_v52  ;;  %v1737_v47 = vmul.f32 %v8455_v61, %v1561_v63  ;;  %v1906_v52 = vadd.f32 %v8474_v17, %v1730_v4  ;;  %v1736_v4 = vmul.f32 %v8462_v41, %v1560_v62  ;;  %v11177_v62 = vld [vmem:[#allocation43_spill] sm:$0xff] }
 0x298   : > { %v1925_v57 = vadd.f32 %v8459_v46, %v1749_v25  ;;  %v11182_v25 = vld [vmem:[#allocation28_spill] sm:$0xff] }
 0x299   : > { %4463 = vmatpush1.bf16.msra.mxu0 %v6160_v58  ;;  %4616 = vmatpush1.bf16.msra.mxu1 %v6163_v13  ;;  %v11167_v58 = vld [vmem:[#allocation27_spill] sm:$0xff]  ;;  %v1913_v38 = vadd.f32 %v8459_v46, %v1737_v47 }
 0x29a   : > { %4464 = vmatprep.subr.bf16.mxu0 %v6168_v21  ;;  %4617 = vmatprep.subr.bf16.mxu1 %v6171_v23  ;;  %v1566_v13 = vmul.f32 %v8629_v43, %v11167_v58  ;;  %v6183_v21 = vld [vmem:[#allocation10 + $0x69c] ss:$24 sps:$4 sm:$0xff]   ;;  %v9247_v43 = vpack.c.bf16 %v1906_v52, %v1900_v19  ;;  %v11175_v58 = vld [vmem:[#allocation32_spill] sm:$0xff] }
 0x29b   : > { %v11168_v23 = vld [vmem:[#allocation37_spill] sm:$0xff]  ;;  %v9250_v63 = vpack.c.bf16 %v1919_v3, %v1913_v38  ;;  %v11173_v47 = vld [vmem:[#allocation39_spill] sm:$0xff]  ;;  %v11178_v38 = vld [vmem:[#allocation26_spill] sm:$0xff] }
 0x29c   : > { %4197 = vmatmul.mubr.bf16.gmra.mxu0 %v9223_v35  ;;  %4350 = vmatmul.mubr.bf16.gmra.mxu1 %v8577_v18  ;;  %v1579_v30 = vmul.f32 %v8680_v54, %v11168_v23  ;;  %11171 = vst [vmem:[#allocation97_spill] sm:$0xff] %v9247_v43  ;;  %v1742_v48 = vmul.f32 %v8462_v41, %v1566_v13  ;;  %v6192_v3 = vld [vmem:[#allocation10 + $0x33c] ss:$24 sps:$4 sm:$0xff]   ;;  %v2376_v23 = vld [vmem:[#allocation11] sm:$0x3f] }
 0x29d   : > { %4206 = vmatprep.mubr.bf16.mxu0 %v9226_v31  ;;  %4359 = vmatprep.mubr.bf16.mxu1 %v8617_v51  ;;  %11172 = vst [vmem:[#allocation100_spill] sm:$0xff] %v9250_v63  ;;  %v1578_v52 = vmul.f32 %v8680_v54, %v11173_v47  ;;  %v1585_v54 = vmul.f32 %v11178_v38, %v11177_v62  ;;  %v6207_v62 = vld [vmem:[#allocation10 + $0x8dc] ss:$24 sps:$4 sm:$0xff]  }
 0x29e   : > { %4465 = vmatpush1.bf16.msra.mxu0 %v6166_v55  ;;  %4618 = vmatpush1.bf16.msra.mxu1 %v6169_v14  ;;  %v1755_v55 = vmul.f32 %v8455_v61, %v1579_v30  ;;  %v6189_v14 = vld [vmem:[#allocation10 + $0x66c] ss:$24 sps:$4 sm:$0xff]  }
 0x29f   : > { %4466 = vmatprep.subr.bf16.mxu0 %v6174_v49  ;;  %4619 = vmatprep.subr.bf16.mxu1 %v6177_v24  ;;  %v1918_v49 = vadd.f32 %v8474_v17, %v1742_v48  ;;  %v6184_v24 = vld [vmem:[#allocation10 + $0x368] ss:$24 sps:$4 sm:$0xff]   ;;  %v11176_v30 = vld [vmem:[#allocation33_spill] sm:$0xff]  ;;  %v1754_v53 = vmul.f32 %v8462_v41, %v1578_v52  ;;  %v1761_v52 = vmul.f32 %v8455_v61, %v1585_v54 }
 0x2a0   : > { %v1572_v19 = vmul.f32 %v8659_v32, %v11176_v30 }
 0x2a2   : > { %4467 = vmatpush1.bf16.msra.mxu0 %v6172_v0  ;;  %4620 = vmatpush1.bf16.msra.mxu1 %v6175_v42  ;;  %v1931_v0 = vadd.f32 %v8459_v46, %v1755_v55  ;;  %v11174_v42 = vld [vmem:[#allocation49_spill] sm:$0xff]  ;;  %v11181_v55 = vld [vmem:[#allocation112_spill] sm:$0xff] }
 0x2a3   : > { %4468 = vmatprep.subr.bf16.mxu0 %v6180_v33  ;;  %4621 = vmatprep.subr.bf16.mxu1 %v6183_v21  ;;  %v1591_v13 = vmul.f32 %v11175_v58, %v11174_v42  ;;  %v6195_v33 = vld [vmem:[#allocation10 + $0x63c] ss:$24 sps:$4 sm:$0xff]   ;;  %v1912_v21 = vadd.f32 %v8474_v17, %v1736_v4  ;;  %v6201_v4 = vld [vmem:[#allocation10 + $0x60c] ss:$24 sps:$4 sm:$0xff]   ;;  %v1930_v42 = vadd.f32 %v8474_v17, %v1754_v53 }
 0x2a4   : > { %4207 = vmatmul.mubr.bf16.gmra.mxu0 %v9247_v43  ;;  %4360 = vmatmul.mubr.bf16.gmra.mxu1 %v8626_v59  ;;  %v9274_v48 = vpack.c.bf16 %v1931_v0, %v1925_v57  ;;  %v11186_v53 = vld [vmem:[#allocation45_spill] sm:$0xff] }
 0x2a5   : > { %4216 = vmatprep.mubr.bf16.mxu0 %v9250_v63  ;;  %4369 = vmatprep.mubr.bf16.mxu1 %v8668_v60  ;;  %v9271_v6 = vpack.c.bf16 %v1918_v49, %v1912_v21  ;;  %v1767_v32 = vmul.f32 %v8455_v61, %v1591_v13  ;;  %v1748_v49 = vmul.f32 %v8462_v41, %v1572_v19  ;;  %v11185_v13 = vld [vmem:[#allocation51_spill] sm:$0xff] }
 0x2a6   : > { %4469 = vmatpush1.bf16.msra.mxu0 %v6178_v12  ;;  %4622 = vmatpush1.bf16.msra.mxu1 %v6181_v1  ;;  %v6190_v12 = vld [vmem:[#allocation10 + $0x338] ss:$24 sps:$4 sm:$0xff]   ;;  %11180 = vst [vmem:[#allocation107_spill] sm:$0xff] %v9274_v48  ;;  %v6199_v21 = vld [vmem:[#allocation10 + $0x608] ss:$24 sps:$4 sm:$0xff]  }
 0x2a7   : > { %4470 = vmatprep.subr.bf16.mxu0 %v6186_v5  ;;  %4623 = vmatprep.subr.bf16.mxu1 %v6189_v14  ;;  %11179 = vst [vmem:[#allocation105_spill] sm:$0xff] %v9271_v6  ;;  %v6193_v1 = vld [vmem:[#allocation10 + $0x638] ss:$24 sps:$4 sm:$0xff]   ;;  %v9277_v5 = vrot.slane %v2376_v23, %v11181_v55  ;;  %v6198_v14 = vld [vmem:[#allocation10 + $0x30c] ss:$24 sps:$4 sm:$0xff]   ;;  %v1943_v57 = vadd.f32 %v8459_v46, %v1767_v32 }
 0x2a8   : > { %v1924_v54 = vadd.f32 %v8474_v17, %v1748_v49 }
 0x2aa   : > { %4471 = vmatpush1.bf16.msra.mxu0 %v6184_v24  ;;  %4624 = vmatpush1.bf16.msra.mxu1 %v6187_v7  ;;  %v11183_v24 = vld [vmem:[#allocation29_spill] sm:$0xff] }
 0x2ab   : > { %4472 = vmatprep.subr.bf16.mxu0 %v6192_v3  ;;  %4625 = vmatprep.subr.bf16.mxu1 %v6195_v33  ;;  %v11184_v7 = vld [vmem:[#allocation109_spill] sm:$0xff]  ;;  %v1590_v3 = vmul.f32 %v11175_v58, %v11185_v13  ;;  %v6196_v33 = vld [vmem:[#allocation10 + $0x308] ss:$24 sps:$4 sm:$0xff]   ;;  %v9301_v13 = vpack.c.bf16 %v1930_v42, %v1924_v54 }
 0x2ac   : > { %4217 = vmatmul.mubr.bf16.gmra.mxu0 %v9271_v6  ;;  %4370 = vmatmul.mubr.bf16.gmra.mxu1 %v11182_v25  ;;  %v9286_v47 = vrot.slane %v2376_v23, %v11184_v7  ;;  %v6204_v23 = vld [vmem:[#allocation10 + $0x5dc] ss:$24 sps:$4 sm:$0xff]   ;;  %v1937_v7 = vadd.f32 %v8459_v46, %v1761_v52  ;;  %v6213_v46 = vld [vmem:[#allocation10 + $0x8ac] ss:$24 sps:$4 sm:$0xff]   ;;  %v6211_v54 = vld [vmem:[#allocation10 + $0x8a8] ss:$24 sps:$4 sm:$0xff]  }
 0x2ad   : > { %4226 = vmatprep.mubr.bf16.mxu0 %v9274_v48  ;;  %4379 = vmatprep.mubr.bf16.mxu1 %v11183_v24  ;;  %11187 = vst [vmem:[#allocation103_spill] sm:$0xff] %v9301_v13  ;;  %v1766_v32 = vmul.f32 %v8462_v41, %v1590_v3  ;;  %v11189_v42 = vld [vmem:[#allocation36_spill] sm:$0xff] }
 0x2ae   : > { %v3882_v0 = vpop.f32.mrf.mxu0  ;;  %4473 = vmatpush1.bf16.msra.mxu0 %v6190_v12  ;;  %4626 = vmatpush1.bf16.msra.mxu1 %v6193_v1  ;;  %v1584_v12 = vmul.f32 %v11178_v38, %v11186_v53  ;;  %v11195_v25 = vld [vmem:[#allocation48_spill] sm:$0xff] }
 0x2af   : > { %v3883_v30 = vadd.f32 %v3882_v0, %v9277_v5  ;;  %v4035_v19 = vpop.f32.mrf.mxu1  ;;  %4474 = vmatprep.subr.bf16.mxu0 %v6198_v14  ;;  %4627 = vmatprep.subr.bf16.mxu1 %v6201_v4  ;;  %v6202_v14 = vld [vmem:[#allocation10 + $0x5d8] ss:$24 sps:$4 sm:$0xff]  }
 0x2b0   : > { %v3884_v61 = vpop.f32.mrf.mxu0  ;;  %v6205_v4 = vld [vmem:[#allocation10 + $0x8d8] ss:$24 sps:$4 sm:$0xff]   ;;  %v1760_v3 = vmul.f32 %v8462_v41, %v1584_v12 }
 0x2b1   : > { %v9297_v1 = vadd.f32 %v4035_v19, %v3883_v30  ;;  %v3885_v58 = vadd.f32 %v3884_v61, %v9286_v47  ;;  %v4037_v55 = vpop.f32.mrf.mxu1  ;;  %v9307_v19 = vpack.c.bf16 %v1943_v57, %v1937_v7  ;;  %v6210_v61 = vld [vmem:[#allocation10 + $0x5ac] ss:$24 sps:$4 sm:$0xff]  }
 0x2b2   : > { %v3886_v0 = vpop.f32.mrf.mxu0  ;;  %4475 = vmatpush1.bf16.msra.mxu0 %v6196_v33  ;;  %4628 = vmatpush1.bf16.msra.mxu1 %v6199_v21  ;;  %v11190_v57 = vld [vmem:[#allocation127_spill] sm:$0xff]  ;;  %v1936_v7 = vadd.f32 %v8474_v17, %v1760_v3 }
 0x2b3   : > { %v9304_v49 = vadd.f32 %v4037_v55, %v3885_v58  ;;  %v3887_v38 = vadd.f32 %v3886_v0, %v9277_v5  ;;  %v4039_v30 = vpop.f32.mrf.mxu1  ;;  %11188 = vst [vmem:[#allocation106_spill] sm:$0xff] %v9307_v19  ;;  %4476 = vmatprep.subr.bf16.mxu0 %v6204_v23  ;;  %4629 = vmatprep.subr.bf16.mxu1 %v6207_v62  ;;  %v6208_v62 = vld [vmem:[#allocation10 + $0x5a8] ss:$24 sps:$4 sm:$0xff]   ;;  %v6216_v58 = vld [vmem:[#allocation10 + $0x57c] ss:$24 sps:$4 sm:$0xff]  }
 0x2b4   : > { %v9309_v52 = vpop.f32.mrf.mxu0  ;;  %4227 = vmatmul.mubr.bf16.gmra.mxu0 %v9301_v13  ;;  %4380 = vmatmul.mubr.bf16.gmra.mxu1 %v11189_v42  ;;  %v1942_v23 = vadd.f32 %v8474_v17, %v1766_v32  ;;  %v6219_v55 = vld [vmem:[#allocation10 + $0x87c] ss:$24 sps:$4 sm:$0xff]  }
 0x2b5   : > { %v9314_v33 = vadd.f32 %v4039_v30, %v3887_v38  ;;  %v9316_v21 = vpop.f32.mrf.mxu1  ;;  %4236 = vmatprep.mubr.bf16.mxu0 %v9307_v19  ;;  %4389 = vmatprep.mubr.bf16.mxu1 %v11190_v57  ;;  %v6222_v57 = vld [vmem:[#allocation10 + $0x54c] ss:$24 sps:$4 sm:$0xff]  }
 0x2b6   : > { %4477 = vmatpush2.bf16.msra.mxu0 %v6202_v14  ;;  %4630 = vmatpush2.bf16.msra.mxu1 %v6205_v4  ;;  %v9326_v14 = vpack.c.bf16 %v1942_v23, %v1936_v7  ;;  %v6214_v4 = vld [vmem:[#allocation10 + $0x578] ss:$24 sps:$4 sm:$0xff]   ;;  %v6228_v7 = vld [vmem:[#allocation10 + $0x51c] ss:$24 sps:$4 sm:$0xff]  }
 0x2b7   : > { %4478 = vmatprep.subr.bf16.mxu0 %v6210_v61  ;;  %4631 = vmatprep.subr.bf16.mxu1 %v6213_v46  ;;  %v6217_v61 = vld [vmem:[#allocation10 + $0x878] ss:$24 sps:$4 sm:$0xff]  }
 0x2b8   : > { %v3892_v53 = vpop.f32.mrf.mxu0  ;;  %11191 = vst [vmem:[#allocation55_spill] sm:$0xff] %v9326_v14 }
 0x2b9   : > { %v3893_v41 = vadd.f32 %v3892_v53, %v9277_v5  ;;  %v4045_v12 = vpop.f32.mrf.mxu1  ;;  %v6225_v53 = vld [vmem:[#allocation10 + $0x84c] ss:$24 sps:$4 sm:$0xff]  }
 0x2ba   : > { %v3894_v0 = vpop.f32.mrf.mxu0  ;;  %4479 = vmatpush2.bf16.msra.mxu0 %v6208_v62  ;;  %4632 = vmatpush2.bf16.msra.mxu1 %v6211_v54  ;;  %v11193_v62 = vld [vmem:[#allocation41_spill] sm:$0xff] }
 0x2bb   : > { %v9323_v38 = vadd.f32 %v4045_v12, %v3893_v41  ;;  %v3895_v30 = vadd.f32 %v3894_v0, %v9286_v47  ;;  %v4047_v32 = vpop.f32.mrf.mxu1  ;;  %4480 = vmatprep.subr.bf16.mxu0 %v6216_v58  ;;  %4633 = vmatprep.subr.bf16.mxu1 %v6219_v55  ;;  %v11192_v41 = vld [vmem:[#allocation42_spill] sm:$0xff]  ;;  %v6220_v55 = vld [vmem:[#allocation10 + $0x548] ss:$24 sps:$4 sm:$0xff]  }
 0x2bc   : > { %v3896_v46 = vpop.f32.mrf.mxu0  ;;  %4237 = vmatmul.mubr.bf16.gmra.mxu0 %v9326_v14  ;;  %4390 = vmatmul.mubr.bf16.gmra.mxu1 %v11192_v41  ;;  %v6223_v12 = vld [vmem:[#allocation10 + $0x848] ss:$24 sps:$4 sm:$0xff]   ;;  %v6231_v0 = vld [vmem:[#allocation10 + $0x81c] ss:$24 sps:$4 sm:$0xff]  }
 0x2bd   : > { %v9328_v42 = vadd.f32 %v4047_v32, %v3895_v30  ;;  %v3897_v17 = vadd.f32 %v3896_v46, %v9277_v5  ;;  %v4049_v3 = vpop.f32.mrf.mxu1  ;;  %4246 = vmatprep.mubr.bf16.mxu0 %v9059_v34  ;;  %4399 = vmatprep.mubr.bf16.mxu1 %v11193_v62  ;;  %v6226_v62 = vld [vmem:[#allocation10 + $0x518] ss:$24 sps:$4 sm:$0xff]  }
 0x2be   : > { %v9333_v23 = vpop.f32.mrf.mxu0  ;;  %4481 = vmatpush2.bf16.msra.mxu0 %v6214_v4  ;;  %4634 = vmatpush2.bf16.msra.mxu1 %v6217_v61 }
 0x2bf   : > { %v9337_v54 = vadd.f32 %v4049_v3, %v3897_v17  ;;  %v9339_v58 = vpop.f32.mrf.mxu1  ;;  %4482 = vmatprep.subr.bf16.mxu0 %v6222_v57  ;;  %4635 = vmatprep.subr.bf16.mxu1 %v6225_v53  ;;  %v6229_v17 = vld [vmem:[#allocation10 + $0x818] ss:$24 sps:$4 sm:$0xff]   ;;  %v6234_v57 = vld [vmem:[#allocation10 + $0x4ec] ss:$24 sps:$4 sm:$0xff]  }
 0x2c0   : > { %v6237_v53 = vld [vmem:[#allocation10 + $0x7ec] ss:$24 sps:$4 sm:$0xff]  }
 0x2c1   : > { %v3902_v30 = vpop.f32.mrf.mxu0 }
 0x2c2   : > { %v3903_v32 = vadd.f32 %v3902_v30, %v9277_v5  ;;  %v4055_v46 = vpop.f32.mrf.mxu1  ;;  %4483 = vmatpush2.bf16.msra.mxu0 %v6220_v55  ;;  %4636 = vmatpush2.bf16.msra.mxu1 %v6223_v12 }
 0x2c3   : > { %v3904_v41 = vpop.f32.mrf.mxu0  ;;  %4484 = vmatprep.subr.bf16.mxu0 %v6228_v7  ;;  %4637 = vmatprep.subr.bf16.mxu1 %v6231_v0  ;;  %v6232_v7 = vld [vmem:[#allocation10 + $0x4e8] ss:$24 sps:$4 sm:$0xff]  }
 0x2c4   : > { %v9342_v3 = vadd.f32 %v4055_v46, %v3903_v32  ;;  %v3905_v4 = vadd.f32 %v3904_v41, %v9286_v47  ;;  %v4057_v61 = vpop.f32.mrf.mxu1  ;;  %4247 = vmatmul.mubr.bf16.gmra.mxu0 %v9064_v26  ;;  %4400 = vmatmul.mubr.bf16.gmra.mxu1 %v11195_v25  ;;  %v11197_v32 = vld [vmem:[#allocation47_spill] sm:$0xff] }
 0x2c5   : > { %v3906_v24 = vpop.f32.mrf.mxu0  ;;  %4256 = vmatprep.mubr.bf16.mxu0 %v9076_v8  ;;  %4409 = vmatprep.mubr.bf16.mxu1 %v11197_v32  ;;  %v6235_v0 = vld [vmem:[#allocation10 + $0x7e8] ss:$24 sps:$4 sm:$0xff]   ;;  %v6238_v32 = vld [vmem:[#allocation10 + $0x4b8] ss:$24 sps:$4 sm:$0xff]  }
 0x2c6   : > { %11194 = vst [vmem:[#allocation61_spill] sm:$0xff] %v9342_v3  ;;  %v9347_v30 = vadd.f32 %v4057_v61, %v3905_v4  ;;  %v3907_v55 = vadd.f32 %v3906_v24, %v9277_v5  ;;  %v4059_v12 = vpop.f32.mrf.mxu1  ;;  %4485 = vmatpush2.bf16.msra.mxu0 %v6226_v62  ;;  %4638 = vmatpush2.bf16.msra.mxu1 %v6229_v17  ;;  %v6240_v4 = vld [vmem:[#allocation10 + $0x4bc] ss:$24 sps:$4 sm:$0xff]   ;;  %v6241_v3 = vld [vmem:[#allocation10 + $0x7b8] ss:$24 sps:$4 sm:$0xff]  }
 0x2c7   : > { %v9352_v41 = vpop.f32.mrf.mxu0  ;;  %4486 = vmatprep.subr.bf16.mxu0 %v6234_v57  ;;  %4639 = vmatprep.subr.bf16.mxu1 %v6237_v53  ;;  %v6243_v61 = vld [vmem:[#allocation10 + $0x7bc] ss:$24 sps:$4 sm:$0xff]   ;;  %v6246_v17 = vld [vmem:[#allocation10 + $0x48c] ss:$24 sps:$4 sm:$0xff]  }
 0x2c8   : > { %11196 = vst [vmem:[#allocation57_spill] sm:$0xff] %v9347_v30  ;;  %v9354_v46 = vadd.f32 %v4059_v12, %v3907_v55  ;;  %v9356_v60 = vpop.f32.mrf.mxu1  ;;  %v6249_v55 = vld [vmem:[#allocation10 + $0x78c] ss:$24 sps:$4 sm:$0xff]  }
 0x2c9   : > { %11199 = vst [vmem:[#allocation69_spill] sm:$0xff] %v9356_v60 }
 0x2ca   : > { %11198 = vst [vmem:[#allocation63_spill] sm:$0xff] %v9354_v46  ;;  %4487 = vmatpush2.bf16.msra.mxu0 %v6232_v7  ;;  %4640 = vmatpush2.bf16.msra.mxu1 %v6235_v0  ;;  %v11201_v46 = vld [vmem:[#allocation54_spill] sm:$0xff] }
 0x2cb   : > { %v3912_v24 = vpop.f32.mrf.mxu0  ;;  %4488 = vmatprep.subr.bf16.mxu0 %v6240_v4  ;;  %4641 = vmatprep.subr.bf16.mxu1 %v6243_v61 }
 0x2cc   : > { %v3913_v25 = vadd.f32 %v3912_v24, %v9277_v5  ;;  %v4065_v30 = vpop.f32.mrf.mxu1  ;;  %4257 = vmatmul.mubr.bf16.gmra.mxu0 %v9082_v39  ;;  %4410 = vmatmul.mubr.bf16.gmra.mxu1 %v11201_v46  ;;  %v6255_v46 = vld [vmem:[#allocation10 + $0x464] ss:$24 sps:$4 sm:$0xff]  }
 0x2cd   : > { %v3914_v62 = vpop.f32.mrf.mxu0  ;;  %4266 = vmatprep.mubr.bf16.mxu0 %v9099_v16  ;;  %4419 = vmatprep.mubr.bf16.mxu1 %v8933_v40 }
 0x2ce   : > { %v9359_v12 = vadd.f32 %v4065_v30, %v3913_v25  ;;  %v3915_v57 = vadd.f32 %v3914_v62, %v9286_v47  ;;  %v4067_v53 = vpop.f32.mrf.mxu1  ;;  %4489 = vmatpush2.bf16.msra.mxu0 %v6238_v32  ;;  %4642 = vmatpush2.bf16.msra.mxu1 %v6241_v3  ;;  %v6244_v25 = vld [vmem:[#allocation10 + $0x488] ss:$24 sps:$4 sm:$0xff]   ;;  %v6252_v62 = vld [vmem:[#allocation10 + $0x164] ss:$24 sps:$4 sm:$0xff]  }
 0x2cf   : > { %v3916_v24 = vpop.f32.mrf.mxu0  ;;  %v6247_v30 = vld [vmem:[#allocation10 + $0x788] ss:$24 sps:$4 sm:$0xff]   ;;  %4490 = vmatprep.subr.bf16.mxu0 %v6246_v17  ;;  %4643 = vmatprep.subr.bf16.mxu1 %v6249_v55 }
 0x2d0   : > { %11200 = vst [vmem:[#allocation75_spill] sm:$0xff] %v9359_v12  ;;  %v9366_v7 = vadd.f32 %v4067_v53, %v3915_v57  ;;  %v3917_v0 = vadd.f32 %v3916_v24, %v9277_v5  ;;  %v4069_v4 = vpop.f32.mrf.mxu1 }
 0x2d1   : > { %v9369_v61 = vpop.f32.mrf.mxu0 }
 0x2d2   : > { %11202 = vst [vmem:[#allocation66_spill] sm:$0xff] %v9366_v7  ;;  %11203 = vst [vmem:[#allocation72_spill] sm:$0xff] %v9369_v61  ;;  %v9371_v12 = vadd.f32 %v4069_v4, %v3917_v0  ;;  %v9373_v60 = vpop.f32.mrf.mxu1  ;;  %4491 = vmatpush2.bf16.msra.mxu0 %v6244_v25  ;;  %4644 = vmatpush2.bf16.msra.mxu1 %v6247_v30  ;;  %v6270_v7 = vld [vmem:[#allocation10 + $0xd4] ss:$24 sps:$4 sm:$0xff]  }
 0x2d3   : > { %11205 = vst [vmem:[#allocation87_spill] sm:$0xff] %v9373_v60  ;;  %4766 = vmatprep.subr.bf16.mxu0 %v6252_v62  ;;  %4919 = vmatprep.subr.bf16.mxu1 %v6255_v46  ;;  %v11220_v60 = vld [vmem:[#allocation85_spill] sm:$0xff] }
 0x2d4   : > { %11204 = vst [vmem:[#allocation81_spill] sm:$0xff] %v9371_v12  ;;  %v3922_v40 = vpop.f32.mrf.mxu0  ;;  %4267 = vmatmul.mubr.bf16.gmra.mxu0 %v9104_v45  ;;  %4420 = vmatmul.mubr.bf16.gmra.mxu1 %v8937_v10  ;;  %v11212_v10 = vld [vmem:[#allocation64_spill] sm:$0xff] }
 0x2d5   : > { %v3923_v57 = vadd.f32 %v3922_v40, %v9277_v5  ;;  %v4075_v53 = vpop.f32.mrf.mxu1  ;;  %4276 = vmatprep.mubr.bf16.mxu0 %v9116_v2  ;;  %4429 = vmatprep.mubr.bf16.mxu1 %v8978_v28  ;;  %v6273_v61 = vld [vmem:[#allocation10 + $0x3d4] ss:$24 sps:$4 sm:$0xff]  }
 0x2d6   : > { %v3924_v3 = vpop.f32.mrf.mxu0 }
 0x2d7   : > { %v9378_v32 = vadd.f32 %v4075_v53, %v3923_v57  ;;  %v3925_v17 = vadd.f32 %v3924_v3, %v9286_v47  ;;  %v4077_v55 = vpop.f32.mrf.mxu1  ;;  %v11211_v3 = vld [vmem:[#allocation86_spill] sm:$0xff] }
 0x2d8   : > { %v3926_v24 = vpop.f32.mrf.mxu0 }
 0x2d9   : > { %11206 = vst [vmem:[#allocation78_spill] sm:$0xff] %v9378_v32  ;;  %v9383_v0 = vadd.f32 %v4077_v55, %v3925_v17  ;;  %v3927_v40 = vadd.f32 %v3926_v24, %v9277_v5  ;;  %v4079_v46 = vpop.f32.mrf.mxu1  ;;  %v11213_v17 = vld [vmem:[#allocation89_spill] sm:$0xff]  ;;  %v11214_v55 = vld [vmem:[#allocation71_spill] sm:$0xff] }
 0x2da   : > { %v9386_v4 = vpop.f32.mrf.mxu0 }
 0x2db   : > { %11207 = vst [vmem:[#allocation84_spill] sm:$0xff] %v9383_v0  ;;  %11208 = vst [vmem:[#allocation93_spill] sm:$0xff] %v9386_v4  ;;  %v9388_v25 = vadd.f32 %v4079_v46, %v3927_v40  ;;  %v9390_v30 = vpop.f32.mrf.mxu1 }
 0x2dc   : > { %11210 = vst [vmem:[#allocation90_spill] sm:$0xff] %v9390_v30  ;;  %4277 = vmatmul.mubr.bf16.gmra.mxu0 %v11211_v3  ;;  %4430 = vmatmul.mubr.bf16.gmra.mxu1 %v11212_v10 }
 0x2dd   : > { %11209 = vst [vmem:[#allocation99_spill] sm:$0xff] %v9388_v25  ;;  %4286 = vmatprep.mubr.bf16.mxu0 %v11213_v17  ;;  %4439 = vmatprep.mubr.bf16.mxu1 %v11214_v55 }
 0x2df   : > { %v3932_v62 = vpop.f32.mrf.mxu0 }
 0x2e0   : > { %v3933_v57 = vadd.f32 %v3932_v62, %v9277_v5  ;;  %v4085_v53 = vpop.f32.mrf.mxu1 }
 0x2e1   : > { %v3934_v28 = vpop.f32.mrf.mxu0 }
 0x2e2   : > { %v9397_v24 = vadd.f32 %v4085_v53, %v3933_v57  ;;  %v3935_v40 = vadd.f32 %v3934_v28, %v9286_v47  ;;  %v4087_v46 = vpop.f32.mrf.mxu1  ;;  %v11221_v57 = vld [vmem:[#allocation70_spill] sm:$0xff] }
 0x2e3   : > { %v3936_v25 = vpop.f32.mrf.mxu0 }
 0x2e4   : > { %11215 = vst [vmem:[#allocation96_spill] sm:$0xff] %v9397_v24  ;;  %v9400_v30 = vadd.f32 %v4087_v46, %v3935_v40  ;;  %v3937_v62 = vadd.f32 %v3936_v25, %v9277_v5  ;;  %v4089_v0 = vpop.f32.mrf.mxu1  ;;  %4287 = vmatmul.mubr.bf16.gmra.mxu0 %v11220_v60  ;;  %4440 = vmatmul.mubr.bf16.gmra.mxu1 %v11221_v57  ;;  %v6261_v24 = vld [vmem:[#allocation10 + $0x434] ss:$24 sps:$4 sm:$0xff]  }
 0x2e5   : > { %v9403_v32 = vpop.f32.mrf.mxu0  ;;  %4296 = vmatprep.mubr.bf16.mxu0 %v9181_v37  ;;  %4449 = vmatprep.mubr.bf16.mxu1 %v9167_v15 }
 0x2e6   : > { %11216 = vst [vmem:[#allocation102_spill] sm:$0xff] %v9400_v30  ;;  %11217 = vst [vmem:[#allocation108_spill] sm:$0xff] %v9403_v32  ;;  %v9405_v4 = vadd.f32 %v4089_v0, %v3937_v62  ;;  %v9407_v10 = vpop.f32.mrf.mxu1 }
 0x2e7   : > { %11219 = vst [vmem:[#allocation110_spill] sm:$0xff] %v9407_v10 }
 0x2e8   : > { %11218 = vst [vmem:[#allocation104_spill] sm:$0xff] %v9405_v4 }
 0x2e9   : > { %v3942_v12 = vpop.f32.mrf.mxu0 }
 0x2ea   : > { %v3943_v28 = vadd.f32 %v3942_v12, %v9277_v5  ;;  %v4095_v53 = vpop.f32.mrf.mxu1 }
 0x2eb   : > { %v3944_v25 = vpop.f32.mrf.mxu0 }
 0x2ec   : > { %v9414_v40 = vadd.f32 %v4095_v53, %v3943_v28  ;;  %v3945_v0 = vadd.f32 %v3944_v25, %v9286_v47  ;;  %v4097_v46 = vpop.f32.mrf.mxu1  ;;  %4297 = vmatmul.mubr.bf16.gmra.mxu0 %v9186_v50  ;;  %4450 = vmatmul.mubr.bf16.gmra.mxu1 %v9173_v11  ;;  %v11227_v53 = vld [vmem:[#allocation122_spill] sm:$0xff] }
 0x2ed   : > { %v3946_v62 = vpop.f32.mrf.mxu0  ;;  %4492 = vmatprep.mubr.bf16.mxu0 %v11227_v53  ;;  %4645 = vmatprep.mubr.bf16.mxu1 %v8657_v36  ;;  %v6258_v36 = vld [vmem:[#allocation10 + $0x134] ss:$24 sps:$4 sm:$0xff]  }
 0x2ee   : > { %11222 = vst [vmem:[#allocation116_spill] sm:$0xff] %v9414_v40  ;;  %v9417_v55 = vadd.f32 %v4097_v46, %v3945_v0  ;;  %v3947_v4 = vadd.f32 %v3946_v62, %v9277_v5  ;;  %v4099_v10 = vpop.f32.mrf.mxu1 }
 0x2ef   : > { %v9420_v57 = vpop.f32.mrf.mxu0 }
 0x2f0   : > { %11223 = vst [vmem:[#allocation121_spill] sm:$0xff] %v9417_v55  ;;  %11224 = vst [vmem:[#allocation115_spill] sm:$0xff] %v9420_v57  ;;  %v9422_v12 = vadd.f32 %v4099_v10, %v3947_v4  ;;  %v9424_v30 = vpop.f32.mrf.mxu1 }
 0x2f1   : > { %11226 = vst [vmem:[#allocation129_spill] sm:$0xff] %v9424_v30  ;;  %v6253_v30 = vld [vmem:[#allocation10 + $0x460] ss:$24 sps:$4 sm:$0xff]  }
 0x2f2   : > { %11225 = vst [vmem:[#allocation119_spill] sm:$0xff] %v9422_v12  ;;  %v6250_v12 = vld [vmem:[#allocation10 + $0x160] ss:$24 sps:$4 sm:$0xff]  }
 0x2f3   : > { %v3952_v28 = vpop.f32.mrf.mxu0 }
 0x2f4   : > { %v3953_v25 = vadd.f32 %v3952_v28, %v9277_v5  ;;  %v4105_v0 = vpop.f32.mrf.mxu1  ;;  %4646 = vmatmul.mubr.bf16.vlgmr.msra.gmra.mxu1 %v8919_v44  ;;  %v6262_v44 = vld [vmem:[#allocation10 + $0x100] ss:$24 sps:$4 sm:$0xff]  }
 0x2f5   : > { %v3954_v46 = vpop.f32.mrf.mxu0  ;;  %4920 = vmatpush1.bf16.msra.mxu1 %v6253_v30  ;;  %4655 = vmatprep.mubr.bf16.mxu1 %v9205_v20 }
 0x2f6   : > { %v9431_v62 = vadd.f32 %v4105_v0, %v3953_v25  ;;  %v3955_v10 = vadd.f32 %v3954_v46, %v9286_v47  ;;  %v4107_v4 = vpop.f32.mrf.mxu1  ;;  %v11233_v25 = vld [vmem:[#allocation124_spill] sm:$0xff]  ;;  %4921 = vmatprep.subr.bf16.mxu1 %v6261_v24  ;;  %v11237_v24 = vld [vmem:[#allocation123_spill] sm:$0xff] }
 0x2f7   : > { %v3956_v15 = vpop.f32.mrf.mxu0  ;;  %4493 = vmatmul.mubr.bf16.vlgmr.msra.gmra.mxu0 %v11233_v25  ;;  %v6256_v0 = vld [vmem:[#allocation10 + $0x130] ss:$24 sps:$4 sm:$0xff]  }
 0x2f8   : > { %11228 = vst [vmem:[#allocation131_spill] sm:$0xff] %v9431_v62  ;;  %v9434_v55 = vadd.f32 %v4107_v4, %v3955_v10  ;;  %v3957_v11 = vadd.f32 %v3956_v15, %v9277_v5  ;;  %v4109_v40 = vpop.f32.mrf.mxu1  ;;  %4767 = vmatpush1.bf16.msra.mxu0 %v6250_v12  ;;  %v6259_v46 = vld [vmem:[#allocation10 + $0x430] ss:$24 sps:$4 sm:$0xff]   ;;  %v11234_v10 = vld [vmem:[#allocation126_spill] sm:$0xff] }
 0x2f9   : > { %v9437_v57 = vpop.f32.mrf.mxu0  ;;  %4502 = vmatprep.mubr.bf16.mxu0 %v11234_v10  ;;  %v6264_v15 = vld [vmem:[#allocation10 + $0x104] ss:$24 sps:$4 sm:$0xff]   ;;  %4768 = vmatprep.subr.bf16.mxu0 %v6258_v36 }
 0x2fa   : > { %11229 = vst [vmem:[#allocation120_spill] sm:$0xff] %v9434_v55  ;;  %11230 = vst [vmem:[#allocation117_spill] sm:$0xff] %v9437_v57  ;;  %v9439_v28 = vadd.f32 %v4109_v40, %v3957_v11  ;;  %v9441_v32 = vpop.f32.mrf.mxu1  ;;  %v6267_v4 = vld [vmem:[#allocation10 + $0x404] ss:$24 sps:$4 sm:$0xff]   ;;  %4922 = vmatpush1.bf16.msra.mxu1 %v6259_v46  ;;  %v11240_v46 = vld [vmem:[#allocation125_spill] sm:$0xff] }
 0x2fb   : > { %11232 = vst [vmem:[#allocation138_spill] sm:$0xff] %v9441_v32  ;;  %v6265_v32 = vld [vmem:[#allocation10 + $0x400] ss:$24 sps:$4 sm:$0xff]   ;;  %4923 = vmatprep.subr.bf16.mxu1 %v6267_v4  ;;  %v6271_v4 = vld [vmem:[#allocation10 + $0x3d0] ss:$24 sps:$4 sm:$0xff]  }
 0x2fc   : > { %11231 = vst [vmem:[#allocation118_spill] sm:$0xff] %v9439_v28  ;;  %4769 = vmatpush1.bf16.msra.mxu0 %v6256_v0  ;;  %4656 = vmatmul.mubr.bf16.gmra.mxu1 %v9223_v35 }
 0x2fd   : > { %4770 = vmatprep.subr.bf16.mxu0 %v6264_v15  ;;  %4665 = vmatprep.mubr.bf16.mxu1 %v9226_v31 }
 0x2fe   : > { %v3962_v55 = vpop.f32.mrf.mxu0  ;;  %v4115_v62 = vpop.f32.mrf.mxu1  ;;  %4924 = vmatpush1.bf16.msra.mxu1 %v6265_v32  ;;  %v6277_v32 = vld [vmem:[#allocation10 + $0x3a0] ss:$24 sps:$4 sm:$0xff]  }
 0x2ff   : > { %v3963_v11 = vadd.f32 %v3962_v55, %v9277_v5  ;;  %4503 = vmatmul.mubr.bf16.gmra.mxu0 %v11237_v24  ;;  %4925 = vmatprep.subr.bf16.mxu1 %v6273_v61  ;;  %v6285_v61 = vld [vmem:[#allocation10 + $0x374] ss:$24 sps:$4 sm:$0xff]  }
 0x300   : > { %v3964_v40 = vpop.f32.mrf.mxu0  ;;  %v4117_v28 = vpop.f32.mrf.mxu1  ;;  %4512 = vmatprep.mubr.bf16.mxu0 %v11240_v46  ;;  %4771 = vmatpush1.bf16.msra.mxu0 %v6262_v44  ;;  %v6274_v44 = vld [vmem:[#allocation10 + $0xa0] ss:$24 sps:$4 sm:$0xff]  }
 0x301   : > { %v9448_v12 = vadd.f32 %v4115_v62, %v3963_v11  ;;  %v3965_v30 = vadd.f32 %v3964_v40, %v9286_v47  ;;  %4772 = vmatprep.subr.bf16.mxu0 %v6270_v7  ;;  %v6279_v40 = vld [vmem:[#allocation10 + $0x3a4] ss:$24 sps:$4 sm:$0xff]   ;;  %v6282_v7 = vld [vmem:[#allocation10 + $0x74] ss:$24 sps:$4 sm:$0xff]  }
 0x302   : > { %v3966_v20 = vpop.f32.mrf.mxu0  ;;  %v4119_v57 = vpop.f32.mrf.mxu1  ;;  %4926 = vmatpush1.bf16.msra.mxu1 %v6271_v4 }
 0x303   : > { %11235 = vst [vmem:[#allocation137_spill] sm:$0xff] %v9448_v12  ;;  %v9451_v36 = vadd.f32 %v4117_v28, %v3965_v30  ;;  %v3967_v55 = vadd.f32 %v3966_v20, %v9277_v5  ;;  %v6268_v28 = vld [vmem:[#allocation10 + $0xd0] ss:$24 sps:$4 sm:$0xff]   ;;  %v6276_v20 = vld [vmem:[#allocation10 + $0xa4] ss:$24 sps:$4 sm:$0xff]   ;;  %4927 = vmatprep.subr.bf16.mxu1 %v6279_v40 }
 0x304   : > { %v9456_v62 = vpop.f32.mrf.mxu0  ;;  %v9458_v0 = vpop.f32.mrf.mxu1  ;;  %4773 = vmatpush1.bf16.msra.mxu0 %v6268_v28  ;;  %4666 = vmatmul.mubr.bf16.gmra.mxu1 %v9247_v43  ;;  %v6291_v40 = vld [vmem:[#allocation10 + $0x344] ss:$24 sps:$4 sm:$0xff]  }
 0x305   : > { %11236 = vst [vmem:[#allocation130_spill] sm:$0xff] %v9451_v36  ;;  %11238 = vst [vmem:[#allocation135_spill] sm:$0xff] %v9456_v62  ;;  %v9462_v15 = vadd.f32 %v4119_v57, %v3967_v55  ;;  %4774 = vmatprep.subr.bf16.mxu0 %v6276_v20  ;;  %v11244_v62 = vld [vmem:[#allocation139_spill] sm:$0xff]  ;;  %4675 = vmatprep.mubr.bf16.mxu1 %v9250_v63 }
 0x306   : > { %11239 = vst [vmem:[#allocation128_spill] sm:$0xff] %v9458_v0  ;;  %v3972_v11 = vpop.f32.mrf.mxu0  ;;  %4928 = vmatpush1.bf16.msra.mxu1 %v6277_v32  ;;  %v6288_v20 = vld [vmem:[#allocation10 + $0x44] ss:$24 sps:$4 sm:$0xff]   ;;  %v6294_v32 = vld [vmem:[#allocation10 + $0x14] ss:$24 sps:$4 sm:$0xff]  }
 0x307   : > { %11241 = vst [vmem:[#allocation133_spill] sm:$0xff] %v9462_v15  ;;  %v3973_v30 = vadd.f32 %v3972_v11, %v9277_v5  ;;  %v4125_v35 = vpop.f32.mrf.mxu1  ;;  %4513 = vmatmul.mubr.bf16.gmra.mxu0 %v11244_v62  ;;  %4929 = vmatprep.subr.bf16.mxu1 %v6285_v61 }
 0x308   : > { %v3974_v36 = vpop.f32.mrf.mxu0  ;;  %4775 = vmatpush1.bf16.msra.mxu0 %v6274_v44 }
 0x309   : > { %v9465_v0 = vadd.f32 %v4125_v35, %v3973_v30  ;;  %v3975_v12 = vadd.f32 %v3974_v36, %v9286_v47  ;;  %v4127_v31 = vpop.f32.mrf.mxu1  ;;  %v11245_v36 = vld [vmem:[#allocation23_spill] sm:$0xff]  ;;  %4776 = vmatprep.subr.bf16.mxu0 %v6282_v7  ;;  %v6297_v7 = vld [vmem:[#allocation10 + $0x314] ss:$24 sps:$4 sm:$0xff]  }
 0x30a   : > { %v3976_v57 = vpop.f32.mrf.mxu0  ;;  %4522 = vmatprep.mubr.bf16.mxu0 %v11245_v36 }
 0x30b   : > { %11242 = vst [vmem:[#allocation134_spill] sm:$0xff] %v9465_v0  ;;  %v9468_v55 = vadd.f32 %v4127_v31, %v3975_v12  ;;  %v3977_v11 = vadd.f32 %v3976_v57, %v9277_v5  ;;  %v4129_v15 = vpop.f32.mrf.mxu1  ;;  %v6280_v31 = vld [vmem:[#allocation10 + $0x70] ss:$24 sps:$4 sm:$0xff]  }
 0x30c   : > { %v9473_v35 = vpop.f32.mrf.mxu0  ;;  %v6283_v12 = vld [vmem:[#allocation10 + $0x370] ss:$24 sps:$4 sm:$0xff]   ;;  %4777 = vmatpush1.bf16.msra.mxu0 %v6280_v31  ;;  %4676 = vmatmul.mubr.bf16.gmra.mxu1 %v9271_v6  ;;  %v6309_v6 = vld [vmem:[#allocation10 + $0x5b4] ss:$24 sps:$4 sm:$0xff]  }
 0x30d   : > { %11243 = vst [vmem:[#allocation25_spill] sm:$0xff] %v9468_v55  ;;  %v9477_v28 = vadd.f32 %v4129_v15, %v3977_v11  ;;  %v9479_v4 = vpop.f32.mrf.mxu1  ;;  %4930 = vmatpush1.bf16.msra.mxu1 %v6283_v12  ;;  %v6286_v15 = vld [vmem:[#allocation10 + $0x40] ss:$24 sps:$4 sm:$0xff]   ;;  %4778 = vmatprep.subr.bf16.mxu0 %v6288_v20  ;;  %v6295_v20 = vld [vmem:[#allocation10 + $0x310] ss:$24 sps:$4 sm:$0xff]  }
 0x30e   : > { %v6289_v11 = vld [vmem:[#allocation10 + $0x340] ss:$24 sps:$4 sm:$0xff]   ;;  %4931 = vmatprep.subr.bf16.mxu1 %v6291_v40  ;;  %4685 = vmatprep.mubr.bf16.mxu1 %v9274_v48 }
 0x30f   : > { %11246 = vst [vmem:[#allocation132_spill] sm:$0xff] %v9477_v28  ;;  %v11248_v28 = vld [vmem:[#allocation30_spill] sm:$0xff]  ;;  %v11250_v48 = vld [vmem:[#allocation35_spill] sm:$0xff] }
 0x310   : > { %v3982_v30 = vpop.f32.mrf.mxu0  ;;  %v4135_v57 = vpop.f32.mrf.mxu1  ;;  %4523 = vmatmul.mubr.bf16.gmra.mxu0 %v11248_v28  ;;  %v11249_v12 = vld [vmem:[#allocation34_spill] sm:$0xff] }
 0x311   : > { %v3983_v43 = vadd.f32 %v3982_v30, %v9277_v5  ;;  %4532 = vmatprep.mubr.bf16.mxu0 %v11249_v12  ;;  %4779 = vmatpush1.bf16.msra.mxu0 %v6286_v15  ;;  %v11251_v15 = vld [vmem:[#allocation40_spill] sm:$0xff] }
 0x312   : > { %v3984_v55 = vpop.f32.mrf.mxu0  ;;  %v4137_v0 = vpop.f32.mrf.mxu1  ;;  %4932 = vmatpush1.bf16.msra.mxu1 %v6289_v11  ;;  %4780 = vmatprep.subr.bf16.mxu0 %v6294_v32  ;;  %v6304_v11 = vld [vmem:[#allocation10 + $0x2b0] ss:$24 sps:$4 sm:$0xff]  }
 0x313   : > { %v9482_v63 = vadd.f32 %v4135_v57, %v3983_v43  ;;  %v3985_v44 = vadd.f32 %v3984_v55, %v9286_v47  ;;  %v6292_v55 = vld [vmem:[#allocation10 + $0x10] ss:$24 sps:$4 sm:$0xff]   ;;  %4933 = vmatprep.subr.bf16.mxu1 %v6297_v7  ;;  %v6300_v57 = vld [vmem:[#allocation10 + $0x2e4] ss:$24 sps:$4 sm:$0xff]  }
 0x314   : > { %v3986_v61 = vpop.f32.mrf.mxu0  ;;  %v4139_v43 = vpop.f32.mrf.mxu1  ;;  %4686 = vmatmul.mubr.bf16.gmra.mxu1 %v9301_v13  ;;  %v6307_v32 = vld [vmem:[#allocation10 + $0x5b0] ss:$24 sps:$4 sm:$0xff]   ;;  %v6312_v7 = vld [vmem:[#allocation10 + $0x284] ss:$24 sps:$4 sm:$0xff]   ;;  %v6345_v13 = vld [vmem:[#allocation10 + $0x494] ss:$24 sps:$4 sm:$0xff]  }
 0x315   : > { %11247 = vst [vmem:[#allocation21_spill] sm:$0xff] %v9482_v63  ;;  %v9487_v30 = vadd.f32 %v4137_v0, %v3985_v44  ;;  %v3987_v31 = vadd.f32 %v3986_v61, %v9277_v5  ;;  %v6303_v63 = vld [vmem:[#allocation10 + $0x5e4] ss:$24 sps:$4 sm:$0xff]   ;;  %4781 = vmatpush1.bf16.msra.mxu0 %v6292_v55  ;;  %v6298_v0 = vld [vmem:[#allocation10 + $0x2e0] ss:$24 sps:$4 sm:$0xff]   ;;  %4695 = vmatprep.mubr.bf16.mxu1 %v9307_v19 }
 0x316   : > { %4934 = vmatpush1.bf16.msra.mxu1 %v6295_v20  ;;  %v6301_v44 = vld [vmem:[#allocation10 + $0x5e0] ss:$24 sps:$4 sm:$0xff]   ;;  %4782 = vmatprep.subr.bf16.mxu0 %v6300_v57  ;;  %v6306_v61 = vld [vmem:[#allocation10 + $0x2b4] ss:$24 sps:$4 sm:$0xff]  }
 0x317   : > { %v9492_v40 = vadd.f32 %v4139_v43, %v3987_v31  ;;  %4935 = vmatprep.subr.bf16.mxu1 %v6303_v63  ;;  %v6315_v31 = vld [vmem:[#allocation10 + $0x584] ss:$24 sps:$4 sm:$0xff]   ;;  %v6310_v63 = vld [vmem:[#allocation10 + $0x280] ss:$24 sps:$4 sm:$0xff]   ;;  %v6318_v55 = vld [vmem:[#allocation10 + $0x254] ss:$24 sps:$4 sm:$0xff]  }
 0x318   : > { %4533 = vmatmul.mubr.bf16.gmra.mxu0 %v11250_v48  ;;  %v6313_v43 = vld [vmem:[#allocation10 + $0x580] ss:$24 sps:$4 sm:$0xff]   ;;  %v6321_v20 = vld [vmem:[#allocation10 + $0x554] ss:$24 sps:$4 sm:$0xff]  }
 0x319   : > { %4542 = vmatprep.mubr.bf16.mxu0 %v11251_v15  ;;  %4783 = vmatpush2.bf16.msra.mxu0 %v6298_v0  ;;  %v11252_v57 = vld [vmem:[#allocation38_spill] sm:$0xff]  ;;  %v11254_v19 = vld [vmem:[#allocation44_spill] sm:$0xff] }
 0x31a   : > { %4936 = vmatpush2.bf16.msra.mxu1 %v6301_v44  ;;  %4784 = vmatprep.subr.bf16.mxu0 %v6306_v61  ;;  %v11253_v0 = vld [vmem:[#allocation46_spill] sm:$0xff]  ;;  %v6319_v44 = vld [vmem:[#allocation10 + $0x550] ss:$24 sps:$4 sm:$0xff]  }
 0x31b   : > { %4937 = vmatprep.subr.bf16.mxu1 %v6309_v6  ;;  %v6316_v6 = vld [vmem:[#allocation10 + $0x250] ss:$24 sps:$4 sm:$0xff]   ;;  %v6324_v61 = vld [vmem:[#allocation10 + $0x224] ss:$24 sps:$4 sm:$0xff]  }
 0x31c   : > { %4696 = vmatmul.mubr.bf16.gmra.mxu1 %v9326_v14  ;;  %v6333_v14 = vld [vmem:[#allocation10 + $0x4f4] ss:$24 sps:$4 sm:$0xff]  }
 0x31d   : > { %4785 = vmatpush2.bf16.msra.mxu0 %v6304_v11  ;;  %4705 = vmatprep.mubr.bf16.mxu1 %v9059_v34  ;;  %v6327_v11 = vld [vmem:[#allocation10 + $0x524] ss:$24 sps:$4 sm:$0xff]  }
 0x31e   : > { %4938 = vmatpush2.bf16.msra.mxu1 %v6307_v32  ;;  %4786 = vmatprep.subr.bf16.mxu0 %v6312_v7  ;;  %v6322_v32 = vld [vmem:[#allocation10 + $0x220] ss:$24 sps:$4 sm:$0xff]  }
 0x31f   : > { %4939 = vmatprep.subr.bf16.mxu1 %v6315_v31  ;;  %v6325_v7 = vld [vmem:[#allocation10 + $0x520] ss:$24 sps:$4 sm:$0xff]   ;;  %v6330_v31 = vld [vmem:[#allocation10 + $0x1f4] ss:$24 sps:$4 sm:$0xff]  }
 0x320   : > { %4543 = vmatmul.mubr.bf16.gmra.mxu0 %v11252_v57 }
 0x321   : > { %4552 = vmatprep.mubr.bf16.mxu0 %v11253_v0  ;;  %4787 = vmatpush2.bf16.msra.mxu0 %v6310_v63  ;;  %v11255_v63 = vld [vmem:[#allocation52_spill] sm:$0xff] }
 0x322   : > { %4940 = vmatpush2.bf16.msra.mxu1 %v6313_v43  ;;  %4788 = vmatprep.subr.bf16.mxu0 %v6318_v55  ;;  %v6328_v43 = vld [vmem:[#allocation10 + $0x1f0] ss:$24 sps:$4 sm:$0xff]  }
 0x323   : > { %4941 = vmatprep.subr.bf16.mxu1 %v6321_v20  ;;  %v6331_v55 = vld [vmem:[#allocation10 + $0x4f0] ss:$24 sps:$4 sm:$0xff]   ;;  %v6336_v20 = vld [vmem:[#allocation10 + $0x1c4] ss:$24 sps:$4 sm:$0xff]  }
 0x324   : > { %4706 = vmatmul.mubr.bf16.gmra.mxu1 %v9064_v26  ;;  %v11256_v26 = vld [vmem:[#allocation50_spill] sm:$0xff] }
 0x325   : > { %4789 = vmatpush2.bf16.msra.mxu0 %v6316_v6  ;;  %4715 = vmatprep.mubr.bf16.mxu1 %v9076_v8  ;;  %v6339_v6 = vld [vmem:[#allocation10 + $0x4c4] ss:$24 sps:$4 sm:$0xff]  }
 0x326   : > { %4942 = vmatpush2.bf16.msra.mxu1 %v6319_v44  ;;  %4790 = vmatprep.subr.bf16.mxu0 %v6324_v61  ;;  %v6334_v44 = vld [vmem:[#allocation10 + $0x1c0] ss:$24 sps:$4 sm:$0xff]  }
 0x327   : > { %4943 = vmatprep.subr.bf16.mxu1 %v6327_v11  ;;  %v6337_v61 = vld [vmem:[#allocation10 + $0x4c0] ss:$24 sps:$4 sm:$0xff]   ;;  %v6342_v11 = vld [vmem:[#allocation10 + $0x194] ss:$24 sps:$4 sm:$0xff]  }
 0x328   : > { %4553 = vmatmul.mubr.bf16.gmra.mxu0 %v11254_v19 }
 0x329   : > { %4562 = vmatprep.mubr.bf16.mxu0 %v11255_v63  ;;  %4791 = vmatpush2.bf16.msra.mxu0 %v6322_v32  ;;  %v11257_v32 = vld [vmem:[#allocation60_spill] sm:$0xff] }
 0x32a   : > { %4944 = vmatpush2.bf16.msra.mxu1 %v6325_v7  ;;  %4792 = vmatprep.subr.bf16.mxu0 %v6330_v31  ;;  %v6343_v7 = vld [vmem:[#allocation10 + $0x490] ss:$24 sps:$4 sm:$0xff]   ;;  %v6348_v31 = vld [vmem:[#allocation10 + $0x764] ss:$24 sps:$4 sm:$0xff]  }
 0x32b   : > { %4945 = vmatprep.subr.bf16.mxu1 %v6333_v14  ;;  %v6340_v14 = vld [vmem:[#allocation10 + $0x190] ss:$24 sps:$4 sm:$0xff]  }
 0x32c   : > { %4716 = vmatmul.mubr.bf16.gmra.mxu1 %v9082_v39  ;;  %v6346_v39 = vld [vmem:[#allocation10 + $0x760] ss:$24 sps:$4 sm:$0xff]  }
 0x32d   : > { %4793 = vmatpush2.bf16.msra.mxu0 %v6328_v43  ;;  %4725 = vmatprep.mubr.bf16.mxu1 %v9099_v16  ;;  %v11258_v43 = vld [vmem:[#allocation59_spill] sm:$0xff] }
 0x32e   : > { %4946 = vmatpush2.bf16.msra.mxu1 %v6331_v55  ;;  %4794 = vmatprep.subr.bf16.mxu0 %v6336_v20  ;;  %v11259_v55 = vld [vmem:[#allocation62_spill] sm:$0xff]  ;;  %v11260_v20 = vld [vmem:[#allocation68_spill] sm:$0xff] }
 0x32f   : > { %4947 = vmatprep.subr.bf16.mxu1 %v6339_v6  ;;  %v11261_v6 = vld [vmem:[#allocation67_spill] sm:$0xff] }
 0x330   : > { %4563 = vmatmul.mubr.bf16.gmra.mxu0 %v11256_v26 }
 0x331   : > { %4572 = vmatprep.mubr.bf16.mxu0 %v11257_v32  ;;  %4795 = vmatpush2.bf16.msra.mxu0 %v6334_v44  ;;  %v9522_v44 = vpop.f32.mrf.mxu0 }
 0x332   : > { %4948 = vmatpush2.bf16.msra.mxu1 %v6337_v61  ;;  %4796 = vmatprep.subr.bf16.mxu0 %v6342_v11  ;;  %v9524_v61 = vpop.f32.mrf.mxu1 }
 0x333   : > { %4949 = vmatprep.subr.bf16.mxu1 %v6345_v13  ;;  %v11262_v13 = vld [vmem:[#allocation74_spill] sm:$0xff] }
 0x334   : > { %4726 = vmatmul.mubr.bf16.gmra.mxu1 %v9104_v45 }
 0x335   : > { %4797 = vmatpush2.bf16.msra.mxu0 %v6340_v14  ;;  %4735 = vmatprep.mubr.bf16.mxu1 %v9116_v2 }
 0x336   : > { %4950 = vmatpush2.bf16.msra.mxu1 %v6343_v7  ;;  %5072 = vmatprep.subr.bf16.mxu0 %v6348_v31 }
 0x337   : > { %5823 = vmatprep.subr.bf16.mxu1 %v6348_v31 }
 0x338   : > { %4573 = vmatmul.mubr.bf16.gmra.mxu0 %v11258_v43 }
 0x339   : > { %4582 = vmatprep.mubr.bf16.mxu0 %v11259_v55 }
 0x33c   : > { %4736 = vmatmul.mubr.bf16.gmra.mxu1 %v11211_v3 }
 0x33d   : > { %4745 = vmatprep.mubr.bf16.mxu1 %v11213_v17 }
 0x340   : > { %4583 = vmatmul.mubr.bf16.gmra.mxu0 %v11260_v20 }
 0x341   : > { %4592 = vmatprep.mubr.bf16.mxu0 %v11261_v6 }
 0x344   : > { %4746 = vmatmul.mubr.bf16.gmra.mxu1 %v11220_v60 }
 0x345   : > { %4755 = vmatprep.mubr.bf16.mxu1 %v9181_v37 }
 0x348   : > { %4593 = vmatmul.mubr.bf16.gmra.mxu0 %v11262_v13 }
 0x349   : > { %4602 = vmatprep.mubr.bf16.mxu0 %v9169_v27 }
 0x34c   : > { %v3992_v11 = vpop.f32.mrf.mxu0  ;;  %v4145_v14 = vpop.f32.mrf.mxu1  ;;  %4756 = vmatmul.mubr.bf16.gmra.mxu1 %v9186_v50 }
 0x34d   : > { %v3993_v7 = vadd.f32 %v3992_v11, %v9277_v5  ;;  %4951 = vmatprep.mubr.bf16.mxu1 %v11227_v53  ;;  %v6351_v53 = vld [vmem:[#allocation10 + $0x734] ss:$24 sps:$4 sm:$0xff]  }
 0x34e   : > { %v3994_v31 = vpop.f32.mrf.mxu0  ;;  %v4147_v60 = vpop.f32.mrf.mxu1 }
 0x34f   : > { %v9531_v17 = vadd.f32 %v4145_v14, %v3993_v7  ;;  %v3995_v37 = vadd.f32 %v3994_v31, %v9286_v47 }
 0x350   : > { %4603 = vmatmul.mubr.bf16.gmra.mxu0 %v9175_v9  ;;  %v3996_v3 = vpop.f32.mrf.mxu0  ;;  %v4149_v2 = vpop.f32.mrf.mxu1 }
 0x351   : > { %4798 = vmatprep.mubr.bf16.mxu0 %v8519_v29  ;;  %v9534_v45 = vadd.f32 %v4147_v60, %v3995_v37  ;;  %v3997_v16 = vadd.f32 %v3996_v3, %v9277_v5  ;;  %v3889_v60 = vadd.f32 %v9309_v52, %v9286_v47 }
 0x352   : > { %v3998_v50 = vpop.f32.mrf.mxu0  ;;  %v4151_v8 = vpop.f32.mrf.mxu1 }
 0x353   : > { %v9537_v11 = vadd.f32 %v4149_v2, %v3997_v16  ;;  %v3999_v29 = vadd.f32 %v3998_v50, %v9286_v47  ;;  %v6349_v16 = vld [vmem:[#allocation10 + $0x730] ss:$24 sps:$4 sm:$0xff]  }
 0x354   : > { %v4188_v34 = vpop.f32.mrf.mxu0  ;;  %v9540_v14 = vpop.f32.mrf.mxu1  ;;  %4952 = vmatmul.mubr.bf16.vlgmr.msra.gmra.mxu1 %v11233_v25  ;;  %v6352_v25 = vld [vmem:[#allocation10 + $0x700] ss:$24 sps:$4 sm:$0xff]  }
 0x355   : > { %v9546_v37 = vadd.f32 %v4151_v8, %v3999_v29  ;;  %v4189_v5 = vadd.f32 %v4188_v34, %v9297_v1  ;;  %5839 = vmatpush1.bf16.msra.mxu1 %v6346_v39  ;;  %4961 = vmatprep.mubr.bf16.mxu1 %v11234_v10  ;;  %v6357_v10 = vld [vmem:[#allocation10 + $0x6d4] ss:$24 sps:$4 sm:$0xff]  }
 0x356   : > { %v4190_v2 = vpop.f32.mrf.mxu0  ;;  %v9551_v50 = vpop.f32.mrf.mxu1  ;;  %5824 = vmatprep.subr.bf16.mxu1 %v6351_v53 }
 0x357   : > { %5225 = vst [vmem:[%s9554_s27] sm:$0xff] %v4189_v5  ;;  %v4191_v8 = vadd.f32 %v4190_v2, %v9304_v49  ;;  %v6358_v2 = vld [vmem:[#allocation10 + $0x6a0] ss:$24 sps:$4 sm:$0xff]  }
 0x358   : > { %4799 = vmatmul.mubr.bf16.vlgmr.msra.gmra.mxu0 %v8528_v22  ;;  %v6354_v22 = vld [vmem:[#allocation10 + $0x704] ss:$24 sps:$4 sm:$0xff]   ;;  %v4192_v34 = vpop.f32.mrf.mxu0 }
 0x359   : > { %5073 = vmatpush1.bf16.msra.mxu0 %v6346_v39  ;;  %4808 = vmatprep.mubr.bf16.mxu0 %v8568_v56  ;;  %v9558_v39 = vpop.f32.mrf.mxu1  ;;  %v4042_v56 = vadd.f32 %v9316_v21, %v3889_v60  ;;  %5226 = vst [vmem:[%s9554_s27 + $0x8] sm:$0xff] %v4191_v8  ;;  %v4193_v1 = vadd.f32 %v4192_v34, %v9314_v33  ;;  %v6355_v60 = vld [vmem:[#allocation10 + $0x6d0] ss:$24 sps:$4 sm:$0xff]  }
 0x35a   : > { %5074 = vmatprep.subr.bf16.mxu0 %v6351_v53  ;;  %5840 = vmatpush1.bf16.msra.mxu1 %v6349_v16  ;;  %v4194_v52 = vpop.f32.mrf.mxu0  ;;  %v3899_v33 = vadd.f32 %v9333_v23, %v9286_v47  ;;  %v6360_v23 = vld [vmem:[#allocation10 + $0x6a4] ss:$24 sps:$4 sm:$0xff]  }
 0x35b   : > { %v9563_v3 = vpop.f32.mrf.mxu1  ;;  %5825 = vmatprep.subr.bf16.mxu1 %v6354_v22  ;;  %5231 = vst [vmem:[%s9554_s27 + $0x30] sm:$0xff] %v4193_v1  ;;  %v4195_v49 = vadd.f32 %v4194_v52, %v4042_v56  ;;  %v11264_v1 = vld [vmem:[#allocation22_spill] sm:$0xff] }
 0x35c   : > { %v4198_v7 = vpop.f32.mrf.mxu0  ;;  %4962 = vmatmul.mubr.bf16.gmra.mxu1 %v11237_v24 }
 0x35d   : > { %5075 = vmatpush1.bf16.msra.mxu0 %v6349_v16  ;;  %v9566_v31 = vpop.f32.mrf.mxu1  ;;  %5232 = vst [vmem:[%s9554_s27 + $0x38] sm:$0xff] %v4195_v49  ;;  %v4199_v21 = vadd.f32 %v4198_v7, %v9323_v38  ;;  %4971 = vmatprep.mubr.bf16.mxu1 %v11240_v46  ;;  %v6361_v49 = vld [vmem:[#allocation10 + $0x670] ss:$24 sps:$4 sm:$0xff]  }
 0x35e   : > { %5076 = vmatprep.subr.bf16.mxu0 %v6354_v22  ;;  %v4200_v29 = vpop.f32.mrf.mxu0  ;;  %5841 = vmatpush1.bf16.msra.mxu1 %v6352_v25  ;;  %v6363_v22 = vld [vmem:[#allocation10 + $0x674] ss:$24 sps:$4 sm:$0xff]  }
 0x35f   : > { %v9576_v53 = vpop.f32.mrf.mxu1  ;;  %5237 = vst [vmem:[%s9554_s27 + $0x60] sm:$0xff] %v4199_v21  ;;  %5826 = vmatprep.subr.bf16.mxu1 %v6357_v10 }
 0x360   : > { %4809 = vmatmul.mubr.bf16.gmra.mxu0 %v8577_v18  ;;  %v4201_v18 = vadd.f32 %v4200_v29, %v9328_v42  ;;  %v4202_v24 = vpop.f32.mrf.mxu0 }
 0x361   : > { %4818 = vmatprep.mubr.bf16.mxu0 %v8617_v51  ;;  %5077 = vmatpush1.bf16.msra.mxu0 %v6352_v25  ;;  %v9580_v38 = vpop.f32.mrf.mxu1  ;;  %v4052_v51 = vadd.f32 %v9339_v58, %v3899_v33  ;;  %v4203_v46 = vadd.f32 %v4202_v24, %v9337_v54  ;;  %v3909_v54 = vadd.f32 %v9352_v41, %v9286_v47  ;;  %v11263_v58 = vld [vmem:[#allocation61_spill] sm:$0xff]  ;;  %v6366_v41 = vld [vmem:[#allocation10 + $0x644] ss:$24 sps:$4 sm:$0xff]  }
 0x362   : > { %5078 = vmatprep.subr.bf16.mxu0 %v6357_v10  ;;  %5238 = vst [vmem:[%s9554_s27 + $0x68] sm:$0xff] %v4201_v18  ;;  %v4204_v5 = vpop.f32.mrf.mxu0  ;;  %5842 = vmatpush1.bf16.msra.mxu1 %v6355_v60  ;;  %v11266_v33 = vld [vmem:[#allocation69_spill] sm:$0xff] }
 0x363   : > { %v9585_v16 = vpop.f32.mrf.mxu1  ;;  %5243 = vst [vmem:[%s9554_s27 + $0x90] sm:$0xff] %v4203_v46  ;;  %v4205_v42 = vadd.f32 %v4204_v5, %v4052_v51  ;;  %5827 = vmatprep.subr.bf16.mxu1 %v6360_v23  ;;  %v4062_v21 = vadd.f32 %v11266_v33, %v3909_v54  ;;  %v6369_v51 = vld [vmem:[#allocation10 + $0x614] ss:$24 sps:$4 sm:$0xff]  }
 0x364   : > { %v4208_v8 = vpop.f32.mrf.mxu0  ;;  %4972 = vmatmul.mubr.bf16.gmra.mxu1 %v11244_v62 }
 0x365   : > { %5079 = vmatpush1.bf16.msra.mxu0 %v6355_v60  ;;  %v9588_v34 = vpop.f32.mrf.mxu1  ;;  %5244 = vst [vmem:[%s9554_s27 + $0x98] sm:$0xff] %v4205_v42  ;;  %v4209_v56 = vadd.f32 %v4208_v8, %v11263_v58  ;;  %4981 = vmatprep.mubr.bf16.mxu1 %v11245_v36  ;;  %v11267_v36 = vld [vmem:[#allocation63_spill] sm:$0xff]  ;;  %v11269_v42 = vld [vmem:[#allocation72_spill] sm:$0xff]  ;;  %v11271_v58 = vld [vmem:[#allocation29_spill] sm:$0xff] }
 0x366   : > { %5080 = vmatprep.subr.bf16.mxu0 %v6360_v23  ;;  %v4210_v52 = vpop.f32.mrf.mxu0  ;;  %5843 = vmatpush1.bf16.msra.mxu1 %v6358_v2  ;;  %v6364_v23 = vld [vmem:[#allocation10 + $0x640] ss:$24 sps:$4 sm:$0xff]  }
 0x367   : > { %v9598_v25 = vpop.f32.mrf.mxu1  ;;  %5249 = vst [vmem:[%s9554_s27 + $0xc0] sm:$0xff] %v4209_v56  ;;  %5828 = vmatprep.subr.bf16.mxu1 %v6363_v22  ;;  %v11270_v8 = vld [vmem:[#allocation75_spill] sm:$0xff] }
 0x368   : > { %4819 = vmatmul.mubr.bf16.gmra.mxu0 %v8626_v59  ;;  %v11265_v59 = vld [vmem:[#allocation57_spill] sm:$0xff]  ;;  %v4212_v10 = vpop.f32.mrf.mxu0 }
 0x369   : > { %4828 = vmatprep.mubr.bf16.mxu0 %v11264_v1  ;;  %5081 = vmatpush1.bf16.msra.mxu0 %v6358_v2  ;;  %v4211_v62 = vadd.f32 %v4210_v52, %v11265_v59  ;;  %v9602_v7 = vpop.f32.mrf.mxu1  ;;  %v4213_v29 = vadd.f32 %v4212_v10, %v11267_v36  ;;  %v11268_v2 = vld [vmem:[#allocation28_spill] sm:$0xff]  ;;  %v11273_v10 = vld [vmem:[#allocation87_spill] sm:$0xff] }
 0x36a   : > { %5082 = vmatprep.subr.bf16.mxu0 %v6363_v22  ;;  %v4214_v60 = vpop.f32.mrf.mxu0  ;;  %5844 = vmatpush1.bf16.msra.mxu1 %v6361_v49  ;;  %v3919_v22 = vadd.f32 %v11269_v42, %v9286_v47  ;;  %v6367_v52 = vld [vmem:[#allocation10 + $0x610] ss:$24 sps:$4 sm:$0xff]   ;;  %v6372_v59 = vld [vmem:[#allocation10 + $0x8e4] ss:$24 sps:$4 sm:$0xff]  }
 0x36b   : > { %5250 = vst [vmem:[%s9554_s27 + $0xc8] sm:$0xff] %v4211_v62  ;;  %v9607_v18 = vpop.f32.mrf.mxu1  ;;  %5255 = vst [vmem:[%s9554_s27 + $0xf0] sm:$0xff] %v4213_v29  ;;  %v4215_v24 = vadd.f32 %v4214_v60, %v4062_v21  ;;  %5829 = vmatprep.subr.bf16.mxu1 %v6366_v41  ;;  %v6370_v60 = vld [vmem:[#allocation10 + $0x8e0] ss:$24 sps:$4 sm:$0xff]   ;;  %v11276_v42 = vld [vmem:[#allocation93_spill] sm:$0xff] }
 0x36c   : > { %v4218_v46 = vpop.f32.mrf.mxu0  ;;  %4982 = vmatmul.mubr.bf16.gmra.mxu1 %v11248_v28  ;;  %v11272_v28 = vld [vmem:[#allocation66_spill] sm:$0xff]  ;;  %v4072_v33 = vadd.f32 %v11273_v10, %v3919_v22  ;;  %v3929_v22 = vadd.f32 %v11276_v42, %v9286_v47 }
 0x36d   : > { %5083 = vmatpush1.bf16.msra.mxu0 %v6361_v49  ;;  %v9610_v5 = vpop.f32.mrf.mxu1  ;;  %5256 = vst [vmem:[%s9554_s27 + $0xf8] sm:$0xff] %v4215_v24  ;;  %v4219_v54 = vadd.f32 %v4218_v46, %v11270_v8  ;;  %4991 = vmatprep.mubr.bf16.mxu1 %v11249_v12  ;;  %v11274_v12 = vld [vmem:[#allocation81_spill] sm:$0xff]  ;;  %v11277_v8 = vld [vmem:[#allocation78_spill] sm:$0xff] }
 0x36e   : > { %5084 = vmatprep.subr.bf16.mxu0 %v6366_v41  ;;  %v4220_v56 = vpop.f32.mrf.mxu0  ;;  %5845 = vmatpush1.bf16.msra.mxu1 %v6364_v23  ;;  %v6375_v24 = vld [vmem:[#allocation10 + $0x8b4] ss:$24 sps:$4 sm:$0xff]  }
 0x36f   : > { %v9620_v1 = vpop.f32.mrf.mxu1  ;;  %5261 = vst [vmem:[%s9554_s27 + $0x120] sm:$0xff] %v4219_v54  ;;  %v4221_v49 = vadd.f32 %v4220_v56, %v11272_v28  ;;  %5830 = vmatprep.subr.bf16.mxu1 %v6369_v51  ;;  %v6373_v28 = vld [vmem:[#allocation10 + $0x8b0] ss:$24 sps:$4 sm:$0xff]  }
 0x370   : > { %4829 = vmatmul.mubr.bf16.gmra.mxu0 %v11268_v2  ;;  %v4222_v62 = vpop.f32.mrf.mxu0  ;;  %v11275_v2 = vld [vmem:[#allocation36_spill] sm:$0xff] }
 0x371   : > { %4838 = vmatprep.mubr.bf16.mxu0 %v11271_v58  ;;  %5085 = vmatpush1.bf16.msra.mxu0 %v6364_v23  ;;  %v9624_v41 = vpop.f32.mrf.mxu1  ;;  %5262 = vst [vmem:[%s9554_s27 + $0x128] sm:$0xff] %v4221_v49  ;;  %v4223_v21 = vadd.f32 %v4222_v62, %v11274_v12  ;;  %v11278_v58 = vld [vmem:[#allocation127_spill] sm:$0xff] }
 0x372   : > { %5086 = vmatprep.subr.bf16.mxu0 %v6369_v51  ;;  %v4224_v36 = vpop.f32.mrf.mxu0  ;;  %5846 = vmatpush1.bf16.msra.mxu1 %v6367_v52 }
 0x373   : > { %v9629_v29 = vpop.f32.mrf.mxu1  ;;  %5267 = vst [vmem:[%s9554_s27 + $0x150] sm:$0xff] %v4223_v21  ;;  %v4225_v23 = vadd.f32 %v4224_v36, %v4072_v33  ;;  %5831 = vmatprep.subr.bf16.mxu1 %v6372_v59  ;;  %v11280_v33 = vld [vmem:[#allocation90_spill] sm:$0xff] }
 0x374   : > { %v4228_v51 = vpop.f32.mrf.mxu0  ;;  %4992 = vmatmul.mubr.bf16.gmra.mxu1 %v11250_v48  ;;  %v11279_v48 = vld [vmem:[#allocation84_spill] sm:$0xff]  ;;  %v4082_v12 = vadd.f32 %v11280_v33, %v3929_v22  ;;  %v11282_v22 = vld [vmem:[#allocation42_spill] sm:$0xff] }
 0x375   : > { %5087 = vmatpush1.bf16.msra.mxu0 %v6367_v52  ;;  %v9632_v46 = vpop.f32.mrf.mxu1  ;;  %5268 = vst [vmem:[%s9554_s27 + $0x158] sm:$0xff] %v4225_v23  ;;  %v4229_v54 = vadd.f32 %v4228_v51, %v11277_v8  ;;  %5001 = vmatprep.mubr.bf16.mxu1 %v11251_v15  ;;  %v11281_v15 = vld [vmem:[#allocation99_spill] sm:$0xff]  ;;  %v11283_v8 = vld [vmem:[#allocation108_spill] sm:$0xff] }
 0x376   : > { %5088 = vmatprep.subr.bf16.mxu0 %v6372_v59  ;;  %v4230_v56 = vpop.f32.mrf.mxu0  ;;  %5847 = vmatpush2.bf16.msra.mxu1 %v6370_v60  ;;  %v6378_v59 = vld [vmem:[#allocation10 + $0x884] ss:$24 sps:$4 sm:$0xff]  }
 0x377   : > { %v9642_v52 = vpop.f32.mrf.mxu1  ;;  %5273 = vst [vmem:[%s9554_s27 + $0x180] sm:$0xff] %v4229_v54  ;;  %v4231_v49 = vadd.f32 %v4230_v56, %v11279_v48  ;;  %5832 = vmatprep.subr.bf16.mxu1 %v6375_v24  ;;  %v3939_v54 = vadd.f32 %v11283_v8, %v9286_v47  ;;  %v6384_v33 = vld [vmem:[#allocation10 + $0x824] ss:$24 sps:$4 sm:$0xff]  }
 0x378   : > { %4839 = vmatmul.mubr.bf16.gmra.mxu0 %v11275_v2  ;;  %v4232_v62 = vpop.f32.mrf.mxu0 }
 0x379   : > { %4848 = vmatprep.mubr.bf16.mxu0 %v11278_v58  ;;  %5089 = vmatpush2.bf16.msra.mxu0 %v6370_v60  ;;  %v9646_v10 = vpop.f32.mrf.mxu1  ;;  %5274 = vst [vmem:[%s9554_s27 + $0x188] sm:$0xff] %v4231_v49  ;;  %v4233_v21 = vadd.f32 %v4232_v62, %v11281_v15  ;;  %v6376_v60 = vld [vmem:[#allocation10 + $0x880] ss:$24 sps:$4 sm:$0xff]   ;;  %v11284_v58 = vld [vmem:[#allocation96_spill] sm:$0xff] }
 0x37a   : > { %5090 = vmatprep.subr.bf16.mxu0 %v6375_v24  ;;  %v4234_v36 = vpop.f32.mrf.mxu0  ;;  %5848 = vmatpush2.bf16.msra.mxu1 %v6373_v28  ;;  %v6381_v24 = vld [vmem:[#allocation10 + $0x854] ss:$24 sps:$4 sm:$0xff]  }
 0x37b   : > { %v9651_v23 = vpop.f32.mrf.mxu1  ;;  %5279 = vst [vmem:[%s9554_s27 + $0x1b0] sm:$0xff] %v4233_v21  ;;  %v4235_v51 = vadd.f32 %v4234_v36, %v4082_v12  ;;  %5833 = vmatprep.subr.bf16.mxu1 %v6378_v59  ;;  %v11287_v21 = vld [vmem:[#allocation110_spill] sm:$0xff] }
 0x37c   : > { %v4238_v2 = vpop.f32.mrf.mxu0  ;;  %5002 = vmatmul.mubr.bf16.gmra.mxu1 %v11252_v57  ;;  %v11286_v57 = vld [vmem:[#allocation102_spill] sm:$0xff]  ;;  %v4092_v36 = vadd.f32 %v11287_v21, %v3939_v54  ;;  %v11289_v54 = vld [vmem:[#allocation48_spill] sm:$0xff] }
 0x37d   : > { %5091 = vmatpush2.bf16.msra.mxu0 %v6373_v28  ;;  %v9654_v42 = vpop.f32.mrf.mxu1  ;;  %5280 = vst [vmem:[%s9554_s27 + $0x1b8] sm:$0xff] %v4235_v51  ;;  %v4239_v56 = vadd.f32 %v4238_v2, %v11284_v58  ;;  %v11285_v28 = vld [vmem:[#allocation41_spill] sm:$0xff]  ;;  %5011 = vmatprep.mubr.bf16.mxu1 %v11253_v0  ;;  %v11288_v0 = vld [vmem:[#allocation104_spill] sm:$0xff] }
 0x37e   : > { %5092 = vmatprep.subr.bf16.mxu0 %v6378_v59  ;;  %v4240_v48 = vpop.f32.mrf.mxu0  ;;  %5849 = vmatpush2.bf16.msra.mxu1 %v6376_v60  ;;  %v6379_v59 = vld [vmem:[#allocation10 + $0x850] ss:$24 sps:$4 sm:$0xff]  }
 0x37f   : > { %v9664_v49 = vpop.f32.mrf.mxu1  ;;  %5285 = vst [vmem:[%s9554_s27 + $0x1e0] sm:$0xff] %v4239_v56  ;;  %v4241_v62 = vadd.f32 %v4240_v48, %v11286_v57  ;;  %5834 = vmatprep.subr.bf16.mxu1 %v6381_v24  ;;  %v11291_v57 = vld [vmem:[#allocation116_spill] sm:$0xff] }
 0x380   : > { %4849 = vmatmul.mubr.bf16.gmra.mxu0 %v11282_v22  ;;  %v4242_v12 = vpop.f32.mrf.mxu0  ;;  %v6385_v21 = vld [vmem:[#allocation10 + $0x7f0] ss:$24 sps:$4 sm:$0xff]  }
 0x381   : > { %4858 = vmatprep.mubr.bf16.mxu0 %v11285_v28  ;;  %5093 = vmatpush2.bf16.msra.mxu0 %v6376_v60  ;;  %v9668_v15 = vpop.f32.mrf.mxu1  ;;  %5286 = vst [vmem:[%s9554_s27 + $0x1e8] sm:$0xff] %v4241_v62  ;;  %v4243_v51 = vadd.f32 %v4242_v12, %v11288_v0  ;;  %v6382_v60 = vld [vmem:[#allocation10 + $0x820] ss:$24 sps:$4 sm:$0xff]   ;;  %v6390_v0 = vld [vmem:[#allocation10 + $0x7c4] ss:$24 sps:$4 sm:$0xff]  }
 0x382   : > { %5094 = vmatprep.subr.bf16.mxu0 %v6381_v24  ;;  %v4244_v2 = vpop.f32.mrf.mxu0  ;;  %5850 = vmatpush2.bf16.msra.mxu1 %v6379_v59  ;;  %v6387_v24 = vld [vmem:[#allocation10 + $0x7f4] ss:$24 sps:$4 sm:$0xff]   ;;  %v11290_v28 = vld [vmem:[#allocation115_spill] sm:$0xff] }
 0x383   : > { %v9673_v22 = vpop.f32.mrf.mxu1  ;;  %5291 = vst [vmem:[%s9554_s27 + $0x210] sm:$0xff] %v4243_v51  ;;  %v4245_v8 = vadd.f32 %v4244_v2, %v4092_v36  ;;  %5835 = vmatprep.subr.bf16.mxu1 %v6384_v33  ;;  %v3949_v48 = vadd.f32 %v11290_v28, %v9286_v47  ;;  %v11292_v62 = vld [vmem:[#allocation47_spill] sm:$0xff] }
 0x384   : > { %v4248_v58 = vpop.f32.mrf.mxu0  ;;  %5012 = vmatmul.mubr.bf16.gmra.mxu1 %v11254_v19  ;;  %v11293_v19 = vld [vmem:[#allocation121_spill] sm:$0xff] }
 0x385   : > { %5095 = vmatpush2.bf16.msra.mxu0 %v6379_v59  ;;  %v9676_v56 = vpop.f32.mrf.mxu1  ;;  %5292 = vst [vmem:[%s9554_s27 + $0x218] sm:$0xff] %v4245_v8  ;;  %v4249_v59 = vadd.f32 %v4248_v58, %v11291_v57  ;;  %5021 = vmatprep.mubr.bf16.mxu1 %v11255_v63  ;;  %v11294_v8 = vld [vmem:[#allocation129_spill] sm:$0xff]  ;;  %v11295_v63 = vld [vmem:[#allocation119_spill] sm:$0xff] }
 0x386   : > { %5096 = vmatprep.subr.bf16.mxu0 %v6384_v33  ;;  %v4250_v33 = vpop.f32.mrf.mxu0  ;;  %5851 = vmatpush2.bf16.msra.mxu1 %v6382_v60  ;;  %v4102_v58 = vadd.f32 %v11294_v8, %v3949_v48  ;;  %v11296_v48 = vld [vmem:[#allocation54_spill] sm:$0xff] }
 0x387   : > { %v9686_v12 = vpop.f32.mrf.mxu1  ;;  %5297 = vst [vmem:[%s9554_s27 + $0x240] sm:$0xff] %v4249_v59  ;;  %v4251_v36 = vadd.f32 %v4250_v33, %v11293_v19  ;;  %5836 = vmatprep.subr.bf16.mxu1 %v6387_v24  ;;  %v11297_v19 = vld [vmem:[#allocation117_spill] sm:$0xff]  ;;  %v11299_v8 = vld [vmem:[#allocation58_spill] sm:$0xff] }
 0x388   : > { %4859 = vmatmul.mubr.bf16.gmra.mxu0 %v11289_v54  ;;  %v4252_v51 = vpop.f32.mrf.mxu0 }
 0x389   : > { %4868 = vmatprep.mubr.bf16.mxu0 %v11292_v62  ;;  %5097 = vmatpush2.bf16.msra.mxu0 %v6382_v60  ;;  %v9690_v2 = vpop.f32.mrf.mxu1  ;;  %5298 = vst [vmem:[%s9554_s27 + $0x248] sm:$0xff] %v4251_v36  ;;  %v4253_v54 = vadd.f32 %v4252_v51, %v11295_v63  ;;  %v6388_v60 = vld [vmem:[#allocation10 + $0x7c0] ss:$24 sps:$4 sm:$0xff]   ;;  %v3959_v36 = vadd.f32 %v11297_v19, %v9286_v47  ;;  %v6391_v63 = vld [vmem:[#allocation10 + $0x790] ss:$24 sps:$4 sm:$0xff]  }
 0x38a   : > { %5098 = vmatprep.subr.bf16.mxu0 %v6387_v24  ;;  %v4254_v28 = vpop.f32.mrf.mxu0  ;;  %5852 = vmatpush2.bf16.msra.mxu1 %v6385_v21  ;;  %v6393_v24 = vld [vmem:[#allocation10 + $0x794] ss:$24 sps:$4 sm:$0xff]   ;;  %v11298_v51 = vld [vmem:[#allocation131_spill] sm:$0xff] }
 0x38b   : > { %v9695_v57 = vpop.f32.mrf.mxu1  ;;  %5303 = vst [vmem:[%s9554_s27 + $0x270] sm:$0xff] %v4253_v54  ;;  %v4255_v59 = vadd.f32 %v4254_v28, %v4102_v58  ;;  %5837 = vmatprep.subr.bf16.mxu1 %v6390_v0 }
 0x38c   : > { %v4258_v62 = vpop.f32.mrf.mxu0  ;;  %5022 = vmatmul.mubr.bf16.gmra.mxu1 %v11256_v26  ;;  %v11300_v26 = vld [vmem:[#allocation120_spill] sm:$0xff] }
 0x38d   : > { %5099 = vmatpush2.bf16.msra.mxu0 %v6385_v21  ;;  %v9698_v33 = vpop.f32.mrf.mxu1  ;;  %5304 = vst [vmem:[%s9554_s27 + $0x278] sm:$0xff] %v4255_v59  ;;  %v4259_v21 = vadd.f32 %v4258_v62, %v11298_v51  ;;  %5031 = vmatprep.mubr.bf16.mxu1 %v11257_v32  ;;  %v11301_v62 = vld [vmem:[#allocation138_spill] sm:$0xff] }
 0x38e   : > { %5100 = vmatprep.subr.bf16.mxu0 %v6390_v0  ;;  %v4260_v0 = vpop.f32.mrf.mxu0  ;;  %5853 = vmatpush2.bf16.msra.mxu1 %v6388_v60  ;;  %v11302_v32 = vld [vmem:[#allocation118_spill] sm:$0xff] }
 0x38f   : > { %v9708_v58 = vpop.f32.mrf.mxu1  ;;  %5309 = vst [vmem:[%s9554_s27 + $0x2a0] sm:$0xff] %v4259_v21  ;;  %v4261_v54 = vadd.f32 %v4260_v0, %v11300_v26  ;;  %5838 = vmatprep.subr.bf16.mxu1 %v6393_v24  ;;  %v11304_v0 = vld [vmem:[#allocation56_spill] sm:$0xff] }
 0x390   : > { %4869 = vmatmul.mubr.bf16.gmra.mxu0 %v11296_v48  ;;  %v4262_v28 = vpop.f32.mrf.mxu0  ;;  %v4112_v48 = vadd.f32 %v11301_v62, %v3959_v36  ;;  %v11305_v36 = vld [vmem:[#allocation135_spill] sm:$0xff]  ;;  %v11307_v62 = vld [vmem:[#allocation65_spill] sm:$0xff] }
 0x391   : > { %4878 = vmatprep.mubr.bf16.mxu0 %v11299_v8  ;;  %5101 = vmatpush2.bf16.msra.mxu0 %v6388_v60  ;;  %v9712_v59 = vpop.f32.mrf.mxu1  ;;  %5310 = vst [vmem:[%s9554_s27 + $0x2a8] sm:$0xff] %v4261_v54  ;;  %v4263_v19 = vadd.f32 %v4262_v28, %v11302_v32  ;;  %v3969_v26 = vadd.f32 %v11305_v36, %v9286_v47  ;;  %v11306_v54 = vld [vmem:[#allocation137_spill] sm:$0xff]  ;;  %v11309_v32 = vld [vmem:[#allocation130_spill] sm:$0xff] }
 0x392   : > { %5102 = vmatprep.subr.bf16.mxu0 %v6393_v24  ;;  %v4264_v51 = vpop.f32.mrf.mxu0  ;;  %5854 = vmatpush2.bf16.msra.mxu1 %v6391_v63 }
 0x393   : > { %v9717_v8 = vpop.f32.mrf.mxu1  ;;  %5315 = vst [vmem:[%s9554_s27 + $0x2d0] sm:$0xff] %v4263_v19  ;;  %v4265_v60 = vadd.f32 %v4264_v51, %v4112_v48 }
 0x394   : > { %v4268_v21 = vpop.f32.mrf.mxu0  ;;  %5032 = vmatmul.mubr.bf16.gmra.mxu1 %v11258_v43 }
 0x395   : > { %5103 = vmatpush2.bf16.msra.mxu0 %v6391_v63  ;;  %v9720_v24 = vpop.f32.mrf.mxu1  ;;  %5316 = vst [vmem:[%s9554_s27 + $0x2d8] sm:$0xff] %v4265_v60  ;;  %v4269_v28 = vadd.f32 %v4268_v21, %v11306_v54  ;;  %5041 = vmatprep.mubr.bf16.mxu1 %v11259_v55  ;;  %v11311_v60 = vld [vmem:[#allocation133_spill] sm:$0xff] }
 0x396   : > { %11303 = vst [vmem:[#allocation27_spill] sm:$0xff] %v9720_v24  ;;  %v4270_v63 = vpop.f32.mrf.mxu0 }
 0x397   : > { %v9730_v48 = vpop.f32.mrf.mxu1  ;;  %5321 = vst [vmem:[%s9554_s27 + $0x300] sm:$0xff] %v4269_v28  ;;  %v4271_v19 = vadd.f32 %v4270_v63, %v11309_v32  ;;  %v11313_v63 = vld [vmem:[#allocation134_spill] sm:$0xff] }
 0x398   : > { %4879 = vmatmul.mubr.bf16.gmra.mxu0 %v11304_v0  ;;  %11308 = vst [vmem:[#allocation37_spill] sm:$0xff] %v9730_v48  ;;  %v4272_v51 = vpop.f32.mrf.mxu0  ;;  %v11310_v0 = vld [vmem:[#allocation128_spill] sm:$0xff] }
 0x399   : > { %4888 = vmatprep.mubr.bf16.mxu0 %v11307_v62  ;;  %v9734_v43 = vpop.f32.mrf.mxu1  ;;  %v4122_v36 = vadd.f32 %v11310_v0, %v3969_v26  ;;  %5322 = vst [vmem:[%s9554_s27 + $0x308] sm:$0xff] %v4271_v19  ;;  %v4273_v24 = vadd.f32 %v4272_v51, %v11311_v60  ;;  %v11312_v48 = vld [vmem:[#allocation64_spill] sm:$0xff]  ;;  %v3979_v26 = vadd.f32 %v9473_v35, %v9286_v47  ;;  %v11314_v19 = vld [vmem:[#allocation71_spill] sm:$0xff]  ;;  %v11315_v0 = vld [vmem:[#allocation25_spill] sm:$0xff] }
 0x39a   : > { %v4274_v21 = vpop.f32.mrf.mxu0  ;;  %v11316_v60 = vld [vmem:[#allocation132_spill] sm:$0xff] }
 0x39b   : > { %v9739_v54 = vpop.f32.mrf.mxu1  ;;  %5327 = vst [vmem:[%s9554_s27 + $0x330] sm:$0xff] %v4273_v24  ;;  %v4275_v55 = vadd.f32 %v4274_v21, %v4122_v36  ;;  %v4132_v35 = vadd.f32 %v9479_v4, %v3979_v26  ;;  %v3989_v4 = vadd.f32 %v9522_v44, %v9286_v47  ;;  %v11318_v26 = vld [vmem:[#allocation21_spill] sm:$0xff] }
 0x39c   : > { %v4278_v62 = vpop.f32.mrf.mxu0  ;;  %5042 = vmatmul.mubr.bf16.gmra.mxu1 %v11260_v20 }
 0x39d   : > { %v9742_v28 = vpop.f32.mrf.mxu1  ;;  %5328 = vst [vmem:[%s9554_s27 + $0x338] sm:$0xff] %v4275_v55  ;;  %v4279_v32 = vadd.f32 %v4278_v62, %v11313_v63  ;;  %5051 = vmatprep.mubr.bf16.mxu1 %v11261_v6  ;;  %v4142_v47 = vadd.f32 %v9524_v61, %v3989_v4  ;;  %v11321_v61 = vld [vmem:[#allocation24_spill] sm:$0xff] }
 0x39e   : > { %v4280_v24 = vpop.f32.mrf.mxu0 }
 0x39f   : > { %v9752_v51 = vpop.f32.mrf.mxu1  ;;  %5333 = vst [vmem:[%s9554_s27 + $0x360] sm:$0xff] %v4279_v32 }
 0x3a0   : > { %4889 = vmatmul.mubr.bf16.gmra.mxu0 %v11312_v48  ;;  %v4281_v48 = vadd.f32 %v4280_v24, %v11315_v0  ;;  %v4282_v36 = vpop.f32.mrf.mxu0  ;;  %v11319_v0 = vld [vmem:[#allocation88_spill] sm:$0xff] }
 0x3a1   : > { %4898 = vmatprep.mubr.bf16.mxu0 %v11314_v19  ;;  %v9756_v20 = vpop.f32.mrf.mxu1  ;;  %v4283_v21 = vadd.f32 %v4282_v36, %v11316_v60  ;;  %v11317_v19 = vld [vmem:[#allocation70_spill] sm:$0xff] }
 0x3a2   : > { %5334 = vst [vmem:[%s9554_s27 + $0x368] sm:$0xff] %v4281_v48  ;;  %v4284_v55 = vpop.f32.mrf.mxu0 }
 0x3a3   : > { %v9761_v62 = vpop.f32.mrf.mxu1  ;;  %5339 = vst [vmem:[%s9554_s27 + $0x390] sm:$0xff] %v4283_v21  ;;  %v4285_v6 = vadd.f32 %v4284_v55, %v4132_v35 }
 0x3a4   : > { %v4288_v63 = vpop.f32.mrf.mxu0  ;;  %5052 = vmatmul.mubr.bf16.gmra.mxu1 %v11262_v13 }
 0x3a5   : > { %v9764_v32 = vpop.f32.mrf.mxu1  ;;  %5340 = vst [vmem:[%s9554_s27 + $0x398] sm:$0xff] %v4285_v6  ;;  %v4289_v24 = vadd.f32 %v4288_v63, %v11318_v26  ;;  %5061 = vmatprep.mubr.bf16.mxu1 %v9169_v27 }
 0x3a6   : > { %v4290_v48 = vpop.f32.mrf.mxu0 }
 0x3a7   : > { %v9774_v36 = vpop.f32.mrf.mxu1  ;;  %5345 = vst [vmem:[%s9554_s27 + $0x3c0] sm:$0xff] %v4289_v24  ;;  %v4291_v35 = vadd.f32 %v4290_v48, %v9487_v30  ;;  %v9796_v24 = vld [vmem:[#allocation11] sm:$0x3f] }
 0x3a8   : > { %4899 = vmatmul.mubr.bf16.gmra.mxu0 %v11317_v19  ;;  %v4292_v60 = vpop.f32.mrf.mxu0  ;;  %v11320_v19 = vld [vmem:[#allocation92_spill] sm:$0xff] }
 0x3a9   : > { %4908 = vmatprep.mubr.bf16.mxu0 %v11319_v0  ;;  %v9778_v13 = vpop.f32.mrf.mxu1  ;;  %5346 = vst [vmem:[%s9554_s27 + $0x3c8] sm:$0xff] %v4291_v35  ;;  %v4293_v44 = vadd.f32 %v4292_v60, %v9492_v40  ;;  %v11322_v40 = vld [vmem:[#allocation77_spill] sm:$0xff]  ;;  %v11324_v60 = vld [vmem:[#allocation111_spill] sm:$0xff] }
 0x3aa   : > { %v4294_v21 = vpop.f32.mrf.mxu0  ;;  %v11323_v0 = vld [vmem:[#allocation113_spill] sm:$0xff] }
 0x3ab   : > { %v9783_v55 = vpop.f32.mrf.mxu1  ;;  %5351 = vst [vmem:[%s9554_s27 + $0x3f0] sm:$0xff] %v4293_v44  ;;  %v4295_v27 = vadd.f32 %v4294_v21, %v4142_v47  ;;  %v9800_v48 = vrot.slane %v9796_v24, %v11323_v0  ;;  %v9808_v47 = vrot.slane %v9796_v24, %v11324_v60  ;;  %v11327_v0 = vld [vmem:[#allocation94_spill] sm:$0xff] }
 0x3ac   : > { %v4298_v6 = vpop.f32.mrf.mxu0  ;;  %5062 = vmatmul.mubr.bf16.gmra.mxu1 %v9175_v9 }
 0x3ad   : > { %v9786_v63 = vpop.f32.mrf.mxu1  ;;  %5352 = vst [vmem:[%s9554_s27 + $0x3f8] sm:$0xff] %v4295_v27  ;;  %v4299_v30 = vadd.f32 %v4298_v6, %v9531_v17  ;;  %5164 = vmatprep.mubr.bf16.mxu1 %v11322_v40  ;;  %v4342_v6 = vadd.f32 %v9540_v14, %v9800_v48  ;;  %v11326_v40 = vld [vmem:[#allocation73_spill] sm:$0xff] }
 0x3ae   : > { %v4300_v4 = vpop.f32.mrf.mxu0 }
 0x3af   : > { %v9794_v26 = vpop.f32.mrf.mxu1  ;;  %5357 = vst [vmem:[%s9554_s27 + $0x420] sm:$0xff] %v4299_v30  ;;  %v4301_v9 = vadd.f32 %v4300_v4, %v9534_v45  ;;  %v4344_v4 = vadd.f32 %v9551_v50, %v9808_v47  ;;  %v4348_v50 = vadd.f32 %v9563_v3, %v9808_v47  ;;  %v4354_v3 = vadd.f32 %v9576_v53, %v9808_v47 }
 0x3b0   : > { %4909 = vmatmul.mubr.bf16.gmra.mxu0 %v11320_v19  ;;  %v4302_v35 = vpop.f32.mrf.mxu0  ;;  %v4358_v53 = vadd.f32 %v9585_v16, %v9808_v47  ;;  %v4364_v16 = vadd.f32 %v9598_v25, %v9808_v47  ;;  %v4368_v25 = vadd.f32 %v9607_v18, %v9808_v47  ;;  %v4374_v18 = vadd.f32 %v9620_v1, %v9808_v47 }
 0x3b1   : > { %5104 = vmatprep.mubr.bf16.mxu0 %v11321_v61  ;;  %v9804_v17 = vpop.f32.mrf.mxu1  ;;  %5358 = vst [vmem:[%s9554_s27 + $0x428] sm:$0xff] %v4301_v9  ;;  %v4303_v44 = vadd.f32 %v4302_v35, %v9537_v11  ;;  %v11325_v61 = vld [vmem:[#allocation53_spill] sm:$0xff]  ;;  %v11328_v9 = vld [vmem:[#allocation76_spill] sm:$0xff]  ;;  %v4378_v1 = vadd.f32 %v9629_v29, %v9808_v47  ;;  %v4384_v29 = vadd.f32 %v9642_v52, %v9808_v47 }
 0x3b2   : > { %v4304_v21 = vpop.f32.mrf.mxu0  ;;  %v4388_v52 = vadd.f32 %v9651_v23, %v9808_v47  ;;  %v4394_v23 = vadd.f32 %v9664_v49, %v9808_v47 }
 0x3b3   : > { %v9812_v27 = vpop.f32.mrf.mxu1  ;;  %5363 = vst [vmem:[%s9554_s27 + $0x450] sm:$0xff] %v4303_v44  ;;  %v4305_v45 = vadd.f32 %v4304_v21, %v9546_v37  ;;  %v4346_v37 = vadd.f32 %v9558_v39, %v9800_v48 }
 0x3b4   : > { %5165 = vmatmul.mubr.bf16.vlgmr.msra.gmra.mxu1 %v11326_v40 }
 0x3b5   : > { %v4647_v30 = vpop.f32.mrf.mxu1  ;;  %5364 = vst [vmem:[%s9554_s27 + $0x458] sm:$0xff] %v4305_v45  ;;  %5174 = vmatprep.mubr.bf16.mxu1 %v11328_v9 }
 0x3b7   : > { %v4494_v19 = vpop.f32.mrf.mxu0  ;;  %v4649_v35 = vpop.f32.mrf.mxu1 }
 0x3b8   : > { %5105 = vmatmul.mubr.bf16.vlgmr.msra.gmra.mxu0 %v11325_v61  ;;  %v4495_v11 = vadd.f32 %v4494_v19, %v4342_v6 }
 0x3b9   : > { %5114 = vmatprep.mubr.bf16.mxu0 %v11327_v0  ;;  %v4496_v14 = vpop.f32.mrf.mxu0  ;;  %v4651_v61 = vpop.f32.mrf.mxu1  ;;  %v4352_v0 = vadd.f32 %v9566_v31, %v9800_v48  ;;  %v11332_v31 = vld [vmem:[#allocation83_spill] sm:$0xff] }
 0x3ba   : > { %v4648_v60 = vadd.f32 %v4647_v30, %v4495_v11  ;;  %v4497_v44 = vadd.f32 %v4496_v14, %v4344_v4  ;;  %v11329_v11 = vld [vmem:[#allocation98_spill] sm:$0xff]  ;;  %v11330_v14 = vld [vmem:[#allocation80_spill] sm:$0xff] }
 0x3bb   : > { %v4498_v21 = vpop.f32.mrf.mxu0  ;;  %v4653_v40 = vpop.f32.mrf.mxu1 }
 0x3bc   : > { %5227 = vst [vmem:[%s9554_s27 + $0x10] sm:$0xff] %v4648_v60  ;;  %v4650_v6 = vadd.f32 %v4649_v35, %v4497_v44  ;;  %v4499_v45 = vadd.f32 %v4498_v21, %v4346_v37  ;;  %5175 = vmatmul.mubr.bf16.gmra.mxu1 %v11330_v14  ;;  %v11331_v60 = vld [vmem:[#allocation101_spill] sm:$0xff] }
 0x3bd   : > { %v4500_v19 = vpop.f32.mrf.mxu0  ;;  %v4657_v4 = vpop.f32.mrf.mxu1  ;;  %5184 = vmatprep.mubr.bf16.mxu1 %v11332_v31  ;;  %v11335_v31 = vld [vmem:[#allocation100_spill] sm:$0xff] }
 0x3be   : > { %5228 = vst [vmem:[%s9554_s27 + $0x18] sm:$0xff] %v4650_v6  ;;  %v4652_v9 = vadd.f32 %v4651_v61, %v4499_v45  ;;  %v4501_v39 = vadd.f32 %v4500_v19, %v4348_v50  ;;  %v4356_v61 = vadd.f32 %v9580_v38, %v9800_v48 }
 0x3bf   : > { %v4504_v30 = vpop.f32.mrf.mxu0  ;;  %v4659_v21 = vpop.f32.mrf.mxu1 }
 0x3c0   : > { %5115 = vmatmul.mubr.bf16.gmra.mxu0 %v11329_v11  ;;  %5233 = vst [vmem:[%s9554_s27 + $0x40] sm:$0xff] %v4652_v9  ;;  %v4654_v35 = vadd.f32 %v4653_v40, %v4501_v39  ;;  %v4505_v37 = vadd.f32 %v4504_v30, %v4352_v0  ;;  %v4362_v30 = vadd.f32 %v9588_v34, %v9800_v48  ;;  %v11336_v34 = vld [vmem:[#allocation82_spill] sm:$0xff] }
 0x3c1   : > { %5124 = vmatprep.mubr.bf16.mxu0 %v11331_v60  ;;  %v4506_v44 = vpop.f32.mrf.mxu0  ;;  %v4661_v19 = vpop.f32.mrf.mxu1 }
 0x3c2   : > { %5234 = vst [vmem:[%s9554_s27 + $0x48] sm:$0xff] %v4654_v35  ;;  %v4658_v50 = vadd.f32 %v4657_v4, %v4505_v37  ;;  %v4507_v6 = vadd.f32 %v4506_v44, %v4354_v3  ;;  %v11333_v3 = vld [vmem:[#allocation97_spill] sm:$0xff]  ;;  %v11334_v35 = vld [vmem:[#allocation79_spill] sm:$0xff] }
 0x3c3   : > { %v4508_v45 = vpop.f32.mrf.mxu0  ;;  %v4663_v39 = vpop.f32.mrf.mxu1 }
 0x3c4   : > { %5239 = vst [vmem:[%s9554_s27 + $0x70] sm:$0xff] %v4658_v50  ;;  %v4660_v40 = vadd.f32 %v4659_v21, %v4507_v6  ;;  %v4509_v0 = vadd.f32 %v4508_v45, %v4356_v61  ;;  %5185 = vmatmul.mubr.bf16.gmra.mxu1 %v11334_v35  ;;  %v4366_v61 = vadd.f32 %v9602_v7, %v9800_v48 }
 0x3c5   : > { %v4510_v9 = vpop.f32.mrf.mxu0  ;;  %v4667_v14 = vpop.f32.mrf.mxu1  ;;  %5194 = vmatprep.mubr.bf16.mxu1 %v11336_v34 }
 0x3c6   : > { %5240 = vst [vmem:[%s9554_s27 + $0x78] sm:$0xff] %v4660_v40  ;;  %v4662_v38 = vadd.f32 %v4661_v19, %v4509_v0  ;;  %v4511_v11 = vadd.f32 %v4510_v9, %v4358_v53 }
 0x3c7   : > { %v4514_v4 = vpop.f32.mrf.mxu0  ;;  %v4669_v21 = vpop.f32.mrf.mxu1 }
 0x3c8   : > { %5125 = vmatmul.mubr.bf16.gmra.mxu0 %v11333_v3  ;;  %5245 = vst [vmem:[%s9554_s27 + $0xa0] sm:$0xff] %v4662_v38  ;;  %v4664_v37 = vadd.f32 %v4663_v39, %v4511_v11  ;;  %v4515_v60 = vadd.f32 %v4514_v4, %v4362_v30  ;;  %v4372_v39 = vadd.f32 %v9610_v5, %v9800_v48  ;;  %v11337_v4 = vld [vmem:[#allocation105_spill] sm:$0xff] }
 0x3c9   : > { %5134 = vmatprep.mubr.bf16.mxu0 %v11335_v31  ;;  %v4516_v44 = vpop.f32.mrf.mxu0  ;;  %v4671_v19 = vpop.f32.mrf.mxu1  ;;  %v11340_v5 = vld [vmem:[#allocation89_spill] sm:$0xff]  ;;  %v4376_v31 = vadd.f32 %v9624_v41, %v9800_v48 }
 0x3ca   : > { %5246 = vst [vmem:[%s9554_s27 + $0xa8] sm:$0xff] %v4664_v37  ;;  %v4668_v50 = vadd.f32 %v4667_v14, %v4515_v60  ;;  %v4517_v6 = vadd.f32 %v4516_v44, %v4364_v16  ;;  %v11338_v14 = vld [vmem:[#allocation86_spill] sm:$0xff]  ;;  %v11339_v16 = vld [vmem:[#allocation107_spill] sm:$0xff] }
 0x3cb   : > { %v4518_v45 = vpop.f32.mrf.mxu0  ;;  %v4673_v9 = vpop.f32.mrf.mxu1 }
 0x3cc   : > { %5251 = vst [vmem:[%s9554_s27 + $0xd0] sm:$0xff] %v4668_v50  ;;  %v4670_v53 = vadd.f32 %v4669_v21, %v4517_v6  ;;  %v4519_v40 = vadd.f32 %v4518_v45, %v4366_v61  ;;  %5195 = vmatmul.mubr.bf16.gmra.mxu1 %v11338_v14  ;;  %v4386_v14 = vadd.f32 %v9646_v10, %v9800_v48 }
 0x3cd   : > { %v4520_v0 = vpop.f32.mrf.mxu0  ;;  %v4677_v11 = vpop.f32.mrf.mxu1  ;;  %5204 = vmatprep.mubr.bf16.mxu1 %v11340_v5 }
 0x3ce   : > { %5252 = vst [vmem:[%s9554_s27 + $0xd8] sm:$0xff] %v4670_v53  ;;  %v4672_v7 = vadd.f32 %v4671_v19, %v4519_v40  ;;  %v4521_v30 = vadd.f32 %v4520_v0, %v4368_v25  ;;  %v4382_v25 = vadd.f32 %v9632_v46, %v9800_v48  ;;  %v11344_v46 = vld [vmem:[#allocation95_spill] sm:$0xff] }
 0x3cf   : > { %v4679_v60 = vpop.f32.mrf.mxu1 }
 0x3d0   : > { %v4524_v38 = vpop.f32.mrf.mxu0  ;;  %5135 = vmatmul.mubr.bf16.gmra.mxu0 %v11337_v4  ;;  %5257 = vst [vmem:[%s9554_s27 + $0x100] sm:$0xff] %v4672_v7  ;;  %v4674_v3 = vadd.f32 %v4673_v9, %v4521_v30  ;;  %v11341_v9 = vld [vmem:[#allocation103_spill] sm:$0xff] }
 0x3d1   : > { %v4525_v35 = vadd.f32 %v4524_v38, %v4372_v39  ;;  %5144 = vmatprep.mubr.bf16.mxu0 %v11339_v16  ;;  %v4681_v61 = vpop.f32.mrf.mxu1  ;;  %v11342_v39 = vld [vmem:[#allocation85_spill] sm:$0xff]  ;;  %v11343_v38 = vld [vmem:[#allocation106_spill] sm:$0xff] }
 0x3d2   : > { %v4526_v37 = vpop.f32.mrf.mxu0  ;;  %5258 = vst [vmem:[%s9554_s27 + $0x108] sm:$0xff] %v4674_v3 }
 0x3d3   : > { %v4678_v34 = vadd.f32 %v4677_v11, %v4525_v35  ;;  %v4527_v44 = vadd.f32 %v4526_v37, %v4374_v18  ;;  %v4683_v19 = vpop.f32.mrf.mxu1 }
 0x3d4   : > { %v4528_v21 = vpop.f32.mrf.mxu0  ;;  %5205 = vmatmul.mubr.bf16.gmra.mxu1 %v11342_v39 }
 0x3d5   : > { %5263 = vst [vmem:[%s9554_s27 + $0x130] sm:$0xff] %v4678_v34  ;;  %v4680_v50 = vadd.f32 %v4679_v60, %v4527_v44  ;;  %v4529_v6 = vadd.f32 %v4528_v21, %v4376_v31  ;;  %v4687_v0 = vpop.f32.mrf.mxu1  ;;  %5214 = vmatprep.mubr.bf16.mxu1 %v11344_v46  ;;  %v4392_v34 = vadd.f32 %v9654_v42, %v9800_v48 }
 0x3d6   : > { %v4530_v45 = vpop.f32.mrf.mxu0  ;;  %v4396_v42 = vadd.f32 %v9668_v15, %v9800_v48 }
 0x3d7   : > { %5264 = vst [vmem:[%s9554_s27 + $0x138] sm:$0xff] %v4680_v50  ;;  %v4682_v41 = vadd.f32 %v4681_v61, %v4529_v6  ;;  %v4531_v53 = vadd.f32 %v4530_v45, %v4378_v1  ;;  %v4689_v4 = vpop.f32.mrf.mxu1  ;;  %v11345_v1 = vld [vmem:[#allocation55_spill] sm:$0xff] }
 0x3d8   : > { %v4534_v40 = vpop.f32.mrf.mxu0  ;;  %5145 = vmatmul.mubr.bf16.gmra.mxu0 %v11341_v9  ;;  %v11346_v50 = vld [vmem:[#allocation91_spill] sm:$0xff]  ;;  %v4398_v9 = vadd.f32 %v9673_v22, %v9808_v47 }
 0x3d9   : > { %5269 = vst [vmem:[%s9554_s27 + $0x160] sm:$0xff] %v4682_v41  ;;  %v4684_v7 = vadd.f32 %v4683_v19, %v4531_v53  ;;  %v4535_v30 = vadd.f32 %v4534_v40, %v4382_v25  ;;  %5154 = vmatprep.mubr.bf16.mxu0 %v11343_v38  ;;  %v4691_v16 = vpop.f32.mrf.mxu1 }
 0x3da   : > { %v4536_v11 = vpop.f32.mrf.mxu0 }
 0x3db   : > { %5270 = vst [vmem:[%s9554_s27 + $0x168] sm:$0xff] %v4684_v7  ;;  %v4688_v18 = vadd.f32 %v4687_v0, %v4535_v30  ;;  %v4537_v3 = vadd.f32 %v4536_v11, %v4384_v29  ;;  %v4693_v31 = vpop.f32.mrf.mxu1  ;;  %v4402_v30 = vadd.f32 %v9676_v56, %v9800_v48 }
 0x3dc   : > { %v4538_v35 = vpop.f32.mrf.mxu0  ;;  %5215 = vmatmul.mubr.bf16.gmra.mxu1 %v11346_v50 }
 0x3dd   : > { %5275 = vst [vmem:[%s9554_s27 + $0x190] sm:$0xff] %v4688_v18  ;;  %v4690_v5 = vadd.f32 %v4689_v4, %v4537_v3  ;;  %v4539_v37 = vadd.f32 %v4538_v35, %v4386_v14  ;;  %v4697_v61 = vpop.f32.mrf.mxu1  ;;  %v4404_v4 = vadd.f32 %v9686_v12, %v9808_v47  ;;  %v4406_v35 = vadd.f32 %v9690_v2, %v9800_v48 }
 0x3de   : > { %v4540_v60 = vpop.f32.mrf.mxu0 }
 0x3df   : > { %5276 = vst [vmem:[%s9554_s27 + $0x198] sm:$0xff] %v4690_v5  ;;  %v4692_v10 = vadd.f32 %v4691_v16, %v4539_v37  ;;  %v4541_v44 = vadd.f32 %v4540_v60, %v4388_v52  ;;  %v4699_v25 = vpop.f32.mrf.mxu1  ;;  %v4408_v37 = vadd.f32 %v9695_v57, %v9808_v47 }
 0x3e0   : > { %v4544_v21 = vpop.f32.mrf.mxu0  ;;  %5155 = vmatmul.mubr.bf16.gmra.mxu0 %v11345_v1  ;;  %v4414_v1 = vadd.f32 %v9708_v58, %v9808_v47 }
 0x3e1   : > { %5281 = vst [vmem:[%s9554_s27 + $0x1c0] sm:$0xff] %v4692_v10  ;;  %v4694_v6 = vadd.f32 %v4693_v31, %v4541_v44  ;;  %v4545_v45 = vadd.f32 %v4544_v21, %v4392_v34  ;;  %v4701_v0 = vpop.f32.mrf.mxu1  ;;  %v4412_v10 = vadd.f32 %v9698_v33, %v9800_v48 }
 0x3e2   : > { %v4546_v19 = vpop.f32.mrf.mxu0 }
 0x3e3   : > { %5282 = vst [vmem:[%s9554_s27 + $0x1c8] sm:$0xff] %v4694_v6  ;;  %v4698_v41 = vadd.f32 %v4697_v61, %v4545_v45  ;;  %v4547_v53 = vadd.f32 %v4546_v19, %v4394_v23  ;;  %v4703_v7 = vpop.f32.mrf.mxu1  ;;  %v4416_v45 = vadd.f32 %v9712_v59, %v9800_v48 }
 0x3e4   : > { %v4548_v40 = vpop.f32.mrf.mxu0 }
 0x3e5   : > { %5287 = vst [vmem:[%s9554_s27 + $0x1f0] sm:$0xff] %v4698_v41  ;;  %v4700_v49 = vadd.f32 %v4699_v25, %v4547_v53  ;;  %v4549_v39 = vadd.f32 %v4548_v40, %v4396_v42  ;;  %v4707_v11 = vpop.f32.mrf.mxu1  ;;  %v4418_v41 = vadd.f32 %v9717_v8, %v9808_v47 }
 0x3e6   : > { %v4550_v29 = vpop.f32.mrf.mxu0 }
 0x3e7   : > { %5288 = vst [vmem:[%s9554_s27 + $0x1f8] sm:$0xff] %v4700_v49  ;;  %v4702_v15 = vadd.f32 %v4701_v0, %v4549_v39  ;;  %v4551_v38 = vadd.f32 %v4550_v29, %v4398_v9  ;;  %v4709_v3 = vpop.f32.mrf.mxu1  ;;  %v11347_v9 = vld [vmem:[#allocation27_spill] sm:$0xff] }
 0x3e8   : > { %v4554_v46 = vpop.f32.mrf.mxu0  ;;  %v4422_v49 = vadd.f32 %v11347_v9, %v9800_v48 }
 0x3e9   : > { %5293 = vst [vmem:[%s9554_s27 + $0x220] sm:$0xff] %v4702_v15  ;;  %v4704_v22 = vadd.f32 %v4703_v7, %v4551_v38  ;;  %v4555_v14 = vadd.f32 %v4554_v46, %v4402_v30  ;;  %v4711_v5 = vpop.f32.mrf.mxu1  ;;  %v11348_v30 = vld [vmem:[#allocation37_spill] sm:$0xff] }
 0x3ea   : > { %v4556_v18 = vpop.f32.mrf.mxu0  ;;  %v4424_v15 = vadd.f32 %v11348_v30, %v9808_v47 }
 0x3eb   : > { %5294 = vst [vmem:[%s9554_s27 + $0x228] sm:$0xff] %v4704_v22  ;;  %v4708_v56 = vadd.f32 %v4707_v11, %v4555_v14  ;;  %v4557_v16 = vadd.f32 %v4556_v18, %v4404_v4  ;;  %v4713_v34 = vpop.f32.mrf.mxu1  ;;  %v4426_v4 = vadd.f32 %v9734_v43, %v9800_v48 }
 0x3ec   : > { %v4558_v52 = vpop.f32.mrf.mxu0 }
 0x3ed   : > { %5299 = vst [vmem:[%s9554_s27 + $0x250] sm:$0xff] %v4708_v56  ;;  %v4710_v12 = vadd.f32 %v4709_v3, %v4557_v16  ;;  %v4559_v60 = vadd.f32 %v4558_v52, %v4406_v35  ;;  %v4717_v61 = vpop.f32.mrf.mxu1  ;;  %v4428_v35 = vadd.f32 %v9739_v54, %v9808_v47 }
 0x3ee   : > { %v4560_v31 = vpop.f32.mrf.mxu0 }
 0x3ef   : > { %5300 = vst [vmem:[%s9554_s27 + $0x258] sm:$0xff] %v4710_v12  ;;  %v4712_v2 = vadd.f32 %v4711_v5, %v4559_v60  ;;  %v4561_v44 = vadd.f32 %v4560_v31, %v4408_v37  ;;  %v4719_v6 = vpop.f32.mrf.mxu1  ;;  %v4432_v37 = vadd.f32 %v9742_v28, %v9800_v48 }
 0x3f0   : > { %v4564_v21 = vpop.f32.mrf.mxu0 }
 0x3f1   : > { %5305 = vst [vmem:[%s9554_s27 + $0x280] sm:$0xff] %v4712_v2  ;;  %v4714_v57 = vadd.f32 %v4713_v34, %v4561_v44  ;;  %v4565_v50 = vadd.f32 %v4564_v21, %v4412_v10  ;;  %v4721_v42 = vpop.f32.mrf.mxu1  ;;  %v4434_v34 = vadd.f32 %v9752_v51, %v9808_v47  ;;  %v4436_v21 = vadd.f32 %v9756_v20, %v9800_v48 }
 0x3f2   : > { %v4566_v23 = vpop.f32.mrf.mxu0 }
 0x3f3   : > { %5306 = vst [vmem:[%s9554_s27 + $0x288] sm:$0xff] %v4714_v57  ;;  %v4718_v33 = vadd.f32 %v4717_v61, %v4565_v50  ;;  %v4567_v19 = vadd.f32 %v4566_v23, %v4414_v1  ;;  %v4723_v0 = vpop.f32.mrf.mxu1  ;;  %v4438_v50 = vadd.f32 %v9761_v62, %v9808_v47 }
 0x3f4   : > { %v4568_v25 = vpop.f32.mrf.mxu0 }
 0x3f5   : > { %5311 = vst [vmem:[%s9554_s27 + $0x2b0] sm:$0xff] %v4718_v33  ;;  %v4720_v58 = vadd.f32 %v4719_v6, %v4567_v19  ;;  %v4569_v53 = vadd.f32 %v4568_v25, %v4416_v45  ;;  %v4727_v7 = vpop.f32.mrf.mxu1  ;;  %v4442_v33 = vadd.f32 %v9764_v32, %v9800_v48 }
 0x3f6   : > { %v4570_v40 = vpop.f32.mrf.mxu0 }
 0x3f7   : > { %5312 = vst [vmem:[%s9554_s27 + $0x2b8] sm:$0xff] %v4720_v58  ;;  %v4722_v59 = vadd.f32 %v4721_v42, %v4569_v53  ;;  %v4571_v39 = vadd.f32 %v4570_v40, %v4418_v41  ;;  %v4729_v11 = vpop.f32.mrf.mxu1  ;;  %v4444_v41 = vadd.f32 %v9774_v36, %v9808_v47 }
 0x3f8   : > { %v4574_v29 = vpop.f32.mrf.mxu0 }
 0x3f9   : > { %5317 = vst [vmem:[%s9554_s27 + $0x2e0] sm:$0xff] %v4722_v59  ;;  %v4724_v8 = vadd.f32 %v4723_v0, %v4571_v39  ;;  %v4575_v38 = vadd.f32 %v4574_v29, %v4422_v49  ;;  %v4731_v3 = vpop.f32.mrf.mxu1  ;;  %v4446_v0 = vadd.f32 %v9778_v13, %v9800_v48  ;;  %v4448_v39 = vadd.f32 %v9783_v55, %v9808_v47 }
 0x3fa   : > { %v4576_v46 = vpop.f32.mrf.mxu0 }
 0x3fb   : > { %5318 = vst [vmem:[%s9554_s27 + $0x2e8] sm:$0xff] %v4724_v8  ;;  %v4728_v22 = vadd.f32 %v4727_v7, %v4575_v38  ;;  %v4577_v14 = vadd.f32 %v4576_v46, %v4424_v15  ;;  %v4733_v5 = vpop.f32.mrf.mxu1  ;;  %v4452_v15 = vadd.f32 %v9786_v63, %v9800_v48 }
 0x3fc   : > { %v4578_v18 = vpop.f32.mrf.mxu0 }
 0x3fd   : > { %5323 = vst [vmem:[%s9554_s27 + $0x310] sm:$0xff] %v4728_v22  ;;  %v4730_v56 = vadd.f32 %v4729_v11, %v4577_v14  ;;  %v4579_v16 = vadd.f32 %v4578_v18, %v4426_v4  ;;  %v4737_v31 = vpop.f32.mrf.mxu1  ;;  %v4454_v11 = vadd.f32 %v9794_v26, %v9808_v47  ;;  %v4456_v18 = vadd.f32 %v9804_v17, %v9800_v48 }
 0x3fe   : > { %v4580_v52 = vpop.f32.mrf.mxu0 }
 0x3ff   : > { %5324 = vst [vmem:[%s9554_s27 + $0x318] sm:$0xff] %v4730_v56  ;;  %v4732_v43 = vadd.f32 %v4731_v3, %v4579_v16  ;;  %v4581_v12 = vadd.f32 %v4580_v52, %v4428_v35  ;;  %v4739_v44 = vpop.f32.mrf.mxu1  ;;  %v4458_v16 = vadd.f32 %v9812_v27, %v9808_v47 }
 0x400   : > { %v4584_v60 = vpop.f32.mrf.mxu0 }
 0x401   : > { %5329 = vst [vmem:[%s9554_s27 + $0x340] sm:$0xff] %v4732_v43  ;;  %v4734_v54 = vadd.f32 %v4733_v5, %v4581_v12  ;;  %v4585_v10 = vadd.f32 %v4584_v60, %v4432_v37  ;;  %v4741_v57 = vpop.f32.mrf.mxu1  ;;  %v11349_v5 = vld [vmem:[#allocation136_spill] sm:$0xff]  ;;  %v11350_v60 = vld [vmem:[#allocation114_spill] sm:$0xff] }
 0x402   : > { %v4586_v2 = vpop.f32.mrf.mxu0  ;;  %v9982_v37 = vrot.slane %v9796_v24, %v11349_v5 }
 0x403   : > { %5330 = vst [vmem:[%s9554_s27 + $0x348] sm:$0xff] %v4734_v54  ;;  %v4738_v28 = vadd.f32 %v4737_v31, %v4585_v10  ;;  %v4587_v61 = vadd.f32 %v4586_v2, %v4434_v34  ;;  %v4743_v45 = vpop.f32.mrf.mxu1  ;;  %v9987_v31 = vrot.slane %v9796_v24, %v11350_v60 }
 0x404   : > { %v4588_v1 = vpop.f32.mrf.mxu0 }
 0x405   : > { %5335 = vst [vmem:[%s9554_s27 + $0x370] sm:$0xff] %v4738_v28  ;;  %v4740_v51 = vadd.f32 %v4739_v44, %v4587_v61  ;;  %v4589_v23 = vadd.f32 %v4588_v1, %v4436_v21  ;;  %v4747_v42 = vpop.f32.mrf.mxu1 }
 0x406   : > { %v4590_v6 = vpop.f32.mrf.mxu0 }
 0x407   : > { %5336 = vst [vmem:[%s9554_s27 + $0x378] sm:$0xff] %v4740_v51  ;;  %v4742_v20 = vadd.f32 %v4741_v57, %v4589_v23  ;;  %v4591_v19 = vadd.f32 %v4590_v6, %v4438_v50  ;;  %v4749_v40 = vpop.f32.mrf.mxu1 }
 0x408   : > { %v4594_v25 = vpop.f32.mrf.mxu0 }
 0x409   : > { %5341 = vst [vmem:[%s9554_s27 + $0x3a0] sm:$0xff] %v4742_v20  ;;  %v4744_v62 = vadd.f32 %v4743_v45, %v4591_v19  ;;  %v4595_v58 = vadd.f32 %v4594_v25, %v4442_v33  ;;  %v4751_v59 = vpop.f32.mrf.mxu1 }
 0x40a   : > { %v4596_v53 = vpop.f32.mrf.mxu0 }
 0x40b   : > { %5342 = vst [vmem:[%s9554_s27 + $0x3a8] sm:$0xff] %v4744_v62  ;;  %v4748_v32 = vadd.f32 %v4747_v42, %v4595_v58  ;;  %v4597_v9 = vadd.f32 %v4596_v53, %v4444_v41  ;;  %v4753_v30 = vpop.f32.mrf.mxu1 }
 0x40c   : > { %v4598_v49 = vpop.f32.mrf.mxu0 }
 0x40d   : > { %5347 = vst [vmem:[%s9554_s27 + $0x3d0] sm:$0xff] %v4748_v32  ;;  %v4750_v36 = vadd.f32 %v4749_v40, %v4597_v9  ;;  %v4599_v29 = vadd.f32 %v4598_v49, %v4446_v0  ;;  %v4757_v46 = vpop.f32.mrf.mxu1 }
 0x40e   : > { %v4600_v7 = vpop.f32.mrf.mxu0 }
 0x40f   : > { %5348 = vst [vmem:[%s9554_s27 + $0x3d8] sm:$0xff] %v4750_v36  ;;  %v4752_v13 = vadd.f32 %v4751_v59, %v4599_v29  ;;  %v4601_v8 = vadd.f32 %v4600_v7, %v4448_v39  ;;  %v4759_v14 = vpop.f32.mrf.mxu1 }
 0x410   : > { %v4604_v38 = vpop.f32.mrf.mxu0 }
 0x411   : > { %5353 = vst [vmem:[%s9554_s27 + $0x400] sm:$0xff] %v4752_v13  ;;  %v4754_v55 = vadd.f32 %v4753_v30, %v4601_v8  ;;  %v4605_v4 = vadd.f32 %v4604_v38, %v4452_v15  ;;  %v4761_v56 = vpop.f32.mrf.mxu1 }
 0x412   : > { %v4606_v22 = vpop.f32.mrf.mxu0 }
 0x413   : > { %5354 = vst [vmem:[%s9554_s27 + $0x408] sm:$0xff] %v4754_v55  ;;  %v4758_v63 = vadd.f32 %v4757_v46, %v4605_v4  ;;  %v4607_v3 = vadd.f32 %v4606_v22, %v4454_v11  ;;  %v4763_v12 = vpop.f32.mrf.mxu1 }
 0x414   : > { %v4608_v35 = vpop.f32.mrf.mxu0 }
 0x415   : > { %5359 = vst [vmem:[%s9554_s27 + $0x430] sm:$0xff] %v4758_v63  ;;  %v4760_v26 = vadd.f32 %v4759_v14, %v4607_v3  ;;  %v4609_v52 = vadd.f32 %v4608_v35, %v4456_v18  ;;  %v4953_v54 = vpop.f32.mrf.mxu1 }
 0x416   : > { %v4610_v43 = vpop.f32.mrf.mxu0 }
 0x417   : > { %5360 = vst [vmem:[%s9554_s27 + $0x438] sm:$0xff] %v4760_v26  ;;  %v4762_v48 = vadd.f32 %v4761_v56, %v4609_v52  ;;  %v4611_v17 = vadd.f32 %v4610_v43, %v4458_v16  ;;  %v4955_v2 = vpop.f32.mrf.mxu1 }
 0x418   : > { %v4800_v34 = vpop.f32.mrf.mxu0 }
 0x419   : > { %5365 = vst [vmem:[%s9554_s27 + $0x460] sm:$0xff] %v4762_v48  ;;  %v4764_v47 = vadd.f32 %v4763_v12, %v4611_v17  ;;  %v4801_v27 = vadd.f32 %v4800_v34, %v9982_v37  ;;  %v4957_v61 = vpop.f32.mrf.mxu1 }
 0x41a   : > { %v4802_v10 = vpop.f32.mrf.mxu0 }
 0x41b   : > { %5366 = vst [vmem:[%s9554_s27 + $0x468] sm:$0xff] %v4764_v47  ;;  %v9992_v44 = vadd.f32 %v4953_v54, %v4801_v27  ;;  %v4803_v21 = vadd.f32 %v4802_v10, %v9987_v31  ;;  %v4959_v50 = vpop.f32.mrf.mxu1 }
 0x41c   : > { %v4804_v28 = vpop.f32.mrf.mxu0 }
 0x41d   : > { %v9995_v1 = vadd.f32 %v4955_v2, %v4803_v21  ;;  %v4805_v24 = vadd.f32 %v4804_v28, %v9982_v37  ;;  %v4963_v45 = vpop.f32.mrf.mxu1 }
 0x41e   : > { %v4806_v57 = vpop.f32.mrf.mxu0 }
 0x41f   : > { %v9998_v51 = vadd.f32 %v4957_v61, %v4805_v24  ;;  %v4807_v23 = vadd.f32 %v4806_v57, %v9987_v31  ;;  %v4965_v25 = vpop.f32.mrf.mxu1 }
 0x420   : > { %v4810_v6 = vpop.f32.mrf.mxu0 }
 0x421   : > { %v10001_v33 = vadd.f32 %v4959_v50, %v4807_v23  ;;  %v4811_v20 = vadd.f32 %v4810_v6, %v9982_v37  ;;  %v4967_v58 = vpop.f32.mrf.mxu1 }
 0x422   : > { %v4812_v19 = vpop.f32.mrf.mxu0 }
 0x423   : > { %v10004_v42 = vadd.f32 %v4963_v45, %v4811_v20  ;;  %v4813_v41 = vadd.f32 %v4812_v19, %v9987_v31  ;;  %v4969_v32 = vpop.f32.mrf.mxu1 }
 0x424   : > { %v4814_v62 = vpop.f32.mrf.mxu0 }
 0x425   : > { %v10007_v53 = vadd.f32 %v4965_v25, %v4813_v41  ;;  %v4815_v40 = vadd.f32 %v4814_v62, %v9982_v37  ;;  %v4973_v39 = vpop.f32.mrf.mxu1 }
 0x426   : > { %v4816_v0 = vpop.f32.mrf.mxu0 }
 0x427   : > { %v10010_v9 = vadd.f32 %v4967_v58, %v4815_v40  ;;  %v4817_v49 = vadd.f32 %v4816_v0, %v9987_v31  ;;  %v4975_v30 = vpop.f32.mrf.mxu1 }
 0x428   : > { %v4820_v59 = vpop.f32.mrf.mxu0 }
 0x429   : > { %v10013_v36 = vadd.f32 %v4969_v32, %v4817_v49  ;;  %v4821_v29 = vadd.f32 %v4820_v59, %v9982_v37  ;;  %v4977_v38 = vpop.f32.mrf.mxu1 }
 0x42a   : > { %v4822_v7 = vpop.f32.mrf.mxu0 }
 0x42b   : > { %v10016_v15 = vadd.f32 %v4973_v39, %v4821_v29  ;;  %v4823_v13 = vadd.f32 %v4822_v7, %v9987_v31  ;;  %v4979_v4 = vpop.f32.mrf.mxu1 }
 0x42c   : > { %v4824_v8 = vpop.f32.mrf.mxu0 }
 0x42d   : > { %v10019_v46 = vadd.f32 %v4975_v30, %v4823_v13  ;;  %v4825_v11 = vadd.f32 %v4824_v8, %v9982_v37  ;;  %v4983_v63 = vpop.f32.mrf.mxu1 }
 0x42e   : > { %v4826_v55 = vpop.f32.mrf.mxu0 }
 0x42f   : > { %v10022_v22 = vadd.f32 %v4977_v38, %v4825_v11  ;;  %v4827_v14 = vadd.f32 %v4826_v55, %v9987_v31  ;;  %v4985_v16 = vpop.f32.mrf.mxu1 }
 0x430   : > { %v4830_v18 = vpop.f32.mrf.mxu0 }
 0x431   : > { %v10025_v3 = vadd.f32 %v4979_v4, %v4827_v14  ;;  %v4831_v35 = vadd.f32 %v4830_v18, %v9982_v37  ;;  %v4987_v43 = vpop.f32.mrf.mxu1 }
 0x432   : > { %v4832_v56 = vpop.f32.mrf.mxu0 }
 0x433   : > { %v10028_v26 = vadd.f32 %v4983_v63, %v4831_v35  ;;  %v4833_v52 = vadd.f32 %v4832_v56, %v9987_v31  ;;  %v4989_v60 = vpop.f32.mrf.mxu1 }
 0x434   : > { %v4834_v5 = vpop.f32.mrf.mxu0 }
 0x435   : > { %v10031_v12 = vadd.f32 %v4985_v16, %v4833_v52  ;;  %v4835_v48 = vadd.f32 %v4834_v5, %v9982_v37  ;;  %v4993_v27 = vpop.f32.mrf.mxu1 }
 0x436   : > { %v4836_v17 = vpop.f32.mrf.mxu0 }
 0x437   : > { %v10034_v34 = vadd.f32 %v4987_v43, %v4835_v48  ;;  %v4837_v54 = vadd.f32 %v4836_v17, %v9987_v31  ;;  %v4995_v28 = vpop.f32.mrf.mxu1 }
 0x438   : > { %v4840_v47 = vpop.f32.mrf.mxu0 }
 0x439   : > { %v10037_v10 = vadd.f32 %v4989_v60, %v4837_v54  ;;  %v4841_v2 = vadd.f32 %v4840_v47, %v9982_v37  ;;  %v4997_v50 = vpop.f32.mrf.mxu1 }
 0x43a   : > { %v4842_v21 = vpop.f32.mrf.mxu0 }
 0x43b   : > { %11351 = vst [vmem:[#allocation20_spill] sm:$0xff] %v10037_v10  ;;  %v10040_v61 = vadd.f32 %v4993_v27, %v4841_v2  ;;  %v4843_v24 = vadd.f32 %v4842_v21, %v9987_v31  ;;  %v4999_v20 = vpop.f32.mrf.mxu1 }
 0x43c   : > { %v4844_v57 = vpop.f32.mrf.mxu0 }
 0x43d   : > { %11352 = vst [vmem:[#allocation31_spill] sm:$0xff] %v10040_v61  ;;  %v10043_v23 = vadd.f32 %v4995_v28, %v4843_v24  ;;  %v4845_v6 = vadd.f32 %v4844_v57, %v9982_v37  ;;  %v5003_v62 = vpop.f32.mrf.mxu1 }
 0x43e   : > { %v4846_v45 = vpop.f32.mrf.mxu0 }
 0x43f   : > { %11353 = vst [vmem:[#allocation39_spill] sm:$0xff] %v10043_v23  ;;  %v10046_v19 = vadd.f32 %v4997_v50, %v4845_v6  ;;  %v4847_v25 = vadd.f32 %v4846_v45, %v9987_v31  ;;  %v5005_v32 = vpop.f32.mrf.mxu1 }
 0x440   : > { %v4850_v41 = vpop.f32.mrf.mxu0 }
 0x441   : > { %11354 = vst [vmem:[#allocation49_spill] sm:$0xff] %v10046_v19  ;;  %v10049_v58 = vadd.f32 %v4999_v20, %v4847_v25  ;;  %v4851_v40 = vadd.f32 %v4850_v41, %v9982_v37  ;;  %v5007_v29 = vpop.f32.mrf.mxu1 }
 0x442   : > { %v4852_v0 = vpop.f32.mrf.mxu0 }
 0x443   : > { %11355 = vst [vmem:[#allocation32_spill] sm:$0xff] %v10049_v58  ;;  %v10052_v49 = vadd.f32 %v5003_v62, %v4851_v40  ;;  %v4853_v59 = vadd.f32 %v4852_v0, %v9987_v31  ;;  %v5009_v8 = vpop.f32.mrf.mxu1 }
 0x444   : > { %v4854_v39 = vpop.f32.mrf.mxu0 }
 0x445   : > { %11356 = vst [vmem:[#allocation33_spill] sm:$0xff] %v10052_v49  ;;  %v10055_v7 = vadd.f32 %v5005_v32, %v4853_v59  ;;  %v4855_v30 = vadd.f32 %v4854_v39, %v9982_v37  ;;  %v5013_v4 = vpop.f32.mrf.mxu1 }
 0x446   : > { %v4856_v13 = vpop.f32.mrf.mxu0 }
 0x447   : > { %11357 = vst [vmem:[#allocation43_spill] sm:$0xff] %v10055_v7  ;;  %v10058_v38 = vadd.f32 %v5007_v29, %v4855_v30  ;;  %v4857_v11 = vadd.f32 %v4856_v13, %v9987_v31  ;;  %v5015_v63 = vpop.f32.mrf.mxu1 }
 0x448   : > { %v4860_v55 = vpop.f32.mrf.mxu0 }
 0x449   : > { %11358 = vst [vmem:[#allocation26_spill] sm:$0xff] %v10058_v38  ;;  %v10061_v14 = vadd.f32 %v5009_v8, %v4857_v11  ;;  %v5017_v56 = vpop.f32.mrf.mxu1  ;;  %v4861_v23 = vadd.f32 %v4860_v55, %v9982_v37 }
 0x44a   : > { %v4862_v18 = vpop.f32.mrf.mxu0 }
 0x44b   : > { %11359 = vst [vmem:[#allocation112_spill] sm:$0xff] %v10061_v14  ;;  %v5019_v52 = vpop.f32.mrf.mxu1 }
 0x44c   : > { %v4864_v35 = vpop.f32.mrf.mxu0 }
 0x44d   : > { %v10063_v43 = vpop.f32.mrf.mxu1 }
 0x44e   : > { %v4866_v16 = vpop.f32.mrf.mxu0 }
 0x44f   : > { %v10065_v17 = vpop.f32.mrf.mxu1  ;;  %v4867_v55 = vadd.f32 %v4866_v16, %v9987_v31 }
 0x450   : > { %v4870_v5 = vpop.f32.mrf.mxu0 }
 0x451   : > { %v10069_v54 = vpop.f32.mrf.mxu1 }
 0x452   : > { %v4872_v48 = vpop.f32.mrf.mxu0 }
 0x453   : > { %v10073_v27 = vpop.f32.mrf.mxu1  ;;  %v4873_v16 = vadd.f32 %v4872_v48, %v9987_v31 }
 0x454   : > { %v10067_v60 = vpop.f32.mrf.mxu0 }
 0x455   : > { %v10077_v21 = vpop.f32.mrf.mxu1 }
 0x456   : > { %v10071_v47 = vpop.f32.mrf.mxu0 }
 0x457   : > { %v10081_v24 = vpop.f32.mrf.mxu1 }
 0x458   : > { %v10075_v2 = vpop.f32.mrf.mxu0 }
 0x459   : > { %v10085_v50 = vpop.f32.mrf.mxu1 }
 0x45a   : > { %v10079_v28 = vpop.f32.mrf.mxu0 }
 0x45b   : > { %v10089_v45 = vpop.f32.mrf.mxu1 }
 0x45c   : > { %v10083_v57 = vpop.f32.mrf.mxu0 }
 0x45d   : > { %v10093_v25 = vpop.f32.mrf.mxu1 }
 0x45e   : > { %v10087_v6 = vpop.f32.mrf.mxu0 }
 0x45f   : > { %v10097_v62 = vpop.f32.mrf.mxu1 }
 0x460   : > { %v10091_v20 = vpop.f32.mrf.mxu0 }
 0x461   : > { %v10101_v0 = vpop.f32.mrf.mxu1 }
 0x462   : > { %v10095_v41 = vpop.f32.mrf.mxu0 }
 0x463   : > { %v10105_v59 = vpop.f32.mrf.mxu1 }
 0x464   : > { %v10099_v40 = vpop.f32.mrf.mxu0 }
 0x465   : > { %v10109_v29 = vpop.f32.mrf.mxu1 }
 0x466   : > { %v10103_v32 = vpop.f32.mrf.mxu0  ;;  %11360 = vst [vmem:[#allocation109_spill] sm:$0xff] %v10109_v29 }
 0x467   : > { %v10113_v13 = vpop.f32.mrf.mxu1 }
 0x468   : > { %v10107_v39 = vpop.f32.mrf.mxu0  ;;  %11361 = vst [vmem:[#allocation51_spill] sm:$0xff] %v10113_v13 }
 0x469   : > { %v10117_v11 = vpop.f32.mrf.mxu1 }
 0x46a   : > { %v10111_v30 = vpop.f32.mrf.mxu0  ;;  %11363 = vst [vmem:[#allocation122_spill] sm:$0xff] %v10117_v11  ;;  %v4863_v11 = vadd.f32 %v4862_v18, %v9987_v31 }
 0x46b   : > { %v10121_v38 = vpop.f32.mrf.mxu1 }
 0x46c   : > { %v10115_v8 = vpop.f32.mrf.mxu0  ;;  %11365 = vst [vmem:[#allocation126_spill] sm:$0xff] %v10121_v38 }
 0x46d   : > { %11362 = vst [vmem:[#allocation45_spill] sm:$0xff] %v10115_v8  ;;  %v10125_v49 = vpop.f32.mrf.mxu1 }
 0x46e   : > { %v10119_v14 = vpop.f32.mrf.mxu0  ;;  %11367 = vst [vmem:[#allocation125_spill] sm:$0xff] %v10125_v49  ;;  %v4865_v49 = vadd.f32 %v4864_v35, %v9982_v37 }
 0x46f   : > { %11364 = vst [vmem:[#allocation124_spill] sm:$0xff] %v10119_v14  ;;  %v10129_v19 = vpop.f32.mrf.mxu1 }
 0x470   : > { %v10123_v7 = vpop.f32.mrf.mxu0  ;;  %11369 = vst [vmem:[#allocation23_spill] sm:$0xff] %v10129_v19  ;;  %v5016_v19 = vadd.f32 %v5015_v63, %v4863_v11  ;;  %v5018_v29 = vadd.f32 %v5017_v56, %v4865_v49  ;;  %v5020_v11 = vadd.f32 %v5019_v52, %v4867_v55 }
 0x471   : > { %11366 = vst [vmem:[#allocation123_spill] sm:$0xff] %v10123_v7  ;;  %v10134_v13 = vpop.f32.mrf.mxu1  ;;  %v5014_v7 = vadd.f32 %v5013_v4, %v4861_v23 }
 0x472   : > { %v10127_v58 = vpop.f32.mrf.mxu0  ;;  %11371 = vst [vmem:[#allocation34_spill] sm:$0xff] %v10134_v13 }
 0x473   : > { %11368 = vst [vmem:[#allocation139_spill] sm:$0xff] %v10127_v58  ;;  %v10139_v38 = vpop.f32.mrf.mxu1 }
 0x474   : > { %v10132_v61 = vpop.f32.mrf.mxu0 }
 0x475   : > { %11370 = vst [vmem:[#allocation30_spill] sm:$0xff] %v10132_v61  ;;  %v5166_v10 = vpop.f32.mrf.mxu1 }
 0x476   : > { %v10137_v14 = vpop.f32.mrf.mxu0  ;;  %v5167_v61 = vadd.f32 %v5166_v10, %v5014_v7 }
 0x477   : > { %11372 = vst [vmem:[#allocation35_spill] sm:$0xff] %v10137_v14  ;;  %v5168_v18 = vpop.f32.mrf.mxu1  ;;  %v4871_v14 = vadd.f32 %v4870_v5, %v9982_v37  ;;  %v5026_v5 = vadd.f32 %v10065_v17, %v4873_v16 }
 0x478   : > { %v5106_v58 = vpop.f32.mrf.mxu0  ;;  %5301 = vst [vmem:[%s9554_s27 + $0x260] sm:$0xff] %v5167_v61  ;;  %v5169_v4 = vadd.f32 %v5168_v18, %v5016_v19 }
 0x479   : > { %v5107_v13 = vadd.f32 %v5106_v58, %v9992_v44  ;;  %v5170_v35 = vpop.f32.mrf.mxu1  ;;  %v5024_v61 = vadd.f32 %v10063_v43, %v4871_v14 }
 0x47a   : > { %v5108_v8 = vpop.f32.mrf.mxu0  ;;  %5302 = vst [vmem:[%s9554_s27 + $0x268] sm:$0xff] %v5169_v4  ;;  %v5171_v10 = vadd.f32 %v5170_v35, %v5018_v29 }
 0x47b   : > { %5229 = vst [vmem:[%s9554_s27 + $0x20] sm:$0xff] %v5107_v13  ;;  %v5109_v23 = vadd.f32 %v5108_v8, %v9995_v1  ;;  %v5172_v49 = vpop.f32.mrf.mxu1  ;;  %v4875_v1 = vadd.f32 %v10067_v60, %v9982_v37 }
 0x47c   : > { %v5110_v63 = vpop.f32.mrf.mxu0  ;;  %5307 = vst [vmem:[%s9554_s27 + $0x290] sm:$0xff] %v5171_v10  ;;  %v5173_v7 = vadd.f32 %v5172_v49, %v5020_v11 }
 0x47d   : > { %5230 = vst [vmem:[%s9554_s27 + $0x28] sm:$0xff] %v5109_v23  ;;  %v5111_v44 = vadd.f32 %v5110_v63, %v9998_v51  ;;  %v5176_v52 = vpop.f32.mrf.mxu1  ;;  %v4877_v51 = vadd.f32 %v10071_v47, %v9987_v31  ;;  %v5028_v29 = vadd.f32 %v10069_v54, %v4875_v1 }
 0x47e   : > { %v5112_v58 = vpop.f32.mrf.mxu0  ;;  %5308 = vst [vmem:[%s9554_s27 + $0x298] sm:$0xff] %v5173_v7  ;;  %v5177_v43 = vadd.f32 %v5176_v52, %v5024_v61 }
 0x47f   : > { %5235 = vst [vmem:[%s9554_s27 + $0x50] sm:$0xff] %v5111_v44  ;;  %v5113_v19 = vadd.f32 %v5112_v58, %v10001_v33  ;;  %v5178_v60 = vpop.f32.mrf.mxu1  ;;  %v4881_v33 = vadd.f32 %v10075_v2, %v9982_v37  ;;  %v5030_v55 = vadd.f32 %v10073_v27, %v4877_v51 }
 0x480   : > { %v5116_v56 = vpop.f32.mrf.mxu0  ;;  %5313 = vst [vmem:[%s9554_s27 + $0x2c0] sm:$0xff] %v5177_v43  ;;  %v5179_v47 = vadd.f32 %v5178_v60, %v5026_v5 }
 0x481   : > { %5236 = vst [vmem:[%s9554_s27 + $0x58] sm:$0xff] %v5113_v19  ;;  %v5117_v14 = vadd.f32 %v5116_v56, %v10004_v42  ;;  %v5180_v8 = vpop.f32.mrf.mxu1  ;;  %v4883_v42 = vadd.f32 %v10079_v28, %v9987_v31  ;;  %v5034_v4 = vadd.f32 %v10077_v21, %v4881_v33 }
 0x482   : > { %v5118_v48 = vpop.f32.mrf.mxu0  ;;  %5314 = vst [vmem:[%s9554_s27 + $0x2c8] sm:$0xff] %v5179_v47  ;;  %v5181_v2 = vadd.f32 %v5180_v8, %v5028_v29  ;;  %v11373_v47 = vld [vmem:[#allocation109_spill] sm:$0xff] }
 0x483   : > { %5241 = vst [vmem:[%s9554_s27 + $0x80] sm:$0xff] %v5117_v14  ;;  %v5119_v17 = vadd.f32 %v5118_v48, %v10007_v53  ;;  %v5182_v23 = vpop.f32.mrf.mxu1  ;;  %v4885_v53 = vadd.f32 %v10083_v57, %v9982_v37  ;;  %v5036_v11 = vadd.f32 %v10081_v24, %v4883_v42 }
 0x484   : > { %v5120_v13 = vpop.f32.mrf.mxu0  ;;  %5319 = vst [vmem:[%s9554_s27 + $0x2f0] sm:$0xff] %v5181_v2  ;;  %v5183_v28 = vadd.f32 %v5182_v23, %v5030_v55  ;;  %v11376_v2 = vld [vmem:[#allocation51_spill] sm:$0xff] }
 0x485   : > { %5242 = vst [vmem:[%s9554_s27 + $0x88] sm:$0xff] %v5119_v17  ;;  %v5121_v54 = vadd.f32 %v5120_v13, %v10010_v9  ;;  %v5186_v35 = vpop.f32.mrf.mxu1  ;;  %v4887_v9 = vadd.f32 %v10087_v6, %v9987_v31  ;;  %v5038_v10 = vadd.f32 %v10085_v50, %v4885_v53 }
 0x486   : > { %v5122_v18 = vpop.f32.mrf.mxu0  ;;  %5320 = vst [vmem:[%s9554_s27 + $0x2f8] sm:$0xff] %v5183_v28  ;;  %v5187_v57 = vadd.f32 %v5186_v35, %v5034_v4  ;;  %v11378_v4 = vld [vmem:[#allocation31_spill] sm:$0xff]  ;;  %v11379_v35 = vld [vmem:[#allocation122_spill] sm:$0xff] }
 0x487   : > { %5247 = vst [vmem:[%s9554_s27 + $0xb0] sm:$0xff] %v5121_v54  ;;  %v5123_v27 = vadd.f32 %v5122_v18, %v10013_v36  ;;  %v5188_v44 = vpop.f32.mrf.mxu1  ;;  %v4891_v36 = vadd.f32 %v10091_v20, %v9982_v37  ;;  %v5040_v61 = vadd.f32 %v10089_v45, %v4887_v9  ;;  %v11380_v9 = vld [vmem:[#allocation123_spill] sm:$0xff] }
 0x488   : > { %v5126_v63 = vpop.f32.mrf.mxu0  ;;  %5325 = vst [vmem:[%s9554_s27 + $0x320] sm:$0xff] %v5187_v57  ;;  %v5189_v6 = vadd.f32 %v5188_v44, %v5036_v11  ;;  %v11381_v57 = vld [vmem:[#allocation39_spill] sm:$0xff] }
 0x489   : > { %5248 = vst [vmem:[%s9554_s27 + $0xb8] sm:$0xff] %v5123_v27  ;;  %v5127_v21 = vadd.f32 %v5126_v63, %v10016_v15  ;;  %v5190_v49 = vpop.f32.mrf.mxu1  ;;  %v4893_v15 = vadd.f32 %v10095_v41, %v9987_v31  ;;  %v5044_v7 = vadd.f32 %v10093_v25, %v4891_v36 }
 0x48a   : > { %v5128_v16 = vpop.f32.mrf.mxu0  ;;  %5326 = vst [vmem:[%s9554_s27 + $0x328] sm:$0xff] %v5189_v6  ;;  %v5191_v20 = vadd.f32 %v5190_v49, %v5038_v10 }
 0x48b   : > { %5253 = vst [vmem:[%s9554_s27 + $0xe0] sm:$0xff] %v5127_v21  ;;  %v5129_v24 = vadd.f32 %v5128_v16, %v10019_v46  ;;  %v5192_v19 = vpop.f32.mrf.mxu1  ;;  %v4895_v46 = vadd.f32 %v10099_v40, %v9982_v37  ;;  %v5046_v5 = vadd.f32 %v10097_v62, %v4893_v15  ;;  %v4911_v21 = vadd.f32 %v11380_v9, %v9982_v37 }
 0x48c   : > { %v5130_v58 = vpop.f32.mrf.mxu0  ;;  %5331 = vst [vmem:[%s9554_s27 + $0x350] sm:$0xff] %v5191_v20  ;;  %v5193_v41 = vadd.f32 %v5192_v19, %v5040_v61  ;;  %v11384_v61 = vld [vmem:[#allocation49_spill] sm:$0xff] }
 0x48d   : > { %5254 = vst [vmem:[%s9554_s27 + $0xe8] sm:$0xff] %v5129_v24  ;;  %v5131_v50 = vadd.f32 %v5130_v58, %v10022_v22  ;;  %v5196_v52 = vpop.f32.mrf.mxu1  ;;  %v4897_v22 = vadd.f32 %v10103_v32, %v9987_v31  ;;  %v5048_v43 = vadd.f32 %v10101_v0, %v4895_v46  ;;  %v11382_v24 = vld [vmem:[#allocation126_spill] sm:$0xff]  ;;  %v11383_v58 = vld [vmem:[#allocation139_spill] sm:$0xff]  ;;  %v11385_v19 = vld [vmem:[#allocation125_spill] sm:$0xff] }
 0x48e   : > { %v5132_v1 = vpop.f32.mrf.mxu0  ;;  %5332 = vst [vmem:[%s9554_s27 + $0x358] sm:$0xff] %v5193_v41  ;;  %v5197_v40 = vadd.f32 %v5196_v52, %v5044_v7  ;;  %v4913_v49 = vadd.f32 %v11383_v58, %v9987_v31  ;;  %v5064_v7 = vadd.f32 %v11385_v19, %v4911_v21  ;;  %v11386_v46 = vld [vmem:[#allocation30_spill] sm:$0xff]  ;;  %v11387_v41 = vld [vmem:[#allocation32_spill] sm:$0xff] }
 0x48f   : > { %5259 = vst [vmem:[%s9554_s27 + $0x110] sm:$0xff] %v5131_v50  ;;  %v5133_v45 = vadd.f32 %v5132_v1, %v10025_v3  ;;  %v5198_v14 = vpop.f32.mrf.mxu1  ;;  %v4901_v3 = vadd.f32 %v10107_v39, %v9982_v37  ;;  %v5050_v29 = vadd.f32 %v10105_v59, %v4897_v22  ;;  %v11375_v59 = vld [vmem:[#allocation20_spill] sm:$0xff] }
 0x490   : > { %v5136_v56 = vpop.f32.mrf.mxu0  ;;  %5337 = vst [vmem:[%s9554_s27 + $0x380] sm:$0xff] %v5197_v40  ;;  %v5199_v32 = vadd.f32 %v5198_v14, %v5046_v5 }
 0x491   : > { %5260 = vst [vmem:[%s9554_s27 + $0x118] sm:$0xff] %v5133_v45  ;;  %v5137_v25 = vadd.f32 %v5136_v56, %v10028_v26  ;;  %v5200_v60 = vpop.f32.mrf.mxu1  ;;  %v4903_v26 = vadd.f32 %v10111_v30, %v9987_v31  ;;  %v5054_v13 = vadd.f32 %v11373_v47, %v4901_v3  ;;  %v4915_v45 = vadd.f32 %v11386_v46, %v9982_v37 }
 0x492   : > { %v5138_v51 = vpop.f32.mrf.mxu0  ;;  %5338 = vst [vmem:[%s9554_s27 + $0x388] sm:$0xff] %v5199_v32  ;;  %v5201_v39 = vadd.f32 %v5200_v60, %v5048_v43  ;;  %v11390_v43 = vld [vmem:[#allocation33_spill] sm:$0xff] }
 0x493   : > { %5265 = vst [vmem:[%s9554_s27 + $0x140] sm:$0xff] %v5137_v25  ;;  %v5139_v62 = vadd.f32 %v5138_v51, %v10031_v12  ;;  %v5202_v17 = vpop.f32.mrf.mxu1  ;;  %v11374_v12 = vld [vmem:[#allocation45_spill] sm:$0xff]  ;;  %v5056_v18 = vadd.f32 %v11376_v2, %v4903_v26  ;;  %v11388_v25 = vld [vmem:[#allocation23_spill] sm:$0xff] }
 0x494   : > { %v5140_v48 = vpop.f32.mrf.mxu0  ;;  %v4905_v8 = vadd.f32 %v11374_v12, %v9982_v37  ;;  %5343 = vst [vmem:[%s9554_s27 + $0x3b0] sm:$0xff] %v5201_v39  ;;  %v5203_v55 = vadd.f32 %v5202_v17, %v5050_v29  ;;  %v5066_v40 = vadd.f32 %v11388_v25, %v4913_v49  ;;  %v11389_v51 = vld [vmem:[#allocation35_spill] sm:$0xff]  ;;  %v11393_v17 = vld [vmem:[#allocation26_spill] sm:$0xff] }
 0x495   : > { %5266 = vst [vmem:[%s9554_s27 + $0x148] sm:$0xff] %v5139_v62  ;;  %v5141_v0 = vadd.f32 %v5140_v48, %v10034_v34  ;;  %v5206_v54 = vpop.f32.mrf.mxu1  ;;  %v11377_v34 = vld [vmem:[#allocation124_spill] sm:$0xff]  ;;  %v4917_v14 = vadd.f32 %v11389_v51, %v9987_v31  ;;  %v11391_v48 = vld [vmem:[#allocation34_spill] sm:$0xff]  ;;  %v11392_v29 = vld [vmem:[#allocation43_spill] sm:$0xff] }
 0x496   : > { %v5142_v33 = vpop.f32.mrf.mxu0  ;;  %v4907_v23 = vadd.f32 %v11377_v34, %v9987_v31  ;;  %5344 = vst [vmem:[%s9554_s27 + $0x3b8] sm:$0xff] %v5203_v55  ;;  %v5207_v27 = vadd.f32 %v5206_v54, %v5054_v13  ;;  %v5058_v11 = vadd.f32 %v11379_v35, %v4905_v8  ;;  %v5068_v60 = vadd.f32 %v11391_v48, %v4915_v45 }
 0x497   : > { %5271 = vst [vmem:[%s9554_s27 + $0x170] sm:$0xff] %v5141_v0  ;;  %v5143_v30 = vadd.f32 %v5142_v33, %v11375_v59  ;;  %v5208_v63 = vpop.f32.mrf.mxu1  ;;  %v5070_v33 = vadd.f32 %v10139_v38, %v4917_v14  ;;  %v11394_v59 = vld [vmem:[#allocation112_spill] sm:$0xff] }
 0x498   : > { %v5146_v42 = vpop.f32.mrf.mxu0  ;;  %5349 = vst [vmem:[%s9554_s27 + $0x3e0] sm:$0xff] %v5207_v27  ;;  %v5209_v44 = vadd.f32 %v5208_v63, %v5056_v18  ;;  %v5060_v6 = vadd.f32 %v11382_v24, %v4907_v23 }
 0x499   : > { %5272 = vst [vmem:[%s9554_s27 + $0x178] sm:$0xff] %v5143_v30  ;;  %v5147_v53 = vadd.f32 %v5146_v42, %v11378_v4  ;;  %v5210_v36 = vpop.f32.mrf.mxu1 }
 0x49a   : > { %v5148_v28 = vpop.f32.mrf.mxu0  ;;  %5350 = vst [vmem:[%s9554_s27 + $0x3e8] sm:$0xff] %v5209_v44  ;;  %v5211_v50 = vadd.f32 %v5210_v36, %v5058_v11 }
 0x49b   : > { %5277 = vst [vmem:[%s9554_s27 + $0x1a0] sm:$0xff] %v5147_v53  ;;  %v5149_v16 = vadd.f32 %v5148_v28, %v11381_v57  ;;  %v5212_v1 = vpop.f32.mrf.mxu1 }
 0x49c   : > { %v5150_v10 = vpop.f32.mrf.mxu0  ;;  %5355 = vst [vmem:[%s9554_s27 + $0x410] sm:$0xff] %v5211_v50  ;;  %v5213_v52 = vadd.f32 %v5212_v1, %v5060_v6 }
 0x49d   : > { %5278 = vst [vmem:[%s9554_s27 + $0x1a8] sm:$0xff] %v5149_v16  ;;  %v5151_v15 = vadd.f32 %v5150_v10, %v11384_v61  ;;  %v5216_v22 = vpop.f32.mrf.mxu1 }
 0x49e   : > { %v5152_v20 = vpop.f32.mrf.mxu0  ;;  %5356 = vst [vmem:[%s9554_s27 + $0x418] sm:$0xff] %v5213_v52  ;;  %v5217_v3 = vadd.f32 %v5216_v22, %v5064_v7 }
 0x49f   : > { %5283 = vst [vmem:[%s9554_s27 + $0x1d0] sm:$0xff] %v5151_v15  ;;  %v5153_v56 = vadd.f32 %v5152_v20, %v11387_v41  ;;  %v5218_v32 = vpop.f32.mrf.mxu1 }
 0x4a0   : > { %v5156_v5 = vpop.f32.mrf.mxu0  ;;  %5361 = vst [vmem:[%s9554_s27 + $0x440] sm:$0xff] %v5217_v3  ;;  %v5219_v0 = vadd.f32 %v5218_v32, %v5066_v40 }
 0x4a1   : > { %5284 = vst [vmem:[%s9554_s27 + $0x1d8] sm:$0xff] %v5153_v56  ;;  %v5157_v37 = vadd.f32 %v5156_v5, %v11390_v43  ;;  %v5220_v39 = vpop.f32.mrf.mxu1 }
 0x4a2   : > { %v5158_v62 = vpop.f32.mrf.mxu0  ;;  %5362 = vst [vmem:[%s9554_s27 + $0x448] sm:$0xff] %v5219_v0  ;;  %v5221_v13 = vadd.f32 %v5220_v39, %v5068_v60 }
 0x4a3   : > { %5289 = vst [vmem:[%s9554_s27 + $0x200] sm:$0xff] %v5157_v37  ;;  %v5159_v26 = vadd.f32 %v5158_v62, %v11392_v29  ;;  %v5222_v8 = vpop.f32.mrf.mxu1 }
 0x4a4   : > { %v5160_v31 = vpop.f32.mrf.mxu0  ;;  %5367 = vst [vmem:[%s9554_s27 + $0x470] sm:$0xff] %v5221_v13  ;;  %v5223_v55 = vadd.f32 %v5222_v8, %v5070_v33 }
 0x4a5   : > { %5290 = vst [vmem:[%s9554_s27 + $0x208] sm:$0xff] %v5159_v26  ;;  %v5161_v47 = vadd.f32 %v5160_v31, %v11393_v17 }
 0x4a6   : > { %v5162_v12 = vpop.f32.mrf.mxu0  ;;  %5368 = vst [vmem:[%s9554_s27 + $0x478] sm:$0xff] %v5223_v55 }
 0x4a7   : > { %5295 = vst [vmem:[%s9554_s27 + $0x230] sm:$0xff] %v5161_v47  ;;  %v5163_v30 = vadd.f32 %v5162_v12, %v11394_v59 }
 0x4a9   : > { %5296 = vst [vmem:[%s9554_s27 + $0x238] sm:$0xff] %v5163_v30 }
 0x4aa   : > { %6616 = shalt.err (!%p6613_p12)
}
 0x4ab   : > { %s6617_s16 = scalar_lea.hbm %s10273_s14, 18432  ;;  %s6621_s9 = scalar_lea.hbm %s10329_s6, 36864 }
 0x4ac   : > { %p6618_p11 = scmp.ne.s32.totalorder %s10273_s14, %s6617_s16  ;;  %p6622_p6 = scmp.lt.s32.totalorder %s10273_s14, %s10329_s6 }
 0x4ad   : > { %p6623_p8 = scmp.lt.s32.totalorder %s6621_s9, %s6617_s16 }
 0x4ae   : > { %p6619_p3 = pnand %p6618_p11, %p6842_p5 }
 0x4af   : > { %p6624_p7 = por %p6623_p8, %p6622_p6 }
 0x4b0   : > { %p6620_p4 = pneg %p6619_p3 }
 0x4b2   : > { %p6625_p13 = pnand %p6624_p7, %p6620_p4 }
 0x4b4   : > { %6628 = shalt.err (!%p6625_p13)
}
 0x4b5   : > { %s6696_s29 = smov 768   ;;  %s6697_s27 = smov 48  }
 0x4b6   : > { %5881 = dma.vmem_to_hbm [thread:$0]  (%p6842_p5), %s10278_s12, 18432, %s10273_s14, %s5370_s30, %s6696_s29, %s6696_s29, %s6697_s27  }
 0x4b7 PF: > { %s5399_s19 = sand.u32 1, %s6671_s21   ;;  %p11395_p9 = scmp.ne.s32.totalorder %s10664_s28, 0 }
 0x4b8   : > { %p11396_p0 = scmp.ge.s32.totalorder %s6683_s24, 2  ;;  %s5400_s25 = scalar_lea.sflag [#allocation4], %s5399_s19 }
 0x4ba   : > { %p5904_p1 = pnand %p11396_p0, %p11395_p9 }
 0x4bc   : > { %p5905_p2 = pneg %p5904_p1 }
 0x4be   : > { %6666 = dma.done.wait (%p5905_p2), %s5400_s25, 18432  }
 0x4bf   : > { %6668 = vsyncadd (%p5905_p2), %s5400_s25, 4294948864  ;;  %p24_p10 = scmp.ge.s32.totalorder %s6820_s11, 4   ;;  %s11397_s21 = smov %s6675_s22 }
 0x4c0   : > { %s11398_s22 = smov %s6679_s23  ;;  %s11399_s23 = smov %s6838_s8 }
 0x4c1   : > { %s11400_s24 = smov %s6820_s11  ;;  %26 = sbr.rel (!%p24_p10) target bundleno = 13 (0xd), region = 118 }
 0x4c6   :  { %5405 = vsyncpa [#allocation3], 1 }
 0x4c7   :  { %5407 = vsyncpa [#allocation3 + $0x1], 1 }
 0x4c8   :  { %5408 = vsyncpa [#allocation6], 1 }
 0x4c9   :  { %5410 = vsyncpa [#allocation6 + $0x1], 1 }
 0x4ca   :  { %5411 = vsyncpa [#allocation9], 1 }
 0x4cb   :  { %5412 = vsyncpa [#allocation12], 1 }
 0x4cc   :  { %5413 = vsyncpa [#allocation4], 1 }
 0x4cd   :  { %5415 = vsyncpa [#allocation4 + $0x1], 1 }

</bundles_post_ra>
